<compile_context>
chip_gen: v7x
topology: tpu7x:2x2x1
jax: 0.10.0
libtpu: 0.0.40
codegen_flags: <defaults>
</compile_context>

<pallas_src>
import functools

import jax
import jax.numpy as jnp
from jax.experimental import pallas as pl
from jax.experimental.pallas import tpu as pltpu


def _round_up(x, m):
    return (x + m - 1) // m * m


@functools.lru_cache(maxsize=None)
def _tuning():
    """(vmem_limit_bytes, tm_target) tuned per TPU generation.

    v7x has 64 MiB physical VMEM -> stay under 48 MiB.  v4/v5e/v6e have
    128 MiB -> raise the cap and use larger M tiles (fewer grid steps and
    deeper pipelining on the memory-bound layers)."""
    try:
        kind = jax.devices()[0].device_kind.lower()
    except Exception:
        kind = ""
    if "v2" in kind or "v3" in kind:
        return 12 * 1024 * 1024, 256
    if "v4" in kind or "v5" in kind or "v6" in kind:
        return 100 * 1024 * 1024, 1024
    return 48 * 1024 * 1024, 512          # v7x / unknown: conservative


def _compiler_params():
    return pltpu.CompilerParams(
        dimension_semantics=("parallel",),
        vmem_limit_bytes=_tuning()[0],
    )


def _m_tiling(m):
    """Pick (tm, m_pad) with tm | m_pad, both multiples of 8.

    Never produces one pathological huge block: if m is not divisible by any
    candidate tile we zero-pad M instead (padded rows are sliced off and add
    nothing to the BN sums)."""
    target = _tuning()[1]
    if m <= target:
        tm = _round_up(m, 8)
        return tm, tm
    for t in (target, 1024, 512, 256, 128, 64, 32, 16, 8):
        if t <= target and m % t == 0:
            return t, m
    return 256, _round_up(m, 256)


# ----------------------------------------------------------------------------
# Pallas kernels
# ----------------------------------------------------------------------------
def _matmul_lrelu_kernel(x_ref, w_ref, o_ref):
    # (TM, K) bf16 @ (K, C) bf16 -> f32 accumulate on the MXU + LeakyReLU(0.2).
    acc = jnp.dot(x_ref[...], w_ref[...], preferred_element_type=jnp.float32)
    acc = jnp.where(acc > 0, acc, 0.2 * acc)
    o_ref[...] = acc.astype(o_ref.dtype)


def _matmul_bn_lrelu_kernel(x_ref, w_ref, g_ref, b_ref, o_ref, *,
                            m_true, m_pad, eps):
    # Whole layer's M rows are in this tile: conv matmul + exact two-pass
    # train-mode BatchNorm (per Cout block) + LeakyReLU, stored as bf16.
    acc = jnp.dot(x_ref[...], w_ref[...], preferred_element_type=jnp.float32)
    inv_m = 1.0 / m_true
    mean = jnp.sum(acc, axis=0, keepdims=True) * inv_m
    centered = acc - mean
    if m_pad > m_true:                       # exclude zero-padded rows
        rows = jax.lax.broadcasted_iota(jnp.int32, centered.shape, 0)
        centered = jnp.where(rows < m_true, centered, 0.0)
    var = jnp.sum(centered * centered, axis=0, keepdims=True) * inv_m
    scale = g_ref[...] * jax.lax.rsqrt(var + eps)
    shift = b_ref[...] - mean * scale
    y = acc * scale + shift
    y = jnp.where(y > 0, y, 0.2 * y)         # LeakyReLU(0.2)
    o_ref[...] = y.astype(o_ref.dtype)


def _matmul_stats_kernel(x_ref, w_ref, conv_ref, stats_ref):
    # Conv matmul + per-tile partial (sum, sum of squares) per output channel.
    # The conv intermediate is downcast to bf16 AFTER the f32 stats are taken.
    acc = jnp.dot(x_ref[...], w_ref[...], preferred_element_type=jnp.float32)
    conv_ref[...] = acc.astype(conv_ref.dtype)
    s = jnp.sum(acc, axis=0, keepdims=True)               # (1, C)
    ss = jnp.sum(acc * acc, axis=0, keepdims=True)        # (1, C)
    stats_ref[...] = jnp.concatenate([s, ss], axis=0)     # (2, C) block


def _bn_lrelu_kernel(x_ref, scale_ref, shift_ref, o_ref):
    # y = x*scale + shift (BN folded) + LeakyReLU(0.2); x is bf16, math in f32.
    y = x_ref[...].astype(jnp.float32) * scale_ref[...] + shift_ref[...]
    y = jnp.where(y > 0, y, 0.2 * y)
    o_ref[...] = y.astype(o_ref.dtype)


# ----------------------------------------------------------------------------
# pallas_call wrappers
# ----------------------------------------------------------------------------
def _conv_matmul_lrelu(patches, w2d, tm, *, out_dtype=jnp.bfloat16):
    m_pad, k = patches.shape
    _, c = w2d.shape
    nm = m_pad // tm
    cost = pl.CostEstimate(
        flops=2 * m_pad * k * c + m_pad * c,
        transcendentals=0,
        bytes_accessed=m_pad * k * 2 + nm * k * c * 2
        + m_pad * c * jnp.dtype(out_dtype).itemsize,
    )
    return pl.pallas_call(
        _matmul_lrelu_kernel,
        out_shape=jax.ShapeDtypeStruct((m_pad, c), out_dtype),
        grid=(nm,),
        in_specs=[
            pl.BlockSpec((tm, k), lambda i: (i, 0)),
            pl.BlockSpec((k, c), lambda i: (0, 0)),
        ],
        out_specs=pl.BlockSpec((tm, c), lambda i: (i, 0)),
        compiler_params=_compiler_params(),
        cost_estimate=cost,
    )(patches, w2d)


def _conv_matmul_bn_lrelu(patches, w2d, gamma, beta, m_true, *,
                          out_dtype=jnp.bfloat16, eps=1e-5):
    m_pad, k = patches.shape
    _, c = w2d.shape
    tc = 128 if (c % 128 == 0 and c > 128) else c     # Cout grid axis (v7x TCs)
    nc = c // tc
    g2 = gamma.reshape(1, c).astype(jnp.float32)
    b2 = beta.reshape(1, c).astype(jnp.float32)
    cost = pl.CostEstimate(
        flops=2 * m_pad * k * c + 10 * m_pad * c,
        transcendentals=c,
        bytes_accessed=m_pad * k * 2 + k * c * 2
        + m_pad * c * jnp.dtype(out_dtype).itemsize,
    )
    kern = functools.partial(_matmul_bn_lrelu_kernel,
                             m_true=m_true, m_pad=m_pad, eps=eps)
    return pl.pallas_call(
        kern,
        out_shape=jax.ShapeDtypeStruct((m_pad, c), out_dtype),
        grid=(nc,),
        in_specs=[
            pl.BlockSpec((m_pad, k), lambda j: (0, 0)),
            pl.BlockSpec((k, tc), lambda j: (0, j)),
            pl.BlockSpec((1, tc), lambda j: (0, j)),
            pl.BlockSpec((1, tc), lambda j: (0, j)),
        ],
        out_specs=pl.BlockSpec((m_pad, tc), lambda j: (0, j)),
        compiler_params=_compiler_params(),
        cost_estimate=cost,
    )(patches, w2d, g2, b2)


def _conv_matmul_stats(patches, w2d, tm):
    m_pad, k = patches.shape
    _, c = w2d.shape
    nm = m_pad // tm
    cost = pl.CostEstimate(
        flops=2 * m_pad * k * c + 3 * m_pad * c,
        transcendentals=0,
        bytes_accessed=m_pad * k * 2 + nm * k * c * 2 + m_pad * c * 2
        + nm * 2 * c * 4,
    )
    return pl.pallas_call(
        _matmul_stats_kernel,
        out_shape=(
            jax.ShapeDtypeStruct((m_pad, c), jnp.bfloat16),   # bf16 intermediate
            jax.ShapeDtypeStruct((nm, 2, c), jnp.float32),    # per-tile partials
        ),
        grid=(nm,),
        in_specs=[
            pl.BlockSpec((tm, k), lambda i: (i, 0)),
            pl.BlockSpec((k, c), lambda i: (0, 0)),
        ],
        out_specs=(
            pl.BlockSpec((tm, c), lambda i: (i, 0)),
            pl.BlockSpec((None, 2, c), lambda i: (i, 0, 0)),
        ),
        compiler_params=_compiler_params(),
        cost_estimate=cost,
    )(patches, w2d)


def _bn_lrelu(conv, scale, shift, tm, *, out_dtype=jnp.bfloat16):
    m_pad, c = conv.shape
    nm = m_pad // tm
    cost = pl.CostEstimate(
        flops=4 * m_pad * c,
        transcendentals=0,
        bytes_accessed=m_pad * c * 2
        + m_pad * c * jnp.dtype(out_dtype).itemsize + 2 * c * 4,
    )
    return pl.pallas_call(
        _bn_lrelu_kernel,
        out_shape=jax.ShapeDtypeStruct((m_pad, c), out_dtype),
        grid=(nm,),
        in_specs=[
            pl.BlockSpec((tm, c), lambda i: (i, 0)),
            pl.BlockSpec((1, c), lambda i: (0, 0)),
            pl.BlockSpec((1, c), lambda i: (0, 0)),
        ],
        out_specs=pl.BlockSpec((tm, c), lambda i: (i, 0)),
        compiler_params=_compiler_params(),
        cost_estimate=cost,
    )(conv, scale.reshape(1, c), shift.reshape(1, c))


# ----------------------------------------------------------------------------
# Glue: im2col (NHWC, bf16 patches), weight reshape, one conv block
# ----------------------------------------------------------------------------
def _im2col(x_nhwc, kh, kw, stride, pad):
    if pad:
        x_nhwc = jnp.pad(x_nhwc, ((0, 0), (pad, pad), (pad, pad), (0, 0)))
    n, hp, wp, c = x_nhwc.shape
    ho = (hp - kh) // stride + 1
    wo = (wp - kw) // stride + 1
    patches = []
    for i in range(kh):
        for j in range(kw):
            patches.append(
                x_nhwc[:, i:i + ho * stride:stride, j:j + wo * stride:stride, :])
    p = jnp.stack(patches, axis=3)            # (N, Ho, Wo, kh*kw, C)
    return p.reshape(n * ho * wo, kh * kw * c), (n, ho, wo)


def _conv_block(x_nhwc, w_oihw, gamma, beta, *, stride, pad, use_bn):
    """conv(4x4, bias=False) [+ train-mode BatchNorm2d] + LeakyReLU(0.2).

    x_nhwc: (N, H, W, Cin) bf16.  Returns (N, Ho, Wo, Cout) bf16.
    """
    cout, cin, kh, kw = w_oihw.shape

    # Only pad Cin up to a multiple of 4 (e.g. 3 -> 4 for the RGB layer).
    # K never has to be a multiple of 128: the kernels always take the full
    # K extent as a single block.
    cin_p = cin if cin % 4 == 0 else _round_up(cin, 4)
    if cin_p != cin:
        x_nhwc = jnp.pad(x_nhwc, ((0, 0), (0, 0), (0, 0), (0, cin_p - cin)))
        w_oihw = jnp.pad(w_oihw, ((0, 0), (0, cin_p - cin), (0, 0), (0, 0)))

    # (Cout, Cin, kh, kw) -> (kh, kw, Cin, Cout) -> (K, Cout); bf16 operands.
    # Cout is NOT padded: a (tm, Cout) block equal to the full last dim is
    # legal, and a masked store beats an extra XLA slice pass.
    w2d = (jnp.transpose(w_oihw, (2, 3, 1, 0))
           .reshape(kh * kw * cin_p, cout).astype(jnp.bfloat16))

    patches, (n, ho, wo) = _im2col(x_nhwc, kh, kw, stride, pad)   # bf16 (M, K)
    m_true = patches.shape[0]
    tm, m_pad = _m_tiling(m_true)
    if m_pad != m_true:
        patches = jnp.pad(patches, ((0, m_pad - m_true), (0, 0)))

    if not use_bn:
        out2d = _conv_matmul_lrelu(patches, w2d, tm)
    elif m_pad == tm:
        # Whole layer's M fits one tile: conv + BN (exact two-pass stats) +
        # LeakyReLU fully fused; no f32 intermediate, single launch, gridded
        # over Cout so both v7x TensorCores get work.
        out2d = _conv_matmul_bn_lrelu(patches, w2d, gamma, beta, m_true)
    else:
        # Large batch: per-tile (sum, sumsq) partials from the f32 accumulator,
        # bf16 conv intermediate, tiny XLA finalize, then BN apply kernel.
        # NOTE: E[x^2]-E[x]^2 can lose precision for huge means; acceptable
        # here (clamped at 0) and documented.
        conv, stats = _conv_matmul_stats(patches, w2d, tm)
        mean = jnp.sum(stats[:, 0, :], axis=0) / m_true
        var = jnp.maximum(jnp.sum(stats[:, 1, :], axis=0) / m_true
                          - mean * mean, 0.0)            # biased, train-mode BN
        inv_std = jax.lax.rsqrt(var + 1e-5)
        scale = (gamma * inv_std).astype(jnp.float32)
        shift = (beta - mean * gamma * inv_std).astype(jnp.float32)
        out2d = _bn_lrelu(conv, scale, shift, tm)

    if m_pad != m_true:
        out2d = out2d[:m_true]
    return out2d.reshape(n, ho, wo, cout)


# ----------------------------------------------------------------------------
# Discriminator forward
# ----------------------------------------------------------------------------
def init_discriminator_params(key, in_channels, ndf=64):
    shapes = [
        (ndf, in_channels, 4, 4),
        (ndf * 2, ndf, 4, 4),
        (ndf * 4, ndf * 2, 4, 4),
        (ndf * 8, ndf * 4, 4, 4),
        (1, ndf * 8, 4, 4),
    ]
    bn_layers = (1, 2, 3)            # layers with BatchNorm2d
    keys = jax.random.split(key, len(shapes))
    params = {}
    for li, (k, shp) in enumerate(zip(keys, shapes)):
        params[f"w{li}"] = jax.random.normal(k, shp, jnp.float32) * 0.02
        if li in bn_layers:
            params[f"gamma{li}"] = jnp.ones((shp[0],), jnp.float32)
            params[f"beta{li}"] = jnp.zeros((shp[0],), jnp.float32)
    return params


def discriminator_forward(params, x_nchw):
    """DCGAN discriminator; x_nchw (N, C, H, W) f32 -> (N, 1) probabilities."""
    n = x_nchw.shape[0]
    x = jnp.transpose(x_nchw, (0, 2, 3, 1)).astype(jnp.bfloat16)  # NHWC bf16

    # (stride, pad, use_bn) for the four conv + LeakyReLU blocks.
    cfgs = [(2, 1, False), (2, 1, True), (2, 1, True), (2, 1, True)]
    for li, (stride, pad, use_bn) in enumerate(cfgs):
        x = _conv_block(x, params[f"w{li}"],
                        params.get(f"gamma{li}"), params.get(f"beta{li}"),
                        stride=stride, pad=pad, use_bn=use_bn)

    # Final conv (Cout=1, 4x4, stride 1, pad 0) + Sigmoid as plain jnp: a
    # (N, 8192) x (8192, 1) matmul with a single output lane is the worst
    # possible MXU/store shape and a pallas_call launch would dominate it.
    w4 = params["w4"]
    patches, _ = _im2col(x, w4.shape[2], w4.shape[3], 1, 0)       # (N, K)
    w2d = jnp.transpose(w4, (2, 3, 1, 0)).reshape(-1, w4.shape[0])
    logits = jnp.dot(patches.astype(jnp.float32), w2d.astype(jnp.float32))
    y = jax.nn.sigmoid(logits)
    return y.reshape(n, -1)                                       # (N, 1)


# ----------------------------------------------------------------------------
if __name__ == "__main__":
    key = jax.random.PRNGKey(0)
    k_x, k_p = jax.random.split(key)

    in_size = (3, 64, 64)   # (C, H, W); 64x64 so the net ends at 1x1 spatial
    params = init_discriminator_params(k_p, in_size[0], ndf=64)
    fwd = jax.jit(discriminator_forward)

    # Small batch: exercises the fully fused conv+BN+LeakyReLU kernels.
    x_small = jax.random.normal(k_x, (2,) + in_size, jnp.float32)
    y_small = jax.block_until_ready(fwd(params, x_small))
    assert y_small.shape == (2, 1), y_small.shape
    assert bool(jnp.all(jnp.isfinite(y_small)))

    # Larger batch: exercises the tiled matmul+stats / BN-apply path.
    x_big = jax.random.normal(k_x, (16,) + in_size, jnp.float32)
    y_big = jax.block_until_ready(fwd(params, x_big))
    assert y_big.shape == (16, 1), y_big.shape
    assert bool(jnp.all(jnp.isfinite(y_big)))

    print("KERNEL_OK")
</pallas_src>

<mosaic_0001>
module attributes {stable_mosaic.version = 11 : i64} {
  func.func @_matmul_lrelu_kernel(%arg0: i32, %arg1: memref<512x64xbf16, #tpu.memory_space<vmem>>, %arg2: memref<64x64xbf16, #tpu.memory_space<vmem>>, %arg3: memref<512x64xbf16, #tpu.memory_space<vmem>>) attributes {dimension_semantics = [#tpu.dimension_semantics<parallel>], iteration_bounds = array<i64: 4>, scalar_prefetch = 0 : i64, scratch_operands = 0 : i64, tpu.core_type = #tpu.core_type<tc>, window_params = [{transform_indices = @transform_0, window_bounds = array<i64: 512, 64>}, {pipeline_mode = #tpu.pipeline_mode<synchronous>, transform_indices = @transform_1, window_bounds = array<i64: 64, 64>}, {transform_indices = @transform_2, window_bounds = array<i64: 512, 64>}]} {
    %c0 = arith.constant 0 : index
    %c0_0 = arith.constant 0 : index
    %0 = vector.load %arg1[%c0, %c0_0] : memref<512x64xbf16, #tpu.memory_space<vmem>>, vector<512x64xbf16>
    %c0_1 = arith.constant 0 : index
    %c0_2 = arith.constant 0 : index
    %1 = vector.load %arg2[%c0_1, %c0_2] : memref<64x64xbf16, #tpu.memory_space<vmem>>, vector<64x64xbf16>
    %cst = arith.constant dense<0.000000e+00> : vector<512x64xf32>
    %2 = tpu.matmul %0, %1, %cst {dimension_numbers = #tpu.dot_dimension_numbers<[1], [0], [0], [1], [0, 0, 1, 1], [], []>} : vector<512x64xbf16>, vector<64x64xbf16>, vector<512x64xf32> -> vector<512x64xf32>
    %cst_3 = arith.constant 0.000000e+00 : f32
    %3 = vector.broadcast %cst_3 : f32 to vector<512x64xf32>
    %4 = arith.cmpf ogt, %2, %3 : vector<512x64xf32>
    %cst_4 = arith.constant 2.000000e-01 : f32
    %5 = vector.broadcast %cst_4 : f32 to vector<512x64xf32>
    %6 = arith.mulf %5, %2 : vector<512x64xf32>
    %7 = arith.select %4, %2, %6 : vector<512x64xi1>, vector<512x64xf32>
    %8 = arith.truncf %7 : vector<512x64xf32> to vector<512x64xbf16>
    %c0_5 = arith.constant 0 : index
    %c0_6 = arith.constant 0 : index
    %9 = vector.load %arg3[%c0_5, %c0_6] : memref<512x64xbf16, #tpu.memory_space<vmem>>, vector<512x64xbf16>
    tpu.vector_store %arg3[%c0_5, %c0_6], %8 {strides = array<i32>} : memref<512x64xbf16, #tpu.memory_space<vmem>>, vector<512x64xbf16>,
    return
  }
  func.func @transform_0(%arg0: i32) -> (i32, i32) {
    %c0_i32 = arith.constant 0 : i32
    %c0_i32_0 = arith.constant 0 : i32
    return %arg0, %c0_i32 : i32, i32
  }
  func.func @transform_1(%arg0: i32) -> (i32, i32) {
    %c0_i32 = arith.constant 0 : i32
    %c0_i32_0 = arith.constant 0 : i32
    %c0_i32_1 = arith.constant 0 : i32
    return %c0_i32, %c0_i32_0 : i32, i32
  }
  func.func @transform_2(%arg0: i32) -> (i32, i32) {
    %c0_i32 = arith.constant 0 : i32
    %c0_i32_0 = arith.constant 0 : i32
    return %arg0, %c0_i32 : i32, i32
  }
}

module attributes {stable_mosaic.version = 11 : i64} {
  func.func @_matmul_bn_lrelu_kernel(%arg0: i32, %arg1: memref<512x1024xbf16, #tpu.memory_space<vmem>>, %arg2: memref<1024x128xbf16, #tpu.memory_space<vmem>>, %arg3: memref<1x128xf32, #tpu.memory_space<vmem>>, %arg4: memref<1x128xf32, #tpu.memory_space<vmem>>, %arg5: memref<512x128xbf16, #tpu.memory_space<vmem>>) attributes {dimension_semantics = [#tpu.dimension_semantics<parallel>], iteration_bounds = array<i64: 1>, scalar_prefetch = 0 : i64, scratch_operands = 0 : i64, tpu.core_type = #tpu.core_type<tc>, window_params = [{pipeline_mode = #tpu.pipeline_mode<synchronous>, transform_indices = @transform_0, window_bounds = array<i64: 512, 1024>}, {transform_indices = @transform_1, window_bounds = array<i64: 1024, 128>}, {transform_indices = @transform_2, window_bounds = array<i64: 1, 128>}, {transform_indices = @transform_3, window_bounds = array<i64: 1, 128>}, {transform_indices = @transform_4, window_bounds = array<i64: 512, 128>}]} {
    %c0 = arith.constant 0 : index
    %c0_0 = arith.constant 0 : index
    %0 = vector.load %arg1[%c0, %c0_0] : memref<512x1024xbf16, #tpu.memory_space<vmem>>, vector<512x1024xbf16>
    %c0_1 = arith.constant 0 : index
    %c0_2 = arith.constant 0 : index
    %1 = vector.load %arg2[%c0_1, %c0_2] : memref<1024x128xbf16, #tpu.memory_space<vmem>>, vector<1024x128xbf16>
    %cst = arith.constant dense<0.000000e+00> : vector<512x128xf32>
    %2 = tpu.matmul %0, %1, %cst {dimension_numbers = #tpu.dot_dimension_numbers<[1], [0], [0], [1], [0, 0, 1, 1], [], []>} : vector<512x1024xbf16>, vector<1024x128xbf16>, vector<512x128xf32> -> vector<512x128xf32>
    %cst_3 = arith.constant dense<0.000000e+00> : vector<128xf32>
    %3 = vector.multi_reduction <add>, %2, %cst_3 [0] : vector<512x128xf32> to vector<128xf32>
    %4 = vector.shape_cast %3 : vector<128xf32> to vector<1x128xf32>
    %cst_4 = arith.constant 0.001953125 : f32
    %5 = vector.broadcast %cst_4 : f32 to vector<1x128xf32>
    %6 = arith.mulf %4, %5 : vector<1x128xf32>
    %7 = vector.broadcast %6 : vector<1x128xf32> to vector<512x128xf32>
    %8 = arith.subf %2, %7 : vector<512x128xf32>
    %9 = arith.mulf %8, %8 : vector<512x128xf32>
    %cst_5 = arith.constant dense<0.000000e+00> : vector<128xf32>
    %10 = vector.multi_reduction <add>, %9, %cst_5 [0] : vector<512x128xf32> to vector<128xf32>
    %11 = vector.shape_cast %10 : vector<128xf32> to vector<1x128xf32>
    %cst_6 = arith.constant 0.001953125 : f32
    %12 = vector.broadcast %cst_6 : f32 to vector<1x128xf32>
    %13 = arith.mulf %11, %12 : vector<1x128xf32>
    %c0_7 = arith.constant 0 : index
    %c0_8 = arith.constant 0 : index
    %14 = vector.load %arg3[%c0_7, %c0_8] : memref<1x128xf32, #tpu.memory_space<vmem>>, vector<1x128xf32>
    %cst_9 = arith.constant 9.99999974E-6 : f32
    %15 = vector.broadcast %cst_9 : f32 to vector<1x128xf32>
    %16 = arith.addf %13, %15 : vector<1x128xf32>
    %17 = math.rsqrt %16 : vector<1x128xf32>
    %18 = arith.mulf %14, %17 : vector<1x128xf32>
    %c0_10 = arith.constant 0 : index
    %c0_11 = arith.constant 0 : index
    %19 = vector.load %arg4[%c0_10, %c0_11] : memref<1x128xf32, #tpu.memory_space<vmem>>, vector<1x128xf32>
    %20 = arith.mulf %6, %18 : vector<1x128xf32>
    %21 = arith.subf %19, %20 : vector<1x128xf32>
    %22 = vector.broadcast %18 : vector<1x128xf32> to vector<512x128xf32>
    %23 = arith.mulf %2, %22 : vector<512x128xf32>
    %24 = vector.broadcast %21 : vector<1x128xf32> to vector<512x128xf32>
    %25 = arith.addf %23, %24 : vector<512x128xf32>
    %cst_12 = arith.constant 0.000000e+00 : f32
    %26 = vector.broadcast %cst_12 : f32 to vector<512x128xf32>
    %27 = arith.cmpf ogt, %25, %26 : vector<512x128xf32>
    %cst_13 = arith.constant 2.000000e-01 : f32
    %28 = vector.broadcast %cst_13 : f32 to vector<512x128xf32>
    %29 = arith.mulf %28, %25 : vector<512x128xf32>
    %30 = arith.select %27, %25, %29 : vector<512x128xi1>, vector<512x128xf32>
    %31 = arith.truncf %30 : vector<512x128xf32> to vector<512x128xbf16>
    %c0_14 = arith.constant 0 : index
    %c0_15 = arith.constant 0 : index
    %32 = vector.load %arg5[%c0_14, %c0_15] : memref<512x128xbf16, #tpu.memory_space<vmem>>, vector<512x128xbf16>
    tpu.vector_store %arg5[%c0_14, %c0_15], %31 {strides = array<i32>} : memref<512x128xbf16, #tpu.memory_space<vmem>>, vector<512x128xbf16>,
    return
  }
  func.func @transform_0(%arg0: i32) -> (i32, i32) {
    %c0_i32 = arith.constant 0 : i32
    %c0_i32_0 = arith.constant 0 : i32
    %c0_i32_1 = arith.constant 0 : i32
    return %c0_i32, %c0_i32_0 : i32, i32
  }
  func.func @transform_1(%arg0: i32) -> (i32, i32) {
    %c0_i32 = arith.constant 0 : i32
    %c0_i32_0 = arith.constant 0 : i32
    return %c0_i32, %arg0 : i32, i32
  }
  func.func @transform_2(%arg0: i32) -> (i32, i32) {
    %c0_i32 = arith.constant 0 : i32
    %c0_i32_0 = arith.constant 0 : i32
    return %c0_i32, %arg0 : i32, i32
  }
  func.func @transform_3(%arg0: i32) -> (i32, i32) {
    %c0_i32 = arith.constant 0 : i32
    %c0_i32_0 = arith.constant 0 : i32
    return %c0_i32, %arg0 : i32, i32
  }
  func.func @transform_4(%arg0: i32) -> (i32, i32) {
    %c0_i32 = arith.constant 0 : i32
    %c0_i32_0 = arith.constant 0 : i32
    return %c0_i32, %arg0 : i32, i32
  }
}

module attributes {stable_mosaic.version = 11 : i64} {
  func.func @_matmul_bn_lrelu_kernel(%arg0: i32, %arg1: memref<128x2048xbf16, #tpu.memory_space<vmem>>, %arg2: memref<2048x128xbf16, #tpu.memory_space<vmem>>, %arg3: memref<1x128xf32, #tpu.memory_space<vmem>>, %arg4: memref<1x128xf32, #tpu.memory_space<vmem>>, %arg5: memref<128x128xbf16, #tpu.memory_space<vmem>>) attributes {dimension_semantics = [#tpu.dimension_semantics<parallel>], iteration_bounds = array<i64: 2>, scalar_prefetch = 0 : i64, scratch_operands = 0 : i64, tpu.core_type = #tpu.core_type<tc>, window_params = [{pipeline_mode = #tpu.pipeline_mode<synchronous>, transform_indices = @transform_0, window_bounds = array<i64: 128, 2048>}, {transform_indices = @transform_1, window_bounds = array<i64: 2048, 128>}, {transform_indices = @transform_2, window_bounds = array<i64: 1, 128>}, {transform_indices = @transform_3, window_bounds = array<i64: 1, 128>}, {transform_indices = @transform_4, window_bounds = array<i64: 128, 128>}]} {
    %c0 = arith.constant 0 : index
    %c0_0 = arith.constant 0 : index
    %0 = vector.load %arg1[%c0, %c0_0] : memref<128x2048xbf16, #tpu.memory_space<vmem>>, vector<128x2048xbf16>
    %c0_1 = arith.constant 0 : index
    %c0_2 = arith.constant 0 : index
    %1 = vector.load %arg2[%c0_1, %c0_2] : memref<2048x128xbf16, #tpu.memory_space<vmem>>, vector<2048x128xbf16>
    %cst = arith.constant dense<0.000000e+00> : vector<128x128xf32>
    %2 = tpu.matmul %0, %1, %cst {dimension_numbers = #tpu.dot_dimension_numbers<[1], [0], [0], [1], [0, 0, 1, 1], [], []>} : vector<128x2048xbf16>, vector<2048x128xbf16>, vector<128x128xf32> -> vector<128x128xf32>
    %cst_3 = arith.constant dense<0.000000e+00> : vector<128xf32>
    %3 = vector.multi_reduction <add>, %2, %cst_3 [0] : vector<128x128xf32> to vector<128xf32>
    %4 = vector.shape_cast %3 : vector<128xf32> to vector<1x128xf32>
    %cst_4 = arith.constant 7.812500e-03 : f32
    %5 = vector.broadcast %cst_4 : f32 to vector<1x128xf32>
    %6 = arith.mulf %4, %5 : vector<1x128xf32>
    %7 = vector.broadcast %6 : vector<1x128xf32> to vector<128x128xf32>
    %8 = arith.subf %2, %7 : vector<128x128xf32>
    %9 = arith.mulf %8, %8 : vector<128x128xf32>
    %cst_5 = arith.constant dense<0.000000e+00> : vector<128xf32>
    %10 = vector.multi_reduction <add>, %9, %cst_5 [0] : vector<128x128xf32> to vector<128xf32>
    %11 = vector.shape_cast %10 : vector<128xf32> to vector<1x128xf32>
    %cst_6 = arith.constant 7.812500e-03 : f32
    %12 = vector.broadcast %cst_6 : f32 to vector<1x128xf32>
    %13 = arith.mulf %11, %12 : vector<1x128xf32>
    %c0_7 = arith.constant 0 : index
    %c0_8 = arith.constant 0 : index
    %14 = vector.load %arg3[%c0_7, %c0_8] : memref<1x128xf32, #tpu.memory_space<vmem>>, vector<1x128xf32>
    %cst_9 = arith.constant 9.99999974E-6 : f32
    %15 = vector.broadcast %cst_9 : f32 to vector<1x128xf32>
    %16 = arith.addf %13, %15 : vector<1x128xf32>
    %17 = math.rsqrt %16 : vector<1x128xf32>
    %18 = arith.mulf %14, %17 : vector<1x128xf32>
    %c0_10 = arith.constant 0 : index
    %c0_11 = arith.constant 0 : index
    %19 = vector.load %arg4[%c0_10, %c0_11] : memref<1x128xf32, #tpu.memory_space<vmem>>, vector<1x128xf32>
    %20 = arith.mulf %6, %18 : vector<1x128xf32>
    %21 = arith.subf %19, %20 : vector<1x128xf32>
    %22 = vector.broadcast %18 : vector<1x128xf32> to vector<128x128xf32>
    %23 = arith.mulf %2, %22 : vector<128x128xf32>
    %24 = vector.broadcast %21 : vector<1x128xf32> to vector<128x128xf32>
    %25 = arith.addf %23, %24 : vector<128x128xf32>
    %cst_12 = arith.constant 0.000000e+00 : f32
    %26 = vector.broadcast %cst_12 : f32 to vector<128x128xf32>
    %27 = arith.cmpf ogt, %25, %26 : vector<128x128xf32>
    %cst_13 = arith.constant 2.000000e-01 : f32
    %28 = vector.broadcast %cst_13 : f32 to vector<128x128xf32>
    %29 = arith.mulf %28, %25 : vector<128x128xf32>
    %30 = arith.select %27, %25, %29 : vector<128x128xi1>, vector<128x128xf32>
    %31 = arith.truncf %30 : vector<128x128xf32> to vector<128x128xbf16>
    %c0_14 = arith.constant 0 : index
    %c0_15 = arith.constant 0 : index
    %32 = vector.load %arg5[%c0_14, %c0_15] : memref<128x128xbf16, #tpu.memory_space<vmem>>, vector<128x128xbf16>
    tpu.vector_store %arg5[%c0_14, %c0_15], %31 {strides = array<i32>} : memref<128x128xbf16, #tpu.memory_space<vmem>>, vector<128x128xbf16>,
    return
  }
  func.func @transform_0(%arg0: i32) -> (i32, i32) {
    %c0_i32 = arith.constant 0 : i32
    %c0_i32_0 = arith.constant 0 : i32
    %c0_i32_1 = arith.constant 0 : i32
    return %c0_i32, %c0_i32_0 : i32, i32
  }
  func.func @transform_1(%arg0: i32) -> (i32, i32) {
    %c0_i32 = arith.constant 0 : i32
    %c0_i32_0 = arith.constant 0 : i32
    return %c0_i32, %arg0 : i32, i32
  }
  func.func @transform_2(%arg0: i32) -> (i32, i32) {
    %c0_i32 = arith.constant 0 : i32
    %c0_i32_0 = arith.constant 0 : i32
    return %c0_i32, %arg0 : i32, i32
  }
  func.func @transform_3(%arg0: i32) -> (i32, i32) {
    %c0_i32 = arith.constant 0 : i32
    %c0_i32_0 = arith.constant 0 : i32
    return %c0_i32, %arg0 : i32, i32
  }
  func.func @transform_4(%arg0: i32) -> (i32, i32) {
    %c0_i32 = arith.constant 0 : i32
    %c0_i32_0 = arith.constant 0 : i32
    return %c0_i32, %arg0 : i32, i32
  }
}

module attributes {stable_mosaic.version = 11 : i64} {
  func.func @_matmul_bn_lrelu_kernel(%arg0: i32, %arg1: memref<32x4096xbf16, #tpu.memory_space<vmem>>, %arg2: memref<4096x128xbf16, #tpu.memory_space<vmem>>, %arg3: memref<1x128xf32, #tpu.memory_space<vmem>>, %arg4: memref<1x128xf32, #tpu.memory_space<vmem>>, %arg5: memref<32x128xbf16, #tpu.memory_space<vmem>>) attributes {dimension_semantics = [#tpu.dimension_semantics<parallel>], iteration_bounds = array<i64: 4>, scalar_prefetch = 0 : i64, scratch_operands = 0 : i64, tpu.core_type = #tpu.core_type<tc>, window_params = [{pipeline_mode = #tpu.pipeline_mode<synchronous>, transform_indices = @transform_0, window_bounds = array<i64: 32, 4096>}, {transform_indices = @transform_1, window_bounds = array<i64: 4096, 128>}, {transform_indices = @transform_2, window_bounds = array<i64: 1, 128>}, {transform_indices = @transform_3, window_bounds = array<i64: 1, 128>}, {transform_indices = @transform_4, window_bounds = array<i64: 32, 128>}]} {
    %c0 = arith.constant 0 : index
    %c0_0 = arith.constant 0 : index
    %0 = vector.load %arg1[%c0, %c0_0] : memref<32x4096xbf16, #tpu.memory_space<vmem>>, vector<32x4096xbf16>
    %c0_1 = arith.constant 0 : index
    %c0_2 = arith.constant 0 : index
    %1 = vector.load %arg2[%c0_1, %c0_2] : memref<4096x128xbf16, #tpu.memory_space<vmem>>, vector<4096x128xbf16>
    %cst = arith.constant dense<0.000000e+00> : vector<32x128xf32>
    %2 = tpu.matmul %0, %1, %cst {dimension_numbers = #tpu.dot_dimension_numbers<[1], [0], [0], [1], [0, 0, 1, 1], [], []>} : vector<32x4096xbf16>, vector<4096x128xbf16>, vector<32x128xf32> -> vector<32x128xf32>
    %cst_3 = arith.constant dense<0.000000e+00> : vector<128xf32>
    %3 = vector.multi_reduction <add>, %2, %cst_3 [0] : vector<32x128xf32> to vector<128xf32>
    %4 = vector.shape_cast %3 : vector<128xf32> to vector<1x128xf32>
    %cst_4 = arith.constant 3.125000e-02 : f32
    %5 = vector.broadcast %cst_4 : f32 to vector<1x128xf32>
    %6 = arith.mulf %4, %5 : vector<1x128xf32>
    %7 = vector.broadcast %6 : vector<1x128xf32> to vector<32x128xf32>
    %8 = arith.subf %2, %7 : vector<32x128xf32>
    %9 = arith.mulf %8, %8 : vector<32x128xf32>
    %cst_5 = arith.constant dense<0.000000e+00> : vector<128xf32>
    %10 = vector.multi_reduction <add>, %9, %cst_5 [0] : vector<32x128xf32> to vector<128xf32>
    %11 = vector.shape_cast %10 : vector<128xf32> to vector<1x128xf32>
    %cst_6 = arith.constant 3.125000e-02 : f32
    %12 = vector.broadcast %cst_6 : f32 to vector<1x128xf32>
    %13 = arith.mulf %11, %12 : vector<1x128xf32>
    %c0_7 = arith.constant 0 : index
    %c0_8 = arith.constant 0 : index
    %14 = vector.load %arg3[%c0_7, %c0_8] : memref<1x128xf32, #tpu.memory_space<vmem>>, vector<1x128xf32>
    %cst_9 = arith.constant 9.99999974E-6 : f32
    %15 = vector.broadcast %cst_9 : f32 to vector<1x128xf32>
    %16 = arith.addf %13, %15 : vector<1x128xf32>
    %17 = math.rsqrt %16 : vector<1x128xf32>
    %18 = arith.mulf %14, %17 : vector<1x128xf32>
    %c0_10 = arith.constant 0 : index
    %c0_11 = arith.constant 0 : index
    %19 = vector.load %arg4[%c0_10, %c0_11] : memref<1x128xf32, #tpu.memory_space<vmem>>, vector<1x128xf32>
    %20 = arith.mulf %6, %18 : vector<1x128xf32>
    %21 = arith.subf %19, %20 : vector<1x128xf32>
    %22 = vector.broadcast %18 : vector<1x128xf32> to vector<32x128xf32>
    %23 = arith.mulf %2, %22 : vector<32x128xf32>
    %24 = vector.broadcast %21 : vector<1x128xf32> to vector<32x128xf32>
    %25 = arith.addf %23, %24 : vector<32x128xf32>
    %cst_12 = arith.constant 0.000000e+00 : f32
    %26 = vector.broadcast %cst_12 : f32 to vector<32x128xf32>
    %27 = arith.cmpf ogt, %25, %26 : vector<32x128xf32>
    %cst_13 = arith.constant 2.000000e-01 : f32
    %28 = vector.broadcast %cst_13 : f32 to vector<32x128xf32>
    %29 = arith.mulf %28, %25 : vector<32x128xf32>
    %30 = arith.select %27, %25, %29 : vector<32x128xi1>, vector<32x128xf32>
    %31 = arith.truncf %30 : vector<32x128xf32> to vector<32x128xbf16>
    %c0_14 = arith.constant 0 : index
    %c0_15 = arith.constant 0 : index
    %32 = vector.load %arg5[%c0_14, %c0_15] : memref<32x128xbf16, #tpu.memory_space<vmem>>, vector<32x128xbf16>
    tpu.vector_store %arg5[%c0_14, %c0_15], %31 {strides = array<i32>} : memref<32x128xbf16, #tpu.memory_space<vmem>>, vector<32x128xbf16>,
    return
  }
  func.func @transform_0(%arg0: i32) -> (i32, i32) {
    %c0_i32 = arith.constant 0 : i32
    %c0_i32_0 = arith.constant 0 : i32
    %c0_i32_1 = arith.constant 0 : i32
    return %c0_i32, %c0_i32_0 : i32, i32
  }
  func.func @transform_1(%arg0: i32) -> (i32, i32) {
    %c0_i32 = arith.constant 0 : i32
    %c0_i32_0 = arith.constant 0 : i32
    return %c0_i32, %arg0 : i32, i32
  }
  func.func @transform_2(%arg0: i32) -> (i32, i32) {
    %c0_i32 = arith.constant 0 : i32
    %c0_i32_0 = arith.constant 0 : i32
    return %c0_i32, %arg0 : i32, i32
  }
  func.func @transform_3(%arg0: i32) -> (i32, i32) {
    %c0_i32 = arith.constant 0 : i32
    %c0_i32_0 = arith.constant 0 : i32
    return %c0_i32, %arg0 : i32, i32
  }
  func.func @transform_4(%arg0: i32) -> (i32, i32) {
    %c0_i32 = arith.constant 0 : i32
    %c0_i32_0 = arith.constant 0 : i32
    return %c0_i32, %arg0 : i32, i32
  }
}

</mosaic_0001>

<bundles_post_ra>
// kernel: discriminator_forward.4
= control target key start
LH: loop header
LB: loop body
LE: loop exit
PB: predicated region body
PF: predicated region fallthrough
CT: control target
= control target key end

     0   :  { %s1749_s9 = smov 0   ;;  %s1982_s0 = inlined_call_operand.vmem [shape: bf16[2048,64], index: 0, kind: input, shape index: {}]   ;;  %s1983_s1 = inlined_call_operand.vmem [shape: bf16[64,64], index: 1, kind: input, shape index: {}]   ;;  %s1984_s2 = inlined_call_operand.vmem [shape: bf16[2048,64], index: 2, kind: output, shape index: {}]  }
   0x1 LB: > { %s1359_s10 = sadd.s32 4294967295, %s1732_s9   ;;  %p1363_p0 = scmp.ge.s32.totalorder %s1732_s9, 1  ;;  %s1732_s9 = sphi %s1749_s9, %s12_s9  }
   0x2   : > { %p113_p1 = scmp.lt.s32.totalorder %s1732_s9, 5 }
   0x4   : > { %p114_p2 = pnand %p1363_p0, %p113_p1 }
   0x5   : > { %v1690_v0 = vld [vmem:[%s1983_s1] sm:$0xff] (!%p114_p2)   ;;  %s1364_s13 = sshll.u32 (!%p114_p2), %s1359_s10, 6  ;;  %v1691_v1 = vld [vmem:[%s1983_s1 + $0x8] sm:$0xff] (!%p114_p2)   ;;  %v1692_v2 = vld [vmem:[%s1983_s1 + $0x10] sm:$0xff] (!%p114_p2)   ;;  %vm404_vm0 = vcmask (!%p114_p2), 523264   ;;  %vm1238_vm3 = vcmask (!%p114_p2), 519168  }
   0x6   : > { %117 = sbr.rel (%p114_p2) target bundleno = 306 (0x132), region = 28  ;;  %p136_p3 = scmp.lt.s32.totalorder (!%p114_p2), %s1364_s13, 255  ;;  %1602 = vmatprep.subr.bf16.mxu0 (!%p114_p2), %v1690_v0  ;;  %1674 = vmatprep.subr.bf16.mxu1 (!%p114_p2), %v1690_v0  ;;  %v1693_v3 = vld [vmem:[%s1983_s1 + $0x18] sm:$0xff] (!%p114_p2)  }
   0x7   : > { %1603 = vmatpush3.bf16.msra.mxu0 (!%p114_p2), %v1690_v0  ;;  %1678 = vmatpush3.bf16.msra.mxu1 (!%p114_p2), %v1690_v0 }
   0x8   : > { %1604 = vmatprep.subr.bf16.mxu0 (!%p114_p2), %v1691_v1  ;;  %1675 = vmatprep.subr.bf16.mxu1 (!%p114_p2), %v1691_v1 }
   0xb   : > { %1605 = vmatpush3.bf16.msra.mxu0 (!%p114_p2), %v1691_v1  ;;  %1679 = vmatpush3.bf16.msra.mxu1 (!%p114_p2), %v1691_v1 }
   0xc   : > { %1606 = vmatprep.subr.bf16.mxu0 (!%p114_p2), %v1692_v2  ;;  %1676 = vmatprep.subr.bf16.mxu1 (!%p114_p2), %v1692_v2 }
   0xd   : > { %s1986_s13 = smov (!%p136_p3, %s1364_s13), 255 }
   0xe   : > { %s1365_s18 = sshll.u32 %s1986_s13, 2 }
   0xf   : > { %s1777_s23 = scalar_lea.vmem %s1982_s0, %s1365_s18  ;;  %1607 = vmatpush3.bf16.msra.mxu0 %v1692_v2  ;;  %1680 = vmatpush3.bf16.msra.mxu1 %v1692_v2  ;;  %s1848_s26 = scalar_lea.vmem %s1984_s2, %s1365_s18 }
  0x10   : > { %v1694_v4 = vld [vmem:[%s1777_s23] sm:$0xff]   ;;  %1608 = vmatprep.subr.bf16.mxu0 %v1693_v3  ;;  %1677 = vmatprep.subr.bf16.mxu1 %v1693_v3  ;;  %v1696_v6 = vld [vmem:[%s1777_s23 + $0x8] sm:$0xff]   ;;  %v1698_v8 = vld [vmem:[%s1777_s23 + $0x10] sm:$0xff]  }
  0x11   : > { %v1695_v5 = vld [vmem:[%s1777_s23 + $0x80] sm:$0xff]   ;;  %1610 = vmatprep.mubr.msk.bf16.mxu0 %vm404_vm0, %v1694_v4  ;;  %v1697_v7 = vld [vmem:[%s1777_s23 + $0x88] sm:$0xff]   ;;  %v1699_v9 = vld [vmem:[%s1777_s23 + $0x90] sm:$0xff]  }
  0x12   : > { %1642 = vmatprep.mubr.msk.bf16.mxu1 %vm404_vm0, %v1695_v5  ;;  %v1700_v10 = vld [vmem:[%s1777_s23 + $0x18] sm:$0xff]   ;;  %v1702_v12 = vld [vmem:[%s1777_s23 + $0x20] sm:$0xff]   ;;  %v1704_v14 = vld [vmem:[%s1777_s23 + $0x28] sm:$0xff]  }
  0x13   : > { %1609 = vmatpush3.bf16.msra.mxu0 %v1693_v3  ;;  %1681 = vmatpush3.bf16.msra.mxu1 %v1693_v3  ;;  %v1701_v11 = vld [vmem:[%s1777_s23 + $0x98] sm:$0xff]   ;;  %v1703_v13 = vld [vmem:[%s1777_s23 + $0xa0] sm:$0xff]   ;;  %v1705_v15 = vld [vmem:[%s1777_s23 + $0xa8] sm:$0xff]  }
  0x14   : > { %v1706_v16 = vld [vmem:[%s1777_s23 + $0x30] sm:$0xff]   ;;  %v1708_v18 = vld [vmem:[%s1777_s23 + $0x38] sm:$0xff]   ;;  %v1710_v20 = vld [vmem:[%s1777_s23 + $0x40] sm:$0xff]  }
  0x15   : > { %v1707_v17 = vld [vmem:[%s1777_s23 + $0xb0] sm:$0xff]   ;;  %v1709_v19 = vld [vmem:[%s1777_s23 + $0xb8] sm:$0xff]   ;;  %v1711_v21 = vld [vmem:[%s1777_s23 + $0xc0] sm:$0xff]  }
  0x16   : > { %1611 = vmatmul.mubr.msk.bf16.vlgmr.msra.gmra.mrb[0].mxu0 %vm404_vm0, %v1696_v6  ;;  %1643 = vmatmul.mubr.msk.bf16.vlgmr.msra.gmra.mrb[0].mxu1 %vm404_vm0, %v1697_v7  ;;  %v1712_v22 = vld [vmem:[%s1777_s23 + $0x48] sm:$0xff]   ;;  %v1714_v24 = vld [vmem:[%s1777_s23 + $0x50] sm:$0xff]   ;;  %v1716_v26 = vld [vmem:[%s1777_s23 + $0x58] sm:$0xff]  }
  0x17   : > { %1614 = vmatprep.mubr.msk.bf16.mxu0 %vm404_vm0, %v1698_v8  ;;  %1646 = vmatprep.mubr.msk.bf16.mxu1 %vm404_vm0, %v1699_v9  ;;  %v1713_v23 = vld [vmem:[%s1777_s23 + $0xc8] sm:$0xff]   ;;  %v1715_v25 = vld [vmem:[%s1777_s23 + $0xd0] sm:$0xff]   ;;  %v1717_v27 = vld [vmem:[%s1777_s23 + $0xd8] sm:$0xff]  }
  0x18   : > { %v1718_v28 = vld [vmem:[%s1777_s23 + $0x60] sm:$0xff]   ;;  %v1720_v30 = vld [vmem:[%s1777_s23 + $0x68] sm:$0xff]   ;;  %v1722_v32 = vld [vmem:[%s1777_s23 + $0x70] sm:$0xff]  }
  0x19   : > { %v1719_v29 = vld [vmem:[%s1777_s23 + $0xe0] sm:$0xff]   ;;  %v1721_v31 = vld [vmem:[%s1777_s23 + $0xe8] sm:$0xff]   ;;  %v1723_v33 = vld [vmem:[%s1777_s23 + $0xf0] sm:$0xff]  }
  0x1a   : > { %v1724_v34 = vld [vmem:[%s1777_s23 + $0x78] sm:$0xff]  }
  0x1b   : > { %v1725_v35 = vld [vmem:[%s1777_s23 + $0xf8] sm:$0xff]  }
  0x1e   : > { %1615 = vmatmul.mubr.msk.bf16.gmra.mrb[4].mxu0 %vm404_vm0, %v1700_v10  ;;  %1647 = vmatmul.mubr.msk.bf16.gmra.mrb[4].mxu1 %vm404_vm0, %v1701_v11 }
  0x1f   : > { %1618 = vmatprep.mubr.msk.bf16.mxu0 %vm404_vm0, %v1702_v12  ;;  %1650 = vmatprep.mubr.msk.bf16.mxu1 %vm404_vm0, %v1703_v13 }
  0x26   : > { %1619 = vmatmul.mubr.msk.bf16.gmra.mrb[8].mxu0 %vm404_vm0, %v1704_v14  ;;  %1651 = vmatmul.mubr.msk.bf16.gmra.mrb[8].mxu1 %vm404_vm0, %v1705_v15 }
  0x27   : > { %1622 = vmatprep.mubr.msk.bf16.mxu0 %vm404_vm0, %v1706_v16  ;;  %1654 = vmatprep.mubr.msk.bf16.mxu1 %vm404_vm0, %v1707_v17 }
  0x2e   : > { %1623 = vmatmul.mubr.msk.bf16.gmra.mrb[12].mxu0 %vm404_vm0, %v1708_v18  ;;  %1655 = vmatmul.mubr.msk.bf16.gmra.mrb[12].mxu1 %vm404_vm0, %v1709_v19 }
  0x2f   : > { %1626 = vmatprep.mubr.msk.bf16.mxu0 %vm404_vm0, %v1710_v20  ;;  %1658 = vmatprep.mubr.msk.bf16.mxu1 %vm404_vm0, %v1711_v21 }
  0x36   : > { %1627 = vmatmul.mubr.msk.bf16.gmra.mrb[16].mxu0 %vm404_vm0, %v1712_v22  ;;  %1659 = vmatmul.mubr.msk.bf16.gmra.mrb[16].mxu1 %vm404_vm0, %v1713_v23 }
  0x37   : > { %1630 = vmatprep.mubr.msk.bf16.mxu0 %vm404_vm0, %v1714_v24  ;;  %1662 = vmatprep.mubr.msk.bf16.mxu1 %vm404_vm0, %v1715_v25 }
  0x3e   : > { %1631 = vmatmul.mubr.msk.bf16.gmra.mrb[20].mxu0 %vm404_vm0, %v1716_v26  ;;  %1663 = vmatmul.mubr.msk.bf16.gmra.mrb[20].mxu1 %vm404_vm0, %v1717_v27 }
  0x3f   : > { %1634 = vmatprep.mubr.msk.bf16.mxu0 %vm404_vm0, %v1718_v28  ;;  %1666 = vmatprep.mubr.msk.bf16.mxu1 %vm404_vm0, %v1719_v29 }
  0x46   : > { %1635 = vmatmul.mubr.msk.bf16.gmra.mrb[24].mxu0 %vm404_vm0, %v1720_v30  ;;  %1667 = vmatmul.mubr.msk.bf16.gmra.mrb[24].mxu1 %vm404_vm0, %v1721_v31 }
  0x47   : > { %1638 = vmatprep.mubr.msk.bf16.mxu0 %vm404_vm0, %v1722_v32  ;;  %1670 = vmatprep.mubr.msk.bf16.mxu1 %vm404_vm0, %v1723_v33 }
  0x4e   : > { %1639 = vmatmul.mubr.msk.bf16.gmra.mrb[28].mxu0 %vm404_vm0, %v1724_v34  ;;  %1671 = vmatmul.mubr.msk.bf16.gmra.mrb[28].mxu1 %vm404_vm0, %v1725_v35 }
  0xe9   : > { %v1612_v36 = vpop.f32.mrb[0].mxu0  ;;  %v1644_v37 = vpop.f32.mrb[0].mxu1 }
  0xea   : > { %vm792_vm1 = vcmp.gt.f32.partialorder %v1612_v36, 0.0  ;;  %v856_v38 = vmul.f32 0.2, %v1612_v36  ;;  %vm824_vm2 = vcmp.gt.f32.partialorder %v1644_v37, 0.0  ;;  %v888_v39 = vmul.f32 0.2, %v1644_v37 }
  0xeb   : > { %v535_v40 = vpop.f32.mrb[1].mxu0  ;;  %v663_v41 = vpop.f32.mrb[1].mxu1 }
  0xec   : > { %v920_v42 = vsel %vm792_vm1, %v1612_v36, %v856_v38  ;;  %v952_v43 = vsel %vm824_vm2, %v1644_v37, %v888_v39  ;;  %vm790_vm4 = vcmp.gt.f32.partialorder %v535_v40, 0.0  ;;  %v854_v44 = vmul.f32 0.2, %v535_v40  ;;  %v1613_v45 = vpop.f32.mrb[2].mxu0  ;;  %v1645_v46 = vpop.f32.mrb[2].mxu1 }
  0xed   : > { %v1504_v47 = vpack.c.bf16 %v920_v42, %v920_v42  ;;  %v1536_v48 = vpack.c.bf16 %v952_v43, %v952_v43  ;;  %vm822_vm5 = vcmp.gt.f32.partialorder %v663_v41, 0.0  ;;  %v886_v49 = vmul.f32 0.2, %v663_v41  ;;  %v538_v50 = vpop.f32.mrb[3].mxu0  ;;  %v666_v51 = vpop.f32.mrb[3].mxu1 }
  0xee   : > { %v918_v52 = vsel %vm790_vm4, %v535_v40, %v854_v44  ;;  %vm793_vm6 = vcmp.gt.f32.partialorder %v1613_v45, 0.0  ;;  %v857_v53 = vmul.f32 0.2, %v1613_v45  ;;  %vm825_vm7 = vcmp.gt.f32.partialorder %v1645_v46, 0.0 }
  0xef   : > { %1241 = vst.msk [vmem:[%s1848_s26 + $0x8] sm:$0xf] %vm1238_vm3, %v1504_v47  ;;  %1273 = vst.msk [vmem:[%s1848_s26 + $0x88] sm:$0xf] %vm1238_vm3, %v1536_v48  ;;  %v1502_v54 = vpack.c.bf16 %v918_v52, %v918_v52  ;;  %v950_v55 = vsel %vm822_vm5, %v663_v41, %v886_v49  ;;  %v889_v56 = vmul.f32 0.2, %v1645_v46 }
  0xf0   : > { %vm791_vm8 = vcmp.gt.f32.partialorder %v538_v50, 0.0  ;;  %v1534_v57 = vpack.c.bf16 %v950_v55, %v950_v55  ;;  %v921_v58 = vsel %vm793_vm6, %v1613_v45, %v857_v53  ;;  %v855_v59 = vmul.f32 0.2, %v538_v50 }
  0xf1   : > { %vm823_vm9 = vcmp.gt.f32.partialorder %v666_v51, 0.0  ;;  %1239 = vst.msk [vmem:[%s1848_s26] sm:$0xf] %vm1238_vm3, %v1502_v54  ;;  %v1505_v60 = vpack.c.bf16 %v921_v58, %v921_v58  ;;  %v953_v61 = vsel %vm825_vm7, %v1645_v46, %v889_v56  ;;  %v887_v62 = vmul.f32 0.2, %v666_v51  ;;  %v1616_v63 = vpop.f32.mrb[4].mxu0 }
  0xf2   : > { %v1648_v0 = vpop.f32.mrb[4].mxu1  ;;  %1271 = vst.msk [vmem:[%s1848_s26 + $0x80] sm:$0xf] %vm1238_vm3, %v1534_v57  ;;  %v1537_v1 = vpack.c.bf16 %v953_v61, %v953_v61  ;;  %v919_v2 = vsel %vm791_vm8, %v538_v50, %v855_v59  ;;  %vm796_vm10 = vcmp.gt.f32.partialorder %v1616_v63, 0.0  ;;  %v860_v3 = vmul.f32 0.2, %v1616_v63 }
  0xf3   : > { %v551_v4 = vpop.f32.mrb[5].mxu0  ;;  %v679_v5 = vpop.f32.mrb[5].mxu1  ;;  %1242 = vst.msk [vmem:[%s1848_s26 + $0xc] sm:$0xf] %vm1238_vm3, %v1505_v60  ;;  %v1503_v6 = vpack.c.bf16 %v919_v2, %v919_v2  ;;  %v951_v7 = vsel %vm823_vm9, %v666_v51, %v887_v62  ;;  %vm828_vm11 = vcmp.gt.f32.partialorder %v1648_v0, 0.0 }
  0xf4   : > { %v892_v8 = vmul.f32 0.2, %v1648_v0  ;;  %v1617_v9 = vpop.f32.mrb[6].mxu0  ;;  %v1649_v10 = vpop.f32.mrb[6].mxu1  ;;  %1274 = vst.msk [vmem:[%s1848_s26 + $0x8c] sm:$0xf] %vm1238_vm3, %v1537_v1  ;;  %v1535_v11 = vpack.c.bf16 %v951_v7, %v951_v7  ;;  %v924_v12 = vsel %vm796_vm10, %v1616_v63, %v860_v3 }
  0xf5   : > { %vm794_vm12 = vcmp.gt.f32.partialorder %v551_v4, 0.0  ;;  %v858_v13 = vmul.f32 0.2, %v551_v4  ;;  %v554_v14 = vpop.f32.mrb[7].mxu0  ;;  %v682_v15 = vpop.f32.mrb[7].mxu1  ;;  %v1508_v16 = vpack.c.bf16 %v924_v12, %v924_v12  ;;  %vm826_vm13 = vcmp.gt.f32.partialorder %v679_v5, 0.0 }
  0xf6   : > { %1240 = vst.msk [vmem:[%s1848_s26 + $0x4] sm:$0xf] %vm1238_vm3, %v1503_v6  ;;  %v956_v17 = vsel %vm828_vm11, %v1648_v0, %v892_v8  ;;  %v890_v18 = vmul.f32 0.2, %v679_v5  ;;  %1272 = vst.msk [vmem:[%s1848_s26 + $0x84] sm:$0xf] %vm1238_vm3, %v1535_v11 }
  0xf7   : > { %v1540_v19 = vpack.c.bf16 %v956_v17, %v956_v17  ;;  %v922_v20 = vsel %vm794_vm12, %v551_v4, %v858_v13  ;;  %vm797_vm14 = vcmp.gt.f32.partialorder %v1617_v9, 0.0  ;;  %v861_v21 = vmul.f32 0.2, %v1617_v9  ;;  %1245 = vst.msk [vmem:[%s1848_s26 + $0x18] sm:$0xf] %vm1238_vm3, %v1508_v16 }
  0xf8   : > { %v1506_v22 = vpack.c.bf16 %v922_v20, %v922_v20  ;;  %v954_v23 = vsel %vm826_vm13, %v679_v5, %v890_v18  ;;  %vm829_vm15 = vcmp.gt.f32.partialorder %v1649_v10, 0.0  ;;  %v893_v24 = vmul.f32 0.2, %v1649_v10 }
  0xf9   : > { %1277 = vst.msk [vmem:[%s1848_s26 + $0x98] sm:$0xf] %vm1238_vm3, %v1540_v19  ;;  %v1538_v25 = vpack.c.bf16 %v954_v23, %v954_v23  ;;  %v925_v26 = vsel %vm797_vm14, %v1617_v9, %v861_v21  ;;  %vm795_vm0 = vcmp.gt.f32.partialorder %v554_v14, 0.0  ;;  %v859_v27 = vmul.f32 0.2, %v554_v14  ;;  %v1620_v31 = vpop.f32.mrb[8].mxu0 }
  0xfa   : > { %1243 = vst.msk [vmem:[%s1848_s26 + $0x10] sm:$0xf] %vm1238_vm3, %v1506_v22  ;;  %v1509_v28 = vpack.c.bf16 %v925_v26, %v925_v26  ;;  %v957_v29 = vsel %vm829_vm15, %v1649_v10, %v893_v24  ;;  %vm827_vm1 = vcmp.gt.f32.partialorder %v682_v15, 0.0  ;;  %v891_v30 = vmul.f32 0.2, %v682_v15  ;;  %v1652_v32 = vpop.f32.mrb[8].mxu1 }
  0xfb   : > { %1275 = vst.msk [vmem:[%s1848_s26 + $0x90] sm:$0xf] %vm1238_vm3, %v1538_v25  ;;  %v1541_v33 = vpack.c.bf16 %v957_v29, %v957_v29  ;;  %v923_v34 = vsel %vm795_vm0, %v554_v14, %v859_v27  ;;  %vm800_vm2 = vcmp.gt.f32.partialorder %v1620_v31, 0.0  ;;  %v864_v35 = vmul.f32 0.2, %v1620_v31  ;;  %v567_v36 = vpop.f32.mrb[9].mxu0 }
  0xfc   : > { %v695_v37 = vpop.f32.mrb[9].mxu1  ;;  %1246 = vst.msk [vmem:[%s1848_s26 + $0x1c] sm:$0xf] %vm1238_vm3, %v1509_v28  ;;  %v1507_v38 = vpack.c.bf16 %v923_v34, %v923_v34  ;;  %v955_v39 = vsel %vm827_vm1, %v682_v15, %v891_v30  ;;  %vm832_vm4 = vcmp.gt.f32.partialorder %v1652_v32, 0.0  ;;  %v896_v40 = vmul.f32 0.2, %v1652_v32 }
  0xfd   : > { %v1621_v41 = vpop.f32.mrb[10].mxu0  ;;  %v1653_v42 = vpop.f32.mrb[10].mxu1  ;;  %1278 = vst.msk [vmem:[%s1848_s26 + $0x9c] sm:$0xf] %vm1238_vm3, %v1541_v33  ;;  %v1539_v43 = vpack.c.bf16 %v955_v39, %v955_v39  ;;  %v928_v44 = vsel %vm800_vm2, %v1620_v31, %v864_v35  ;;  %vm798_vm5 = vcmp.gt.f32.partialorder %v567_v36, 0.0  ;;  %vm830_vm6 = vcmp.gt.f32.partialorder %v695_v37, 0.0 }
  0xfe   : > { %v862_v45 = vmul.f32 0.2, %v567_v36  ;;  %v570_v46 = vpop.f32.mrb[11].mxu0  ;;  %v698_v47 = vpop.f32.mrb[11].mxu1  ;;  %1244 = vst.msk [vmem:[%s1848_s26 + $0x14] sm:$0xf] %vm1238_vm3, %v1507_v38  ;;  %v1512_v48 = vpack.c.bf16 %v928_v44, %v928_v44  ;;  %v960_v49 = vsel %vm832_vm4, %v1652_v32, %v896_v40 }
  0xff   : > { %v894_v50 = vmul.f32 0.2, %v695_v37  ;;  %1276 = vst.msk [vmem:[%s1848_s26 + $0x94] sm:$0xf] %vm1238_vm3, %v1539_v43  ;;  %v1544_v51 = vpack.c.bf16 %v960_v49, %v960_v49  ;;  %vm801_vm7 = vcmp.gt.f32.partialorder %v1621_v41, 0.0  ;;  %vm833_vm8 = vcmp.gt.f32.partialorder %v1653_v42, 0.0 }
 0x100   : > { %v926_v52 = vsel %vm798_vm5, %v567_v36, %v862_v45  ;;  %v865_v53 = vmul.f32 0.2, %v1621_v41  ;;  %1249 = vst.msk [vmem:[%s1848_s26 + $0x28] sm:$0xf] %vm1238_vm3, %v1512_v48  ;;  %v897_v56 = vmul.f32 0.2, %v1653_v42 }
 0x101   : > { %v1510_v54 = vpack.c.bf16 %v926_v52, %v926_v52  ;;  %v958_v55 = vsel %vm830_vm6, %v695_v37, %v894_v50  ;;  %1281 = vst.msk [vmem:[%s1848_s26 + $0xa8] sm:$0xf] %vm1238_vm3, %v1544_v51  ;;  %vm799_vm9 = vcmp.gt.f32.partialorder %v570_v46, 0.0  ;;  %v863_v59 = vmul.f32 0.2, %v570_v46  ;;  %v1624_v63 = vpop.f32.mrb[12].mxu0 }
 0x102   : > { %v1542_v57 = vpack.c.bf16 %v958_v55, %v958_v55  ;;  %v929_v58 = vsel %vm801_vm7, %v1621_v41, %v865_v53  ;;  %v961_v61 = vsel %vm833_vm8, %v1653_v42, %v897_v56  ;;  %vm831_vm10 = vcmp.gt.f32.partialorder %v698_v47, 0.0  ;;  %v1656_v0 = vpop.f32.mrb[12].mxu1  ;;  %v583_v4 = vpop.f32.mrb[13].mxu0 }
 0x103   : > { %1247 = vst.msk [vmem:[%s1848_s26 + $0x20] sm:$0xf] %vm1238_vm3, %v1510_v54  ;;  %v1513_v60 = vpack.c.bf16 %v929_v58, %v929_v58  ;;  %v895_v62 = vmul.f32 0.2, %v698_v47  ;;  %v1545_v1 = vpack.c.bf16 %v961_v61, %v961_v61  ;;  %v927_v2 = vsel %vm799_vm9, %v570_v46, %v863_v59  ;;  %v711_v5 = vpop.f32.mrb[13].mxu1  ;;  %v1625_v9 = vpop.f32.mrb[14].mxu0 }
 0x104   : > { %1279 = vst.msk [vmem:[%s1848_s26 + $0xa0] sm:$0xf] %vm1238_vm3, %v1542_v57  ;;  %vm804_vm11 = vcmp.gt.f32.partialorder %v1624_v63, 0.0  ;;  %v868_v3 = vmul.f32 0.2, %v1624_v63  ;;  %v1511_v6 = vpack.c.bf16 %v927_v2, %v927_v2  ;;  %vm836_vm12 = vcmp.gt.f32.partialorder %v1656_v0, 0.0 }
 0x105   : > { %1250 = vst.msk [vmem:[%s1848_s26 + $0x2c] sm:$0xf] %vm1238_vm3, %v1513_v60  ;;  %v959_v7 = vsel %vm831_vm10, %v698_v47, %v895_v62  ;;  %v900_v8 = vmul.f32 0.2, %v1656_v0  ;;  %v1657_v10 = vpop.f32.mrb[14].mxu1  ;;  %vm802_vm13 = vcmp.gt.f32.partialorder %v583_v4, 0.0 }
 0x106   : > { %1282 = vst.msk [vmem:[%s1848_s26 + $0xac] sm:$0xf] %vm1238_vm3, %v1545_v1  ;;  %v1543_v11 = vpack.c.bf16 %v959_v7, %v959_v7  ;;  %v932_v12 = vsel %vm804_vm11, %v1624_v63, %v868_v3  ;;  %v866_v13 = vmul.f32 0.2, %v583_v4  ;;  %v586_v14 = vpop.f32.mrb[15].mxu0  ;;  %v714_v15 = vpop.f32.mrb[15].mxu1 }
 0x107   : > { %1248 = vst.msk [vmem:[%s1848_s26 + $0x24] sm:$0xf] %vm1238_vm3, %v1511_v6  ;;  %v1516_v16 = vpack.c.bf16 %v932_v12, %v932_v12  ;;  %v964_v17 = vsel %vm836_vm12, %v1656_v0, %v900_v8  ;;  %vm834_vm14 = vcmp.gt.f32.partialorder %v711_v5, 0.0  ;;  %v898_v18 = vmul.f32 0.2, %v711_v5 }
 0x108   : > { %1280 = vst.msk [vmem:[%s1848_s26 + $0xa4] sm:$0xf] %vm1238_vm3, %v1543_v11  ;;  %v1548_v19 = vpack.c.bf16 %v964_v17, %v964_v17  ;;  %v930_v20 = vsel %vm802_vm13, %v583_v4, %v866_v13  ;;  %vm805_vm15 = vcmp.gt.f32.partialorder %v1625_v9, 0.0  ;;  %v869_v21 = vmul.f32 0.2, %v1625_v9 }
 0x109   : > { %1253 = vst.msk [vmem:[%s1848_s26 + $0x38] sm:$0xf] %vm1238_vm3, %v1516_v16  ;;  %v1514_v22 = vpack.c.bf16 %v930_v20, %v930_v20  ;;  %v962_v23 = vsel %vm834_vm14, %v711_v5, %v898_v18  ;;  %vm837_vm0 = vcmp.gt.f32.partialorder %v1657_v10, 0.0  ;;  %v901_v24 = vmul.f32 0.2, %v1657_v10  ;;  %v1628_v31 = vpop.f32.mrb[16].mxu0 }
 0x10a   : > { %1285 = vst.msk [vmem:[%s1848_s26 + $0xb8] sm:$0xf] %vm1238_vm3, %v1548_v19  ;;  %v1546_v25 = vpack.c.bf16 %v962_v23, %v962_v23  ;;  %v933_v26 = vsel %vm805_vm15, %v1625_v9, %v869_v21  ;;  %vm803_vm1 = vcmp.gt.f32.partialorder %v586_v14, 0.0  ;;  %v867_v27 = vmul.f32 0.2, %v586_v14  ;;  %v1660_v32 = vpop.f32.mrb[16].mxu1 }
 0x10b   : > { %1251 = vst.msk [vmem:[%s1848_s26 + $0x30] sm:$0xf] %vm1238_vm3, %v1514_v22  ;;  %v1517_v28 = vpack.c.bf16 %v933_v26, %v933_v26  ;;  %v965_v29 = vsel %vm837_vm0, %v1657_v10, %v901_v24  ;;  %vm835_vm2 = vcmp.gt.f32.partialorder %v714_v15, 0.0  ;;  %v899_v30 = vmul.f32 0.2, %v714_v15  ;;  %v599_v36 = vpop.f32.mrb[17].mxu0 }
 0x10c   : > { %1283 = vst.msk [vmem:[%s1848_s26 + $0xb0] sm:$0xf] %vm1238_vm3, %v1546_v25  ;;  %v1549_v33 = vpack.c.bf16 %v965_v29, %v965_v29  ;;  %v931_v34 = vsel %vm803_vm1, %v586_v14, %v867_v27  ;;  %vm808_vm4 = vcmp.gt.f32.partialorder %v1628_v31, 0.0  ;;  %v872_v35 = vmul.f32 0.2, %v1628_v31  ;;  %v727_v37 = vpop.f32.mrb[17].mxu1 }
 0x10d   : > { %1254 = vst.msk [vmem:[%s1848_s26 + $0x3c] sm:$0xf] %vm1238_vm3, %v1517_v28  ;;  %v1515_v38 = vpack.c.bf16 %v931_v34, %v931_v34  ;;  %v963_v39 = vsel %vm835_vm2, %v714_v15, %v899_v30  ;;  %vm840_vm5 = vcmp.gt.f32.partialorder %v1660_v32, 0.0  ;;  %v904_v40 = vmul.f32 0.2, %v1660_v32  ;;  %v1629_v41 = vpop.f32.mrb[18].mxu0 }
 0x10e   : > { %v1661_v42 = vpop.f32.mrb[18].mxu1  ;;  %1286 = vst.msk [vmem:[%s1848_s26 + $0xbc] sm:$0xf] %vm1238_vm3, %v1549_v33  ;;  %v1547_v43 = vpack.c.bf16 %v963_v39, %v963_v39  ;;  %v936_v44 = vsel %vm808_vm4, %v1628_v31, %v872_v35  ;;  %vm806_vm6 = vcmp.gt.f32.partialorder %v599_v36, 0.0  ;;  %v870_v45 = vmul.f32 0.2, %v599_v36 }
 0x10f   : > { %v602_v46 = vpop.f32.mrb[19].mxu0  ;;  %v730_v47 = vpop.f32.mrb[19].mxu1  ;;  %1252 = vst.msk [vmem:[%s1848_s26 + $0x34] sm:$0xf] %vm1238_vm3, %v1515_v38  ;;  %v1520_v48 = vpack.c.bf16 %v936_v44, %v936_v44  ;;  %v968_v49 = vsel %vm840_vm5, %v1660_v32, %v904_v40  ;;  %vm838_vm7 = vcmp.gt.f32.partialorder %v727_v37, 0.0  ;;  %vm809_vm8 = vcmp.gt.f32.partialorder %v1629_v41, 0.0 }
 0x110   : > { %v902_v50 = vmul.f32 0.2, %v727_v37  ;;  %1284 = vst.msk [vmem:[%s1848_s26 + $0xb4] sm:$0xf] %vm1238_vm3, %v1547_v43  ;;  %v1552_v51 = vpack.c.bf16 %v968_v49, %v968_v49  ;;  %v934_v52 = vsel %vm806_vm6, %v599_v36, %v870_v45  ;;  %v873_v53 = vmul.f32 0.2, %v1629_v41 }
 0x111   : > { %1257 = vst.msk [vmem:[%s1848_s26 + $0x48] sm:$0xf] %vm1238_vm3, %v1520_v48  ;;  %v1518_v54 = vpack.c.bf16 %v934_v52, %v934_v52  ;;  %vm841_vm9 = vcmp.gt.f32.partialorder %v1661_v42, 0.0  ;;  %v905_v56 = vmul.f32 0.2, %v1661_v42  ;;  %vm807_vm10 = vcmp.gt.f32.partialorder %v602_v46, 0.0 }
 0x112   : > { %v966_v55 = vsel %vm838_vm7, %v727_v37, %v902_v50  ;;  %1289 = vst.msk [vmem:[%s1848_s26 + $0xc8] sm:$0xf] %vm1238_vm3, %v1552_v51  ;;  %v937_v58 = vsel %vm809_vm8, %v1629_v41, %v873_v53  ;;  %v871_v59 = vmul.f32 0.2, %v602_v46  ;;  %vm839_vm11 = vcmp.gt.f32.partialorder %v730_v47, 0.0  ;;  %v1632_v63 = vpop.f32.mrb[20].mxu0 }
 0x113   : > { %v1550_v57 = vpack.c.bf16 %v966_v55, %v966_v55  ;;  %1255 = vst.msk [vmem:[%s1848_s26 + $0x40] sm:$0xf] %vm1238_vm3, %v1518_v54  ;;  %v1521_v60 = vpack.c.bf16 %v937_v58, %v937_v58  ;;  %v969_v61 = vsel %vm841_vm9, %v1661_v42, %v905_v56  ;;  %v903_v62 = vmul.f32 0.2, %v730_v47  ;;  %v1664_v0 = vpop.f32.mrb[20].mxu1  ;;  %v615_v4 = vpop.f32.mrb[21].mxu0 }
 0x114   : > { %v1553_v1 = vpack.c.bf16 %v969_v61, %v969_v61  ;;  %v935_v2 = vsel %vm807_vm10, %v602_v46, %v871_v59  ;;  %vm812_vm12 = vcmp.gt.f32.partialorder %v1632_v63, 0.0  ;;  %v876_v3 = vmul.f32 0.2, %v1632_v63  ;;  %v743_v5 = vpop.f32.mrb[21].mxu1  ;;  %v1633_v9 = vpop.f32.mrb[22].mxu0 }
 0x115   : > { %1287 = vst.msk [vmem:[%s1848_s26 + $0xc0] sm:$0xf] %vm1238_vm3, %v1550_v57  ;;  %1258 = vst.msk [vmem:[%s1848_s26 + $0x4c] sm:$0xf] %vm1238_vm3, %v1521_v60  ;;  %v1519_v6 = vpack.c.bf16 %v935_v2, %v935_v2  ;;  %v967_v7 = vsel %vm839_vm11, %v730_v47, %v903_v62  ;;  %vm844_vm13 = vcmp.gt.f32.partialorder %v1664_v0, 0.0  ;;  %v1665_v10 = vpop.f32.mrb[22].mxu1 }
 0x116   : > { %v908_v8 = vmul.f32 0.2, %v1664_v0  ;;  %1290 = vst.msk [vmem:[%s1848_s26 + $0xcc] sm:$0xf] %vm1238_vm3, %v1553_v1  ;;  %v1551_v11 = vpack.c.bf16 %v967_v7, %v967_v7  ;;  %v940_v12 = vsel %vm812_vm12, %v1632_v63, %v876_v3  ;;  %vm810_vm14 = vcmp.gt.f32.partialorder %v615_v4, 0.0  ;;  %v618_v14 = vpop.f32.mrb[23].mxu0 }
 0x117   : > { %v874_v13 = vmul.f32 0.2, %v615_v4  ;;  %v746_v15 = vpop.f32.mrb[23].mxu1  ;;  %1256 = vst.msk [vmem:[%s1848_s26 + $0x44] sm:$0xf] %vm1238_vm3, %v1519_v6  ;;  %v1524_v16 = vpack.c.bf16 %v940_v12, %v940_v12  ;;  %vm842_vm15 = vcmp.gt.f32.partialorder %v743_v5, 0.0 }
 0x118   : > { %v972_v17 = vsel %vm844_vm13, %v1664_v0, %v908_v8  ;;  %v906_v18 = vmul.f32 0.2, %v743_v5  ;;  %1288 = vst.msk [vmem:[%s1848_s26 + $0xc4] sm:$0xf] %vm1238_vm3, %v1551_v11  ;;  %vm813_vm0 = vcmp.gt.f32.partialorder %v1633_v9, 0.0  ;;  %vm845_vm1 = vcmp.gt.f32.partialorder %v1665_v10, 0.0 }
 0x119   : > { %v1556_v19 = vpack.c.bf16 %v972_v17, %v972_v17  ;;  %v938_v20 = vsel %vm810_vm14, %v615_v4, %v874_v13  ;;  %v877_v21 = vmul.f32 0.2, %v1633_v9  ;;  %1261 = vst.msk [vmem:[%s1848_s26 + $0x58] sm:$0xf] %vm1238_vm3, %v1524_v16  ;;  %v909_v24 = vmul.f32 0.2, %v1665_v10 }
 0x11a   : > { %v1522_v22 = vpack.c.bf16 %v938_v20, %v938_v20  ;;  %v970_v23 = vsel %vm842_vm15, %v743_v5, %v906_v18  ;;  %vm811_vm2 = vcmp.gt.f32.partialorder %v618_v14, 0.0  ;;  %v875_v27 = vmul.f32 0.2, %v618_v14  ;;  %v1636_v31 = vpop.f32.mrb[24].mxu0  ;;  %v1668_v32 = vpop.f32.mrb[24].mxu1 }
 0x11b   : > { %1293 = vst.msk [vmem:[%s1848_s26 + $0xd8] sm:$0xf] %vm1238_vm3, %v1556_v19  ;;  %v1554_v25 = vpack.c.bf16 %v970_v23, %v970_v23  ;;  %v941_v26 = vsel %vm813_vm0, %v1633_v9, %v877_v21  ;;  %v973_v29 = vsel %vm845_vm1, %v1665_v10, %v909_v24  ;;  %vm843_vm4 = vcmp.gt.f32.partialorder %v746_v15, 0.0  ;;  %v631_v36 = vpop.f32.mrb[25].mxu0  ;;  %v759_v37 = vpop.f32.mrb[25].mxu1 }
 0x11c   : > { %1259 = vst.msk [vmem:[%s1848_s26 + $0x50] sm:$0xf] %vm1238_vm3, %v1522_v22  ;;  %v1525_v28 = vpack.c.bf16 %v941_v26, %v941_v26  ;;  %v907_v30 = vmul.f32 0.2, %v746_v15  ;;  %v1557_v33 = vpack.c.bf16 %v973_v29, %v973_v29  ;;  %v939_v34 = vsel %vm811_vm2, %v618_v14, %v875_v27  ;;  %v1637_v41 = vpop.f32.mrb[26].mxu0  ;;  %v1669_v42 = vpop.f32.mrb[26].mxu1 }
 0x11d   : > { %1291 = vst.msk [vmem:[%s1848_s26 + $0xd0] sm:$0xf] %vm1238_vm3, %v1554_v25  ;;  %vm816_vm5 = vcmp.gt.f32.partialorder %v1636_v31, 0.0  ;;  %v880_v35 = vmul.f32 0.2, %v1636_v31  ;;  %v1523_v38 = vpack.c.bf16 %v939_v34, %v939_v34  ;;  %vm848_vm6 = vcmp.gt.f32.partialorder %v1668_v32, 0.0 }
 0x11e   : > { %1262 = vst.msk [vmem:[%s1848_s26 + $0x5c] sm:$0xf] %vm1238_vm3, %v1525_v28  ;;  %v971_v39 = vsel %vm843_vm4, %v746_v15, %v907_v30  ;;  %v912_v40 = vmul.f32 0.2, %v1668_v32  ;;  %1294 = vst.msk [vmem:[%s1848_s26 + $0xdc] sm:$0xf] %vm1238_vm3, %v1557_v33 }
 0x11f   : > { %v1555_v43 = vpack.c.bf16 %v971_v39, %v971_v39  ;;  %v944_v44 = vsel %vm816_vm5, %v1636_v31, %v880_v35  ;;  %vm814_vm7 = vcmp.gt.f32.partialorder %v631_v36, 0.0  ;;  %v878_v45 = vmul.f32 0.2, %v631_v36  ;;  %v634_v46 = vpop.f32.mrb[27].mxu0  ;;  %v762_v47 = vpop.f32.mrb[27].mxu1 }
 0x120   : > { %1260 = vst.msk [vmem:[%s1848_s26 + $0x54] sm:$0xf] %vm1238_vm3, %v1523_v38  ;;  %v1528_v48 = vpack.c.bf16 %v944_v44, %v944_v44  ;;  %v976_v49 = vsel %vm848_vm6, %v1668_v32, %v912_v40  ;;  %vm846_vm8 = vcmp.gt.f32.partialorder %v759_v37, 0.0  ;;  %v910_v50 = vmul.f32 0.2, %v759_v37 }
 0x121   : > { %1292 = vst.msk [vmem:[%s1848_s26 + $0xd4] sm:$0xf] %vm1238_vm3, %v1555_v43  ;;  %v1560_v51 = vpack.c.bf16 %v976_v49, %v976_v49  ;;  %v942_v52 = vsel %vm814_vm7, %v631_v36, %v878_v45  ;;  %vm817_vm9 = vcmp.gt.f32.partialorder %v1637_v41, 0.0  ;;  %v881_v53 = vmul.f32 0.2, %v1637_v41  ;;  %v1640_v63 = vpop.f32.mrb[28].mxu0 }
 0x122   : > { %1265 = vst.msk [vmem:[%s1848_s26 + $0x68] sm:$0xf] %vm1238_vm3, %v1528_v48  ;;  %v1526_v54 = vpack.c.bf16 %v942_v52, %v942_v52  ;;  %v974_v55 = vsel %vm846_vm8, %v759_v37, %v910_v50  ;;  %vm849_vm10 = vcmp.gt.f32.partialorder %v1669_v42, 0.0  ;;  %v913_v56 = vmul.f32 0.2, %v1669_v42  ;;  %v1672_v0 = vpop.f32.mrb[28].mxu1 }
 0x123   : > { %1297 = vst.msk [vmem:[%s1848_s26 + $0xe8] sm:$0xf] %vm1238_vm3, %v1560_v51  ;;  %v1558_v57 = vpack.c.bf16 %v974_v55, %v974_v55  ;;  %v945_v58 = vsel %vm817_vm9, %v1637_v41, %v881_v53  ;;  %vm815_vm11 = vcmp.gt.f32.partialorder %v634_v46, 0.0  ;;  %v879_v59 = vmul.f32 0.2, %v634_v46  ;;  %v647_v4 = vpop.f32.mrb[29].mxu0 }
 0x124   : > { %1263 = vst.msk [vmem:[%s1848_s26 + $0x60] sm:$0xf] %vm1238_vm3, %v1526_v54  ;;  %v1529_v60 = vpack.c.bf16 %v945_v58, %v945_v58  ;;  %v977_v61 = vsel %vm849_vm10, %v1669_v42, %v913_v56  ;;  %vm847_vm12 = vcmp.gt.f32.partialorder %v762_v47, 0.0  ;;  %v911_v62 = vmul.f32 0.2, %v762_v47  ;;  %v775_v5 = vpop.f32.mrb[29].mxu1 }
 0x125   : > { %1295 = vst.msk [vmem:[%s1848_s26 + $0xe0] sm:$0xf] %vm1238_vm3, %v1558_v57  ;;  %v1561_v1 = vpack.c.bf16 %v977_v61, %v977_v61  ;;  %v943_v2 = vsel %vm815_vm11, %v634_v46, %v879_v59  ;;  %vm820_vm13 = vcmp.gt.f32.partialorder %v1640_v63, 0.0  ;;  %v884_v3 = vmul.f32 0.2, %v1640_v63  ;;  %v1641_v9 = vpop.f32.mrb[30].mxu0 }
 0x126   : > { %1266 = vst.msk [vmem:[%s1848_s26 + $0x6c] sm:$0xf] %vm1238_vm3, %v1529_v60  ;;  %v1527_v6 = vpack.c.bf16 %v943_v2, %v943_v2  ;;  %v975_v7 = vsel %vm847_vm12, %v762_v47, %v911_v62  ;;  %vm852_vm14 = vcmp.gt.f32.partialorder %v1672_v0, 0.0  ;;  %v916_v8 = vmul.f32 0.2, %v1672_v0  ;;  %v1673_v10 = vpop.f32.mrb[30].mxu1 }
 0x127   : > { %1298 = vst.msk [vmem:[%s1848_s26 + $0xec] sm:$0xf] %vm1238_vm3, %v1561_v1  ;;  %v1559_v11 = vpack.c.bf16 %v975_v7, %v975_v7  ;;  %v948_v12 = vsel %vm820_vm13, %v1640_v63, %v884_v3  ;;  %vm818_vm15 = vcmp.gt.f32.partialorder %v647_v4, 0.0  ;;  %v882_v13 = vmul.f32 0.2, %v647_v4  ;;  %v650_v14 = vpop.f32.mrb[31].mxu0 }
 0x128   : > { %v778_v15 = vpop.f32.mrb[31].mxu1  ;;  %1264 = vst.msk [vmem:[%s1848_s26 + $0x64] sm:$0xf] %vm1238_vm3, %v1527_v6  ;;  %v1532_v16 = vpack.c.bf16 %v948_v12, %v948_v12  ;;  %v980_v17 = vsel %vm852_vm14, %v1672_v0, %v916_v8  ;;  %vm850_vm0 = vcmp.gt.f32.partialorder %v775_v5, 0.0  ;;  %v914_v18 = vmul.f32 0.2, %v775_v5 }
 0x129   : > { %1296 = vst.msk [vmem:[%s1848_s26 + $0xe4] sm:$0xf] %vm1238_vm3, %v1559_v11  ;;  %v1564_v19 = vpack.c.bf16 %v980_v17, %v980_v17  ;;  %v946_v20 = vsel %vm818_vm15, %v647_v4, %v882_v13  ;;  %vm821_vm1 = vcmp.gt.f32.partialorder %v1641_v9, 0.0  ;;  %v885_v21 = vmul.f32 0.2, %v1641_v9 }
 0x12a   : > { %1269 = vst.msk [vmem:[%s1848_s26 + $0x78] sm:$0xf] %vm1238_vm3, %v1532_v16  ;;  %v1530_v22 = vpack.c.bf16 %v946_v20, %v946_v20  ;;  %v978_v23 = vsel %vm850_vm0, %v775_v5, %v914_v18  ;;  %vm853_vm2 = vcmp.gt.f32.partialorder %v1673_v10, 0.0  ;;  %v917_v24 = vmul.f32 0.2, %v1673_v10 }
 0x12b   : > { %1301 = vst.msk [vmem:[%s1848_s26 + $0xf8] sm:$0xf] %vm1238_vm3, %v1564_v19  ;;  %v1562_v25 = vpack.c.bf16 %v978_v23, %v978_v23  ;;  %v949_v26 = vsel %vm821_vm1, %v1641_v9, %v885_v21  ;;  %vm819_vm4 = vcmp.gt.f32.partialorder %v650_v14, 0.0  ;;  %v883_v27 = vmul.f32 0.2, %v650_v14 }
 0x12c   : > { %1267 = vst.msk [vmem:[%s1848_s26 + $0x70] sm:$0xf] %vm1238_vm3, %v1530_v22  ;;  %v1533_v28 = vpack.c.bf16 %v949_v26, %v949_v26  ;;  %v981_v29 = vsel %vm853_vm2, %v1673_v10, %v917_v24  ;;  %vm851_vm5 = vcmp.gt.f32.partialorder %v778_v15, 0.0  ;;  %v915_v30 = vmul.f32 0.2, %v778_v15 }
 0x12d   : > { %1299 = vst.msk [vmem:[%s1848_s26 + $0xf0] sm:$0xf] %vm1238_vm3, %v1562_v25  ;;  %v1565_v31 = vpack.c.bf16 %v981_v29, %v981_v29  ;;  %v947_v32 = vsel %vm819_vm4, %v650_v14, %v883_v27 }
 0x12e   : > { %1270 = vst.msk [vmem:[%s1848_s26 + $0x7c] sm:$0xf] %vm1238_vm3, %v1533_v28  ;;  %v1531_v33 = vpack.c.bf16 %v947_v32, %v947_v32  ;;  %v979_v34 = vsel %vm851_vm5, %v778_v15, %v915_v30 }
 0x12f   : > { %1302 = vst.msk [vmem:[%s1848_s26 + $0xfc] sm:$0xf] %vm1238_vm3, %v1565_v31  ;;  %v1563_v35 = vpack.c.bf16 %v979_v34, %v979_v34 }
 0x130   : > { %1268 = vst.msk [vmem:[%s1848_s26 + $0x74] sm:$0xf] %vm1238_vm3, %v1531_v33 }
 0x131   : > { %1300 = vst.msk [vmem:[%s1848_s26 + $0xf4] sm:$0xf] %vm1238_vm3, %v1563_v35 }
 0x132 PF: > { %s12_s9 = sadd.s32 1, %s1732_s9  }
 0x133   : > { %p9_p4 = scmp.ge.s32.totalorder %s12_s9, 6  }
 0x135   :  { %11 = sbr.rel (!%p9_p4) target bundleno = 1 (0x1), region = 58 }

// kernel: discriminator_forward.5
= control target key start
LH: loop header
LB: loop body
LE: loop exit
PB: predicated region body
PF: predicated region fallthrough
CT: control target
= control target key end

     0   :  { %v5179_v0 = vmov 0   ;;  %s7827_s1 = inlined_call_operand.vmem [shape: bf16[1024,128], index: 1, kind: input, shape index: {}]   ;;  %s7828_s0 = inlined_call_operand.vmem [shape: bf16[512,1024], index: 0, kind: input, shape index: {}]   ;;  %s7829_s2 = inlined_call_operand.vmem [shape: f32[1,128], index: 2, kind: input, shape index: {}]   ;;  %s7830_s3 = inlined_call_operand.vmem [shape: f32[1,128], index: 3, kind: input, shape index: {}]   ;;  %s7831_s4 = inlined_call_operand.vmem [shape: bf16[512,128], index: 4, kind: output, shape index: {}]  }
   0x1   :  { %2066 = vmatprep.subr.bf16.mxu1 %v5179_v0  ;;  %2644 = vmatprep.subr.bf16.mxu0 %v5179_v0  ;;  %v5113_v1 = vld [vmem:[%s7827_s1] sm:$0xff]   ;;  %v5115_v3 = vld [vmem:[%s7827_s1 + $0x8] sm:$0xff]   ;;  %v5117_v5 = vld [vmem:[%s7827_s1 + $0x10] sm:$0xff]  }
   0x2   :  { %v5114_v2 = vld [vmem:[%s7827_s1 + $0x100] sm:$0xff]   ;;  %2067 = vmatpush1.bf16.msra.mxu1 %v5113_v1  ;;  %v5116_v4 = vld [vmem:[%s7827_s1 + $0x108] sm:$0xff]   ;;  %v5118_v6 = vld [vmem:[%s7827_s1 + $0x110] sm:$0xff]  }
   0x3   :  { %2645 = vmatpush1.bf16.msra.mxu0 %v5114_v2  ;;  %2068 = vmatprep.subr.bf16.mxu1 %v5179_v0  ;;  %v5119_v7 = vld [vmem:[%s7827_s1 + $0x18] sm:$0xff]   ;;  %v5121_v9 = vld [vmem:[%s7827_s1 + $0x20] sm:$0xff]   ;;  %v5123_v11 = vld [vmem:[%s7827_s1 + $0x28] sm:$0xff]  }
   0x4   :  { %2646 = vmatprep.subr.bf16.mxu0 %v5179_v0  ;;  %v5120_v8 = vld [vmem:[%s7827_s1 + $0x118] sm:$0xff]   ;;  %v5122_v10 = vld [vmem:[%s7827_s1 + $0x120] sm:$0xff]   ;;  %v5124_v12 = vld [vmem:[%s7827_s1 + $0x128] sm:$0xff]  }
   0x5   :  { %v5125_v13 = vld [vmem:[%s7827_s1 + $0x30] sm:$0xff]   ;;  %v5127_v15 = vld [vmem:[%s7827_s1 + $0x38] sm:$0xff]   ;;  %v5129_v17 = vld [vmem:[%s7827_s1 + $0x40] sm:$0xff]  }
   0x6   :  { %2069 = vmatpush1.bf16.msra.mxu1 %v5115_v3  ;;  %v5126_v14 = vld [vmem:[%s7827_s1 + $0x130] sm:$0xff]   ;;  %v5128_v16 = vld [vmem:[%s7827_s1 + $0x138] sm:$0xff]   ;;  %v5130_v18 = vld [vmem:[%s7827_s1 + $0x140] sm:$0xff]  }
   0x7   :  { %2647 = vmatpush1.bf16.msra.mxu0 %v5116_v4  ;;  %2070 = vmatprep.subr.bf16.mxu1 %v5179_v0  ;;  %v5280_v19 = vld [vmem:[%s7828_s0] sm:$0xff]  ;;  %v5290_v21 = vld [vmem:[%s7828_s0 + $0x10] sm:$0xff]  ;;  %v5131_v24 = vld [vmem:[%s7827_s1 + $0x48] sm:$0xff]  }
   0x8   :  { %2648 = vmatprep.subr.bf16.mxu0 %v5179_v0  ;;  %v5285_v20 = vld [vmem:[%s7828_s0 + $0x20] sm:$0xff]  ;;  %v5297_v23 = vld [vmem:[%s7828_s0 + $0x30] sm:$0xff]  ;;  %v5132_v26 = vld [vmem:[%s7827_s1 + $0x148] sm:$0xff]  }
   0x9   :  { %v4154_v22 = vcombine.high %v5280_v19, %v5285_v20  ;;  %v4158_v25 = vcombine.high %v5290_v21, %v5297_v23  ;;  %v5133_v27 = vld [vmem:[%s7827_s1 + $0x50] sm:$0xff]   ;;  %v5135_v29 = vld [vmem:[%s7827_s1 + $0x58] sm:$0xff]   ;;  %v5137_v31 = vld [vmem:[%s7827_s1 + $0x60] sm:$0xff]   ;;  %v4153_v42 = vcombine.low %v5280_v19, %v5285_v20  ;;  %v4157_v44 = vcombine.low %v5290_v21, %v5297_v23 }
   0xa   :  { %2071 = vmatpush1.bf16.msra.mxu1 %v5117_v5  ;;  %v5134_v28 = vld [vmem:[%s7827_s1 + $0x150] sm:$0xff]   ;;  %v5136_v30 = vld [vmem:[%s7827_s1 + $0x158] sm:$0xff]   ;;  %v5138_v32 = vld [vmem:[%s7827_s1 + $0x160] sm:$0xff]  }
   0xb   :  { %2649 = vmatpush1.bf16.msra.mxu0 %v5118_v6  ;;  %2072 = vmatprep.subr.bf16.mxu1 %v5179_v0  ;;  %v5139_v33 = vld [vmem:[%s7827_s1 + $0x68] sm:$0xff]   ;;  %v5141_v35 = vld [vmem:[%s7827_s1 + $0x70] sm:$0xff]   ;;  %v5143_v37 = vld [vmem:[%s7827_s1 + $0x78] sm:$0xff]  }
   0xc   :  { %2650 = vmatprep.subr.bf16.mxu0 %v5179_v0  ;;  %2098 = vmatprep.mubr.bf16.mxu1 %v4154_v22  ;;  %v5140_v34 = vld [vmem:[%s7827_s1 + $0x168] sm:$0xff]   ;;  %v5142_v36 = vld [vmem:[%s7827_s1 + $0x170] sm:$0xff]   ;;  %v5144_v38 = vld [vmem:[%s7827_s1 + $0x178] sm:$0xff]  }
   0xd   :  { %2676 = vmatprep.mubr.bf16.mxu0 %v4158_v25  ;;  %v26_v39 = vld [vmem:[%s7828_s0 + $0x40] sm:$0xff]  ;;  %v28_v41 = vld [vmem:[%s7828_s0 + $0x50] sm:$0xff]  ;;  %v5147_v51 = vld [vmem:[%s7827_s1 + $0x88] sm:$0xff]  }
   0xe   :  { %2073 = vmatpush1.bf16.msra.mxu1 %v5119_v7  ;;  %v30_v40 = vld [vmem:[%s7828_s0 + $0x60] sm:$0xff]  ;;  %v32_v43 = vld [vmem:[%s7828_s0 + $0x70] sm:$0xff]  ;;  %v5148_v52 = vld [vmem:[%s7827_s1 + $0x188] sm:$0xff]  }
   0xf   :  { %2651 = vmatpush1.bf16.msra.mxu0 %v5120_v8  ;;  %2074 = vmatprep.subr.bf16.mxu1 %v5179_v0  ;;  %v5145_v45 = vld [vmem:[%s7827_s1 + $0x80] sm:$0xff]   ;;  %v4162_v47 = vcombine.high %v26_v39, %v30_v40  ;;  %v4166_v48 = vcombine.high %v28_v41, %v32_v43  ;;  %v36_v53 = vld [vmem:[%s7828_s0 + $0x90] sm:$0xff]  ;;  %v4161_v55 = vcombine.low %v26_v39, %v30_v40  ;;  %v5151_v2 = vld [vmem:[%s7827_s1 + $0x98] sm:$0xff]  }
  0x10   :  { %2652 = vmatprep.subr.bf16.mxu0 %v5179_v0  ;;  %v5146_v46 = vld [vmem:[%s7827_s1 + $0x180] sm:$0xff]   ;;  %v40_v54 = vld [vmem:[%s7828_s0 + $0xb0] sm:$0xff]  ;;  %v4165_v56 = vcombine.low %v28_v41, %v32_v43  ;;  %v5152_v3 = vld [vmem:[%s7827_s1 + $0x198] sm:$0xff]  }
  0x11   :  { %v34_v49 = vld [vmem:[%s7828_s0 + $0x80] sm:$0xff]  ;;  %v4174_v58 = vcombine.high %v36_v53, %v40_v54  ;;  %v5149_v59 = vld [vmem:[%s7827_s1 + $0x90] sm:$0xff]   ;;  %v4173_v6 = vcombine.low %v36_v53, %v40_v54  ;;  %v5164_v39 = vld [vmem:[%s7827_s1 + $0x1c8] sm:$0xff]  }
  0x12   :  { %2075 = vmatpush1.bf16.msra.mxu1 %v5121_v9  ;;  %v38_v50 = vld [vmem:[%s7828_s0 + $0xa0] sm:$0xff]  ;;  %v5150_v60 = vld [vmem:[%s7827_s1 + $0x190] sm:$0xff]   ;;  %v5167_v54 = vld [vmem:[%s7827_s1 + $0xd8] sm:$0xff]  }
  0x13   :  { %2653 = vmatpush1.bf16.msra.mxu0 %v5122_v10  ;;  %2076 = vmatprep.subr.bf16.mxu1 %v5179_v0  ;;  %v4170_v57 = vcombine.high %v34_v49, %v38_v50  ;;  %v42_v61 = vld [vmem:[%s7828_s0 + $0xc0] sm:$0xff]  ;;  %v44_v63 = vld [vmem:[%s7828_s0 + $0xd0] sm:$0xff]  ;;  %v4169_v4 = vcombine.low %v34_v49, %v38_v50 }
  0x14   :  { %2654 = vmatprep.subr.bf16.mxu0 %v5179_v0  ;;  %v46_v62 = vld [vmem:[%s7828_s0 + $0xe0] sm:$0xff]  ;;  %v48_v1 = vld [vmem:[%s7828_s0 + $0xf0] sm:$0xff] }
  0x15   :  { %v5153_v5 = vld [vmem:[%s7827_s1 + $0xa0] sm:$0xff]   ;;  %v4178_v7 = vcombine.high %v42_v61, %v46_v62  ;;  %v4182_v9 = vcombine.high %v44_v63, %v48_v1  ;;  %v5157_v20 = vld [vmem:[%s7827_s1 + $0xb0] sm:$0xff]  }
  0x16   :  { %2077 = vmatpush1.bf16.msra.mxu1 %v5123_v11  ;;  %v5154_v8 = vld [vmem:[%s7827_s1 + $0x1a0] sm:$0xff]   ;;  %v5158_v21 = vld [vmem:[%s7827_s1 + $0x1b0] sm:$0xff]  }
  0x17   :  { %2655 = vmatpush1.bf16.msra.mxu0 %v5124_v12  ;;  %2078 = vmatprep.subr.bf16.mxu1 %v5179_v0  ;;  %v50_v10 = vld [vmem:[%s7828_s0 + $0x100] sm:$0xff]  ;;  %v52_v12 = vld [vmem:[%s7828_s0 + $0x110] sm:$0xff] }
  0x18   :  { %2656 = vmatprep.subr.bf16.mxu0 %v5179_v0  ;;  %v54_v11 = vld [vmem:[%s7828_s0 + $0x120] sm:$0xff]  ;;  %v60_v25 = vld [vmem:[%s7828_s0 + $0x150] sm:$0xff] }
  0x19   :  { %v58_v22 = vld [vmem:[%s7828_s0 + $0x140] sm:$0xff]  ;;  %v80_v49 = vld [vmem:[%s7828_s0 + $0x1f0] sm:$0xff] }
  0x1a   :  { %2079 = vmatpush1.bf16.msra.mxu1 %v5125_v13  ;;  %v56_v13 = vld [vmem:[%s7828_s0 + $0x130] sm:$0xff]  ;;  %v62_v23 = vld [vmem:[%s7828_s0 + $0x160] sm:$0xff] }
  0x1b   :  { %2657 = vmatpush1.bf16.msra.mxu0 %v5126_v14  ;;  %2080 = vmatprep.subr.bf16.mxu1 %v5179_v0  ;;  %v5155_v14 = vld [vmem:[%s7827_s1 + $0xa8] sm:$0xff]   ;;  %v4190_v19 = vcombine.high %v52_v12, %v56_v13  ;;  %v4193_v40 = vcombine.low %v58_v22, %v62_v23 }
  0x1c   :  { %2658 = vmatprep.subr.bf16.mxu0 %v5179_v0 }
  0x1e   :  { %2081 = vmatpush1.bf16.msra.mxu1 %v5127_v15  ;;  %v5156_v15 = vld [vmem:[%s7827_s1 + $0x1a8] sm:$0xff]  }
  0x1f   :  { %2659 = vmatpush1.bf16.msra.mxu0 %v5128_v16  ;;  %2082 = vmatprep.subr.bf16.mxu1 %v5179_v0  ;;  %v4177_v16 = vcombine.low %v42_v61, %v46_v62 }
  0x20   :  { %2660 = vmatprep.subr.bf16.mxu0 %v5179_v0 }
  0x22   :  { %2083 = vmatpush1.bf16.msra.mxu1 %v5129_v17  ;;  %v4181_v17 = vcombine.low %v44_v63, %v48_v1  ;;  %v90_v1 = vld [vmem:[%s7828_s0 + $0x240] sm:$0xff] }
  0x23   :  { %2661 = vmatpush1.bf16.msra.mxu0 %v5130_v18  ;;  %2084 = vmatprep.subr.bf16.mxu1 %v5179_v0  ;;  %v4186_v18 = vcombine.high %v50_v10, %v54_v11 }
  0x24   :  { %2662 = vmatprep.subr.bf16.mxu0 %v5179_v0 }
  0x26   :  { %2085 = vmatpush1.bf16.msra.mxu1 %v5131_v24  ;;  %v5159_v24 = vld [vmem:[%s7827_s1 + $0xb8] sm:$0xff]  }
  0x27   :  { %2663 = vmatpush1.bf16.msra.mxu0 %v5132_v26  ;;  %2086 = vmatprep.subr.bf16.mxu1 %v5179_v0  ;;  %v64_v26 = vld [vmem:[%s7828_s0 + $0x170] sm:$0xff] }
  0x28   :  { %2664 = vmatprep.subr.bf16.mxu0 %v5179_v0  ;;  %v4197_v41 = vcombine.low %v60_v25, %v64_v26 }
  0x2a   :  { %2087 = vmatpush1.bf16.msra.mxu1 %v5133_v27  ;;  %v5160_v27 = vld [vmem:[%s7827_s1 + $0x1b8] sm:$0xff]  }
  0x2b   :  { %2665 = vmatpush1.bf16.msra.mxu0 %v5134_v28  ;;  %2088 = vmatprep.subr.bf16.mxu1 %v5179_v0  ;;  %v4185_v28 = vcombine.low %v50_v10, %v54_v11  ;;  %v5170_v10 = vld [vmem:[%s7827_s1 + $0x1e0] sm:$0xff]  }
  0x2c   :  { %2666 = vmatprep.subr.bf16.mxu0 %v5179_v0  ;;  %v98_v11 = vld [vmem:[%s7828_s0 + $0x280] sm:$0xff] }
  0x2e   :  { %2089 = vmatpush1.bf16.msra.mxu1 %v5135_v29  ;;  %v4189_v29 = vcombine.low %v52_v12, %v56_v13  ;;  %v102_v12 = vld [vmem:[%s7828_s0 + $0x2a0] sm:$0xff]  ;;  %v100_v13 = vld [vmem:[%s7828_s0 + $0x290] sm:$0xff] }
  0x2f   :  { %2667 = vmatpush1.bf16.msra.mxu0 %v5136_v30  ;;  %2090 = vmatprep.subr.bf16.mxu1 %v5179_v0  ;;  %v4194_v30 = vcombine.high %v58_v22, %v62_v23  ;;  %v112_v22 = vld [vmem:[%s7828_s0 + $0x2f0] sm:$0xff]  ;;  %v4233_v23 = vcombine.low %v98_v11, %v102_v12 }
  0x30   :  { %2668 = vmatprep.subr.bf16.mxu0 %v5179_v0 }
  0x32   :  { %2091 = vmatpush1.bf16.msra.mxu1 %v5137_v31  ;;  %v4198_v31 = vcombine.high %v60_v25, %v64_v26 }
  0x33   :  { %2669 = vmatpush1.bf16.msra.mxu0 %v5138_v32  ;;  %2092 = vmatprep.subr.bf16.mxu1 %v5179_v0  ;;  %v5161_v32 = vld [vmem:[%s7827_s1 + $0xc0] sm:$0xff]  }
  0x34   :  { %2670 = vmatprep.subr.bf16.mxu0 %v5179_v0 }
  0x36   :  { %2093 = vmatpush1.bf16.msra.mxu1 %v5139_v33  ;;  %v5162_v33 = vld [vmem:[%s7827_s1 + $0x1c0] sm:$0xff]  }
  0x37   :  { %2671 = vmatpush1.bf16.msra.mxu0 %v5140_v34  ;;  %2094 = vmatprep.subr.bf16.mxu1 %v5179_v0  ;;  %v66_v34 = vld [vmem:[%s7828_s0 + $0x180] sm:$0xff] }
  0x38   :  { %2672 = vmatprep.subr.bf16.mxu0 %v5179_v0 }
  0x3a   :  { %2095 = vmatpush1.bf16.msra.mxu1 %v5141_v35  ;;  %v70_v35 = vld [vmem:[%s7828_s0 + $0x1a0] sm:$0xff] }
  0x3b   :  { %2673 = vmatpush1.bf16.msra.mxu0 %v5142_v36  ;;  %2096 = vmatprep.subr.bf16.mxu1 %v5179_v0  ;;  %v5163_v36 = vld [vmem:[%s7827_s1 + $0xc8] sm:$0xff]   ;;  %v4201_v50 = vcombine.low %v66_v34, %v70_v35 }
  0x3c   :  { %2674 = vmatprep.subr.bf16.mxu0 %v5179_v0 }
  0x3e   :  { %2097 = vmatpush1.bf16.msra.mxu1 %v5143_v37  ;;  %v68_v37 = vld [vmem:[%s7828_s0 + $0x190] sm:$0xff] }
  0x3f   :  { %2675 = vmatpush1.bf16.msra.mxu0 %v5144_v38  ;;  %2355 = vmatprep.subr.bf16.mxu1 %v5179_v0  ;;  %v72_v38 = vld [vmem:[%s7828_s0 + $0x1b0] sm:$0xff] }
  0x40   :  { %2933 = vmatprep.subr.bf16.mxu0 %v5179_v0  ;;  %v4206_v43 = vcombine.high %v68_v37, %v72_v38 }
  0x41   :  { %2099 = vmatmul.mubr.bf16.vlgmr.msra.gmra.mrb[0].mxu1 %v4153_v42  ;;  %v4202_v42 = vcombine.high %v66_v34, %v70_v35 }
  0x42   :  { %2677 = vmatmul.mubr.bf16.vlgmr.msra.gmra.mrb[0].mxu0 %v4157_v44  ;;  %2356 = vmatpush1.bf16.msra.mxu1 %v5145_v45  ;;  %v5165_v44 = vld [vmem:[%s7827_s1 + $0xd0] sm:$0xff]  }
  0x43   :  { %2934 = vmatpush1.bf16.msra.mxu0 %v5146_v46  ;;  %2106 = vmatprep.mubr.bf16.mxu1 %v4162_v47  ;;  %v5166_v45 = vld [vmem:[%s7827_s1 + $0x1d0] sm:$0xff]   ;;  %v74_v46 = vld [vmem:[%s7828_s0 + $0x1c0] sm:$0xff] }
  0x44   :  { %2684 = vmatprep.mubr.bf16.mxu0 %v4166_v48  ;;  %2357 = vmatprep.subr.bf16.mxu1 %v5179_v0  ;;  %v78_v47 = vld [vmem:[%s7828_s0 + $0x1e0] sm:$0xff]  ;;  %v76_v48 = vld [vmem:[%s7828_s0 + $0x1d0] sm:$0xff] }
  0x45   :  { %2935 = vmatprep.subr.bf16.mxu0 %v5179_v0  ;;  %v4214_v53 = vcombine.high %v76_v48, %v80_v49  ;;  %v4213_v61 = vcombine.low %v76_v48, %v80_v49  ;;  %v134_v48 = vld [vmem:[%s7828_s0 + $0x3a0] sm:$0xff]  ;;  %v132_v49 = vld [vmem:[%s7828_s0 + $0x390] sm:$0xff] }
  0x46   :  { %2358 = vmatpush1.bf16.msra.mxu1 %v5147_v51  ;;  %v4205_v51 = vcombine.low %v68_v37, %v72_v38  ;;  %v122_v37 = vld [vmem:[%s7828_s0 + $0x340] sm:$0xff] }
  0x47   :  { %2936 = vmatpush1.bf16.msra.mxu0 %v5148_v52  ;;  %2359 = vmatprep.subr.bf16.mxu1 %v5179_v0  ;;  %v4210_v52 = vcombine.high %v74_v46, %v78_v47  ;;  %v126_v38 = vld [vmem:[%s7828_s0 + $0x360] sm:$0xff] }
  0x48   :  { %2937 = vmatprep.subr.bf16.mxu0 %v5179_v0 }
  0x49   :  { %2107 = vmatmul.mubr.bf16.gmra.mrb[4].mxu1 %v4161_v55  ;;  %v5168_v55 = vld [vmem:[%s7827_s1 + $0x1d8] sm:$0xff]  }
  0x4a   :  { %2685 = vmatmul.mubr.bf16.gmra.mrb[4].mxu0 %v4165_v56  ;;  %2114 = vmatprep.mubr.bf16.mxu1 %v4170_v57  ;;  %v82_v56 = vld [vmem:[%s7828_s0 + $0x200] sm:$0xff] }
  0x4b   :  { %2692 = vmatprep.mubr.bf16.mxu0 %v4174_v58  ;;  %2360 = vmatpush1.bf16.msra.mxu1 %v5149_v59  ;;  %v86_v57 = vld [vmem:[%s7828_s0 + $0x220] sm:$0xff]  ;;  %v84_v58 = vld [vmem:[%s7828_s0 + $0x210] sm:$0xff] }
  0x4c   :  { %2938 = vmatpush1.bf16.msra.mxu0 %v5150_v60  ;;  %2361 = vmatprep.subr.bf16.mxu1 %v5179_v0  ;;  %v88_v59 = vld [vmem:[%s7828_s0 + $0x230] sm:$0xff]  ;;  %v4209_v60 = vcombine.low %v74_v46, %v78_v47  ;;  %v4218_v62 = vcombine.high %v82_v56, %v86_v57  ;;  %v130_v47 = vld [vmem:[%s7828_s0 + $0x380] sm:$0xff] }
  0x4d   :  { %2939 = vmatprep.subr.bf16.mxu0 %v5179_v0  ;;  %v4222_v63 = vcombine.high %v84_v58, %v88_v59  ;;  %v5174_v46 = vld [vmem:[%s7827_s1 + $0x1f0] sm:$0xff]  }
  0x4f   :  { %2362 = vmatpush1.bf16.msra.mxu1 %v5151_v2  ;;  %v94_v2 = vld [vmem:[%s7828_s0 + $0x260] sm:$0xff] }
  0x50   :  { %2940 = vmatpush1.bf16.msra.mxu0 %v5152_v3  ;;  %2363 = vmatprep.subr.bf16.mxu1 %v5179_v0  ;;  %v92_v3 = vld [vmem:[%s7828_s0 + $0x250] sm:$0xff] }
  0x51   :  { %2115 = vmatmul.mubr.bf16.gmra.mrb[8].mxu1 %v4169_v4  ;;  %2941 = vmatprep.subr.bf16.mxu0 %v5179_v0  ;;  %v96_v4 = vld [vmem:[%s7828_s0 + $0x270] sm:$0xff] }
  0x52   :  { %2693 = vmatmul.mubr.bf16.gmra.mrb[8].mxu0 %v4173_v6  ;;  %2122 = vmatprep.mubr.bf16.mxu1 %v4178_v7  ;;  %v4221_v6 = vcombine.low %v84_v58, %v88_v59  ;;  %v4226_v7 = vcombine.high %v90_v1, %v94_v2  ;;  %v4265_v58 = vcombine.low %v130_v47, %v134_v48 }
  0x53   :  { %2700 = vmatprep.mubr.bf16.mxu0 %v4182_v9  ;;  %2364 = vmatpush1.bf16.msra.mxu1 %v5153_v5  ;;  %v4217_v5 = vcombine.low %v82_v56, %v86_v57  ;;  %v5169_v9 = vld [vmem:[%s7827_s1 + $0xe0] sm:$0xff]   ;;  %v140_v57 = vld [vmem:[%s7828_s0 + $0x3d0] sm:$0xff] }
  0x54   :  { %2942 = vmatpush1.bf16.msra.mxu0 %v5154_v8  ;;  %2365 = vmatprep.subr.bf16.mxu1 %v5179_v0  ;;  %v4230_v8 = vcombine.high %v92_v3, %v96_v4  ;;  %v142_v56 = vld [vmem:[%s7828_s0 + $0x3e0] sm:$0xff] }
  0x55   :  { %2943 = vmatprep.subr.bf16.mxu0 %v5179_v0 }
  0x57   :  { %2366 = vmatpush1.bf16.msra.mxu1 %v5155_v14  ;;  %v104_v14 = vld [vmem:[%s7828_s0 + $0x2b0] sm:$0xff] }
  0x58   :  { %2944 = vmatpush1.bf16.msra.mxu0 %v5156_v15  ;;  %2367 = vmatprep.subr.bf16.mxu1 %v5179_v0  ;;  %v4225_v15 = vcombine.low %v90_v1, %v94_v2  ;;  %v146_v1 = vld [vmem:[%s7828_s0 + $0x400] sm:$0xff] }
  0x59   :  { %2123 = vmatmul.mubr.bf16.gmra.mrb[12].mxu1 %v4177_v16  ;;  %2945 = vmatprep.subr.bf16.mxu0 %v5179_v0  ;;  %v4229_v16 = vcombine.low %v92_v3, %v96_v4  ;;  %v150_v2 = vld [vmem:[%s7828_s0 + $0x420] sm:$0xff]  ;;  %v148_v3 = vld [vmem:[%s7828_s0 + $0x410] sm:$0xff] }
  0x5a   :  { %2701 = vmatmul.mubr.bf16.gmra.mrb[12].mxu0 %v4181_v17  ;;  %2130 = vmatprep.mubr.bf16.mxu1 %v4186_v18  ;;  %v4234_v17 = vcombine.high %v98_v11, %v102_v12  ;;  %v4238_v18 = vcombine.high %v100_v13, %v104_v14  ;;  %v152_v4 = vld [vmem:[%s7828_s0 + $0x430] sm:$0xff] }
  0x5b   :  { %2708 = vmatprep.mubr.bf16.mxu0 %v4190_v19  ;;  %2368 = vmatpush1.bf16.msra.mxu1 %v5157_v20  ;;  %v106_v19 = vld [vmem:[%s7828_s0 + $0x2c0] sm:$0xff]  ;;  %v156_v11 = vld [vmem:[%s7828_s0 + $0x450] sm:$0xff] }
  0x5c   :  { %2946 = vmatpush1.bf16.msra.mxu0 %v5158_v21  ;;  %2369 = vmatprep.subr.bf16.mxu1 %v5179_v0  ;;  %v110_v20 = vld [vmem:[%s7828_s0 + $0x2e0] sm:$0xff]  ;;  %v108_v21 = vld [vmem:[%s7828_s0 + $0x2d0] sm:$0xff] }
  0x5d   :  { %2947 = vmatprep.subr.bf16.mxu0 %v5179_v0  ;;  %v4242_v25 = vcombine.high %v106_v19, %v110_v20  ;;  %v4246_v26 = vcombine.high %v108_v21, %v112_v22  ;;  %v4245_v34 = vcombine.low %v108_v21, %v112_v22  ;;  %v160_v12 = vld [vmem:[%s7828_s0 + $0x470] sm:$0xff] }
  0x5e   :  { %v4293_v22 = vcombine.low %v156_v11, %v160_v12 }
  0x5f   :  { %2370 = vmatpush1.bf16.msra.mxu1 %v5159_v24  ;;  %v4237_v24 = vcombine.low %v100_v13, %v104_v14  ;;  %v4281_v13 = vcombine.low %v146_v1, %v150_v2  ;;  %v4285_v14 = vcombine.low %v148_v3, %v152_v4 }
  0x60   :  { %2948 = vmatpush1.bf16.msra.mxu0 %v5160_v27  ;;  %2371 = vmatprep.subr.bf16.mxu1 %v5179_v0  ;;  %v5171_v27 = vld [vmem:[%s7827_s1 + $0xe8] sm:$0xff]  }
  0x61   :  { %2131 = vmatmul.mubr.bf16.gmra.mrb[16].mxu1 %v4185_v28  ;;  %2949 = vmatprep.subr.bf16.mxu0 %v5179_v0  ;;  %v5172_v28 = vld [vmem:[%s7827_s1 + $0x1e8] sm:$0xff]  }
  0x62   :  { %2709 = vmatmul.mubr.bf16.gmra.mrb[16].mxu0 %v4189_v29  ;;  %2138 = vmatprep.mubr.bf16.mxu1 %v4194_v30  ;;  %v114_v29 = vld [vmem:[%s7828_s0 + $0x300] sm:$0xff] }
  0x63   :  { %2716 = vmatprep.mubr.bf16.mxu0 %v4198_v31  ;;  %2372 = vmatpush1.bf16.msra.mxu1 %v5161_v32  ;;  %v118_v30 = vld [vmem:[%s7828_s0 + $0x320] sm:$0xff]  ;;  %v116_v31 = vld [vmem:[%s7828_s0 + $0x310] sm:$0xff] }
  0x64   :  { %2950 = vmatpush1.bf16.msra.mxu0 %v5162_v33  ;;  %2373 = vmatprep.subr.bf16.mxu1 %v5179_v0  ;;  %v120_v32 = vld [vmem:[%s7828_s0 + $0x330] sm:$0xff]  ;;  %v4241_v33 = vcombine.low %v106_v19, %v110_v20  ;;  %v4250_v35 = vcombine.high %v114_v29, %v118_v30 }
  0x65   :  { %2951 = vmatprep.subr.bf16.mxu0 %v5179_v0  ;;  %v164_v19 = vld [vmem:[%s7828_s0 + $0x490] sm:$0xff] }
  0x66   :  { %v168_v20 = vld [vmem:[%s7828_s0 + $0x4b0] sm:$0xff] }
  0x67   :  { %2374 = vmatpush1.bf16.msra.mxu1 %v5163_v36  ;;  %v4254_v36 = vcombine.high %v116_v31, %v120_v32 }
  0x68   :  { %2952 = vmatpush1.bf16.msra.mxu0 %v5164_v39  ;;  %2375 = vmatprep.subr.bf16.mxu1 %v5179_v0  ;;  %v124_v39 = vld [vmem:[%s7828_s0 + $0x350] sm:$0xff] }
  0x69   :  { %2139 = vmatmul.mubr.bf16.gmra.mrb[20].mxu1 %v4193_v40  ;;  %2953 = vmatprep.subr.bf16.mxu0 %v5179_v0  ;;  %v128_v40 = vld [vmem:[%s7828_s0 + $0x370] sm:$0xff] }
  0x6a   :  { %2717 = vmatmul.mubr.bf16.gmra.mrb[20].mxu0 %v4197_v41  ;;  %2146 = vmatprep.mubr.bf16.mxu1 %v4202_v42  ;;  %v4249_v41 = vcombine.low %v114_v29, %v118_v30  ;;  %v4253_v42 = vcombine.low %v116_v31, %v120_v32  ;;  %v4301_v30 = vcombine.low %v164_v19, %v168_v20 }
  0x6b   :  { %2724 = vmatprep.mubr.bf16.mxu0 %v4206_v43  ;;  %2376 = vmatpush1.bf16.msra.mxu1 %v5165_v44  ;;  %v4258_v43 = vcombine.high %v122_v37, %v126_v38  ;;  %v4262_v44 = vcombine.high %v124_v39, %v128_v40 }
  0x6c   :  { %2954 = vmatpush1.bf16.msra.mxu0 %v5166_v45  ;;  %2377 = vmatprep.subr.bf16.mxu1 %v5179_v0  ;;  %v5173_v45 = vld [vmem:[%s7827_s1 + $0xf0] sm:$0xff]  }
  0x6d   :  { %2955 = vmatprep.subr.bf16.mxu0 %v5179_v0 }
  0x6f   :  { %2378 = vmatpush1.bf16.msra.mxu1 %v5167_v54 }
  0x70   :  { %2956 = vmatpush1.bf16.msra.mxu0 %v5168_v55  ;;  %2379 = vmatprep.subr.bf16.mxu1 %v5179_v0  ;;  %v138_v55 = vld [vmem:[%s7828_s0 + $0x3c0] sm:$0xff] }
  0x71   :  { %2147 = vmatmul.mubr.bf16.gmra.mrb[24].mxu1 %v4201_v50  ;;  %2957 = vmatprep.subr.bf16.mxu0 %v5179_v0  ;;  %v136_v50 = vld [vmem:[%s7828_s0 + $0x3b0] sm:$0xff] }
  0x72   :  { %2725 = vmatmul.mubr.bf16.gmra.mrb[24].mxu0 %v4205_v51  ;;  %2154 = vmatprep.mubr.bf16.mxu1 %v4210_v52  ;;  %v4257_v51 = vcombine.low %v122_v37, %v126_v38  ;;  %v4261_v52 = vcombine.low %v124_v39, %v128_v40  ;;  %v4270_v54 = vcombine.high %v132_v49, %v136_v50 }
  0x73   :  { %2732 = vmatprep.mubr.bf16.mxu0 %v4214_v53  ;;  %2380 = vmatpush1.bf16.msra.mxu1 %v5169_v9  ;;  %v4266_v53 = vcombine.high %v130_v47, %v134_v48  ;;  %v4269_v59 = vcombine.low %v132_v49, %v136_v50  ;;  %v154_v9 = vld [vmem:[%s7828_s0 + $0x440] sm:$0xff] }
  0x74   :  { %2958 = vmatpush1.bf16.msra.mxu0 %v5170_v10  ;;  %2381 = vmatprep.subr.bf16.mxu1 %v5179_v0  ;;  %v158_v10 = vld [vmem:[%s7828_s0 + $0x460] sm:$0xff] }
  0x75   :  { %2959 = vmatprep.subr.bf16.mxu0 %v5179_v0  ;;  %v4289_v21 = vcombine.low %v154_v9, %v158_v10  ;;  %v194_v49 = vld [vmem:[%s7828_s0 + $0x580] sm:$0xff] }
  0x76   :  { %v198_v50 = vld [vmem:[%s7828_s0 + $0x5a0] sm:$0xff] }
  0x77   :  { %2382 = vmatpush1.bf16.msra.mxu1 %v5171_v27  ;;  %v172_v27 = vld [vmem:[%s7828_s0 + $0x4d0] sm:$0xff] }
  0x78   :  { %2960 = vmatpush1.bf16.msra.mxu0 %v5172_v28  ;;  %2383 = vmatprep.subr.bf16.mxu1 %v5179_v0  ;;  %v176_v28 = vld [vmem:[%s7828_s0 + $0x4f0] sm:$0xff] }
  0x79   :  { %2155 = vmatmul.mubr.bf16.gmra.mrb[28].mxu1 %v4209_v60  ;;  %2961 = vmatprep.subr.bf16.mxu0 %v5179_v0  ;;  %v4274_v60 = vcombine.high %v138_v55, %v142_v56  ;;  %v4310_v32 = vcombine.high %v172_v27, %v176_v28  ;;  %v4309_v38 = vcombine.low %v172_v27, %v176_v28  ;;  %v236_v27 = vld [vmem:[%s7828_s0 + $0x6d0] sm:$0xff] }
  0x7a   :  { %2733 = vmatmul.mubr.bf16.gmra.mrb[28].mxu0 %v4213_v61  ;;  %2162 = vmatprep.mubr.bf16.mxu1 %v4218_v62  ;;  %v5175_v62 = vld [vmem:[%s7827_s1 + $0xf8] sm:$0xff]   ;;  %v240_v28 = vld [vmem:[%s7828_s0 + $0x6f0] sm:$0xff] }
  0x7b   :  { %2740 = vmatprep.mubr.bf16.mxu0 %v4222_v63  ;;  %2384 = vmatpush1.bf16.msra.mxu1 %v5173_v45  ;;  %v5176_v63 = vld [vmem:[%s7827_s1 + $0x1f8] sm:$0xff]  }
  0x7c   :  { %2962 = vmatpush1.bf16.msra.mxu0 %v5174_v46  ;;  %2385 = vmatprep.subr.bf16.mxu1 %v5179_v0 }
  0x7d   :  { %2963 = vmatprep.subr.bf16.mxu0 %v5179_v0  ;;  %v144_v0 = vld [vmem:[%s7828_s0 + $0x3f0] sm:$0xff] }
  0x7e   :  { %v4278_v61 = vcombine.high %v140_v57, %v144_v0 }
  0x7f   :  { %2386 = vmatpush1.bf16.msra.mxu1 %v5175_v62 }
  0x80   :  { %2964 = vmatpush1.bf16.msra.mxu0 %v5176_v63 }
  0x81   :  { %2163 = vmatmul.mubr.bf16.gmra.mrb[32].mxu1 %v4217_v5  ;;  %v4273_v5 = vcombine.low %v138_v55, %v142_v56  ;;  %v4330_v55 = vcombine.high %v194_v49, %v198_v50 }
  0x82   :  { %2741 = vmatmul.mubr.bf16.gmra.mrb[32].mxu0 %v4221_v6  ;;  %2170 = vmatprep.mubr.bf16.mxu1 %v4226_v7  ;;  %v4277_v6 = vcombine.low %v140_v57, %v144_v0  ;;  %v4282_v7 = vcombine.high %v146_v1, %v150_v2  ;;  %v202_v57 = vld [vmem:[%s7828_s0 + $0x5c0] sm:$0xff] }
  0x83   :  { %2748 = vmatprep.mubr.bf16.mxu0 %v4230_v8  ;;  %v4286_v8 = vcombine.high %v148_v3, %v152_v4  ;;  %v206_v0 = vld [vmem:[%s7828_s0 + $0x5e0] sm:$0xff]  ;;  %v212_v3 = vld [vmem:[%s7828_s0 + $0x610] sm:$0xff] }
  0x84   :  { %v4338_v62 = vcombine.high %v202_v57, %v206_v0  ;;  %v210_v1 = vld [vmem:[%s7828_s0 + $0x600] sm:$0xff]  ;;  %v216_v4 = vld [vmem:[%s7828_s0 + $0x630] sm:$0xff] }
  0x85   :  { %v214_v2 = vld [vmem:[%s7828_s0 + $0x620] sm:$0xff] }
  0x89   :  { %2171 = vmatmul.mubr.bf16.gmra.mrb[36].mxu1 %v4225_v15  ;;  %v4290_v15 = vcombine.high %v154_v9, %v158_v10  ;;  %v218_v9 = vld [vmem:[%s7828_s0 + $0x640] sm:$0xff] }
  0x8a   :  { %2749 = vmatmul.mubr.bf16.gmra.mrb[36].mxu0 %v4229_v16  ;;  %2178 = vmatprep.mubr.bf16.mxu1 %v4234_v17  ;;  %v4294_v16 = vcombine.high %v156_v11, %v160_v12  ;;  %v162_v17 = vld [vmem:[%s7828_s0 + $0x480] sm:$0xff]  ;;  %v220_v11 = vld [vmem:[%s7828_s0 + $0x650] sm:$0xff] }
  0x8b   :  { %2756 = vmatprep.mubr.bf16.mxu0 %v4238_v18  ;;  %v166_v18 = vld [vmem:[%s7828_s0 + $0x4a0] sm:$0xff]  ;;  %v224_v12 = vld [vmem:[%s7828_s0 + $0x670] sm:$0xff] }
  0x8c   :  { %v4297_v29 = vcombine.low %v162_v17, %v166_v18  ;;  %v222_v10 = vld [vmem:[%s7828_s0 + $0x660] sm:$0xff] }
  0x91   :  { %2179 = vmatmul.mubr.bf16.gmra.mrb[40].mxu1 %v4233_v23  ;;  %v4298_v23 = vcombine.high %v162_v17, %v166_v18  ;;  %v226_v17 = vld [vmem:[%s7828_s0 + $0x680] sm:$0xff] }
  0x92   :  { %2757 = vmatmul.mubr.bf16.gmra.mrb[40].mxu0 %v4237_v24  ;;  %2186 = vmatprep.mubr.bf16.mxu1 %v4242_v25  ;;  %v4302_v24 = vcombine.high %v164_v19, %v168_v20  ;;  %v170_v25 = vld [vmem:[%s7828_s0 + $0x4c0] sm:$0xff]  ;;  %v228_v19 = vld [vmem:[%s7828_s0 + $0x690] sm:$0xff] }
  0x93   :  { %2764 = vmatprep.mubr.bf16.mxu0 %v4246_v26  ;;  %v174_v26 = vld [vmem:[%s7828_s0 + $0x4e0] sm:$0xff]  ;;  %v232_v20 = vld [vmem:[%s7828_s0 + $0x6b0] sm:$0xff] }
  0x94   :  { %v4306_v31 = vcombine.high %v170_v25, %v174_v26  ;;  %v4305_v37 = vcombine.low %v170_v25, %v174_v26  ;;  %v230_v18 = vld [vmem:[%s7828_s0 + $0x6a0] sm:$0xff] }
  0x95   :  { %v234_v25 = vld [vmem:[%s7828_s0 + $0x6c0] sm:$0xff] }
  0x96   :  { %v238_v26 = vld [vmem:[%s7828_s0 + $0x6e0] sm:$0xff] }
  0x99   :  { %2187 = vmatmul.mubr.bf16.gmra.mrb[44].mxu1 %v4241_v33  ;;  %v178_v33 = vld [vmem:[%s7828_s0 + $0x500] sm:$0xff] }
  0x9a   :  { %2765 = vmatmul.mubr.bf16.gmra.mrb[44].mxu0 %v4245_v34  ;;  %2194 = vmatprep.mubr.bf16.mxu1 %v4250_v35  ;;  %v182_v34 = vld [vmem:[%s7828_s0 + $0x520] sm:$0xff]  ;;  %v180_v35 = vld [vmem:[%s7828_s0 + $0x510] sm:$0xff] }
  0x9b   :  { %2772 = vmatprep.mubr.bf16.mxu0 %v4254_v36  ;;  %v184_v36 = vld [vmem:[%s7828_s0 + $0x530] sm:$0xff]  ;;  %v4314_v39 = vcombine.high %v178_v33, %v182_v34  ;;  %v4313_v45 = vcombine.low %v178_v33, %v182_v34  ;;  %v242_v33 = vld [vmem:[%s7828_s0 + $0x700] sm:$0xff] }
  0x9c   :  { %v4318_v40 = vcombine.high %v180_v35, %v184_v36  ;;  %v4317_v46 = vcombine.low %v180_v35, %v184_v36  ;;  %v246_v34 = vld [vmem:[%s7828_s0 + $0x720] sm:$0xff]  ;;  %v244_v35 = vld [vmem:[%s7828_s0 + $0x710] sm:$0xff] }
  0x9d   :  { %v248_v36 = vld [vmem:[%s7828_s0 + $0x730] sm:$0xff] }
  0xa1   :  { %2195 = vmatmul.mubr.bf16.gmra.mrb[48].mxu1 %v4249_v41  ;;  %v186_v41 = vld [vmem:[%s7828_s0 + $0x540] sm:$0xff] }
  0xa2   :  { %2773 = vmatmul.mubr.bf16.gmra.mrb[48].mxu0 %v4253_v42  ;;  %2202 = vmatprep.mubr.bf16.mxu1 %v4258_v43  ;;  %v190_v42 = vld [vmem:[%s7828_s0 + $0x560] sm:$0xff]  ;;  %v188_v43 = vld [vmem:[%s7828_s0 + $0x550] sm:$0xff] }
  0xa3   :  { %2780 = vmatprep.mubr.bf16.mxu0 %v4262_v44  ;;  %v192_v44 = vld [vmem:[%s7828_s0 + $0x570] sm:$0xff]  ;;  %v4322_v47 = vcombine.high %v186_v41, %v190_v42 }
  0xa4   :  { %v4326_v48 = vcombine.high %v188_v43, %v192_v44 }
  0xa9   :  { %2203 = vmatmul.mubr.bf16.gmra.mrb[52].mxu1 %v4257_v51  ;;  %v196_v51 = vld [vmem:[%s7828_s0 + $0x590] sm:$0xff] }
  0xaa   :  { %2781 = vmatmul.mubr.bf16.gmra.mrb[52].mxu0 %v4261_v52  ;;  %2210 = vmatprep.mubr.bf16.mxu1 %v4266_v53  ;;  %v200_v52 = vld [vmem:[%s7828_s0 + $0x5b0] sm:$0xff]  ;;  %v4321_v53 = vcombine.low %v186_v41, %v190_v42  ;;  %v250_v41 = vld [vmem:[%s7828_s0 + $0x740] sm:$0xff] }
  0xab   :  { %2788 = vmatprep.mubr.bf16.mxu0 %v4270_v54  ;;  %v4325_v54 = vcombine.low %v188_v43, %v192_v44  ;;  %v4334_v56 = vcombine.high %v196_v51, %v200_v52  ;;  %v254_v42 = vld [vmem:[%s7828_s0 + $0x760] sm:$0xff]  ;;  %v252_v43 = vld [vmem:[%s7828_s0 + $0x750] sm:$0xff] }
  0xac   :  { %v256_v44 = vld [vmem:[%s7828_s0 + $0x770] sm:$0xff] }
  0xb1   :  { %2211 = vmatmul.mubr.bf16.gmra.mrb[56].mxu1 %v4265_v58  ;;  %v204_v58 = vld [vmem:[%s7828_s0 + $0x5d0] sm:$0xff] }
  0xb2   :  { %2789 = vmatmul.mubr.bf16.gmra.mrb[56].mxu0 %v4269_v59  ;;  %2218 = vmatprep.mubr.bf16.mxu1 %v4274_v60  ;;  %v208_v59 = vld [vmem:[%s7828_s0 + $0x5f0] sm:$0xff]  ;;  %v4329_v60 = vcombine.low %v194_v49, %v198_v50  ;;  %v258_v49 = vld [vmem:[%s7828_s0 + $0x780] sm:$0xff] }
  0xb3   :  { %2796 = vmatprep.mubr.bf16.mxu0 %v4278_v61  ;;  %v4333_v61 = vcombine.low %v196_v51, %v200_v52  ;;  %v4342_v63 = vcombine.high %v204_v58, %v208_v59  ;;  %v262_v50 = vld [vmem:[%s7828_s0 + $0x7a0] sm:$0xff]  ;;  %v260_v51 = vld [vmem:[%s7828_s0 + $0x790] sm:$0xff] }
  0xb4   :  { %v264_v52 = vld [vmem:[%s7828_s0 + $0x7b0] sm:$0xff] }
  0xb9   :  { %2219 = vmatmul.mubr.bf16.gmra.mrb[60].mxu1 %v4273_v5  ;;  %v4337_v5 = vcombine.low %v202_v57, %v206_v0  ;;  %v266_v57 = vld [vmem:[%s7828_s0 + $0x7c0] sm:$0xff] }
  0xba   :  { %2797 = vmatmul.mubr.bf16.gmra.mrb[60].mxu0 %v4277_v6  ;;  %2226 = vmatprep.mubr.bf16.mxu1 %v4282_v7  ;;  %v4341_v6 = vcombine.low %v204_v58, %v208_v59  ;;  %v4346_v7 = vcombine.high %v210_v1, %v214_v2  ;;  %v270_v0 = vld [vmem:[%s7828_s0 + $0x7e0] sm:$0xff]  ;;  %v268_v58 = vld [vmem:[%s7828_s0 + $0x7d0] sm:$0xff] }
  0xbb   :  { %2804 = vmatprep.mubr.bf16.mxu0 %v4286_v8  ;;  %v4350_v8 = vcombine.high %v212_v3, %v216_v4  ;;  %v272_v59 = vld [vmem:[%s7828_s0 + $0x7f0] sm:$0xff] }
  0xc1   :  { %2227 = vmatmul.mubr.bf16.gmra.mrb[64].mxu1 %v4281_v13  ;;  %v4345_v13 = vcombine.low %v210_v1, %v214_v2  ;;  %v19_v1 = vld [vmem:[%s7828_s0 + $0x8] sm:$0xff] }
  0xc2   :  { %2805 = vmatmul.mubr.bf16.gmra.mrb[64].mxu0 %v4285_v14  ;;  %2234 = vmatprep.mubr.bf16.mxu1 %v4290_v15  ;;  %v4349_v14 = vcombine.low %v212_v3, %v216_v4  ;;  %v4354_v15 = vcombine.high %v218_v9, %v222_v10  ;;  %v23_v2 = vld [vmem:[%s7828_s0 + $0x28] sm:$0xff]  ;;  %v21_v3 = vld [vmem:[%s7828_s0 + $0x18] sm:$0xff] }
  0xc3   :  { %2812 = vmatprep.mubr.bf16.mxu0 %v4294_v16  ;;  %v4358_v16 = vcombine.high %v220_v11, %v224_v12  ;;  %v25_v4 = vld [vmem:[%s7828_s0 + $0x38] sm:$0xff] }
  0xc9   :  { %2235 = vmatmul.mubr.bf16.gmra.mrb[68].mxu1 %v4289_v21  ;;  %v4353_v21 = vcombine.low %v218_v9, %v222_v10  ;;  %v27_v9 = vld [vmem:[%s7828_s0 + $0x48] sm:$0xff] }
  0xca   :  { %2813 = vmatmul.mubr.bf16.gmra.mrb[68].mxu0 %v4293_v22  ;;  %2242 = vmatprep.mubr.bf16.mxu1 %v4298_v23  ;;  %v4357_v22 = vcombine.low %v220_v11, %v224_v12  ;;  %v4362_v23 = vcombine.high %v226_v17, %v230_v18  ;;  %v31_v10 = vld [vmem:[%s7828_s0 + $0x68] sm:$0xff]  ;;  %v29_v11 = vld [vmem:[%s7828_s0 + $0x58] sm:$0xff] }
  0xcb   :  { %2820 = vmatprep.mubr.bf16.mxu0 %v4302_v24  ;;  %v4366_v24 = vcombine.high %v228_v19, %v232_v20  ;;  %v33_v12 = vld [vmem:[%s7828_s0 + $0x78] sm:$0xff] }
  0xd1   :  { %2243 = vmatmul.mubr.bf16.gmra.mrb[72].mxu1 %v4297_v29  ;;  %v4361_v29 = vcombine.low %v226_v17, %v230_v18  ;;  %v35_v17 = vld [vmem:[%s7828_s0 + $0x88] sm:$0xff] }
  0xd2   :  { %2821 = vmatmul.mubr.bf16.gmra.mrb[72].mxu0 %v4301_v30  ;;  %2250 = vmatprep.mubr.bf16.mxu1 %v4306_v31  ;;  %v4365_v30 = vcombine.low %v228_v19, %v232_v20  ;;  %v4370_v31 = vcombine.high %v234_v25, %v238_v26  ;;  %v39_v18 = vld [vmem:[%s7828_s0 + $0xa8] sm:$0xff]  ;;  %v37_v19 = vld [vmem:[%s7828_s0 + $0x98] sm:$0xff] }
  0xd3   :  { %2828 = vmatprep.mubr.bf16.mxu0 %v4310_v32  ;;  %v4374_v32 = vcombine.high %v236_v27, %v240_v28  ;;  %v41_v20 = vld [vmem:[%s7828_s0 + $0xb8] sm:$0xff] }
  0xd9   :  { %2251 = vmatmul.mubr.bf16.gmra.mrb[76].mxu1 %v4305_v37  ;;  %v4369_v37 = vcombine.low %v234_v25, %v238_v26  ;;  %v43_v25 = vld [vmem:[%s7828_s0 + $0xc8] sm:$0xff] }
  0xda   :  { %2829 = vmatmul.mubr.bf16.gmra.mrb[76].mxu0 %v4309_v38  ;;  %2258 = vmatprep.mubr.bf16.mxu1 %v4314_v39  ;;  %v4373_v38 = vcombine.low %v236_v27, %v240_v28  ;;  %v4378_v39 = vcombine.high %v242_v33, %v246_v34  ;;  %v47_v26 = vld [vmem:[%s7828_s0 + $0xe8] sm:$0xff]  ;;  %v45_v27 = vld [vmem:[%s7828_s0 + $0xd8] sm:$0xff] }
  0xdb   :  { %2836 = vmatprep.mubr.bf16.mxu0 %v4318_v40  ;;  %v4382_v40 = vcombine.high %v244_v35, %v248_v36  ;;  %v49_v28 = vld [vmem:[%s7828_s0 + $0xf8] sm:$0xff] }
  0xe1   :  { %2259 = vmatmul.mubr.bf16.gmra.mrb[80].mxu1 %v4313_v45  ;;  %v4377_v45 = vcombine.low %v242_v33, %v246_v34  ;;  %v51_v33 = vld [vmem:[%s7828_s0 + $0x108] sm:$0xff] }
  0xe2   :  { %2837 = vmatmul.mubr.bf16.gmra.mrb[80].mxu0 %v4317_v46  ;;  %2266 = vmatprep.mubr.bf16.mxu1 %v4322_v47  ;;  %v4381_v46 = vcombine.low %v244_v35, %v248_v36  ;;  %v4386_v47 = vcombine.high %v250_v41, %v254_v42  ;;  %v55_v34 = vld [vmem:[%s7828_s0 + $0x128] sm:$0xff]  ;;  %v53_v35 = vld [vmem:[%s7828_s0 + $0x118] sm:$0xff] }
  0xe3   :  { %2844 = vmatprep.mubr.bf16.mxu0 %v4326_v48  ;;  %v4390_v48 = vcombine.high %v252_v43, %v256_v44  ;;  %v57_v36 = vld [vmem:[%s7828_s0 + $0x138] sm:$0xff] }
  0xe9   :  { %2267 = vmatmul.mubr.bf16.gmra.mrb[84].mxu1 %v4321_v53  ;;  %v4385_v53 = vcombine.low %v250_v41, %v254_v42  ;;  %v59_v41 = vld [vmem:[%s7828_s0 + $0x148] sm:$0xff] }
  0xea   :  { %2845 = vmatmul.mubr.bf16.gmra.mrb[84].mxu0 %v4325_v54  ;;  %2274 = vmatprep.mubr.bf16.mxu1 %v4330_v55  ;;  %v4389_v54 = vcombine.low %v252_v43, %v256_v44  ;;  %v4394_v55 = vcombine.high %v258_v49, %v262_v50  ;;  %v63_v42 = vld [vmem:[%s7828_s0 + $0x168] sm:$0xff]  ;;  %v61_v43 = vld [vmem:[%s7828_s0 + $0x158] sm:$0xff] }
  0xeb   :  { %2852 = vmatprep.mubr.bf16.mxu0 %v4334_v56  ;;  %v4398_v56 = vcombine.high %v260_v51, %v264_v52  ;;  %v65_v44 = vld [vmem:[%s7828_s0 + $0x178] sm:$0xff] }
  0xf1   :  { %2275 = vmatmul.mubr.bf16.gmra.mrb[88].mxu1 %v4329_v60  ;;  %v4393_v60 = vcombine.low %v258_v49, %v262_v50  ;;  %v67_v49 = vld [vmem:[%s7828_s0 + $0x188] sm:$0xff] }
  0xf2   :  { %2853 = vmatmul.mubr.bf16.gmra.mrb[88].mxu0 %v4333_v61  ;;  %2282 = vmatprep.mubr.bf16.mxu1 %v4338_v62  ;;  %v4397_v61 = vcombine.low %v260_v51, %v264_v52  ;;  %v4402_v62 = vcombine.high %v266_v57, %v270_v0  ;;  %v71_v50 = vld [vmem:[%s7828_s0 + $0x1a8] sm:$0xff]  ;;  %v69_v51 = vld [vmem:[%s7828_s0 + $0x198] sm:$0xff] }
  0xf3   :  { %2860 = vmatprep.mubr.bf16.mxu0 %v4342_v63  ;;  %v4406_v63 = vcombine.high %v268_v58, %v272_v59  ;;  %v73_v52 = vld [vmem:[%s7828_s0 + $0x1b8] sm:$0xff] }
  0xf9   :  { %2283 = vmatmul.mubr.bf16.gmra.mrb[92].mxu1 %v4337_v5  ;;  %v4401_v5 = vcombine.low %v266_v57, %v270_v0  ;;  %v75_v57 = vld [vmem:[%s7828_s0 + $0x1c8] sm:$0xff] }
  0xfa   :  { %2861 = vmatmul.mubr.bf16.gmra.mrb[92].mxu0 %v4341_v6  ;;  %2290 = vmatprep.mubr.bf16.mxu1 %v4346_v7  ;;  %v4405_v6 = vcombine.low %v268_v58, %v272_v59  ;;  %v4156_v7 = vcombine.high %v19_v1, %v23_v2  ;;  %v79_v0 = vld [vmem:[%s7828_s0 + $0x1e8] sm:$0xff]  ;;  %v77_v58 = vld [vmem:[%s7828_s0 + $0x1d8] sm:$0xff] }
  0xfb   :  { %2868 = vmatprep.mubr.bf16.mxu0 %v4350_v8  ;;  %v4160_v8 = vcombine.high %v21_v3, %v25_v4  ;;  %v81_v59 = vld [vmem:[%s7828_s0 + $0x1f8] sm:$0xff] }
 0x101   :  { %2291 = vmatmul.mubr.bf16.gmra.mrb[96].mxu1 %v4345_v13  ;;  %v4155_v13 = vcombine.low %v19_v1, %v23_v2  ;;  %v83_v1 = vld [vmem:[%s7828_s0 + $0x208] sm:$0xff] }
 0x102   :  { %2869 = vmatmul.mubr.bf16.gmra.mrb[96].mxu0 %v4349_v14  ;;  %2298 = vmatprep.mubr.bf16.mxu1 %v4354_v15  ;;  %v4159_v14 = vcombine.low %v21_v3, %v25_v4  ;;  %v4164_v15 = vcombine.high %v27_v9, %v31_v10  ;;  %v87_v2 = vld [vmem:[%s7828_s0 + $0x228] sm:$0xff]  ;;  %v85_v3 = vld [vmem:[%s7828_s0 + $0x218] sm:$0xff] }
 0x103   :  { %2876 = vmatprep.mubr.bf16.mxu0 %v4358_v16  ;;  %v4168_v16 = vcombine.high %v29_v11, %v33_v12  ;;  %v89_v4 = vld [vmem:[%s7828_s0 + $0x238] sm:$0xff] }
 0x109   :  { %2299 = vmatmul.mubr.bf16.gmra.mrb[100].mxu1 %v4353_v21  ;;  %v4163_v21 = vcombine.low %v27_v9, %v31_v10  ;;  %v91_v9 = vld [vmem:[%s7828_s0 + $0x248] sm:$0xff] }
 0x10a   :  { %2877 = vmatmul.mubr.bf16.gmra.mrb[100].mxu0 %v4357_v22  ;;  %2306 = vmatprep.mubr.bf16.mxu1 %v4362_v23  ;;  %v4167_v22 = vcombine.low %v29_v11, %v33_v12  ;;  %v4172_v23 = vcombine.high %v35_v17, %v39_v18  ;;  %v95_v10 = vld [vmem:[%s7828_s0 + $0x268] sm:$0xff]  ;;  %v93_v11 = vld [vmem:[%s7828_s0 + $0x258] sm:$0xff] }
 0x10b   :  { %2884 = vmatprep.mubr.bf16.mxu0 %v4366_v24  ;;  %v4176_v24 = vcombine.high %v37_v19, %v41_v20  ;;  %v97_v12 = vld [vmem:[%s7828_s0 + $0x278] sm:$0xff] }
 0x111   :  { %2307 = vmatmul.mubr.bf16.gmra.mrb[104].mxu1 %v4361_v29  ;;  %v4171_v29 = vcombine.low %v35_v17, %v39_v18  ;;  %v99_v17 = vld [vmem:[%s7828_s0 + $0x288] sm:$0xff] }
 0x112   :  { %2885 = vmatmul.mubr.bf16.gmra.mrb[104].mxu0 %v4365_v30  ;;  %2314 = vmatprep.mubr.bf16.mxu1 %v4370_v31  ;;  %v4175_v30 = vcombine.low %v37_v19, %v41_v20  ;;  %v4180_v31 = vcombine.high %v43_v25, %v47_v26  ;;  %v103_v18 = vld [vmem:[%s7828_s0 + $0x2a8] sm:$0xff]  ;;  %v101_v19 = vld [vmem:[%s7828_s0 + $0x298] sm:$0xff] }
 0x113   :  { %2892 = vmatprep.mubr.bf16.mxu0 %v4374_v32  ;;  %v4184_v32 = vcombine.high %v45_v27, %v49_v28  ;;  %v105_v20 = vld [vmem:[%s7828_s0 + $0x2b8] sm:$0xff] }
 0x119   :  { %2315 = vmatmul.mubr.bf16.gmra.mrb[108].mxu1 %v4369_v37  ;;  %v4179_v37 = vcombine.low %v43_v25, %v47_v26  ;;  %v107_v25 = vld [vmem:[%s7828_s0 + $0x2c8] sm:$0xff] }
 0x11a   :  { %2893 = vmatmul.mubr.bf16.gmra.mrb[108].mxu0 %v4373_v38  ;;  %2322 = vmatprep.mubr.bf16.mxu1 %v4378_v39  ;;  %v4183_v38 = vcombine.low %v45_v27, %v49_v28  ;;  %v4188_v39 = vcombine.high %v51_v33, %v55_v34  ;;  %v111_v26 = vld [vmem:[%s7828_s0 + $0x2e8] sm:$0xff]  ;;  %v109_v27 = vld [vmem:[%s7828_s0 + $0x2d8] sm:$0xff] }
 0x11b   :  { %2900 = vmatprep.mubr.bf16.mxu0 %v4382_v40  ;;  %v4192_v40 = vcombine.high %v53_v35, %v57_v36  ;;  %v113_v28 = vld [vmem:[%s7828_s0 + $0x2f8] sm:$0xff] }
 0x121   :  { %2323 = vmatmul.mubr.bf16.gmra.mrb[112].mxu1 %v4377_v45  ;;  %v4187_v45 = vcombine.low %v51_v33, %v55_v34  ;;  %v115_v33 = vld [vmem:[%s7828_s0 + $0x308] sm:$0xff] }
 0x122   :  { %2901 = vmatmul.mubr.bf16.gmra.mrb[112].mxu0 %v4381_v46  ;;  %2330 = vmatprep.mubr.bf16.mxu1 %v4386_v47  ;;  %v4191_v46 = vcombine.low %v53_v35, %v57_v36  ;;  %v4196_v47 = vcombine.high %v59_v41, %v63_v42  ;;  %v119_v34 = vld [vmem:[%s7828_s0 + $0x328] sm:$0xff]  ;;  %v117_v35 = vld [vmem:[%s7828_s0 + $0x318] sm:$0xff] }
 0x123   :  { %2908 = vmatprep.mubr.bf16.mxu0 %v4390_v48  ;;  %v4200_v48 = vcombine.high %v61_v43, %v65_v44  ;;  %v121_v36 = vld [vmem:[%s7828_s0 + $0x338] sm:$0xff] }
 0x129   :  { %2331 = vmatmul.mubr.bf16.gmra.mrb[116].mxu1 %v4385_v53  ;;  %v4195_v53 = vcombine.low %v59_v41, %v63_v42  ;;  %v123_v41 = vld [vmem:[%s7828_s0 + $0x348] sm:$0xff] }
 0x12a   :  { %2909 = vmatmul.mubr.bf16.gmra.mrb[116].mxu0 %v4389_v54  ;;  %2338 = vmatprep.mubr.bf16.mxu1 %v4394_v55  ;;  %v4199_v54 = vcombine.low %v61_v43, %v65_v44  ;;  %v4204_v55 = vcombine.high %v67_v49, %v71_v50  ;;  %v127_v42 = vld [vmem:[%s7828_s0 + $0x368] sm:$0xff]  ;;  %v125_v43 = vld [vmem:[%s7828_s0 + $0x358] sm:$0xff] }
 0x12b   :  { %2916 = vmatprep.mubr.bf16.mxu0 %v4398_v56  ;;  %v4208_v56 = vcombine.high %v69_v51, %v73_v52  ;;  %v129_v44 = vld [vmem:[%s7828_s0 + $0x378] sm:$0xff] }
 0x131   :  { %2339 = vmatmul.mubr.bf16.gmra.mrb[120].mxu1 %v4393_v60  ;;  %v4203_v60 = vcombine.low %v67_v49, %v71_v50  ;;  %v131_v49 = vld [vmem:[%s7828_s0 + $0x388] sm:$0xff] }
 0x132   :  { %2917 = vmatmul.mubr.bf16.gmra.mrb[120].mxu0 %v4397_v61  ;;  %2346 = vmatprep.mubr.bf16.mxu1 %v4402_v62  ;;  %v4207_v61 = vcombine.low %v69_v51, %v73_v52  ;;  %v4212_v62 = vcombine.high %v75_v57, %v79_v0  ;;  %v135_v50 = vld [vmem:[%s7828_s0 + $0x3a8] sm:$0xff]  ;;  %v133_v51 = vld [vmem:[%s7828_s0 + $0x398] sm:$0xff] }
 0x133   :  { %2924 = vmatprep.mubr.bf16.mxu0 %v4406_v63  ;;  %v4216_v63 = vcombine.high %v77_v58, %v81_v59  ;;  %v137_v52 = vld [vmem:[%s7828_s0 + $0x3b8] sm:$0xff] }
 0x139   :  { %2347 = vmatmul.mubr.bf16.gmra.mrb[124].mxu1 %v4401_v5  ;;  %v4211_v5 = vcombine.low %v75_v57, %v79_v0  ;;  %v139_v57 = vld [vmem:[%s7828_s0 + $0x3c8] sm:$0xff] }
 0x13a   :  { %2925 = vmatmul.mubr.bf16.gmra.mrb[124].mxu0 %v4405_v6  ;;  %2387 = vmatprep.mubr.bf16.mxu1 %v4156_v7  ;;  %v4215_v6 = vcombine.low %v77_v58, %v81_v59  ;;  %v4220_v7 = vcombine.high %v83_v1, %v87_v2  ;;  %v143_v0 = vld [vmem:[%s7828_s0 + $0x3e8] sm:$0xff]  ;;  %v141_v58 = vld [vmem:[%s7828_s0 + $0x3d8] sm:$0xff] }
 0x13b   :  { %2965 = vmatprep.mubr.bf16.mxu0 %v4160_v8  ;;  %v4224_v8 = vcombine.high %v85_v3, %v89_v4  ;;  %v145_v59 = vld [vmem:[%s7828_s0 + $0x3f8] sm:$0xff] }
 0x141   :  { %2388 = vmatmul.mubr.bf16.vlgmr.msra.gmra.mrb[0].mxu1 %v4155_v13  ;;  %v4219_v13 = vcombine.low %v83_v1, %v87_v2  ;;  %v147_v1 = vld [vmem:[%s7828_s0 + $0x408] sm:$0xff] }
 0x142   :  { %2966 = vmatmul.mubr.bf16.vlgmr.msra.gmra.mrb[0].mxu0 %v4159_v14  ;;  %2395 = vmatprep.mubr.bf16.mxu1 %v4164_v15  ;;  %v4223_v14 = vcombine.low %v85_v3, %v89_v4  ;;  %v4228_v15 = vcombine.high %v91_v9, %v95_v10  ;;  %v151_v2 = vld [vmem:[%s7828_s0 + $0x428] sm:$0xff]  ;;  %v149_v3 = vld [vmem:[%s7828_s0 + $0x418] sm:$0xff] }
 0x143   :  { %2973 = vmatprep.mubr.bf16.mxu0 %v4168_v16  ;;  %v4232_v16 = vcombine.high %v93_v11, %v97_v12  ;;  %v153_v4 = vld [vmem:[%s7828_s0 + $0x438] sm:$0xff] }
 0x149   :  { %2396 = vmatmul.mubr.bf16.gmra.mrb[4].mxu1 %v4163_v21  ;;  %v4227_v21 = vcombine.low %v91_v9, %v95_v10  ;;  %v155_v9 = vld [vmem:[%s7828_s0 + $0x448] sm:$0xff] }
 0x14a   :  { %2974 = vmatmul.mubr.bf16.gmra.mrb[4].mxu0 %v4167_v22  ;;  %2403 = vmatprep.mubr.bf16.mxu1 %v4172_v23  ;;  %v4231_v22 = vcombine.low %v93_v11, %v97_v12  ;;  %v4236_v23 = vcombine.high %v99_v17, %v103_v18  ;;  %v159_v10 = vld [vmem:[%s7828_s0 + $0x468] sm:$0xff]  ;;  %v157_v11 = vld [vmem:[%s7828_s0 + $0x458] sm:$0xff] }
 0x14b   :  { %2981 = vmatprep.mubr.bf16.mxu0 %v4176_v24  ;;  %v4240_v24 = vcombine.high %v101_v19, %v105_v20  ;;  %v161_v12 = vld [vmem:[%s7828_s0 + $0x478] sm:$0xff] }
 0x151   :  { %2404 = vmatmul.mubr.bf16.gmra.mrb[8].mxu1 %v4171_v29  ;;  %v4235_v29 = vcombine.low %v99_v17, %v103_v18  ;;  %v163_v17 = vld [vmem:[%s7828_s0 + $0x488] sm:$0xff] }
 0x152   :  { %2982 = vmatmul.mubr.bf16.gmra.mrb[8].mxu0 %v4175_v30  ;;  %2411 = vmatprep.mubr.bf16.mxu1 %v4180_v31  ;;  %v4239_v30 = vcombine.low %v101_v19, %v105_v20  ;;  %v4244_v31 = vcombine.high %v107_v25, %v111_v26  ;;  %v167_v18 = vld [vmem:[%s7828_s0 + $0x4a8] sm:$0xff]  ;;  %v165_v19 = vld [vmem:[%s7828_s0 + $0x498] sm:$0xff] }
 0x153   :  { %2989 = vmatprep.mubr.bf16.mxu0 %v4184_v32  ;;  %v4248_v32 = vcombine.high %v109_v27, %v113_v28  ;;  %v169_v20 = vld [vmem:[%s7828_s0 + $0x4b8] sm:$0xff] }
 0x159   :  { %2412 = vmatmul.mubr.bf16.gmra.mrb[12].mxu1 %v4179_v37  ;;  %v4243_v37 = vcombine.low %v107_v25, %v111_v26  ;;  %v171_v25 = vld [vmem:[%s7828_s0 + $0x4c8] sm:$0xff] }
 0x15a   :  { %2990 = vmatmul.mubr.bf16.gmra.mrb[12].mxu0 %v4183_v38  ;;  %2419 = vmatprep.mubr.bf16.mxu1 %v4188_v39  ;;  %v4247_v38 = vcombine.low %v109_v27, %v113_v28  ;;  %v4252_v39 = vcombine.high %v115_v33, %v119_v34  ;;  %v175_v26 = vld [vmem:[%s7828_s0 + $0x4e8] sm:$0xff]  ;;  %v173_v27 = vld [vmem:[%s7828_s0 + $0x4d8] sm:$0xff] }
 0x15b   :  { %2997 = vmatprep.mubr.bf16.mxu0 %v4192_v40  ;;  %v4256_v40 = vcombine.high %v117_v35, %v121_v36  ;;  %v177_v28 = vld [vmem:[%s7828_s0 + $0x4f8] sm:$0xff] }
 0x161   :  { %2420 = vmatmul.mubr.bf16.gmra.mrb[16].mxu1 %v4187_v45  ;;  %v4251_v45 = vcombine.low %v115_v33, %v119_v34  ;;  %v179_v33 = vld [vmem:[%s7828_s0 + $0x508] sm:$0xff] }
 0x162   :  { %2998 = vmatmul.mubr.bf16.gmra.mrb[16].mxu0 %v4191_v46  ;;  %2427 = vmatprep.mubr.bf16.mxu1 %v4196_v47  ;;  %v4255_v46 = vcombine.low %v117_v35, %v121_v36  ;;  %v4260_v47 = vcombine.high %v123_v41, %v127_v42  ;;  %v183_v34 = vld [vmem:[%s7828_s0 + $0x528] sm:$0xff]  ;;  %v181_v35 = vld [vmem:[%s7828_s0 + $0x518] sm:$0xff] }
 0x163   :  { %3005 = vmatprep.mubr.bf16.mxu0 %v4200_v48  ;;  %v4264_v48 = vcombine.high %v125_v43, %v129_v44  ;;  %v185_v36 = vld [vmem:[%s7828_s0 + $0x538] sm:$0xff] }
 0x169   :  { %2428 = vmatmul.mubr.bf16.gmra.mrb[20].mxu1 %v4195_v53  ;;  %v4259_v53 = vcombine.low %v123_v41, %v127_v42  ;;  %v187_v41 = vld [vmem:[%s7828_s0 + $0x548] sm:$0xff] }
 0x16a   :  { %3006 = vmatmul.mubr.bf16.gmra.mrb[20].mxu0 %v4199_v54  ;;  %2435 = vmatprep.mubr.bf16.mxu1 %v4204_v55  ;;  %v4263_v54 = vcombine.low %v125_v43, %v129_v44  ;;  %v4268_v55 = vcombine.high %v131_v49, %v135_v50  ;;  %v191_v42 = vld [vmem:[%s7828_s0 + $0x568] sm:$0xff]  ;;  %v189_v43 = vld [vmem:[%s7828_s0 + $0x558] sm:$0xff] }
 0x16b   :  { %3013 = vmatprep.mubr.bf16.mxu0 %v4208_v56  ;;  %v4272_v56 = vcombine.high %v133_v51, %v137_v52  ;;  %v193_v44 = vld [vmem:[%s7828_s0 + $0x578] sm:$0xff] }
 0x171   :  { %2436 = vmatmul.mubr.bf16.gmra.mrb[24].mxu1 %v4203_v60  ;;  %v4267_v60 = vcombine.low %v131_v49, %v135_v50  ;;  %v195_v49 = vld [vmem:[%s7828_s0 + $0x588] sm:$0xff] }
 0x172   :  { %3014 = vmatmul.mubr.bf16.gmra.mrb[24].mxu0 %v4207_v61  ;;  %2443 = vmatprep.mubr.bf16.mxu1 %v4212_v62  ;;  %v4271_v61 = vcombine.low %v133_v51, %v137_v52  ;;  %v4276_v62 = vcombine.high %v139_v57, %v143_v0  ;;  %v199_v50 = vld [vmem:[%s7828_s0 + $0x5a8] sm:$0xff]  ;;  %v197_v51 = vld [vmem:[%s7828_s0 + $0x598] sm:$0xff] }
 0x173   :  { %3021 = vmatprep.mubr.bf16.mxu0 %v4216_v63  ;;  %v4280_v63 = vcombine.high %v141_v58, %v145_v59  ;;  %v201_v52 = vld [vmem:[%s7828_s0 + $0x5b8] sm:$0xff] }
 0x179   :  { %2444 = vmatmul.mubr.bf16.gmra.mrb[28].mxu1 %v4211_v5  ;;  %v4275_v5 = vcombine.low %v139_v57, %v143_v0  ;;  %v203_v57 = vld [vmem:[%s7828_s0 + $0x5c8] sm:$0xff] }
 0x17a   :  { %3022 = vmatmul.mubr.bf16.gmra.mrb[28].mxu0 %v4215_v6  ;;  %2451 = vmatprep.mubr.bf16.mxu1 %v4220_v7  ;;  %v4279_v6 = vcombine.low %v141_v58, %v145_v59  ;;  %v4284_v7 = vcombine.high %v147_v1, %v151_v2  ;;  %v207_v0 = vld [vmem:[%s7828_s0 + $0x5e8] sm:$0xff]  ;;  %v205_v58 = vld [vmem:[%s7828_s0 + $0x5d8] sm:$0xff] }
 0x17b   :  { %3029 = vmatprep.mubr.bf16.mxu0 %v4224_v8  ;;  %v4288_v8 = vcombine.high %v149_v3, %v153_v4  ;;  %v209_v59 = vld [vmem:[%s7828_s0 + $0x5f8] sm:$0xff] }
 0x181   :  { %2452 = vmatmul.mubr.bf16.gmra.mrb[32].mxu1 %v4219_v13  ;;  %v4283_v13 = vcombine.low %v147_v1, %v151_v2  ;;  %v211_v1 = vld [vmem:[%s7828_s0 + $0x608] sm:$0xff] }
 0x182   :  { %3030 = vmatmul.mubr.bf16.gmra.mrb[32].mxu0 %v4223_v14  ;;  %2459 = vmatprep.mubr.bf16.mxu1 %v4228_v15  ;;  %v4287_v14 = vcombine.low %v149_v3, %v153_v4  ;;  %v4292_v15 = vcombine.high %v155_v9, %v159_v10  ;;  %v215_v2 = vld [vmem:[%s7828_s0 + $0x628] sm:$0xff]  ;;  %v213_v3 = vld [vmem:[%s7828_s0 + $0x618] sm:$0xff] }
 0x183   :  { %3037 = vmatprep.mubr.bf16.mxu0 %v4232_v16  ;;  %v4296_v16 = vcombine.high %v157_v11, %v161_v12  ;;  %v217_v4 = vld [vmem:[%s7828_s0 + $0x638] sm:$0xff] }
 0x189   :  { %2460 = vmatmul.mubr.bf16.gmra.mrb[36].mxu1 %v4227_v21  ;;  %v4291_v21 = vcombine.low %v155_v9, %v159_v10  ;;  %v219_v9 = vld [vmem:[%s7828_s0 + $0x648] sm:$0xff] }
 0x18a   :  { %3038 = vmatmul.mubr.bf16.gmra.mrb[36].mxu0 %v4231_v22  ;;  %2467 = vmatprep.mubr.bf16.mxu1 %v4236_v23  ;;  %v4295_v22 = vcombine.low %v157_v11, %v161_v12  ;;  %v4300_v23 = vcombine.high %v163_v17, %v167_v18  ;;  %v223_v10 = vld [vmem:[%s7828_s0 + $0x668] sm:$0xff]  ;;  %v221_v11 = vld [vmem:[%s7828_s0 + $0x658] sm:$0xff] }
 0x18b   :  { %3045 = vmatprep.mubr.bf16.mxu0 %v4240_v24  ;;  %v4304_v24 = vcombine.high %v165_v19, %v169_v20  ;;  %v225_v12 = vld [vmem:[%s7828_s0 + $0x678] sm:$0xff] }
 0x191   :  { %2468 = vmatmul.mubr.bf16.gmra.mrb[40].mxu1 %v4235_v29  ;;  %v4299_v29 = vcombine.low %v163_v17, %v167_v18  ;;  %v227_v17 = vld [vmem:[%s7828_s0 + $0x688] sm:$0xff] }
 0x192   :  { %3046 = vmatmul.mubr.bf16.gmra.mrb[40].mxu0 %v4239_v30  ;;  %2475 = vmatprep.mubr.bf16.mxu1 %v4244_v31  ;;  %v4303_v30 = vcombine.low %v165_v19, %v169_v20  ;;  %v4308_v31 = vcombine.high %v171_v25, %v175_v26  ;;  %v231_v18 = vld [vmem:[%s7828_s0 + $0x6a8] sm:$0xff]  ;;  %v229_v19 = vld [vmem:[%s7828_s0 + $0x698] sm:$0xff] }
 0x193   :  { %3053 = vmatprep.mubr.bf16.mxu0 %v4248_v32  ;;  %v4312_v32 = vcombine.high %v173_v27, %v177_v28  ;;  %v233_v20 = vld [vmem:[%s7828_s0 + $0x6b8] sm:$0xff] }
 0x199   :  { %2476 = vmatmul.mubr.bf16.gmra.mrb[44].mxu1 %v4243_v37  ;;  %v4307_v37 = vcombine.low %v171_v25, %v175_v26  ;;  %v235_v25 = vld [vmem:[%s7828_s0 + $0x6c8] sm:$0xff] }
 0x19a   :  { %3054 = vmatmul.mubr.bf16.gmra.mrb[44].mxu0 %v4247_v38  ;;  %2483 = vmatprep.mubr.bf16.mxu1 %v4252_v39  ;;  %v4311_v38 = vcombine.low %v173_v27, %v177_v28  ;;  %v4316_v39 = vcombine.high %v179_v33, %v183_v34  ;;  %v239_v26 = vld [vmem:[%s7828_s0 + $0x6e8] sm:$0xff]  ;;  %v237_v27 = vld [vmem:[%s7828_s0 + $0x6d8] sm:$0xff] }
 0x19b   :  { %3061 = vmatprep.mubr.bf16.mxu0 %v4256_v40  ;;  %v4320_v40 = vcombine.high %v181_v35, %v185_v36  ;;  %v241_v28 = vld [vmem:[%s7828_s0 + $0x6f8] sm:$0xff] }
 0x1a1   :  { %2484 = vmatmul.mubr.bf16.gmra.mrb[48].mxu1 %v4251_v45  ;;  %v4315_v45 = vcombine.low %v179_v33, %v183_v34  ;;  %v243_v33 = vld [vmem:[%s7828_s0 + $0x708] sm:$0xff] }
 0x1a2   :  { %3062 = vmatmul.mubr.bf16.gmra.mrb[48].mxu0 %v4255_v46  ;;  %2491 = vmatprep.mubr.bf16.mxu1 %v4260_v47  ;;  %v4319_v46 = vcombine.low %v181_v35, %v185_v36  ;;  %v4324_v47 = vcombine.high %v187_v41, %v191_v42  ;;  %v247_v34 = vld [vmem:[%s7828_s0 + $0x728] sm:$0xff]  ;;  %v245_v36 = vld [vmem:[%s7828_s0 + $0x718] sm:$0xff] }
 0x1a3   :  { %3069 = vmatprep.mubr.bf16.mxu0 %v4264_v48  ;;  %v4328_v48 = vcombine.high %v189_v43, %v193_v44 }
 0x1a9   :  { %2492 = vmatmul.mubr.bf16.gmra.mrb[52].mxu1 %v4259_v53  ;;  %v4323_v53 = vcombine.low %v187_v41, %v191_v42 }
 0x1aa   :  { %3070 = vmatmul.mubr.bf16.gmra.mrb[52].mxu0 %v4263_v54  ;;  %2499 = vmatprep.mubr.bf16.mxu1 %v4268_v55  ;;  %v4327_v54 = vcombine.low %v189_v43, %v193_v44  ;;  %v4332_v55 = vcombine.high %v195_v49, %v199_v50  ;;  %v4375_v44 = vcombine.low %v237_v27, %v241_v28 }
 0x1ab   :  { %3077 = vmatprep.mubr.bf16.mxu0 %v4272_v56  ;;  %v4336_v56 = vcombine.high %v197_v51, %v201_v52 }
 0x1b1   :  { %2500 = vmatmul.mubr.bf16.gmra.mrb[56].mxu1 %v4267_v60  ;;  %v4331_v60 = vcombine.low %v195_v49, %v199_v50 }
 0x1b2   :  { %3078 = vmatmul.mubr.bf16.gmra.mrb[56].mxu0 %v4271_v61  ;;  %2507 = vmatprep.mubr.bf16.mxu1 %v4276_v62  ;;  %v4335_v61 = vcombine.low %v197_v51, %v201_v52  ;;  %v4340_v62 = vcombine.high %v203_v57, %v207_v0  ;;  %v251_v51 = vld [vmem:[%s7828_s0 + $0x748] sm:$0xff] }
 0x1b3   :  { %3085 = vmatprep.mubr.bf16.mxu0 %v4280_v63  ;;  %v4344_v63 = vcombine.high %v205_v58, %v209_v59  ;;  %v255_v52 = vld [vmem:[%s7828_s0 + $0x768] sm:$0xff] }
 0x1b9   :  { %2508 = vmatmul.mubr.bf16.gmra.mrb[60].mxu1 %v4275_v5  ;;  %v4339_v5 = vcombine.low %v203_v57, %v207_v0  ;;  %v4379_v0 = vcombine.low %v243_v33, %v247_v34 }
 0x1ba   :  { %3086 = vmatmul.mubr.bf16.gmra.mrb[60].mxu0 %v4279_v6  ;;  %2515 = vmatprep.mubr.bf16.mxu1 %v4284_v7  ;;  %v4343_v6 = vcombine.low %v205_v58, %v209_v59  ;;  %v4348_v7 = vcombine.high %v211_v1, %v215_v2 }
 0x1bb   :  { %3093 = vmatprep.mubr.bf16.mxu0 %v4288_v8  ;;  %v4352_v8 = vcombine.high %v213_v3, %v217_v4 }
 0x1c1   :  { %2516 = vmatmul.mubr.bf16.gmra.mrb[64].mxu1 %v4283_v13  ;;  %v4347_v13 = vcombine.low %v211_v1, %v215_v2 }
 0x1c2   :  { %3094 = vmatmul.mubr.bf16.gmra.mrb[64].mxu0 %v4287_v14  ;;  %2523 = vmatprep.mubr.bf16.mxu1 %v4292_v15  ;;  %v4351_v14 = vcombine.low %v213_v3, %v217_v4  ;;  %v4356_v15 = vcombine.high %v219_v9, %v223_v10 }
 0x1c3   :  { %3101 = vmatprep.mubr.bf16.mxu0 %v4296_v16  ;;  %v4360_v16 = vcombine.high %v221_v11, %v225_v12 }
 0x1c9   :  { %2524 = vmatmul.mubr.bf16.gmra.mrb[68].mxu1 %v4291_v21  ;;  %v4355_v21 = vcombine.low %v219_v9, %v223_v10  ;;  %v265_v9 = vld [vmem:[%s7828_s0 + $0x7b8] sm:$0xff] }
 0x1ca   :  { %3102 = vmatmul.mubr.bf16.gmra.mrb[68].mxu0 %v4295_v22  ;;  %2531 = vmatprep.mubr.bf16.mxu1 %v4300_v23  ;;  %v4359_v22 = vcombine.low %v221_v11, %v225_v12  ;;  %v4364_v23 = vcombine.high %v227_v17, %v231_v18  ;;  %v4387_v12 = vcombine.low %v251_v51, %v255_v52 }
 0x1cb   :  { %3109 = vmatprep.mubr.bf16.mxu0 %v4304_v24  ;;  %v4368_v24 = vcombine.high %v229_v19, %v233_v20 }
 0x1d1   :  { %2532 = vmatmul.mubr.bf16.gmra.mrb[72].mxu1 %v4299_v29  ;;  %v4363_v29 = vcombine.low %v227_v17, %v231_v18 }
 0x1d2   :  { %3110 = vmatmul.mubr.bf16.gmra.mrb[72].mxu0 %v4303_v30  ;;  %2539 = vmatprep.mubr.bf16.mxu1 %v4308_v31  ;;  %v4367_v30 = vcombine.low %v229_v19, %v233_v20  ;;  %v4372_v31 = vcombine.high %v235_v25, %v239_v26 }
 0x1d3   :  { %3117 = vmatprep.mubr.bf16.mxu0 %v4312_v32  ;;  %v4376_v32 = vcombine.high %v237_v27, %v241_v28  ;;  %v273_v27 = vld [vmem:[%s7828_s0 + $0x7f8] sm:$0xff] }
 0x1d9   :  { %2540 = vmatmul.mubr.bf16.gmra.mrb[76].mxu1 %v4307_v37  ;;  %v249_v37 = vld [vmem:[%s7828_s0 + $0x738] sm:$0xff] }
 0x1da   :  { %3118 = vmatmul.mubr.bf16.gmra.mrb[76].mxu0 %v4311_v38  ;;  %2547 = vmatprep.mubr.bf16.mxu1 %v4316_v39 }
 0x1db   :  { %3125 = vmatprep.mubr.bf16.mxu0 %v4320_v40  ;;  %v4371_v40 = vcombine.low %v235_v25, %v239_v26  ;;  %v269_v26 = vld [vmem:[%s7828_s0 + $0x7d8] sm:$0xff] }
 0x1e1   :  { %2548 = vmatmul.mubr.bf16.gmra.mrb[80].mxu1 %v4315_v45  ;;  %v4380_v45 = vcombine.high %v243_v33, %v247_v34 }
 0x1e2   :  { %3126 = vmatmul.mubr.bf16.gmra.mrb[80].mxu0 %v4319_v46  ;;  %2555 = vmatprep.mubr.bf16.mxu1 %v4324_v47 }
 0x1e3   :  { %3133 = vmatprep.mubr.bf16.mxu0 %v4328_v48  ;;  %v4384_v48 = vcombine.high %v245_v36, %v249_v37 }
 0x1e9   :  { %2556 = vmatmul.mubr.bf16.gmra.mrb[84].mxu1 %v4323_v53 }
 0x1ea   :  { %3134 = vmatmul.mubr.bf16.gmra.mrb[84].mxu0 %v4327_v54  ;;  %2563 = vmatprep.mubr.bf16.mxu1 %v4332_v55  ;;  %v253_v54 = vld [vmem:[%s7828_s0 + $0x758] sm:$0xff] }
 0x1eb   :  { %3141 = vmatprep.mubr.bf16.mxu0 %v4336_v56  ;;  %v257_v55 = vld [vmem:[%s7828_s0 + $0x778] sm:$0xff] }
 0x1ec   :  { %v4392_v2 = vcombine.high %v253_v54, %v257_v55 }
 0x1f1   :  { %2564 = vmatmul.mubr.bf16.gmra.mrb[88].mxu1 %v4331_v60 }
 0x1f2   :  { %3142 = vmatmul.mubr.bf16.gmra.mrb[88].mxu0 %v4335_v61  ;;  %2571 = vmatprep.mubr.bf16.mxu1 %v4340_v62  ;;  %v4383_v61 = vcombine.low %v245_v36, %v249_v37  ;;  %v4388_v62 = vcombine.high %v251_v51, %v255_v52 }
 0x1f3   :  { %3149 = vmatprep.mubr.bf16.mxu0 %v4344_v63 }
 0x1f9   :  { %2572 = vmatmul.mubr.bf16.gmra.mrb[92].mxu1 %v4339_v5  ;;  %v259_v5 = vld [vmem:[%s7828_s0 + $0x788] sm:$0xff] }
 0x1fa   :  { %3150 = vmatmul.mubr.bf16.gmra.mrb[92].mxu0 %v4343_v6  ;;  %2579 = vmatprep.mubr.bf16.mxu1 %v4348_v7  ;;  %v263_v6 = vld [vmem:[%s7828_s0 + $0x7a8] sm:$0xff] }
 0x1fb   :  { %3157 = vmatprep.mubr.bf16.mxu0 %v4352_v8  ;;  %v261_v8 = vld [vmem:[%s7828_s0 + $0x798] sm:$0xff]  ;;  %v4396_v17 = vcombine.high %v259_v5, %v263_v6 }
 0x1fc   :  { %v4400_v20 = vcombine.high %v261_v8, %v265_v9  ;;  %v4399_v34 = vcombine.low %v261_v8, %v265_v9 }
 0x201   :  { %2580 = vmatmul.mubr.bf16.gmra.mrb[96].mxu1 %v4347_v13 }
 0x202   :  { %3158 = vmatmul.mubr.bf16.gmra.mrb[96].mxu0 %v4351_v14  ;;  %2587 = vmatprep.mubr.bf16.mxu1 %v4356_v15 }
 0x203   :  { %3165 = vmatprep.mubr.bf16.mxu0 %v4360_v16  ;;  %v4391_v16 = vcombine.low %v253_v54, %v257_v55 }
 0x209   :  { %2588 = vmatmul.mubr.bf16.gmra.mrb[100].mxu1 %v4355_v21 }
 0x20a   :  { %3166 = vmatmul.mubr.bf16.gmra.mrb[100].mxu0 %v4359_v22  ;;  %2595 = vmatprep.mubr.bf16.mxu1 %v4364_v23  ;;  %v267_v23 = vld [vmem:[%s7828_s0 + $0x7c8] sm:$0xff] }
 0x20b   :  { %3173 = vmatprep.mubr.bf16.mxu0 %v4368_v24  ;;  %v271_v24 = vld [vmem:[%s7828_s0 + $0x7e8] sm:$0xff] }
 0x211   :  { %2596 = vmatmul.mubr.bf16.gmra.mrb[104].mxu1 %v4363_v29 }
 0x212   :  { %3174 = vmatmul.mubr.bf16.gmra.mrb[104].mxu0 %v4367_v30  ;;  %2603 = vmatprep.mubr.bf16.mxu1 %v4372_v31  ;;  %v4395_v30 = vcombine.low %v259_v5, %v263_v6 }
 0x213   :  { %3181 = vmatprep.mubr.bf16.mxu0 %v4376_v32 }
 0x214   :  { %v2389_v35 = vpop.f32.mrb[0].mxu1 }
 0x215   :  { %v2967_v38 = vpop.f32.mrb[0].mxu0  ;;  %v2391_v39 = vpop.f32.mrb[1].mxu1 }
 0x216   :  { %v6209_v41 = vadd.f32 %v2967_v38, %v2389_v35  ;;  %v2969_v42 = vpop.f32.mrb[1].mxu0  ;;  %v2392_v43 = vpop.f32.mrb[2].mxu1  ;;  %v4404_v35 = vcombine.high %v267_v23, %v271_v24  ;;  %v4408_v38 = vcombine.high %v269_v26, %v273_v27 }
 0x217   :  { %v2970_v46 = vpop.f32.mrb[2].mxu0  ;;  %v2394_v47 = vpop.f32.mrb[3].mxu1 }
 0x218   :  { %v6211_v49 = vadd.f32 %v2970_v46, %v2392_v43  ;;  %v2972_v50 = vpop.f32.mrb[3].mxu0 }
 0x219   :  { %2604 = vmatmul.mubr.bf16.gmra.mrb[108].mxu1 %v4371_v40  ;;  %v4407_v50 = vcombine.low %v269_v26, %v273_v27 }
 0x21a   :  { %3182 = vmatmul.mubr.bf16.gmra.mrb[108].mxu0 %v4375_v44  ;;  %2611 = vmatprep.mubr.bf16.mxu1 %v4380_v45  ;;  %v4403_v45 = vcombine.low %v267_v23, %v271_v24 }
 0x21b   :  { %3189 = vmatprep.mubr.bf16.mxu0 %v4384_v48 }
 0x21c   :  { %v2397_v53 = vpop.f32.mrb[4].mxu1 }
 0x21d   :  { %v2975_v56 = vpop.f32.mrb[4].mxu0  ;;  %v2399_v57 = vpop.f32.mrb[5].mxu1 }
 0x21e   :  { %v6225_v58 = vadd.f32 %v2975_v56, %v2397_v53  ;;  %v2977_v59 = vpop.f32.mrb[5].mxu0  ;;  %v2400_v60 = vpop.f32.mrb[6].mxu1 }
 0x21f   :  { %v2978_v63 = vpop.f32.mrb[6].mxu0  ;;  %v2402_v1 = vpop.f32.mrb[7].mxu1 }
 0x220   :  { %v6227_v3 = vadd.f32 %v2978_v63, %v2400_v60  ;;  %v2980_v4 = vpop.f32.mrb[7].mxu0 }
 0x221   :  { %2612 = vmatmul.mubr.bf16.gmra.mrb[112].mxu1 %v4379_v0 }
 0x222   :  { %7910 = vst [vmem:[#allocation2_spill] sm:$0xff] %v6227_v3  ;;  %3190 = vmatmul.mubr.bf16.gmra.mrb[112].mxu0 %v4383_v61  ;;  %2619 = vmatprep.mubr.bf16.mxu1 %v4388_v62 }
 0x223   :  { %3197 = vmatprep.mubr.bf16.mxu0 %v4392_v2 }
 0x224   :  { %v2405_v7 = vpop.f32.mrb[8].mxu1 }
 0x225   :  { %v2983_v10 = vpop.f32.mrb[8].mxu0  ;;  %v2407_v11 = vpop.f32.mrb[9].mxu1 }
 0x226   :  { %v6241_v13 = vadd.f32 %v2983_v10, %v2405_v7  ;;  %v2985_v14 = vpop.f32.mrb[9].mxu0  ;;  %v2408_v15 = vpop.f32.mrb[10].mxu1 }
 0x227   :  { %v2986_v18 = vpop.f32.mrb[10].mxu0  ;;  %v2410_v19 = vpop.f32.mrb[11].mxu1 }
 0x228   :  { %7911 = vst [vmem:[#allocation3_spill] sm:$0xff] %v6241_v13  ;;  %v6243_v21 = vadd.f32 %v2986_v18, %v2408_v15  ;;  %v2988_v22 = vpop.f32.mrb[11].mxu0 }
 0x229   :  { %2620 = vmatmul.mubr.bf16.gmra.mrb[116].mxu1 %v4387_v12 }
 0x22a   :  { %3198 = vmatmul.mubr.bf16.gmra.mrb[116].mxu0 %v4391_v16  ;;  %2627 = vmatprep.mubr.bf16.mxu1 %v4396_v17 }
 0x22b   :  { %3205 = vmatprep.mubr.bf16.mxu0 %v4400_v20 }
 0x22c   :  { %v2413_v25 = vpop.f32.mrb[12].mxu1 }
 0x22d   :  { %v2991_v28 = vpop.f32.mrb[12].mxu0  ;;  %v2415_v29 = vpop.f32.mrb[13].mxu1 }
 0x22e   :  { %v6257_v31 = vadd.f32 %v2991_v28, %v2413_v25  ;;  %v2993_v32 = vpop.f32.mrb[13].mxu0  ;;  %v2416_v33 = vpop.f32.mrb[14].mxu1 }
 0x22f   :  { %v2994_v36 = vpop.f32.mrb[14].mxu0  ;;  %v2418_v37 = vpop.f32.mrb[15].mxu1 }
 0x230   :  { %v6259_v39 = vadd.f32 %v2994_v36, %v2416_v33  ;;  %v2996_v40 = vpop.f32.mrb[15].mxu0 }
 0x231   :  { %2628 = vmatmul.mubr.bf16.gmra.mrb[120].mxu1 %v4395_v30 }
 0x232   :  { %3206 = vmatmul.mubr.bf16.gmra.mrb[120].mxu0 %v4399_v34  ;;  %2635 = vmatprep.mubr.bf16.mxu1 %v4404_v35 }
 0x233   :  { %3213 = vmatprep.mubr.bf16.mxu0 %v4408_v38 }
 0x234   :  { %v2421_v42 = vpop.f32.mrb[16].mxu1 }
 0x235   :  { %v2999_v43 = vpop.f32.mrb[16].mxu0  ;;  %v2423_v44 = vpop.f32.mrb[17].mxu1 }
 0x236   :  { %v6261_v46 = vadd.f32 %v2999_v43, %v2421_v42  ;;  %v3001_v47 = vpop.f32.mrb[17].mxu0  ;;  %v2424_v48 = vpop.f32.mrb[18].mxu1 }
 0x237   :  { %v3002_v51 = vpop.f32.mrb[18].mxu0  ;;  %v2426_v52 = vpop.f32.mrb[19].mxu1  ;;  %v3222_v47 = vadd.f32 %v6211_v49, %v6209_v41 }
 0x238   :  { %v6263_v53 = vadd.f32 %v3002_v51, %v2424_v48  ;;  %v3004_v54 = vpop.f32.mrb[19].mxu0 }
 0x239   :  { %2636 = vmatmul.mubr.bf16.gmra.mrb[124].mxu1 %v4403_v45  ;;  %v3223_v51 = vadd.f32 %v6225_v58, %v3222_v47 }
 0x23a   :  { %3214 = vmatmul.mubr.bf16.gmra.mrb[124].mxu0 %v4407_v50 }
 0x23c   :  { %v2429_v55 = vpop.f32.mrb[20].mxu1 }
 0x23d   :  { %v3007_v56 = vpop.f32.mrb[20].mxu0  ;;  %v2431_v57 = vpop.f32.mrb[21].mxu1 }
 0x23e   :  { %v6265_v0 = vadd.f32 %v3007_v56, %v2429_v55  ;;  %v3009_v59 = vpop.f32.mrb[21].mxu0  ;;  %v2432_v60 = vpop.f32.mrb[22].mxu1  ;;  %v3224_v56 = vadd.f32 %v6227_v3, %v3223_v51 }
 0x23f   :  { %v3010_v61 = vpop.f32.mrb[22].mxu0  ;;  %v2434_v62 = vpop.f32.mrb[23].mxu1 }
 0x240   :  { %v6267_v63 = vadd.f32 %v3010_v61, %v2432_v60  ;;  %v3012_v1 = vpop.f32.mrb[23].mxu0 }
 0x241   :  { %v3225_v1 = vadd.f32 %v6241_v13, %v3224_v56 }
 0x244   :  { %v2437_v2 = vpop.f32.mrb[24].mxu1 }
 0x245   :  { %v3015_v4 = vpop.f32.mrb[24].mxu0  ;;  %v2439_v5 = vpop.f32.mrb[25].mxu1 }
 0x246   :  { %v6269_v6 = vadd.f32 %v3015_v4, %v2437_v2  ;;  %v3017_v7 = vpop.f32.mrb[25].mxu0  ;;  %v2440_v8 = vpop.f32.mrb[26].mxu1  ;;  %v3226_v5 = vadd.f32 %v6243_v21, %v3225_v1 }
 0x247   :  { %v3018_v9 = vpop.f32.mrb[26].mxu0  ;;  %v2442_v10 = vpop.f32.mrb[27].mxu1 }
 0x248   :  { %v6271_v11 = vadd.f32 %v3018_v9, %v2440_v8  ;;  %v3020_v12 = vpop.f32.mrb[27].mxu0  ;;  %v3227_v10 = vadd.f32 %v6257_v31, %v3226_v5 }
 0x24c   :  { %v2445_v14 = vpop.f32.mrb[28].mxu1 }
 0x24d   :  { %v3023_v15 = vpop.f32.mrb[28].mxu0  ;;  %v2447_v16 = vpop.f32.mrb[29].mxu1 }
 0x24e   :  { %v6273_v17 = vadd.f32 %v3023_v15, %v2445_v14  ;;  %v3025_v18 = vpop.f32.mrb[29].mxu0  ;;  %v2448_v19 = vpop.f32.mrb[30].mxu1 }
 0x24f   :  { %v3026_v20 = vpop.f32.mrb[30].mxu0  ;;  %v2450_v22 = vpop.f32.mrb[31].mxu1 }
 0x250   :  { %v6275_v23 = vadd.f32 %v3026_v20, %v2448_v19  ;;  %v3028_v24 = vpop.f32.mrb[31].mxu0  ;;  %v3228_v22 = vadd.f32 %v6259_v39, %v3227_v10 }
 0x252   :  { %v3229_v24 = vadd.f32 %v6261_v46, %v3228_v22 }
 0x254   :  { %v2453_v25 = vpop.f32.mrb[32].mxu1 }
 0x255   :  { %v3031_v26 = vpop.f32.mrb[32].mxu0  ;;  %v2455_v27 = vpop.f32.mrb[33].mxu1 }
 0x256   :  { %v6277_v28 = vadd.f32 %v3031_v26, %v2453_v25  ;;  %v3033_v29 = vpop.f32.mrb[33].mxu0  ;;  %v2456_v30 = vpop.f32.mrb[34].mxu1 }
 0x257   :  { %v3034_v32 = vpop.f32.mrb[34].mxu0  ;;  %v2458_v33 = vpop.f32.mrb[35].mxu1 }
 0x258   :  { %v6279_v34 = vadd.f32 %v3034_v32, %v2456_v30  ;;  %v3036_v35 = vpop.f32.mrb[35].mxu0 }
 0x25c   :  { %v2461_v36 = vpop.f32.mrb[36].mxu1 }
 0x25d   :  { %v3039_v37 = vpop.f32.mrb[36].mxu0  ;;  %v2463_v38 = vpop.f32.mrb[37].mxu1 }
 0x25e   :  { %v6281_v40 = vadd.f32 %v3039_v37, %v2461_v36  ;;  %v3041_v42 = vpop.f32.mrb[37].mxu0  ;;  %v2464_v43 = vpop.f32.mrb[38].mxu1  ;;  %v3230_v36 = vadd.f32 %v6263_v53, %v3229_v24 }
 0x25f   :  { %v3042_v44 = vpop.f32.mrb[38].mxu0  ;;  %v2466_v45 = vpop.f32.mrb[39].mxu1 }
 0x260   :  { %v6285_v48 = vadd.f32 %v3042_v44, %v2464_v43  ;;  %v3044_v50 = vpop.f32.mrb[39].mxu0  ;;  %v3231_v42 = vadd.f32 %v6265_v0, %v3230_v36 }
 0x262   :  { %v3232_v47 = vadd.f32 %v6267_v63, %v3231_v42 }
 0x264   :  { %v2469_v52 = vpop.f32.mrb[40].mxu1  ;;  %v3233_v56 = vadd.f32 %v6269_v6, %v3232_v47 }
 0x265   :  { %v3047_v54 = vpop.f32.mrb[40].mxu0  ;;  %v2471_v55 = vpop.f32.mrb[41].mxu1 }
 0x266   :  { %v6289_v57 = vadd.f32 %v3047_v54, %v2469_v52  ;;  %v3049_v59 = vpop.f32.mrb[41].mxu0  ;;  %v2472_v60 = vpop.f32.mrb[42].mxu1 }
 0x267   :  { %v3050_v61 = vpop.f32.mrb[42].mxu0  ;;  %v2474_v62 = vpop.f32.mrb[43].mxu1 }
 0x268   :  { %v6292_v2 = vadd.f32 %v3050_v61, %v2472_v60  ;;  %v3052_v4 = vpop.f32.mrb[43].mxu0  ;;  %v3234_v61 = vadd.f32 %v6271_v11, %v3233_v56 }
 0x26a   :  { %v3235_v5 = vadd.f32 %v6273_v17, %v3234_v61 }
 0x26c   :  { %v2477_v7 = vpop.f32.mrb[44].mxu1 }
 0x26d   :  { %v3055_v8 = vpop.f32.mrb[44].mxu0  ;;  %v2479_v9 = vpop.f32.mrb[45].mxu1 }
 0x26e   :  { %v6296_v12 = vadd.f32 %v3055_v8, %v2477_v7  ;;  %v3057_v14 = vpop.f32.mrb[45].mxu0  ;;  %v2480_v15 = vpop.f32.mrb[46].mxu1 }
 0x26f   :  { %v3058_v16 = vpop.f32.mrb[46].mxu0  ;;  %v2482_v18 = vpop.f32.mrb[47].mxu1 }
 0x270   :  { %v6298_v19 = vadd.f32 %v3058_v16, %v2480_v15  ;;  %v3060_v20 = vpop.f32.mrb[47].mxu0  ;;  %v3236_v18 = vadd.f32 %v6275_v23, %v3235_v5 }
 0x272   :  { %v3237_v20 = vadd.f32 %v6277_v28, %v3236_v18 }
 0x274   :  { %v2485_v25 = vpop.f32.mrb[48].mxu1 }
 0x275   :  { %v3063_v26 = vpop.f32.mrb[48].mxu0  ;;  %v2487_v27 = vpop.f32.mrb[49].mxu1 }
 0x276   :  { %v6302_v29 = vadd.f32 %v3063_v26, %v2485_v25  ;;  %v3065_v30 = vpop.f32.mrb[49].mxu0  ;;  %v2488_v32 = vpop.f32.mrb[50].mxu1 }
 0x277   :  { %v3066_v33 = vpop.f32.mrb[50].mxu0  ;;  %v2490_v35 = vpop.f32.mrb[51].mxu1 }
 0x278   :  { %v6305_v37 = vadd.f32 %v3066_v33, %v2488_v32  ;;  %v3068_v38 = vpop.f32.mrb[51].mxu0  ;;  %v3238_v35 = vadd.f32 %v6279_v34, %v3237_v20 }
 0x27a   :  { %v3239_v42 = vadd.f32 %v6281_v40, %v3238_v35 }
 0x27c   :  { %v2493_v43 = vpop.f32.mrb[52].mxu1  ;;  %v3240_v47 = vadd.f32 %v6285_v48, %v3239_v42 }
 0x27d   :  { %v3071_v44 = vpop.f32.mrb[52].mxu0  ;;  %v2495_v45 = vpop.f32.mrb[53].mxu1 }
 0x27e   :  { %v6309_v50 = vadd.f32 %v3071_v44, %v2493_v43  ;;  %v3073_v51 = vpop.f32.mrb[53].mxu0  ;;  %v2496_v52 = vpop.f32.mrb[54].mxu1 }
 0x27f   :  { %v3074_v54 = vpop.f32.mrb[54].mxu0  ;;  %v2498_v55 = vpop.f32.mrb[55].mxu1 }
 0x280   :  { %v6312_v59 = vadd.f32 %v3074_v54, %v2496_v52  ;;  %v3076_v60 = vpop.f32.mrb[55].mxu0 }
 0x281   :  { %v3241_v60 = vadd.f32 %v6289_v57, %v3240_v47 }
 0x284   :  { %v2501_v62 = vpop.f32.mrb[56].mxu1 }
 0x285   :  { %v3079_v1 = vpop.f32.mrb[56].mxu0  ;;  %v2503_v4 = vpop.f32.mrb[57].mxu1 }
 0x286   :  { %v6316_v7 = vadd.f32 %v3079_v1, %v2501_v62  ;;  %v3081_v8 = vpop.f32.mrb[57].mxu0  ;;  %v2504_v9 = vpop.f32.mrb[58].mxu1  ;;  %v3242_v1 = vadd.f32 %v6292_v2, %v3241_v60 }
 0x287   :  { %v3082_v10 = vpop.f32.mrb[58].mxu0  ;;  %v2506_v14 = vpop.f32.mrb[59].mxu1 }
 0x288   :  { %v6318_v15 = vadd.f32 %v3082_v10, %v2504_v9  ;;  %v3084_v16 = vpop.f32.mrb[59].mxu0  ;;  %v3243_v9 = vadd.f32 %v6296_v12, %v3242_v1 }
 0x28c   :  { %v2509_v22 = vpop.f32.mrb[60].mxu1 }
 0x28d   :  { %v3087_v24 = vpop.f32.mrb[60].mxu0  ;;  %v2511_v25 = vpop.f32.mrb[61].mxu1 }
 0x28e   :  { %v6322_v26 = vadd.f32 %v3087_v24, %v2509_v22  ;;  %v3089_v27 = vpop.f32.mrb[61].mxu0  ;;  %v2512_v30 = vpop.f32.mrb[62].mxu1  ;;  %v3244_v25 = vadd.f32 %v6298_v19, %v3243_v9 }
 0x28f   :  { %v3090_v32 = vpop.f32.mrb[62].mxu0  ;;  %v2514_v33 = vpop.f32.mrb[63].mxu1 }
 0x290   :  { %v6325_v36 = vadd.f32 %v3090_v32, %v2512_v30  ;;  %v3092_v38 = vpop.f32.mrb[63].mxu0  ;;  %v3245_v27 = vadd.f32 %v6302_v29, %v3244_v25 }
 0x294   :  { %v2517_v43 = vpop.f32.mrb[64].mxu1 }
 0x295   :  { %v3095_v44 = vpop.f32.mrb[64].mxu0  ;;  %v2519_v45 = vpop.f32.mrb[65].mxu1 }
 0x296   :  { %v6329_v51 = vadd.f32 %v3095_v44, %v2517_v43  ;;  %v3097_v52 = vpop.f32.mrb[65].mxu0  ;;  %v2520_v54 = vpop.f32.mrb[66].mxu1  ;;  %v3246_v45 = vadd.f32 %v6305_v37, %v3245_v27 }
 0x297   :  { %v3098_v55 = vpop.f32.mrb[66].mxu0  ;;  %v2522_v56 = vpop.f32.mrb[67].mxu1 }
 0x298   :  { %v6332_v61 = vadd.f32 %v3098_v55, %v2520_v54  ;;  %v3100_v62 = vpop.f32.mrb[67].mxu0  ;;  %v3247_v54 = vadd.f32 %v6309_v50, %v3246_v45 }
 0x29a   :  { %v3248_v62 = vadd.f32 %v6312_v59, %v3247_v54 }
 0x29c   :  { %v2525_v4 = vpop.f32.mrb[68].mxu1 }
 0x29d   :  { %v3103_v5 = vpop.f32.mrb[68].mxu0  ;;  %v2527_v8 = vpop.f32.mrb[69].mxu1 }
 0x29e   :  { %v6336_v10 = vadd.f32 %v3103_v5, %v2525_v4  ;;  %v3105_v14 = vpop.f32.mrb[69].mxu0  ;;  %v2528_v16 = vpop.f32.mrb[70].mxu1 }
 0x29f   :  { %v3106_v18 = vpop.f32.mrb[70].mxu0  ;;  %v2530_v20 = vpop.f32.mrb[71].mxu1  ;;  %v3249_v14 = vadd.f32 %v6316_v7, %v3248_v62 }
 0x2a0   :  { %7912 = vst [vmem:[#allocation4_spill] sm:$0xff] %v6336_v10  ;;  %v6338_v22 = vadd.f32 %v3106_v18, %v2528_v16  ;;  %v3108_v24 = vpop.f32.mrb[71].mxu0 }
 0x2a1   :  { %v3250_v20 = vadd.f32 %v6318_v15, %v3249_v14 }
 0x2a2   :  { %7913 = vst [vmem:[#allocation5_spill] sm:$0xff] %v6338_v22 }
 0x2a4   :  { %v2533_v30 = vpop.f32.mrb[72].mxu1 }
 0x2a5   :  { %v3111_v32 = vpop.f32.mrb[72].mxu0  ;;  %v2535_v33 = vpop.f32.mrb[73].mxu1 }
 0x2a6   :  { %v6342_v35 = vadd.f32 %v3111_v32, %v2533_v30  ;;  %v3113_v38 = vpop.f32.mrb[73].mxu0  ;;  %v2536_v42 = vpop.f32.mrb[74].mxu1  ;;  %v3251_v30 = vadd.f32 %v6322_v26, %v3250_v20 }
 0x2a7   :  { %v3114_v43 = vpop.f32.mrb[74].mxu0  ;;  %v2538_v44 = vpop.f32.mrb[75].mxu1 }
 0x2a8   :  { %7914 = vst [vmem:[#allocation6_spill] sm:$0xff] %v6342_v35  ;;  %v6345_v47 = vadd.f32 %v3114_v43, %v2536_v42  ;;  %v3116_v52 = vpop.f32.mrb[75].mxu0 }
 0x2a9   :  { %v3252_v52 = vadd.f32 %v6325_v36, %v3251_v30 }
 0x2ab   :  { %v3253_v54 = vadd.f32 %v6329_v51, %v3252_v52 }
 0x2ac   :  { %v2541_v55 = vpop.f32.mrb[76].mxu1 }
 0x2ad   :  { %v3119_v56 = vpop.f32.mrb[76].mxu0  ;;  %v2543_v60 = vpop.f32.mrb[77].mxu1  ;;  %v3254_v14 = vadd.f32 %v6332_v61, %v3253_v54 }
 0x2ae   :  { %v6349_v1 = vadd.f32 %v3119_v56, %v2541_v55  ;;  %v3121_v4 = vpop.f32.mrb[77].mxu0  ;;  %v2544_v5 = vpop.f32.mrb[78].mxu1 }
 0x2af   :  { %v3122_v8 = vpop.f32.mrb[78].mxu0  ;;  %v2546_v9 = vpop.f32.mrb[79].mxu1 }
 0x2b0   :  { %7915 = vst [vmem:[#allocation7_spill] sm:$0xff] %v6349_v1  ;;  %v6352_v16 = vadd.f32 %v3122_v8, %v2544_v5  ;;  %v3124_v18 = vpop.f32.mrb[79].mxu0 }
 0x2b2   :  { %7916 = vst [vmem:[#allocation8_spill] sm:$0xff] %v6352_v16 }
 0x2b4   :  { %v2549_v24 = vpop.f32.mrb[80].mxu1 }
 0x2b5   :  { %v3127_v25 = vpop.f32.mrb[80].mxu0  ;;  %v2551_v27 = vpop.f32.mrb[81].mxu1 }
 0x2b6   :  { %v6356_v32 = vadd.f32 %v3127_v25, %v2549_v24  ;;  %v3129_v33 = vpop.f32.mrb[81].mxu0  ;;  %v2552_v38 = vpop.f32.mrb[82].mxu1  ;;  %v3255_v24 = vadd.f32 %v6336_v10, %v3254_v14 }
 0x2b7   :  { %v3130_v42 = vpop.f32.mrb[82].mxu0  ;;  %v2554_v43 = vpop.f32.mrb[83].mxu1 }
 0x2b8   :  { %7917 = vst [vmem:[#allocation9_spill] sm:$0xff] %v6356_v32  ;;  %v6358_v44 = vadd.f32 %v3130_v42, %v2552_v38  ;;  %v3132_v45 = vpop.f32.mrb[83].mxu0  ;;  %v3256_v33 = vadd.f32 %v6338_v22, %v3255_v24 }
 0x2ba   :  { %7918 = vst [vmem:[#allocation10_spill] sm:$0xff] %v6358_v44 }
 0x2bc   :  { %v2557_v55 = vpop.f32.mrb[84].mxu1 }
 0x2bd   :  { %v3135_v56 = vpop.f32.mrb[84].mxu0  ;;  %v2559_v60 = vpop.f32.mrb[85].mxu1 }
 0x2be   :  { %v6362_v62 = vadd.f32 %v3135_v56, %v2557_v55  ;;  %v3137_v4 = vpop.f32.mrb[85].mxu0  ;;  %v2560_v5 = vpop.f32.mrb[86].mxu1  ;;  %v3257_v55 = vadd.f32 %v6342_v35, %v3256_v33 }
 0x2bf   :  { %v3138_v8 = vpop.f32.mrb[86].mxu0  ;;  %v2562_v9 = vpop.f32.mrb[87].mxu1 }
 0x2c0   :  { %7919 = vst [vmem:[#allocation11_spill] sm:$0xff] %v6362_v62  ;;  %v6365_v18 = vadd.f32 %v3138_v8, %v2560_v5  ;;  %v3140_v20 = vpop.f32.mrb[87].mxu0  ;;  %v3258_v60 = vadd.f32 %v6345_v47, %v3257_v55 }
 0x2c2   :  { %7920 = vst [vmem:[#allocation12_spill] sm:$0xff] %v6365_v18  ;;  %v3259_v9 = vadd.f32 %v6349_v1, %v3258_v60 }
 0x2c4   :  { %v2565_v25 = vpop.f32.mrb[88].mxu1  ;;  %v3260_v33 = vadd.f32 %v6352_v16, %v3259_v9 }
 0x2c5   :  { %v3143_v27 = vpop.f32.mrb[88].mxu0  ;;  %v2567_v30 = vpop.f32.mrb[89].mxu1 }
 0x2c6   :  { %v6369_v38 = vadd.f32 %v3143_v27, %v2565_v25  ;;  %v3145_v42 = vpop.f32.mrb[89].mxu0  ;;  %v2568_v43 = vpop.f32.mrb[90].mxu1 }
 0x2c7   :  { %v3146_v45 = vpop.f32.mrb[90].mxu0  ;;  %v2570_v52 = vpop.f32.mrb[91].mxu1 }
 0x2c8   :  { %7921 = vst [vmem:[#allocation13_spill] sm:$0xff] %v6369_v38  ;;  %v6372_v56 = vadd.f32 %v3146_v45, %v2568_v43  ;;  %v3148_v54 = vpop.f32.mrb[91].mxu0  ;;  %v3261_v43 = vadd.f32 %v6356_v32, %v3260_v33 }
 0x2ca   :  { %7922 = vst [vmem:[#allocation14_spill] sm:$0xff] %v6372_v56 }
 0x2cc   :  { %v2573_v4 = vpop.f32.mrb[92].mxu1 }
 0x2cd   :  { %v3151_v5 = vpop.f32.mrb[92].mxu0  ;;  %v2575_v8 = vpop.f32.mrb[93].mxu1 }
 0x2ce   :  { %v6376_v14 = vadd.f32 %v3151_v5, %v2573_v4  ;;  %v3153_v20 = vpop.f32.mrb[93].mxu0  ;;  %v2576_v24 = vpop.f32.mrb[94].mxu1 }
 0x2cf   :  { %v3154_v25 = vpop.f32.mrb[94].mxu0  ;;  %v2578_v27 = vpop.f32.mrb[95].mxu1  ;;  %v3262_v20 = vadd.f32 %v6358_v44, %v3261_v43 }
 0x2d0   :  { %7923 = vst [vmem:[#allocation15_spill] sm:$0xff] %v6376_v14  ;;  %v6378_v30 = vadd.f32 %v3154_v25, %v2576_v24  ;;  %v3156_v42 = vpop.f32.mrb[95].mxu0 }
 0x2d1   :  { %v3263_v25 = vadd.f32 %v6362_v62, %v3262_v20 }
 0x2d2   :  { %7924 = vst [vmem:[#allocation16_spill] sm:$0xff] %v6378_v30 }
 0x2d3   :  { %v3264_v33 = vadd.f32 %v6365_v18, %v3263_v25 }
 0x2d4   :  { %v2581_v45 = vpop.f32.mrb[96].mxu1 }
 0x2d5   :  { %v3159_v52 = vpop.f32.mrb[96].mxu0  ;;  %v2583_v55 = vpop.f32.mrb[97].mxu1 }
 0x2d6   :  { %v6382_v54 = vadd.f32 %v3159_v52, %v2581_v45  ;;  %v3161_v8 = vpop.f32.mrb[97].mxu0  ;;  %v2584_v60 = vpop.f32.mrb[98].mxu1 }
 0x2d7   :  { %v3162_v4 = vpop.f32.mrb[98].mxu0  ;;  %v2586_v5 = vpop.f32.mrb[99].mxu1 }
 0x2d8   :  { %7925 = vst [vmem:[#allocation17_spill] sm:$0xff] %v6382_v54  ;;  %v6385_v1 = vadd.f32 %v3162_v4, %v2584_v60  ;;  %v3164_v24 = vpop.f32.mrb[99].mxu0  ;;  %v3265_v5 = vadd.f32 %v6369_v38, %v3264_v33 }
 0x2da   :  { %7926 = vst [vmem:[#allocation18_spill] sm:$0xff] %v6385_v1  ;;  %v3266_v60 = vadd.f32 %v6372_v56, %v3265_v5 }
 0x2dc   :  { %v2589_v27 = vpop.f32.mrb[100].mxu1 }
 0x2dd   :  { %v3167_v9 = vpop.f32.mrb[100].mxu0  ;;  %v2591_v42 = vpop.f32.mrb[101].mxu1 }
 0x2de   :  { %v6389_v32 = vadd.f32 %v3167_v9, %v2589_v27  ;;  %v3169_v45 = vpop.f32.mrb[101].mxu0  ;;  %v2592_v52 = vpop.f32.mrb[102].mxu1  ;;  %v3267_v42 = vadd.f32 %v6376_v14, %v3266_v60 }
 0x2df   :  { %v3170_v55 = vpop.f32.mrb[102].mxu0  ;;  %v2594_v8 = vpop.f32.mrb[103].mxu1 }
 0x2e0   :  { %7927 = vst [vmem:[#allocation19_spill] sm:$0xff] %v6389_v32  ;;  %v6392_v16 = vadd.f32 %v3170_v55, %v2592_v52  ;;  %v3172_v43 = vpop.f32.mrb[103].mxu0  ;;  %v3268_v33 = vadd.f32 %v6378_v30, %v3267_v42 }
 0x2e2   :  { %7928 = vst [vmem:[#allocation20_spill] sm:$0xff] %v6392_v16  ;;  %v3269_v52 = vadd.f32 %v6382_v54, %v3268_v33 }
 0x2e4   :  { %v2597_v4 = vpop.f32.mrb[104].mxu1 }
 0x2e5   :  { %v3175_v20 = vpop.f32.mrb[104].mxu0  ;;  %v2599_v24 = vpop.f32.mrb[105].mxu1 }
 0x2e6   :  { %v6396_v62 = vadd.f32 %v3175_v20, %v2597_v4  ;;  %v3177_v25 = vpop.f32.mrb[105].mxu0  ;;  %v2600_v27 = vpop.f32.mrb[106].mxu1 }
 0x2e7   :  { %v3178_v9 = vpop.f32.mrb[106].mxu0  ;;  %v2602_v45 = vpop.f32.mrb[107].mxu1  ;;  %v3270_v25 = vadd.f32 %v6385_v1, %v3269_v52 }
 0x2e8   :  { %7929 = vst [vmem:[#allocation21_spill] sm:$0xff] %v6396_v62  ;;  %v6398_v18 = vadd.f32 %v3178_v9, %v2600_v27  ;;  %v3180_v8 = vpop.f32.mrb[107].mxu0 }
 0x2e9   :  { %v3271_v9 = vadd.f32 %v6389_v32, %v3270_v25 }
 0x2ea   :  { %7930 = vst [vmem:[#allocation22_spill] sm:$0xff] %v6398_v18 }
 0x2eb   :  { %v3272_v33 = vadd.f32 %v6392_v16, %v3271_v9 }
 0x2ec   :  { %v2605_v55 = vpop.f32.mrb[108].mxu1 }
 0x2ed   :  { %v3183_v5 = vpop.f32.mrb[108].mxu0  ;;  %v2607_v43 = vpop.f32.mrb[109].mxu1 }
 0x2ee   :  { %v6402_v56 = vadd.f32 %v3183_v5, %v2605_v55  ;;  %v3185_v24 = vpop.f32.mrb[109].mxu0  ;;  %v2608_v60 = vpop.f32.mrb[110].mxu1 }
 0x2ef   :  { %v3186_v4 = vpop.f32.mrb[110].mxu0  ;;  %v2610_v20 = vpop.f32.mrb[111].mxu1 }
 0x2f0   :  { %7931 = vst [vmem:[#allocation23_spill] sm:$0xff] %v6402_v56  ;;  %v6405_v14 = vadd.f32 %v3186_v4, %v2608_v60  ;;  %v3188_v27 = vpop.f32.mrb[111].mxu0  ;;  %v3273_v20 = vadd.f32 %v6396_v62, %v3272_v33 }
 0x2f2   :  { %7932 = vst [vmem:[#allocation24_spill] sm:$0xff] %v6405_v14  ;;  %v3274_v60 = vadd.f32 %v6398_v18, %v3273_v20 }
 0x2f4   :  { %v2613_v45 = vpop.f32.mrb[112].mxu1 }
 0x2f5   :  { %v3191_v42 = vpop.f32.mrb[112].mxu0  ;;  %v2615_v8 = vpop.f32.mrb[113].mxu1 }
 0x2f6   :  { %v6409_v54 = vadd.f32 %v3191_v42, %v2613_v45  ;;  %v3193_v55 = vpop.f32.mrb[113].mxu0  ;;  %v2616_v5 = vpop.f32.mrb[114].mxu1  ;;  %v3275_v8 = vadd.f32 %v6402_v56, %v3274_v60 }
 0x2f7   :  { %v3194_v43 = vpop.f32.mrb[114].mxu0  ;;  %v2618_v24 = vpop.f32.mrb[115].mxu1 }
 0x2f8   :  { %7933 = vst [vmem:[#allocation25_spill] sm:$0xff] %v6409_v54  ;;  %v6412_v30 = vadd.f32 %v3194_v43, %v2616_v5  ;;  %v3196_v52 = vpop.f32.mrb[115].mxu0  ;;  %v3276_v33 = vadd.f32 %v6405_v14, %v3275_v8 }
 0x2fa   :  { %7934 = vst [vmem:[#allocation26_spill] sm:$0xff] %v6412_v30  ;;  %v3277_v5 = vadd.f32 %v6409_v54, %v3276_v33 }
 0x2fc   :  { %v2621_v4 = vpop.f32.mrb[116].mxu1 }
 0x2fd   :  { %v3199_v25 = vpop.f32.mrb[116].mxu0  ;;  %v2623_v27 = vpop.f32.mrb[117].mxu1 }
 0x2fe   :  { %v6416_v32 = vadd.f32 %v3199_v25, %v2621_v4  ;;  %v3201_v9 = vpop.f32.mrb[117].mxu0  ;;  %v2624_v45 = vpop.f32.mrb[118].mxu1 }
 0x2ff   :  { %v3202_v42 = vpop.f32.mrb[118].mxu0  ;;  %v2626_v55 = vpop.f32.mrb[119].mxu1  ;;  %v3278_v9 = vadd.f32 %v6412_v30, %v3277_v5 }
 0x300   :  { %7935 = vst [vmem:[#allocation27_spill] sm:$0xff] %v6416_v32  ;;  %v6418_v16 = vadd.f32 %v3202_v42, %v2624_v45  ;;  %v3204_v24 = vpop.f32.mrb[119].mxu0 }
 0x301   :  { %v3279_v42 = vadd.f32 %v6416_v32, %v3278_v9 }
 0x302   :  { %7936 = vst [vmem:[#allocation28_spill] sm:$0xff] %v6418_v16 }
 0x303   :  { %v3280_v33 = vadd.f32 %v6418_v16, %v3279_v42 }
 0x304   :  { %v2629_v43 = vpop.f32.mrb[120].mxu1 }
 0x305   :  { %v3207_v20 = vpop.f32.mrb[120].mxu0  ;;  %v2631_v52 = vpop.f32.mrb[121].mxu1 }
 0x306   :  { %v6422_v18 = vadd.f32 %v3207_v20, %v2629_v43  ;;  %v3209_v27 = vpop.f32.mrb[121].mxu0  ;;  %v2632_v60 = vpop.f32.mrb[122].mxu1 }
 0x307   :  { %v3210_v4 = vpop.f32.mrb[122].mxu0  ;;  %v2634_v25 = vpop.f32.mrb[123].mxu1 }
 0x308   :  { %7937 = vst [vmem:[#allocation29_spill] sm:$0xff] %v6422_v18  ;;  %v6425_v56 = vadd.f32 %v3210_v4, %v2632_v60  ;;  %v3212_v45 = vpop.f32.mrb[123].mxu0  ;;  %v3281_v25 = vadd.f32 %v6422_v18, %v3280_v33 }
 0x30a   :  { %7938 = vst [vmem:[#allocation30_spill] sm:$0xff] %v6425_v56  ;;  %v3282_v60 = vadd.f32 %v6425_v56, %v3281_v25 }
 0x30c   :  { %v2637_v55 = vpop.f32.mrb[124].mxu1 }
 0x30d   :  { %v3215_v8 = vpop.f32.mrb[124].mxu0  ;;  %v2639_v24 = vpop.f32.mrb[125].mxu1 }
 0x30e   :  { %v6429_v54 = vadd.f32 %v3215_v8, %v2637_v55  ;;  %v3217_v43 = vpop.f32.mrb[125].mxu0  ;;  %v2640_v20 = vpop.f32.mrb[126].mxu1 }
 0x30f   :  { %v3218_v52 = vpop.f32.mrb[126].mxu0  ;;  %v2642_v27 = vpop.f32.mrb[127].mxu1 }
 0x310   :  { %7939 = vst [vmem:[#allocation31_spill] sm:$0xff] %v6429_v54  ;;  %v6432_v14 = vadd.f32 %v3218_v52, %v2640_v20  ;;  %v3220_v5 = vpop.f32.mrb[127].mxu0  ;;  %v3283_v4 = vadd.f32 %v6429_v54, %v3282_v60 }
 0x312   :  { %v3284_v9 = vadd.f32 %v6432_v14, %v3283_v4 }
 0x314   :  { %v3285_v45 = vrot.slane %v3284_v9, 4 }
 0x316   :  { %v3286_v24 = vadd.f32 %v3285_v45, %v3284_v9 }
 0x318   :  { %v3287_v42 = vrot.slane %v3286_v24, 2 }
 0x31a   :  { %v3288_v55 = vadd.f32 %v3287_v42, %v3286_v24 }
 0x31c   :  { %v3289_v8 = vrot.slane %v3288_v55, 1 }
 0x31e   :  { %v3290_v43 = vadd.f32 %v3289_v8, %v3288_v55 }
 0x320   :  { %v6437_v16 = vmul.f32 0.001953125, %v3290_v43 }
 0x322   :  { %v3292_v33 = vsub.f32 %v6209_v41, %v6437_v16  ;;  %v3293_v20 = vsub.f32 %v6211_v49, %v6437_v16  ;;  %v3294_v52 = vsub.f32 %v6225_v58, %v6437_v16  ;;  %v3295_v5 = vsub.f32 %v6227_v3, %v6437_v16 }
 0x323   :  { %v3296_v60 = vsub.f32 %v6241_v13, %v6437_v16  ;;  %v3297_v45 = vsub.f32 %v6243_v21, %v6437_v16  ;;  %v3298_v55 = vsub.f32 %v6257_v31, %v6437_v16  ;;  %v3300_v13 = vsub.f32 %v6261_v46, %v6437_v16 }
 0x324   :  { %v3356_v27 = vmul.f32 %v3292_v33, %v3292_v33  ;;  %v3357_v25 = vmul.f32 %v3293_v20, %v3293_v20  ;;  %v3358_v4 = vmul.f32 %v3294_v52, %v3294_v52  ;;  %v3359_v24 = vmul.f32 %v3295_v5, %v3295_v5 }
 0x325   :  { %v3360_v8 = vmul.f32 %v3296_v60, %v3296_v60  ;;  %v3299_v33 = vsub.f32 %v6259_v39, %v6437_v16  ;;  %v3361_v20 = vmul.f32 %v3297_v45, %v3297_v45  ;;  %v3362_v52 = vmul.f32 %v3298_v55, %v3298_v55 }
 0x326   :  { %v3420_v9 = vadd.f32 %v3357_v25, %v3356_v27  ;;  %v3301_v25 = vsub.f32 %v6263_v53, %v6437_v16  ;;  %v3364_v60 = vmul.f32 %v3300_v13, %v3300_v13 }
 0x327   :  { %v3363_v5 = vmul.f32 %v3299_v33, %v3299_v33 }
 0x328   :  { %v3421_v42 = vadd.f32 %v3420_v9, %v3358_v4  ;;  %v3302_v9 = vsub.f32 %v6265_v0, %v6437_v16  ;;  %v3365_v45 = vmul.f32 %v3301_v25, %v3301_v25 }
 0x32a   :  { %v3422_v43 = vadd.f32 %v3421_v42, %v3359_v24  ;;  %v3303_v42 = vsub.f32 %v6267_v63, %v6437_v16  ;;  %v3366_v55 = vmul.f32 %v3302_v9, %v3302_v9 }
 0x32c   :  { %v3423_v3 = vadd.f32 %v3422_v43, %v3360_v8  ;;  %v3304_v43 = vsub.f32 %v6269_v6, %v6437_v16  ;;  %v3367_v33 = vmul.f32 %v3303_v42, %v3303_v42 }
 0x32e   :  { %v3424_v27 = vadd.f32 %v3423_v3, %v3361_v20  ;;  %v3305_v20 = vsub.f32 %v6271_v11, %v6437_v16  ;;  %v3368_v13 = vmul.f32 %v3304_v43, %v3304_v43 }
 0x330   :  { %v3425_v4 = vadd.f32 %v3424_v27, %v3362_v52  ;;  %v3306_v27 = vsub.f32 %v6273_v17, %v6437_v16  ;;  %v3369_v25 = vmul.f32 %v3305_v20, %v3305_v20 }
 0x332   :  { %v3426_v24 = vadd.f32 %v3425_v4, %v3363_v5  ;;  %v3307_v4 = vsub.f32 %v6275_v23, %v6437_v16  ;;  %v3370_v9 = vmul.f32 %v3306_v27, %v3306_v27 }
 0x334   :  { %v3427_v8 = vadd.f32 %v3426_v24, %v3364_v60  ;;  %v3308_v24 = vsub.f32 %v6277_v28, %v6437_v16  ;;  %v3371_v42 = vmul.f32 %v3307_v4, %v3307_v4 }
 0x336   :  { %v3428_v3 = vadd.f32 %v3427_v8, %v3365_v45  ;;  %v3309_v8 = vsub.f32 %v6279_v34, %v6437_v16  ;;  %v3372_v43 = vmul.f32 %v3308_v24, %v3308_v24 }
 0x338   :  { %v3429_v52 = vadd.f32 %v3428_v3, %v3366_v55  ;;  %v3310_v3 = vsub.f32 %v6281_v40, %v6437_v16  ;;  %v3373_v20 = vmul.f32 %v3309_v8, %v3309_v8 }
 0x33a   :  { %v3430_v5 = vadd.f32 %v3429_v52, %v3367_v33  ;;  %v3311_v52 = vsub.f32 %v6285_v48, %v6437_v16  ;;  %v3374_v27 = vmul.f32 %v3310_v3, %v3310_v3 }
 0x33c   :  { %v3431_v60 = vadd.f32 %v3430_v5, %v3368_v13  ;;  %v3312_v5 = vsub.f32 %v6289_v57, %v6437_v16  ;;  %v3375_v4 = vmul.f32 %v3311_v52, %v3311_v52 }
 0x33e   :  { %v3432_v45 = vadd.f32 %v3431_v60, %v3369_v25  ;;  %v3313_v60 = vsub.f32 %v6292_v2, %v6437_v16  ;;  %v3376_v24 = vmul.f32 %v3312_v5, %v3312_v5 }
 0x340   :  { %v3433_v55 = vadd.f32 %v3432_v45, %v3370_v9  ;;  %v3314_v45 = vsub.f32 %v6296_v12, %v6437_v16  ;;  %v3377_v8 = vmul.f32 %v3313_v60, %v3313_v60 }
 0x342   :  { %v3434_v33 = vadd.f32 %v3433_v55, %v3371_v42  ;;  %v3315_v55 = vsub.f32 %v6298_v19, %v6437_v16  ;;  %v3378_v3 = vmul.f32 %v3314_v45, %v3314_v45 }
 0x344   :  { %v3435_v13 = vadd.f32 %v3434_v33, %v3372_v43  ;;  %v3316_v33 = vsub.f32 %v6302_v29, %v6437_v16  ;;  %v3379_v52 = vmul.f32 %v3315_v55, %v3315_v55 }
 0x346   :  { %v3436_v25 = vadd.f32 %v3435_v13, %v3373_v20  ;;  %v3317_v13 = vsub.f32 %v6305_v37, %v6437_v16  ;;  %v3380_v5 = vmul.f32 %v3316_v33, %v3316_v33 }
 0x348   :  { %v3437_v9 = vadd.f32 %v3436_v25, %v3374_v27  ;;  %v3318_v25 = vsub.f32 %v6309_v50, %v6437_v16  ;;  %v3381_v60 = vmul.f32 %v3317_v13, %v3317_v13 }
 0x34a   :  { %v3438_v42 = vadd.f32 %v3437_v9, %v3375_v4  ;;  %v3319_v9 = vsub.f32 %v6312_v59, %v6437_v16  ;;  %v3382_v45 = vmul.f32 %v3318_v25, %v3318_v25 }
 0x34c   :  { %v3439_v43 = vadd.f32 %v3438_v42, %v3376_v24  ;;  %v3320_v42 = vsub.f32 %v6316_v7, %v6437_v16  ;;  %v3383_v55 = vmul.f32 %v3319_v9, %v3319_v9 }
 0x34e   :  { %v3440_v20 = vadd.f32 %v3439_v43, %v3377_v8  ;;  %v3321_v43 = vsub.f32 %v6318_v15, %v6437_v16  ;;  %v3384_v33 = vmul.f32 %v3320_v42, %v3320_v42 }
 0x350   :  { %v3441_v27 = vadd.f32 %v3440_v20, %v3378_v3  ;;  %v3322_v20 = vsub.f32 %v6322_v26, %v6437_v16  ;;  %v3385_v13 = vmul.f32 %v3321_v43, %v3321_v43 }
 0x352   :  { %v3442_v4 = vadd.f32 %v3441_v27, %v3379_v52  ;;  %v3323_v27 = vsub.f32 %v6325_v36, %v6437_v16  ;;  %v3386_v25 = vmul.f32 %v3322_v20, %v3322_v20 }
 0x354   :  { %v3443_v24 = vadd.f32 %v3442_v4, %v3380_v5  ;;  %v3324_v4 = vsub.f32 %v6329_v51, %v6437_v16  ;;  %v3387_v9 = vmul.f32 %v3323_v27, %v3323_v27 }
 0x356   :  { %v3444_v8 = vadd.f32 %v3443_v24, %v3381_v60  ;;  %v3325_v24 = vsub.f32 %v6332_v61, %v6437_v16  ;;  %v3388_v42 = vmul.f32 %v3324_v4, %v3324_v4 }
 0x358   :  { %v3445_v3 = vadd.f32 %v3444_v8, %v3382_v45  ;;  %v3326_v8 = vsub.f32 %v6336_v10, %v6437_v16  ;;  %v3389_v43 = vmul.f32 %v3325_v24, %v3325_v24 }
 0x35a   :  { %v3446_v52 = vadd.f32 %v3445_v3, %v3383_v55  ;;  %v3327_v3 = vsub.f32 %v6338_v22, %v6437_v16  ;;  %v3390_v20 = vmul.f32 %v3326_v8, %v3326_v8 }
 0x35c   :  { %v3447_v5 = vadd.f32 %v3446_v52, %v3384_v33  ;;  %v3328_v52 = vsub.f32 %v6342_v35, %v6437_v16  ;;  %v3391_v27 = vmul.f32 %v3327_v3, %v3327_v3 }
 0x35e   :  { %v3448_v60 = vadd.f32 %v3447_v5, %v3385_v13  ;;  %v3329_v5 = vsub.f32 %v6345_v47, %v6437_v16  ;;  %v3392_v4 = vmul.f32 %v3328_v52, %v3328_v52 }
 0x360   :  { %v3449_v45 = vadd.f32 %v3448_v60, %v3386_v25  ;;  %v7940_v60 = vld [vmem:[#allocation7_spill] sm:$0xff]  ;;  %v3393_v24 = vmul.f32 %v3329_v5, %v3329_v5 }
 0x361   :  { %v3330_v10 = vsub.f32 %v7940_v60, %v6437_v16 }
 0x362   :  { %v3450_v55 = vadd.f32 %v3449_v45, %v3387_v9  ;;  %v7941_v45 = vld [vmem:[#allocation8_spill] sm:$0xff] }
 0x363   :  { %v3331_v22 = vsub.f32 %v7941_v45, %v6437_v16  ;;  %v3394_v8 = vmul.f32 %v3330_v10, %v3330_v10 }
 0x364   :  { %v3451_v33 = vadd.f32 %v3450_v55, %v3388_v42  ;;  %v7942_v55 = vld [vmem:[#allocation9_spill] sm:$0xff] }
 0x365   :  { %v3332_v35 = vsub.f32 %v7942_v55, %v6437_v16  ;;  %v3395_v3 = vmul.f32 %v3331_v22, %v3331_v22 }
 0x366   :  { %v3452_v13 = vadd.f32 %v3451_v33, %v3389_v43  ;;  %v3333_v33 = vsub.f32 %v6358_v44, %v6437_v16 }
 0x367   :  { %v3396_v52 = vmul.f32 %v3332_v35, %v3332_v35 }
 0x368   :  { %v3453_v25 = vadd.f32 %v3452_v13, %v3390_v20  ;;  %v7943_v13 = vld [vmem:[#allocation11_spill] sm:$0xff]  ;;  %v3397_v5 = vmul.f32 %v3333_v33, %v3333_v33 }
 0x369   :  { %v3334_v60 = vsub.f32 %v7943_v13, %v6437_v16 }
 0x36a   :  { %v3454_v9 = vadd.f32 %v3453_v25, %v3391_v27  ;;  %v7944_v25 = vld [vmem:[#allocation12_spill] sm:$0xff] }
 0x36b   :  { %v3335_v45 = vsub.f32 %v7944_v25, %v6437_v16  ;;  %v3398_v10 = vmul.f32 %v3334_v60, %v3334_v60 }
 0x36c   :  { %v3455_v42 = vadd.f32 %v3454_v9, %v3392_v4  ;;  %v3336_v9 = vsub.f32 %v6369_v38, %v6437_v16 }
 0x36d   :  { %v3399_v22 = vmul.f32 %v3335_v45, %v3335_v45 }
 0x36e   :  { %v3456_v43 = vadd.f32 %v3455_v42, %v3393_v24  ;;  %v7945_v42 = vld [vmem:[#allocation14_spill] sm:$0xff]  ;;  %v3400_v35 = vmul.f32 %v3336_v9, %v3336_v9 }
 0x36f   :  { %v3337_v44 = vsub.f32 %v7945_v42, %v6437_v16 }
 0x370   :  { %v3457_v20 = vadd.f32 %v3456_v43, %v3394_v8  ;;  %v7946_v43 = vld [vmem:[#allocation15_spill] sm:$0xff] }
 0x371   :  { %v3338_v13 = vsub.f32 %v7946_v43, %v6437_v16  ;;  %v3401_v33 = vmul.f32 %v3337_v44, %v3337_v44 }
 0x372   :  { %v3458_v27 = vadd.f32 %v3457_v20, %v3395_v3  ;;  %v7947_v20 = vld [vmem:[#allocation16_spill] sm:$0xff] }
 0x373   :  { %v3339_v25 = vsub.f32 %v7947_v20, %v6437_v16  ;;  %v3402_v60 = vmul.f32 %v3338_v13, %v3338_v13 }
 0x374   :  { %v3459_v4 = vadd.f32 %v3458_v27, %v3396_v52  ;;  %v7948_v27 = vld [vmem:[#allocation17_spill] sm:$0xff] }
 0x375   :  { %v3340_v38 = vsub.f32 %v7948_v27, %v6437_v16  ;;  %v3403_v45 = vmul.f32 %v3339_v25, %v3339_v25 }
 0x376   :  { %v3460_v24 = vadd.f32 %v3459_v4, %v3397_v5  ;;  %v3341_v4 = vsub.f32 %v6385_v1, %v6437_v16 }
 0x377   :  { %v3404_v9 = vmul.f32 %v3340_v38, %v3340_v38 }
 0x378   :  { %v3461_v8 = vadd.f32 %v3460_v24, %v3398_v10  ;;  %v7949_v24 = vld [vmem:[#allocation19_spill] sm:$0xff]  ;;  %v3405_v44 = vmul.f32 %v3341_v4, %v3341_v4 }
 0x379   :  { %v3342_v43 = vsub.f32 %v7949_v24, %v6437_v16 }
 0x37a   :  { %v3462_v3 = vadd.f32 %v3461_v8, %v3399_v22  ;;  %v7950_v8 = vld [vmem:[#allocation20_spill] sm:$0xff] }
 0x37b   :  { %v3343_v20 = vsub.f32 %v7950_v8, %v6437_v16  ;;  %v3406_v13 = vmul.f32 %v3342_v43, %v3342_v43 }
 0x37c   :  { %v3463_v52 = vadd.f32 %v3462_v3, %v3400_v35  ;;  %v3344_v3 = vsub.f32 %v6396_v62, %v6437_v16 }
 0x37d   :  { %v3407_v25 = vmul.f32 %v3343_v20, %v3343_v20 }
 0x37e   :  { %v3464_v5 = vadd.f32 %v3463_v52, %v3401_v33  ;;  %v7951_v52 = vld [vmem:[#allocation22_spill] sm:$0xff]  ;;  %v3408_v38 = vmul.f32 %v3344_v3, %v3344_v3 }
 0x37f   :  { %v3345_v1 = vsub.f32 %v7951_v52, %v6437_v16 }
 0x380   :  { %v3465_v10 = vadd.f32 %v3464_v5, %v3402_v60  ;;  %v7952_v5 = vld [vmem:[#allocation23_spill] sm:$0xff] }
 0x381   :  { %v3346_v24 = vsub.f32 %v7952_v5, %v6437_v16  ;;  %v3409_v4 = vmul.f32 %v3345_v1, %v3345_v1 }
 0x382   :  { %v3466_v22 = vadd.f32 %v3465_v10, %v3403_v45  ;;  %v7953_v10 = vld [vmem:[#allocation24_spill] sm:$0xff] }
 0x383   :  { %v3347_v8 = vsub.f32 %v7953_v10, %v6437_v16  ;;  %v3410_v43 = vmul.f32 %v3346_v24, %v3346_v24 }
 0x384   :  { %v3467_v35 = vadd.f32 %v3466_v22, %v3404_v9  ;;  %v7954_v22 = vld [vmem:[#allocation25_spill] sm:$0xff] }
 0x385   :  { %v3348_v62 = vsub.f32 %v7954_v22, %v6437_v16  ;;  %v3411_v20 = vmul.f32 %v3347_v8, %v3347_v8 }
 0x386   :  { %v3468_v33 = vadd.f32 %v3467_v35, %v3405_v44  ;;  %v3349_v35 = vsub.f32 %v6412_v30, %v6437_v16 }
 0x387   :  { %v3412_v3 = vmul.f32 %v3348_v62, %v3348_v62 }
 0x388   :  { %v3469_v60 = vadd.f32 %v3468_v33, %v3406_v13  ;;  %v3350_v33 = vsub.f32 %v6416_v32, %v6437_v16  ;;  %v3413_v1 = vmul.f32 %v3349_v35, %v3349_v35 }
 0x38a   :  { %v3470_v45 = vadd.f32 %v3469_v60, %v3407_v25  ;;  %v7955_v60 = vld [vmem:[#allocation28_spill] sm:$0xff]  ;;  %v3414_v24 = vmul.f32 %v3350_v33, %v3350_v33 }
 0x38b   :  { %v3351_v10 = vsub.f32 %v7955_v60, %v6437_v16 }
 0x38c   :  { %v3471_v9 = vadd.f32 %v3470_v45, %v3408_v38  ;;  %v3352_v45 = vsub.f32 %v6422_v18, %v6437_v16 }
 0x38d   :  { %v3415_v8 = vmul.f32 %v3351_v10, %v3351_v10 }
 0x38e   :  { %v3472_v44 = vadd.f32 %v3471_v9, %v3409_v4  ;;  %v3353_v9 = vsub.f32 %v6425_v56, %v6437_v16  ;;  %v3416_v62 = vmul.f32 %v3352_v45, %v3352_v45  ;;  %v3498_v45 = vlaneseq }
 0x390   :  { %v3473_v13 = vadd.f32 %v3472_v44, %v3410_v43  ;;  %v3354_v44 = vsub.f32 %v6429_v54, %v6437_v16  ;;  %v3417_v35 = vmul.f32 %v3353_v9, %v3353_v9  ;;  %v3490_v9 = vld [vmem:[%s7829_s2] sm:$0x1] }
 0x392   :  { %v3474_v25 = vadd.f32 %v3473_v13, %v3411_v20  ;;  %v3355_v13 = vsub.f32 %v6432_v14, %v6437_v16 }
 0x394   :  { %v3475_v38 = vadd.f32 %v3474_v25, %v3412_v3  ;;  %v3418_v25 = vmul.f32 %v3354_v44, %v3354_v44  ;;  %v3419_v18 = vmul.f32 %v3355_v13, %v3355_v13 }
 0x396   :  { %v3476_v4 = vadd.f32 %v3475_v38, %v3413_v1 }
 0x398   :  { %v3477_v43 = vadd.f32 %v3476_v4, %v3414_v24 }
 0x39a   :  { %v3478_v20 = vadd.f32 %v3477_v43, %v3415_v8  ;;  %v3499_v43 = vshrl.u32 %v3498_v45, 7 }
 0x39c   :  { %v3479_v3 = vadd.f32 %v3478_v20, %v3416_v62  ;;  %v3500_v62 = vsub.s32 0, %v3499_v43 }
 0x39e   :  { %v3480_v60 = vadd.f32 %v3479_v3, %v3417_v35  ;;  %v7957_v35 = vld [vmem:[#allocation3_spill] sm:$0xff] }
 0x3a0   :  { %v3481_v33 = vadd.f32 %v3480_v60, %v3418_v25 }
 0x3a2   :  { %v3482_v1 = vadd.f32 %v3481_v33, %v3419_v18 }
 0x3a4   :  { %v3483_v38 = vrot.slane %v3482_v1, 4 }
 0x3a6   :  { %v3484_v32 = vadd.f32 %v3483_v38, %v3482_v1  ;;  %v7958_v1 = vld [vmem:[#allocation4_spill] sm:$0xff]  ;;  %v7959_v38 = vld [vmem:[#allocation5_spill] sm:$0xff] }
 0x3a8   :  { %v3485_v56 = vrot.slane %v3484_v32, 2 }
 0x3aa   :  { %v3486_v10 = vadd.f32 %v3485_v56, %v3484_v32  ;;  %v3494_v32 = vld [vmem:[%s7830_s3] sm:$0x1] }
 0x3ac   :  { %v3487_v24 = vrot.slane %v3486_v10, 1 }
 0x3ae   :  { %v3488_v4 = vadd.f32 %v3487_v24, %v3486_v10  ;;  %v7960_v10 = vld [vmem:[#allocation6_spill] sm:$0xff]  ;;  %v7961_v24 = vld [vmem:[#allocation7_spill] sm:$0xff] }
 0x3b0   :  { %v3489_v30 = vmul.f32 0.001953125, %v3488_v4  ;;  %v7962_v4 = vld [vmem:[#allocation8_spill] sm:$0xff] }
 0x3b2   :  { %v3491_v54 = vadd.f32 1e-05, %v3489_v30 }
 0x3b4   :  { %5177 = vrsqrt.f32 %v3491_v54 }
 0x3be   :  { %v5178_v8 = vpop.eup %5177 }
 0x3bf   :  { %v3493_v44 = vmul.f32 %v5178_v8, %v3490_v9  ;;  %v7963_v9 = vld [vmem:[#allocation10_spill] sm:$0xff] }
 0x3c1   :  { %v3495_v18 = vmul.f32 %v3493_v44, %v6437_v16  ;;  %v6574_v56 = vrot.slane %v3493_v44, %v3500_v62  ;;  %v7956_v16 = vld [vmem:[#allocation2_spill] sm:$0xff]  ;;  %v7964_v44 = vld [vmem:[#allocation11_spill] sm:$0xff] }
 0x3c3   :  { %v3496_v60 = vsub.f32 %v3494_v32, %v3495_v18  ;;  %v6578_v30 = vmul.f32 %v6209_v41, %v6574_v56  ;;  %v6582_v54 = vmul.f32 %v6211_v49, %v6574_v56  ;;  %v6586_v20 = vmul.f32 %v6225_v58, %v6574_v56  ;;  %v7965_v18 = vld [vmem:[#allocation12_spill] sm:$0xff] }
 0x3c4   :  { %v6590_v13 = vmul.f32 %v7956_v16, %v6574_v56  ;;  %v6594_v3 = vmul.f32 %v7957_v35, %v6574_v56  ;;  %v6598_v41 = vmul.f32 %v6243_v21, %v6574_v56  ;;  %v6602_v49 = vmul.f32 %v6257_v31, %v6574_v56  ;;  %v7966_v16 = vld [vmem:[#allocation13_spill] sm:$0xff] }
 0x3c5   :  { %v6606_v58 = vmul.f32 %v6259_v39, %v6574_v56  ;;  %v6610_v25 = vmul.f32 %v6261_v46, %v6574_v56  ;;  %v6614_v33 = vmul.f32 %v6263_v53, %v6574_v56  ;;  %v6618_v21 = vmul.f32 %v6265_v0, %v6574_v56 }
 0x3c6   :  { %v6622_v31 = vmul.f32 %v6267_v63, %v6574_v56  ;;  %v6626_v39 = vmul.f32 %v6269_v6, %v6574_v56  ;;  %v6630_v46 = vmul.f32 %v6271_v11, %v6574_v56  ;;  %v6634_v53 = vmul.f32 %v6273_v17, %v6574_v56 }
 0x3c7   :  { %v6638_v0 = vmul.f32 %v6275_v23, %v6574_v56  ;;  %v6642_v63 = vmul.f32 %v6277_v28, %v6574_v56  ;;  %v6646_v6 = vmul.f32 %v6279_v34, %v6574_v56  ;;  %v6650_v11 = vmul.f32 %v6281_v40, %v6574_v56 }
 0x3c8   :  { %v6654_v17 = vmul.f32 %v6285_v48, %v6574_v56  ;;  %v6658_v23 = vmul.f32 %v6289_v57, %v6574_v56  ;;  %v6662_v28 = vmul.f32 %v6292_v2, %v6574_v56  ;;  %v6666_v34 = vmul.f32 %v6296_v12, %v6574_v56 }
 0x3c9   :  { %v6670_v40 = vmul.f32 %v6298_v19, %v6574_v56  ;;  %v6674_v48 = vmul.f32 %v6302_v29, %v6574_v56  ;;  %v6678_v57 = vmul.f32 %v6305_v37, %v6574_v56  ;;  %v6682_v2 = vmul.f32 %v6309_v50, %v6574_v56 }
 0x3ca   :  { %v6686_v12 = vmul.f32 %v6312_v59, %v6574_v56  ;;  %v6690_v19 = vmul.f32 %v6316_v7, %v6574_v56  ;;  %v6694_v29 = vmul.f32 %v6318_v15, %v6574_v56  ;;  %v6698_v37 = vmul.f32 %v6322_v26, %v6574_v56 }
 0x3cb   :  { %v6702_v50 = vmul.f32 %v6325_v36, %v6574_v56  ;;  %v6706_v59 = vmul.f32 %v6329_v51, %v6574_v56  ;;  %v6710_v7 = vmul.f32 %v6332_v61, %v6574_v56  ;;  %v6714_v15 = vmul.f32 %v7958_v1, %v6574_v56  ;;  %v7967_v1 = vld [vmem:[#allocation15_spill] sm:$0xff] }
 0x3cc   :  { %v6718_v26 = vmul.f32 %v7959_v38, %v6574_v56  ;;  %v6722_v36 = vmul.f32 %v7960_v10, %v6574_v56  ;;  %v6726_v51 = vmul.f32 %v6345_v47, %v6574_v56  ;;  %v6730_v61 = vmul.f32 %v7961_v24, %v6574_v56  ;;  %v7969_v10 = vld [vmem:[#allocation16_spill] sm:$0xff] }
 0x3cd   :  { %v6734_v45 = vmul.f32 %v7962_v4, %v6574_v56  ;;  %v6738_v8 = vmul.f32 %v7942_v55, %v6574_v56  ;;  %v6742_v43 = vmul.f32 %v7963_v9, %v6574_v56  ;;  %v6746_v47 = vmul.f32 %v7964_v44, %v6574_v56  ;;  %v7971_v9 = vld [vmem:[#allocation18_spill] sm:$0xff] }
 0x3ce   :  { %v6750_v32 = vmul.f32 %v7965_v18, %v6574_v56  ;;  %v6754_v35 = vmul.f32 %v7966_v16, %v6574_v56  ;;  %v6758_v55 = vmul.f32 %v7945_v42, %v6574_v56  ;;  %v6762_v38 = vmul.f32 %v7967_v1, %v6574_v56  ;;  %v7972_v18 = vld [vmem:[#allocation19_spill] sm:$0xff]  ;;  %v7973_v1 = vld [vmem:[#allocation20_spill] sm:$0xff] }
 0x3cf   :  { %v6766_v24 = vmul.f32 %v7969_v10, %v6574_v56  ;;  %v6770_v4 = vmul.f32 %v7948_v27, %v6574_v56  ;;  %v6774_v44 = vmul.f32 %v7971_v9, %v6574_v56  ;;  %v6778_v42 = vmul.f32 %v7972_v18, %v6574_v56  ;;  %v7974_v10 = vld [vmem:[#allocation21_spill] sm:$0xff]  ;;  %v7978_v18 = vld [vmem:[#allocation24_spill] sm:$0xff] }
 0x3d0   :  { %7968 = vst [vmem:[#allocation9_spill] sm:$0xff] %v6762_v38  ;;  %v6780_v16 = vrot.slane %v3496_v60, %v3500_v62  ;;  %v6784_v38 = vmul.f32 %v7973_v1, %v6574_v56  ;;  %v6792_v27 = vmul.f32 %v7951_v52, %v6574_v56  ;;  %v6796_v9 = vmul.f32 %v7952_v5, %v6574_v56  ;;  %v7981_v1 = vld [vmem:[#allocation26_spill] sm:$0xff] }
 0x3d1   :  { %7970 = vst [vmem:[#allocation14_spill] sm:$0xff] %v6766_v24  ;;  %v6788_v24 = vmul.f32 %v7974_v10, %v6574_v56  ;;  %v6800_v62 = vmul.f32 %v7978_v18, %v6574_v56  ;;  %v6804_v60 = vmul.f32 %v7954_v22, %v6574_v56  ;;  %v6808_v10 = vmul.f32 %v7981_v1, %v6574_v56 }
 0x3d2   :  { %7976 = vst [vmem:[#allocation22_spill] sm:$0xff] %v6792_v27  ;;  %7977 = vst [vmem:[#allocation23_spill] sm:$0xff] %v6796_v9  ;;  %v7983_v27 = vld [vmem:[#allocation28_spill] sm:$0xff]  ;;  %v7984_v9 = vld [vmem:[#allocation29_spill] sm:$0xff] }
 0x3d3   :  { %7975 = vst [vmem:[#allocation17_spill] sm:$0xff] %v6788_v24  ;;  %7979 = vst [vmem:[#allocation25_spill] sm:$0xff] %v6800_v62  ;;  %v7982_v24 = vld [vmem:[#allocation27_spill] sm:$0xff]  ;;  %v6816_v5 = vmul.f32 %v7983_v27, %v6574_v56  ;;  %v6820_v18 = vmul.f32 %v7984_v9, %v6574_v56  ;;  %v7985_v62 = vld [vmem:[#allocation30_spill] sm:$0xff]  ;;  %v6836_v27 = vadd.f32 %v6780_v16, %v6578_v30 }
 0x3d4   :  { %7980 = vst [vmem:[#allocation2_spill] sm:$0xff] %v6804_v60  ;;  %v6812_v52 = vmul.f32 %v7982_v24, %v6574_v56  ;;  %v6824_v22 = vmul.f32 %v7985_v62, %v6574_v56  ;;  %v7986_v60 = vld [vmem:[#allocation31_spill] sm:$0xff]  ;;  %v6832_v24 = vmul.f32 %v6432_v14, %v6574_v56  ;;  %v6840_v9 = vadd.f32 %v6780_v16, %v6582_v54 }
 0x3d5   :  { %v6828_v1 = vmul.f32 %v7986_v60, %v6574_v56  ;;  %v6844_v62 = vadd.f32 %v6780_v16, %v6586_v20  ;;  %v6848_v60 = vadd.f32 %v6780_v16, %v6590_v13  ;;  %v6852_v14 = vadd.f32 %v6780_v16, %v6594_v3 }
 0x3d6   :  { %v6856_v56 = vadd.f32 %v6780_v16, %v6598_v41  ;;  %v6860_v30 = vadd.f32 %v6780_v16, %v6602_v49  ;;  %v6864_v54 = vadd.f32 %v6780_v16, %v6606_v58  ;;  %v6868_v20 = vadd.f32 %v6780_v16, %v6610_v25 }
 0x3d7   :  { %v6872_v13 = vadd.f32 %v6780_v16, %v6614_v33  ;;  %v6876_v3 = vadd.f32 %v6780_v16, %v6618_v21  ;;  %v6880_v41 = vadd.f32 %v6780_v16, %v6622_v31  ;;  %v6884_v49 = vadd.f32 %v6780_v16, %v6626_v39 }
 0x3d8   :  { %v6888_v58 = vadd.f32 %v6780_v16, %v6630_v46  ;;  %v6892_v25 = vadd.f32 %v6780_v16, %v6634_v53  ;;  %v6896_v33 = vadd.f32 %v6780_v16, %v6638_v0  ;;  %v6900_v21 = vadd.f32 %v6780_v16, %v6642_v63 }
 0x3d9   :  { %v6904_v31 = vadd.f32 %v6780_v16, %v6646_v6  ;;  %v6908_v39 = vadd.f32 %v6780_v16, %v6650_v11  ;;  %v6912_v46 = vadd.f32 %v6780_v16, %v6654_v17  ;;  %v6916_v53 = vadd.f32 %v6780_v16, %v6658_v23 }
 0x3da   :  { %v6920_v0 = vadd.f32 %v6780_v16, %v6662_v28  ;;  %v6924_v63 = vadd.f32 %v6780_v16, %v6666_v34  ;;  %v6928_v6 = vadd.f32 %v6780_v16, %v6670_v40  ;;  %v6932_v11 = vadd.f32 %v6780_v16, %v6674_v48 }
 0x3db   :  { %v6936_v17 = vadd.f32 %v6780_v16, %v6678_v57  ;;  %v6940_v23 = vadd.f32 %v6780_v16, %v6682_v2  ;;  %v6944_v28 = vadd.f32 %v6780_v16, %v6686_v12  ;;  %v6948_v34 = vadd.f32 %v6780_v16, %v6690_v19 }
 0x3dc   :  { %v6952_v40 = vadd.f32 %v6780_v16, %v6694_v29  ;;  %v6956_v48 = vadd.f32 %v6780_v16, %v6698_v37  ;;  %v6960_v57 = vadd.f32 %v6780_v16, %v6702_v50  ;;  %v6964_v2 = vadd.f32 %v6780_v16, %v6706_v59 }
 0x3dd   :  { %v6968_v12 = vadd.f32 %v6780_v16, %v6710_v7  ;;  %v6972_v19 = vadd.f32 %v6780_v16, %v6714_v15  ;;  %v6976_v29 = vadd.f32 %v6780_v16, %v6718_v26  ;;  %v6980_v37 = vadd.f32 %v6780_v16, %v6722_v36 }
 0x3de   :  { %v6984_v50 = vadd.f32 %v6780_v16, %v6726_v51  ;;  %v6988_v59 = vadd.f32 %v6780_v16, %v6730_v61  ;;  %v6992_v7 = vadd.f32 %v6780_v16, %v6734_v45  ;;  %v6996_v15 = vadd.f32 %v6780_v16, %v6738_v8  ;;  %v7988_v8 = vld [vmem:[#allocation9_spill] sm:$0xff] }
 0x3df   :  { %v7000_v26 = vadd.f32 %v6780_v16, %v6742_v43  ;;  %v7004_v36 = vadd.f32 %v6780_v16, %v6746_v47  ;;  %v7008_v51 = vadd.f32 %v6780_v16, %v6750_v32  ;;  %v7012_v61 = vadd.f32 %v6780_v16, %v6754_v35 }
 0x3e0   :  { %v7016_v45 = vadd.f32 %v6780_v16, %v6758_v55  ;;  %v7020_v43 = vadd.f32 %v6780_v16, %v7988_v8  ;;  %v7028_v32 = vadd.f32 %v6780_v16, %v6770_v4  ;;  %v7032_v35 = vadd.f32 %v6780_v16, %v6774_v44 }
 0x3e1   :  { %7987 = vst [vmem:[#allocation3_spill] sm:$0xff] %v7000_v26  ;;  %v7990_v26 = vld [vmem:[#allocation14_spill] sm:$0xff]  ;;  %v7036_v55 = vadd.f32 %v6780_v16, %v6778_v42  ;;  %v7040_v8 = vadd.f32 %v6780_v16, %v6784_v38  ;;  %vm3637_vm0 = vcmp.gt.f32.partialorder %v6836_v27, 0.0  ;;  %vm3638_vm1 = vcmp.gt.f32.partialorder %v6840_v9, 0.0 }
 0x3e2   :  { %7989 = vst [vmem:[#allocation4_spill] sm:$0xff] %v7020_v43  ;;  %v7024_v47 = vadd.f32 %v6780_v16, %v7990_v26  ;;  %7992 = vst [vmem:[#allocation6_spill] sm:$0xff] %v7028_v32  ;;  %v7996_v43 = vld [vmem:[#allocation17_spill] sm:$0xff]  ;;  %v8000_v32 = vld [vmem:[#allocation23_spill] sm:$0xff]  ;;  %vm3639_vm2 = vcmp.gt.f32.partialorder %v6844_v62, 0.0  ;;  %vm3640_vm3 = vcmp.gt.f32.partialorder %v6848_v60, 0.0 }
 0x3e3   :  { %7993 = vst [vmem:[#allocation7_spill] sm:$0xff] %v7032_v35  ;;  %7994 = vst [vmem:[#allocation8_spill] sm:$0xff] %v7036_v55  ;;  %v7044_v26 = vadd.f32 %v6780_v16, %v7996_v43  ;;  %v7052_v44 = vadd.f32 %v6780_v16, %v8000_v32  ;;  %v8002_v35 = vld [vmem:[#allocation25_spill] sm:$0xff]  ;;  %v8004_v55 = vld [vmem:[#allocation2_spill] sm:$0xff]  ;;  %v7064_v43 = vadd.f32 %v6780_v16, %v6808_v10  ;;  %vm3641_vm4 = vcmp.gt.f32.partialorder %v6852_v14, 0.0 }
 0x3e4   :  { %7991 = vst [vmem:[#allocation5_spill] sm:$0xff] %v7024_v47  ;;  %7995 = vst [vmem:[#allocation10_spill] sm:$0xff] %v7040_v8  ;;  %v7998_v47 = vld [vmem:[#allocation22_spill] sm:$0xff]  ;;  %v7056_v42 = vadd.f32 %v6780_v16, %v8002_v35  ;;  %v7060_v38 = vadd.f32 %v6780_v16, %v8004_v55  ;;  %v7072_v32 = vadd.f32 %v6780_v16, %v6816_v5  ;;  %vm3642_vm5 = vcmp.gt.f32.partialorder %v6856_v56, 0.0 }
 0x3e5   :  { %7997 = vst [vmem:[#allocation11_spill] sm:$0xff] %v7044_v26  ;;  %v7048_v4 = vadd.f32 %v6780_v16, %v7998_v47  ;;  %8001 = vst [vmem:[#allocation13_spill] sm:$0xff] %v7052_v44  ;;  %v7068_v47 = vadd.f32 %v6780_v16, %v6812_v52  ;;  %v7076_v35 = vadd.f32 %v6780_v16, %v6820_v18  ;;  %vm3643_vm6 = vcmp.gt.f32.partialorder %v6860_v30, 0.0 }
 0x3e6   :  { %8003 = vst [vmem:[#allocation15_spill] sm:$0xff] %v7056_v42  ;;  %8005 = vst [vmem:[#allocation16_spill] sm:$0xff] %v7060_v38  ;;  %v7080_v55 = vadd.f32 %v6780_v16, %v6824_v22  ;;  %vm3644_vm7 = vcmp.gt.f32.partialorder %v6864_v54, 0.0  ;;  %vm3645_vm8 = vcmp.gt.f32.partialorder %v6868_v20, 0.0  ;;  %v7093_v10 = vadd.f32 %v6780_v16, %v6828_v1 }
 0x3e7   :  { %7999 = vst [vmem:[#allocation12_spill] sm:$0xff] %v7048_v4  ;;  %8006 = vst [vmem:[#allocation18_spill] sm:$0xff] %v7064_v43  ;;  %vm3646_vm9 = vcmp.gt.f32.partialorder %v6872_v13, 0.0  ;;  %v3701_v52 = vmul.f32 0.2, %v6836_v27  ;;  %v7101_v22 = vadd.f32 %v6780_v16, %v6832_v24  ;;  %vm3647_vm10 = vcmp.gt.f32.partialorder %v6876_v3, 0.0 }
 0x3e8   :  { %8007 = vst [vmem:[#allocation19_spill] sm:$0xff] %v7068_v47  ;;  %8008 = vst [vmem:[#allocation20_spill] sm:$0xff] %v7072_v32  ;;  %v3702_v5 = vmul.f32 0.2, %v6840_v9  ;;  %v3703_v18 = vmul.f32 0.2, %v6844_v62 }
 0x3e9   :  { %8009 = vst [vmem:[#allocation21_spill] sm:$0xff] %v7076_v35  ;;  %8010 = vst [vmem:[#allocation24_spill] sm:$0xff] %v7080_v55  ;;  %v3704_v55 = vmul.f32 0.2, %v6848_v60  ;;  %v3705_v35 = vmul.f32 0.2, %v6852_v14  ;;  %v7114_v16 = vsel %vm3637_vm0, %v6836_v27, %v3701_v52 }
 0x3ea   :  { %8011 = vst [vmem:[#allocation26_spill] sm:$0xff] %v7093_v10  ;;  %8012 = vst [vmem:[#allocation27_spill] sm:$0xff] %v7101_v22  ;;  %v3706_v1 = vmul.f32 0.2, %v6856_v56  ;;  %vm3648_vm11 = vcmp.gt.f32.partialorder %v6880_v41, 0.0  ;;  %vm3649_vm12 = vcmp.gt.f32.partialorder %v6884_v49, 0.0  ;;  %v7125_v38 = vsel %vm3638_vm1, %v6840_v9, %v3702_v5 }
 0x3eb   :  { %v3707_v10 = vmul.f32 0.2, %v6860_v30  ;;  %v3708_v32 = vmul.f32 0.2, %v6864_v54  ;;  %v3709_v47 = vmul.f32 0.2, %v6868_v20  ;;  %v7155_v44 = vsel %vm3640_vm3, %v6848_v60, %v3704_v55 }
 0x3ec   :  { %8013 = vst [vmem:[#allocation28_spill] sm:$0xff] %v7114_v16  ;;  %v3710_v24 = vmul.f32 0.2, %v6872_v13  ;;  %v3711_v22 = vmul.f32 0.2, %v6876_v3  ;;  %8014 = vst [vmem:[#allocation29_spill] sm:$0xff] %v7125_v38  ;;  %v7140_v16 = vsel %vm3639_vm2, %v6844_v62, %v3703_v18 }
 0x3ed   :  { %v7120_v43 = vmul.f32 0.2, %v6880_v41  ;;  %vm3650_vm13 = vcmp.gt.f32.partialorder %v6888_v58, 0.0  ;;  %v7129_v42 = vmul.f32 0.2, %v6884_v49  ;;  %8015 = vst [vmem:[#allocation30_spill] sm:$0xff] %v7140_v16 }
 0x3ee   :  { %v7132_v27 = vmul.f32 0.2, %v6888_v58  ;;  %v7135_v52 = vmul.f32 0.2, %v6892_v25  ;;  %vm3651_vm14 = vcmp.gt.f32.partialorder %v6892_v25, 0.0  ;;  %8017 = vst [vmem:[#allocation9_spill] sm:$0xff] %v7155_v44 }
 0x3ef   :  { %v7144_v9 = vmul.f32 0.2, %v6896_v33  ;;  %v7147_v5 = vmul.f32 0.2, %v6900_v21  ;;  %v7150_v38 = vmul.f32 0.2, %v6904_v31 }
 0x3f0   :  { %vm3652_vm15 = vcmp.gt.f32.partialorder %v6896_v33, 0.0  ;;  %v7159_v62 = vmul.f32 0.2, %v6908_v39  ;;  %v7162_v18 = vmul.f32 0.2, %v6912_v46  ;;  %vm3653_vm0 = vcmp.gt.f32.partialorder %v6900_v21, 0.0 }
 0x3f1   :  { %8016 = vst [vmem:[#allocation31_spill] sm:$0xff] %v7150_v38  ;;  %v7165_v16 = vmul.f32 0.2, %v6916_v53  ;;  %v7170_v38 = vsel %vm3641_vm4, %v6852_v14, %v3705_v35  ;;  %v7174_v60 = vmul.f32 0.2, %v6920_v0  ;;  %vm3654_vm1 = vcmp.gt.f32.partialorder %v6904_v31, 0.0 }
 0x3f2   :  { %8019 = vst [vmem:[#allocation17_spill] sm:$0xff] %v7170_v38  ;;  %v7177_v55 = vmul.f32 0.2, %v6924_v63  ;;  %v7180_v44 = vmul.f32 0.2, %v6928_v6  ;;  %vm3655_vm2 = vcmp.gt.f32.partialorder %v6908_v39, 0.0 }
 0x3f3   :  { %8018 = vst [vmem:[#allocation14_spill] sm:$0xff] %v7165_v16  ;;  %v7185_v16 = vsel %vm3642_vm5, %v6856_v56, %v3706_v1  ;;  %v7189_v14 = vmul.f32 0.2, %v6932_v11  ;;  %v7192_v35 = vmul.f32 0.2, %v6936_v17  ;;  %vm3656_vm3 = vcmp.gt.f32.partialorder %v6912_v46, 0.0 }
 0x3f4   :  { %8020 = vst [vmem:[#allocation22_spill] sm:$0xff] %v7180_v44  ;;  %8021 = vst [vmem:[#allocation23_spill] sm:$0xff] %v7185_v16  ;;  %v7195_v38 = vmul.f32 0.2, %v6940_v23  ;;  %v7200_v44 = vsel %vm3643_vm6, %v6860_v30, %v3707_v10  ;;  %v7204_v56 = vmul.f32 0.2, %v6944_v28 }
 0x3f5   :  { %8023 = vst [vmem:[#allocation2_spill] sm:$0xff] %v7200_v44  ;;  %v7207_v1 = vmul.f32 0.2, %v6948_v34  ;;  %v7210_v16 = vmul.f32 0.2, %v6952_v40  ;;  %vm3659_vm6 = vcmp.gt.f32.partialorder %v6924_v63, 0.0 }
 0x3f6   :  { %8022 = vst [vmem:[#allocation25_spill] sm:$0xff] %v7195_v38  ;;  %v7215_v38 = vsel %vm3644_vm7, %v6864_v54, %v3708_v32  ;;  %v7221_v30 = vmul.f32 0.2, %v6956_v48  ;;  %v7224_v10 = vmul.f32 0.2, %v6960_v57  ;;  %v7232_v54 = vsel %vm3645_vm8, %v6868_v20, %v3709_v47 }
 0x3f7   :  { %8024 = vst [vmem:[#allocation32_spill] sm:$0xff] %v7215_v38  ;;  %v7227_v44 = vmul.f32 0.2, %v6964_v2  ;;  %8026 = vst [vmem:[#allocation34_spill] sm:$0xff] %v7232_v54  ;;  %v7239_v32 = vmul.f32 0.2, %v6968_v12  ;;  %v7250_v20 = vsel %vm3646_vm9, %v6872_v13, %v3710_v24  ;;  %v7268_v13 = vsel %vm3647_vm10, %v6876_v3, %v3711_v22 }
 0x3f8   :  { %v7242_v38 = vmul.f32 0.2, %v6972_v19  ;;  %8028 = vst [vmem:[#allocation36_spill] sm:$0xff] %v7250_v20  ;;  %vm3663_vm8 = vcmp.gt.f32.partialorder %v6940_v23, 0.0  ;;  %v7257_v47 = vmul.f32 0.2, %v6980_v37  ;;  %v7287_v3 = vsel %vm3648_vm11, %v6880_v41, %v7120_v43 }
 0x3f9   :  { %8025 = vst [vmem:[#allocation33_spill] sm:$0xff] %v7227_v44  ;;  %v7245_v44 = vmul.f32 0.2, %v6976_v29  ;;  %v7260_v54 = vmul.f32 0.2, %v6984_v50  ;;  %8031 = vst [vmem:[#allocation39_spill] sm:$0xff] %v7268_v13  ;;  %v7306_v41 = vsel %vm3649_vm12, %v6884_v49, %v7129_v42  ;;  %v7325_v49 = vsel %vm3650_vm13, %v6888_v58, %v7132_v27 }
 0x3fa   :  { %vm3667_vm9 = vcmp.gt.f32.partialorder %v6956_v48, 0.0  ;;  %v7275_v24 = vmul.f32 0.2, %v6992_v7  ;;  %v7278_v20 = vmul.f32 0.2, %v6996_v15  ;;  %8034 = vst [vmem:[#allocation41_spill] sm:$0xff] %v7287_v3  ;;  %v7344_v58 = vsel %vm3651_vm14, %v6892_v25, %v7135_v52 }
 0x3fb   :  { %8027 = vst [vmem:[#allocation35_spill] sm:$0xff] %v7245_v44  ;;  %8029 = vst [vmem:[#allocation37_spill] sm:$0xff] %v7260_v54  ;;  %v7263_v44 = vmul.f32 0.2, %v6988_v59  ;;  %vm3671_vm10 = vcmp.gt.f32.partialorder %v6972_v19, 0.0  ;;  %vm3675_vm11 = vcmp.gt.f32.partialorder %v6988_v59, 0.0  ;;  %v7363_v25 = vsel %vm3652_vm15, %v6896_v33, %v7144_v9 }
 0x3fc   :  { %v7294_v22 = vmul.f32 0.2, %v7004_v36  ;;  %v7297_v13 = vmul.f32 0.2, %v7008_v51  ;;  %8038 = vst [vmem:[#allocation45_spill] sm:$0xff] %v7306_v41  ;;  %v8040_v3 = vld [vmem:[#allocation4_spill] sm:$0xff]  ;;  %v7376_v33 = vsel %vm3653_vm0, %v6900_v21, %v7147_v5 }
 0x3fd   :  { %8030 = vst [vmem:[#allocation38_spill] sm:$0xff] %v7263_v44  ;;  %v8032_v44 = vld [vmem:[#allocation3_spill] sm:$0xff]  ;;  %v7313_v43 = vmul.f32 0.2, %v7016_v45  ;;  %8044 = vst [vmem:[#allocation47_spill] sm:$0xff] %v7325_v49  ;;  %vm3679_vm12 = vcmp.gt.f32.partialorder %v7004_v36, 0.0 }
 0x3fe   :  { %v7281_v54 = vmul.f32 0.2, %v8032_v44  ;;  %8035 = vst [vmem:[#allocation42_spill] sm:$0xff] %v7294_v22  ;;  %8036 = vst [vmem:[#allocation43_spill] sm:$0xff] %v7297_v13  ;;  %v7316_v13 = vmul.f32 0.2, %v8040_v3 }
 0x3ff   :  { %8039 = vst [vmem:[#allocation46_spill] sm:$0xff] %v7313_v43  ;;  %v8045_v42 = vld [vmem:[#allocation6_spill] sm:$0xff]  ;;  %8050 = vst [vmem:[#allocation49_spill] sm:$0xff] %v7344_v58  ;;  %vm3683_vm13 = vcmp.gt.f32.partialorder %v8040_v3, 0.0  ;;  %v7351_v27 = vmul.f32 0.2, %v7040_v8 }
 0x400   :  { %8033 = vst [vmem:[#allocation40_spill] sm:$0xff] %v7281_v54  ;;  %v7300_v54 = vmul.f32 0.2, %v7012_v61  ;;  %8041 = vst [vmem:[#allocation4_spill] sm:$0xff] %v7316_v13  ;;  %v7332_v41 = vmul.f32 0.2, %v8045_v42 }
 0x401   :  { %v8046_v13 = vld [vmem:[#allocation7_spill] sm:$0xff]  ;;  %8051 = vst [vmem:[#allocation50_spill] sm:$0xff] %v7351_v27  ;;  %v7354_v49 = vmul.f32 0.2, %v7044_v26  ;;  %8054 = vst [vmem:[#allocation53_spill] sm:$0xff] %v7363_v25  ;;  %v8055_v52 = vld [vmem:[#allocation13_spill] sm:$0xff] }
 0x402   :  { %8037 = vst [vmem:[#allocation44_spill] sm:$0xff] %v7300_v54  ;;  %v8042_v54 = vld [vmem:[#allocation5_spill] sm:$0xff]  ;;  %v7335_v43 = vmul.f32 0.2, %v8046_v13  ;;  %v3755_v58 = vmul.f32 0.2, %v8055_v52 }
 0x403   :  { %v7319_v22 = vmul.f32 0.2, %v8042_v54  ;;  %8052 = vst [vmem:[#allocation51_spill] sm:$0xff] %v7354_v49  ;;  %v8056_v49 = vld [vmem:[#allocation15_spill] sm:$0xff]  ;;  %v8057_v13 = vld [vmem:[#allocation16_spill] sm:$0xff]  ;;  %8058 = vst [vmem:[#allocation54_spill] sm:$0xff] %v7376_v33 }
 0x404   :  { %8047 = vst [vmem:[#allocation6_spill] sm:$0xff] %v7335_v43  ;;  %v3756_v27 = vmul.f32 0.2, %v8056_v49  ;;  %vm3691_vm15 = vcmp.gt.f32.partialorder %v8055_v52, 0.0  ;;  %v8059_v9 = vld [vmem:[#allocation18_spill] sm:$0xff]  ;;  %v8061_v8 = vld [vmem:[#allocation20_spill] sm:$0xff] }
 0x405   :  { %8043 = vst [vmem:[#allocation5_spill] sm:$0xff] %v7319_v22  ;;  %v8048_v22 = vld [vmem:[#allocation8_spill] sm:$0xff]  ;;  %v3758_v25 = vmul.f32 0.2, %v8059_v9  ;;  %v8062_v43 = vld [vmem:[#allocation31_spill] sm:$0xff]  ;;  %v8064_v5 = vld [vmem:[#allocation21_spill] sm:$0xff] }
 0x406   :  { %v7338_v44 = vmul.f32 0.2, %v8048_v22  ;;  %vm3687_vm14 = vcmp.gt.f32.partialorder %v8048_v22, 0.0  ;;  %v3760_v22 = vmul.f32 0.2, %v8061_v8  ;;  %v7389_v21 = vsel %vm3654_vm1, %v6904_v31, %v8062_v43  ;;  %v8065_v33 = vld [vmem:[#allocation24_spill] sm:$0xff] }
 0x407   :  { %vm3697_vm4 = vcmp.gt.f32.partialorder %v8064_v5, 0.0  ;;  %v3761_v9 = vmul.f32 0.2, %v8064_v5  ;;  %v8066_v49 = vld [vmem:[#allocation26_spill] sm:$0xff]  ;;  %v7402_v31 = vsel %vm3655_vm2, %v6908_v39, %v7159_v62  ;;  %v8067_v43 = vld [vmem:[#allocation27_spill] sm:$0xff]  ;;  %v7411_v5 = vsel %vm3656_vm3, %v6912_v46, %v7162_v18 }
 0x408   :  { %8049 = vst [vmem:[#allocation48_spill] sm:$0xff] %v7338_v44  ;;  %v7357_v44 = vmul.f32 0.2, %v7048_v4  ;;  %v8060_v4 = vld [vmem:[#allocation19_spill] sm:$0xff]  ;;  %v3763_v52 = vmul.f32 0.2, %v8066_v49  ;;  %v7429_v62 = vsel %vm3659_vm6, %v6924_v63, %v7177_v55 }
 0x409   :  { %v3759_v26 = vmul.f32 0.2, %v8060_v4  ;;  %8063 = vst [vmem:[#allocation19_spill] sm:$0xff] %v7389_v21  ;;  %vm3695_vm0 = vcmp.gt.f32.partialorder %v8060_v4, 0.0  ;;  %vm3699_vm1 = vcmp.gt.f32.partialorder %v8066_v49, 0.0  ;;  %vm3700_vm5 = vcmp.gt.f32.partialorder %v8067_v43, 0.0 }
 0x40a   :  { %8053 = vst [vmem:[#allocation52_spill] sm:$0xff] %v7357_v44  ;;  %v3757_v44 = vmul.f32 0.2, %v8057_v13  ;;  %v3762_v13 = vmul.f32 0.2, %v8065_v33  ;;  %v8068_v33 = vld [vmem:[#allocation14_spill] sm:$0xff] }
 0x40b   :  { %v3764_v21 = vmul.f32 0.2, %v8067_v43  ;;  %vm8069_vm7 = vcmp.gt.f32.partialorder %v6916_v53, 0.0  ;;  %vm8070_vm2 = vcmp.gt.f32.partialorder %v6920_v0, 0.0  ;;  %v8071_v46 = vld [vmem:[#allocation22_spill] sm:$0xff]  ;;  %vm8072_vm3 = vcmp.gt.f32.partialorder %v6928_v6, 0.0 }
 0x40c   :  { %v7417_v8 = vsel %vm8069_vm7, %v6916_v53, %v8068_v33  ;;  %v7423_v39 = vsel %vm8070_vm2, %v6920_v0, %v7174_v60  ;;  %v7435_v18 = vsel %vm8072_vm3, %v6928_v6, %v8071_v46  ;;  %vm8073_vm7 = vcmp.gt.f32.partialorder %v6932_v11, 0.0  ;;  %v8075_v63 = vld [vmem:[#allocation25_spill] sm:$0xff]  ;;  %v8106_v33 = vld [vmem:[#allocation7_spill] sm:$0xff] }
 0x40d   :  { %v7441_v53 = vsel %vm8073_vm7, %v6932_v11, %v7189_v14  ;;  %vm8074_vm2 = vcmp.gt.f32.partialorder %v6936_v17, 0.0  ;;  %v7453_v60 = vsel %vm3663_vm8, %v6940_v23, %v8075_v63  ;;  %vm8076_vm6 = vcmp.gt.f32.partialorder %v6944_v28, 0.0  ;;  %v8109_v63 = vld [vmem:[#allocation8_spill] sm:$0xff] }
 0x40e   :  { %v7447_v0 = vsel %vm8074_vm2, %v6936_v17, %v7192_v35  ;;  %v7459_v6 = vsel %vm8076_vm6, %v6944_v28, %v7204_v56  ;;  %vm8077_vm3 = vcmp.gt.f32.partialorder %v6948_v34, 0.0  ;;  %vm8078_vm7 = vcmp.gt.f32.partialorder %v6952_v40, 0.0  ;;  %v8092_v35 = vld [vmem:[#allocation3_spill] sm:$0xff] }
 0x40f   :  { %v7465_v11 = vsel %vm8077_vm3, %v6948_v34, %v7207_v1  ;;  %v7471_v17 = vsel %vm8078_vm7, %v6952_v40, %v7210_v16  ;;  %v7477_v23 = vsel %vm3667_vm9, %v6956_v48, %v7221_v30  ;;  %vm8079_vm8 = vcmp.gt.f32.partialorder %v6960_v57, 0.0  ;;  %v8080_v34 = vld [vmem:[#allocation33_spill] sm:$0xff] }
 0x410   :  { %v7483_v28 = vsel %vm8079_vm8, %v6960_v57, %v7224_v10  ;;  %vm8081_vm2 = vcmp.gt.f32.partialorder %v6964_v2, 0.0  ;;  %vm8082_vm6 = vcmp.gt.f32.partialorder %v6968_v12, 0.0  ;;  %v7501_v48 = vsel %vm3671_vm10, %v6972_v19, %v7242_v38  ;;  %v8083_v57 = vld [vmem:[#allocation35_spill] sm:$0xff]  ;;  %v8088_v19 = vld [vmem:[#allocation38_spill] sm:$0xff] }
 0x411   :  { %v7489_v55 = vsel %vm8081_vm2, %v6964_v2, %v8080_v34  ;;  %v7495_v40 = vsel %vm8082_vm6, %v6968_v12, %v7239_v32  ;;  %vm8084_vm9 = vcmp.gt.f32.partialorder %v6976_v29, 0.0  ;;  %vm8085_vm3 = vcmp.gt.f32.partialorder %v6980_v37, 0.0  ;;  %v8086_v12 = vld [vmem:[#allocation37_spill] sm:$0xff]  ;;  %v8099_v32 = vld [vmem:[#allocation46_spill] sm:$0xff] }
 0x412   :  { %v7507_v16 = vsel %vm8084_vm9, %v6976_v29, %v8083_v57  ;;  %v7513_v2 = vsel %vm8085_vm3, %v6980_v37, %v7257_v47  ;;  %vm8087_vm7 = vcmp.gt.f32.partialorder %v6984_v50, 0.0  ;;  %v7525_v38 = vsel %vm3675_vm11, %v6988_v59, %v8088_v19  ;;  %v8094_v59 = vld [vmem:[#allocation42_spill] sm:$0xff] }
 0x413   :  { %v7519_v14 = vsel %vm8087_vm7, %v6984_v50, %v8086_v12  ;;  %vm8089_vm10 = vcmp.gt.f32.partialorder %v6992_v7, 0.0  ;;  %vm8090_vm8 = vcmp.gt.f32.partialorder %v6996_v15, 0.0  ;;  %v8091_v50 = vld [vmem:[#allocation40_spill] sm:$0xff]  ;;  %vm8093_vm2 = vcmp.gt.f32.partialorder %v8092_v35, 0.0  ;;  %v8111_v57 = vld [vmem:[#allocation10_spill] sm:$0xff] }
 0x414   :  { %v7531_v29 = vsel %vm8089_vm10, %v6992_v7, %v7275_v24  ;;  %v7537_v37 = vsel %vm8090_vm8, %v6996_v15, %v7278_v20  ;;  %v7543_v56 = vsel %vm8093_vm2, %v8092_v35, %v8091_v50  ;;  %v7549_v1 = vsel %vm3679_vm12, %v7004_v36, %v8094_v59  ;;  %v8095_v7 = vld [vmem:[#allocation43_spill] sm:$0xff]  ;;  %v8097_v15 = vld [vmem:[#allocation44_spill] sm:$0xff] }
 0x415   :  { %vm8096_vm11 = vcmp.gt.f32.partialorder %v7008_v51, 0.0  ;;  %vm8098_vm6 = vcmp.gt.f32.partialorder %v7012_v61, 0.0  ;;  %vm8100_vm9 = vcmp.gt.f32.partialorder %v7016_v45, 0.0  ;;  %v8101_v36 = vld [vmem:[#allocation4_spill] sm:$0xff]  ;;  %vm8103_vm12 = vcmp.gt.f32.partialorder %v8042_v54, 0.0 }
 0x416   :  { %v7555_v30 = vsel %vm8096_vm11, %v7008_v51, %v8095_v7  ;;  %v7561_v10 = vsel %vm8098_vm6, %v7012_v61, %v8097_v15  ;;  %v7567_v20 = vsel %vm8100_vm9, %v7016_v45, %v8099_v32  ;;  %v7573_v47 = vsel %vm3683_vm13, %v8040_v3, %v8101_v36  ;;  %v8102_v51 = vld [vmem:[#allocation5_spill] sm:$0xff]  ;;  %v8105_v45 = vld [vmem:[#allocation6_spill] sm:$0xff]  ;;  %v8108_v3 = vld [vmem:[#allocation48_spill] sm:$0xff] }
 0x417   :  { %v7579_v24 = vsel %vm8103_vm12, %v8042_v54, %v8102_v51  ;;  %vm8104_vm3 = vcmp.gt.f32.partialorder %v8045_v42, 0.0  ;;  %vm8107_vm7 = vcmp.gt.f32.partialorder %v8106_v33, 0.0  ;;  %v7597_v34 = vsel %vm3687_vm14, %v8109_v63, %v8108_v3  ;;  %v8110_v54 = vld [vmem:[#allocation50_spill] sm:$0xff]  ;;  %v8116_v50 = vld [vmem:[#allocation52_spill] sm:$0xff]  ;;  %v8119_v7 = vld [vmem:[#allocation13_spill] sm:$0xff] }
 0x418   :  { %v7585_v61 = vsel %vm8104_vm3, %v8045_v42, %v7332_v41  ;;  %v7591_v46 = vsel %vm8107_vm7, %v8106_v33, %v8105_v45  ;;  %vm8112_vm13 = vcmp.gt.f32.partialorder %v8111_v57, 0.0  ;;  %v8113_v41 = vld [vmem:[#allocation51_spill] sm:$0xff]  ;;  %v8117_v35 = vld [vmem:[#allocation12_spill] sm:$0xff]  ;;  %v7620_v15 = vsel %vm3691_vm15, %v8119_v7, %v3755_v58  ;;  %v8124_v33 = vld [vmem:[#allocation18_spill] sm:$0xff] }
 0x419   :  { %v7603_v12 = vsel %vm8112_vm13, %v8111_v57, %v8110_v54  ;;  %v8114_v42 = vld [vmem:[#allocation11_spill] sm:$0xff]  ;;  %vm8118_vm8 = vcmp.gt.f32.partialorder %v8117_v35, 0.0  ;;  %v8122_v51 = vld [vmem:[#allocation16_spill] sm:$0xff]  ;;  %vm8125_vm11 = vcmp.gt.f32.partialorder %v8124_v33, 0.0  ;;  %v7640_v58 = vsel %vm3695_vm0, %v8060_v4, %v3759_v26  ;;  %v8128_v54 = vld [vmem:[#allocation21_spill] sm:$0xff] }
 0x41a   :  { %vm8115_vm10 = vcmp.gt.f32.partialorder %v8114_v42, 0.0  ;;  %v7615_v59 = vsel %vm8118_vm8, %v8117_v35, %v8116_v50  ;;  %v8120_v32 = vld [vmem:[#allocation15_spill] sm:$0xff]  ;;  %vm8123_vm2 = vcmp.gt.f32.partialorder %v8122_v51, 0.0  ;;  %v7635_v3 = vsel %vm8125_vm11, %v8124_v33, %v3758_v25  ;;  %v8126_v63 = vld [vmem:[#allocation20_spill] sm:$0xff]  ;;  %v8136_v50 = vld [vmem:[#allocation9_spill] sm:$0xff] }
 0x41b   :  { %v7609_v19 = vsel %vm8115_vm10, %v8114_v42, %v8113_v41  ;;  %vm8121_vm14 = vcmp.gt.f32.partialorder %v8120_v32, 0.0  ;;  %v7630_v45 = vsel %vm8123_vm2, %v8122_v51, %v3757_v44  ;;  %vm8127_vm15 = vcmp.gt.f32.partialorder %v8126_v63, 0.0  ;;  %v8129_v57 = vld [vmem:[#allocation24_spill] sm:$0xff]  ;;  %v8134_v41 = vld [vmem:[#allocation29_spill] sm:$0xff]  ;;  %v8139_v51 = vld [vmem:[#allocation2_spill] sm:$0xff] }
 0x41c   :  { %v7625_v36 = vsel %vm8121_vm14, %v8120_v32, %v3756_v27  ;;  %v7645_v27 = vsel %vm8127_vm15, %v8126_v63, %v3760_v22  ;;  %v7650_v44 = vsel %vm3697_vm4, %v8128_v54, %v3761_v9  ;;  %vm8130_vm6 = vcmp.gt.f32.partialorder %v8129_v57, 0.0  ;;  %v8133_v22 = vld [vmem:[#allocation28_spill] sm:$0xff]  ;;  %v8135_v9 = vld [vmem:[#allocation30_spill] sm:$0xff]  ;;  %v8137_v7 = vld [vmem:[#allocation17_spill] sm:$0xff] }
 0x41d   :  { %v7655_v25 = vsel %vm8130_vm6, %v8129_v57, %v3762_v13  ;;  %v7660_v26 = vsel %vm3699_vm1, %v8066_v49, %v3763_v52  ;;  %v7665_v4 = vsel %vm3700_vm5, %v8067_v43, %v3764_v21  ;;  %v4604_v42 = vpack.c.bf16 %v8134_v41, %v8133_v22  ;;  %v8138_v32 = vld [vmem:[#allocation23_spill] sm:$0xff]  ;;  %v8140_v33 = vld [vmem:[#allocation32_spill] sm:$0xff]  ;;  %v8141_v54 = vld [vmem:[#allocation34_spill] sm:$0xff] }
 0x41e   :  { %8131 = vst [vmem:[#allocation31_spill] sm:$0xff] %v7655_v25  ;;  %8132 = vst [vmem:[#allocation26_spill] sm:$0xff] %v7660_v26  ;;  %v4609_v35 = vpack.c.bf16 %v8136_v50, %v8135_v9  ;;  %v4614_v13 = vpack.c.bf16 %v8138_v32, %v8137_v7  ;;  %v4619_v63 = vpack.c.bf16 %v8140_v33, %v8139_v51  ;;  %v8142_v49 = vld [vmem:[#allocation36_spill] sm:$0xff]  ;;  %v8143_v57 = vld [vmem:[#allocation39_spill] sm:$0xff] }
 0x41f   :  { %v4624_v52 = vpack.c.bf16 %v8142_v49, %v8141_v54  ;;  %v8144_v26 = vld [vmem:[#allocation41_spill] sm:$0xff]  ;;  %4605 = vst [vmem:[%s7831_s4] sm:$0xff] %v4604_v42   ;;  %v8146_v43 = vld [vmem:[#allocation47_spill] sm:$0xff]  ;;  %v8149_v7 = vld [vmem:[#allocation54_spill] sm:$0xff]  ;;  %v4654_v42 = vpack.c.bf16 %v7423_v39, %v7417_v8  ;;  %v4674_v8 = vpack.c.bf16 %v7471_v17, %v7465_v11  ;;  %v4679_v39 = vpack.c.bf16 %v7483_v28, %v7477_v23 }
 0x420   :  { %v4629_v25 = vpack.c.bf16 %v8144_v26, %v8143_v57  ;;  %4761 = vst [vmem:[%s7831_s4 + $0x8] sm:$0xff] %v4609_v35   ;;  %v8145_v21 = vld [vmem:[#allocation45_spill] sm:$0xff]  ;;  %v8150_v32 = vld [vmem:[#allocation19_spill] sm:$0xff]  ;;  %v4649_v26 = vpack.c.bf16 %v7411_v5, %v7402_v31  ;;  %4762 = vst [vmem:[%s7831_s4 + $0x10] sm:$0xff] %v4614_v13   ;;  %v4659_v5 = vpack.c.bf16 %v7435_v18, %v7429_v62 }
 0x421   :  { %v4634_v22 = vpack.c.bf16 %v8146_v43, %v8145_v21  ;;  %v8147_v41 = vld [vmem:[#allocation49_spill] sm:$0xff]  ;;  %v4644_v51 = vpack.c.bf16 %v8150_v32, %v8149_v7  ;;  %4763 = vst [vmem:[%s7831_s4 + $0x18] sm:$0xff] %v4619_v63   ;;  %4764 = vst [vmem:[%s7831_s4 + $0x20] sm:$0xff] %v4624_v52   ;;  %v4664_v31 = vpack.c.bf16 %v7447_v0, %v7441_v53 }
 0x422   :  { %v8148_v9 = vld [vmem:[#allocation53_spill] sm:$0xff]  ;;  %4765 = vst [vmem:[%s7831_s4 + $0x28] sm:$0xff] %v4629_v25   ;;  %v4669_v35 = vpack.c.bf16 %v7459_v6, %v7453_v60  ;;  %4769 = vst [vmem:[%s7831_s4 + $0x48] sm:$0xff] %v4649_v26   ;;  %v4684_v62 = vpack.c.bf16 %v7495_v40, %v7489_v55  ;;  %v4689_v18 = vpack.c.bf16 %v7507_v16, %v7501_v48 }
 0x423   :  { %v4639_v50 = vpack.c.bf16 %v8148_v9, %v8147_v41  ;;  %4766 = vst [vmem:[%s7831_s4 + $0x30] sm:$0xff] %v4634_v22   ;;  %4768 = vst [vmem:[%s7831_s4 + $0x40] sm:$0xff] %v4644_v51   ;;  %v4694_v53 = vpack.c.bf16 %v7519_v14, %v7513_v2  ;;  %v4699_v0 = vpack.c.bf16 %v7531_v29, %v7525_v38 }
 0x424   :  { %4770 = vst [vmem:[%s7831_s4 + $0x50] sm:$0xff] %v4654_v42   ;;  %4771 = vst [vmem:[%s7831_s4 + $0x58] sm:$0xff] %v4659_v5   ;;  %v4704_v60 = vpack.c.bf16 %v7543_v56, %v7537_v37  ;;  %v4709_v6 = vpack.c.bf16 %v7555_v30, %v7549_v1  ;;  %v4714_v11 = vpack.c.bf16 %v7567_v20, %v7561_v10 }
 0x425   :  { %4767 = vst [vmem:[%s7831_s4 + $0x38] sm:$0xff] %v4639_v50   ;;  %4772 = vst [vmem:[%s7831_s4 + $0x60] sm:$0xff] %v4664_v31   ;;  %v4719_v17 = vpack.c.bf16 %v7579_v24, %v7573_v47  ;;  %v4724_v23 = vpack.c.bf16 %v7591_v46, %v7585_v61  ;;  %v4729_v28 = vpack.c.bf16 %v7603_v12, %v7597_v34  ;;  %v8151_v2 = vld [vmem:[#allocation31_spill] sm:$0xff]  ;;  %v8152_v38 = vld [vmem:[#allocation26_spill] sm:$0xff] }
 0x426   :  { %4773 = vst [vmem:[%s7831_s4 + $0x68] sm:$0xff] %v4669_v35   ;;  %4774 = vst [vmem:[%s7831_s4 + $0x70] sm:$0xff] %v4674_v8   ;;  %v4734_v55 = vpack.c.bf16 %v7615_v59, %v7609_v19  ;;  %v4739_v40 = vpack.c.bf16 %v7625_v36, %v7620_v15  ;;  %v4744_v48 = vpack.c.bf16 %v7635_v3, %v7630_v45 }
 0x427   :  { %4775 = vst [vmem:[%s7831_s4 + $0x78] sm:$0xff] %v4679_v39   ;;  %4776 = vst [vmem:[%s7831_s4 + $0x80] sm:$0xff] %v4684_v62   ;;  %v4749_v16 = vpack.c.bf16 %v7645_v27, %v7640_v58  ;;  %v4754_v14 = vpack.c.bf16 %v8151_v2, %v7650_v44  ;;  %v4759_v29 = vpack.c.bf16 %v7665_v4, %v8152_v38 }
 0x428   :  { %4777 = vst [vmem:[%s7831_s4 + $0x88] sm:$0xff] %v4689_v18   ;;  %4778 = vst [vmem:[%s7831_s4 + $0x90] sm:$0xff] %v4694_v53  }
 0x429   :  { %4779 = vst [vmem:[%s7831_s4 + $0x98] sm:$0xff] %v4699_v0   ;;  %4780 = vst [vmem:[%s7831_s4 + $0xa0] sm:$0xff] %v4704_v60  }
 0x42a   :  { %4781 = vst [vmem:[%s7831_s4 + $0xa8] sm:$0xff] %v4709_v6   ;;  %4782 = vst [vmem:[%s7831_s4 + $0xb0] sm:$0xff] %v4714_v11  }
 0x42b   :  { %4783 = vst [vmem:[%s7831_s4 + $0xb8] sm:$0xff] %v4719_v17   ;;  %4784 = vst [vmem:[%s7831_s4 + $0xc0] sm:$0xff] %v4724_v23  }
 0x42c   :  { %4785 = vst [vmem:[%s7831_s4 + $0xc8] sm:$0xff] %v4729_v28   ;;  %4786 = vst [vmem:[%s7831_s4 + $0xd0] sm:$0xff] %v4734_v55  }
 0x42d   :  { %4787 = vst [vmem:[%s7831_s4 + $0xd8] sm:$0xff] %v4739_v40   ;;  %4788 = vst [vmem:[%s7831_s4 + $0xe0] sm:$0xff] %v4744_v48  }
 0x42e   :  { %4789 = vst [vmem:[%s7831_s4 + $0xe8] sm:$0xff] %v4749_v16   ;;  %4790 = vst [vmem:[%s7831_s4 + $0xf0] sm:$0xff] %v4754_v14  }
 0x42f   :  { %4791 = vst [vmem:[%s7831_s4 + $0xf8] sm:$0xff] %v4759_v29  }

// kernel: discriminator_forward.6
= control target key start
LH: loop header
LB: loop body
LE: loop exit
PB: predicated region body
PF: predicated region fallthrough
CT: control target
= control target key end

     0   :  { %s5350_s15 = smov 0   ;;  %s5352_s16 = smov 0   ;;  %s6756_s0 = inlined_call_operand.vmem [shape: bf16[128,2048], index: 0, kind: input, shape index: {}]   ;;  %s6757_s1 = inlined_call_operand.vmem [shape: bf16[2048,256], index: 1, kind: input, shape index: {}]   ;;  %s6758_s2 = inlined_call_operand.vmem [shape: f32[1,256], index: 2, kind: input, shape index: {}]   ;;  %s6759_s3 = inlined_call_operand.vmem [shape: f32[1,256], index: 3, kind: input, shape index: {}]   ;;  %s6760_s4 = inlined_call_operand.vmem [shape: bf16[128,256], index: 4, kind: output, shape index: {}]  }
   0x1   :  { %s5354_s17 = smov 0  }
   0x2 LB: > { %s5366_s18 = sadd.s32 4294967295, %s5323_s17   ;;  %s5369_s19 = sadd.s32 1, %s5323_s17   ;;  %s5323_s17 = sphi %s5354_s17, %s6764_s17   ;;  %s5319_s16 = sphi %s5352_s16, %s6763_s16   ;;  %s5315_s15 = sphi %s5350_s15, %s6762_s15  }
   0x3   : > { %s39_s20 = ssub.s32 %s5323_s17, %s5369_s19  ;;  %s42_s21 = sadd.s32 1, %s5319_s16 }
   0x4   : > { %p40_p0 = scmp.eq.s32.totalorder %s39_s20, 0  ;;  %p49_p1 = scmp.ne.s32.totalorder %s5319_s16, %s5315_s15 }
   0x5   : > { %p50_p2 = scmp.eq.s32.totalorder %s5323_s17, 0  ;;  %p131_p3 = scmp.eq.s32.totalorder %s5366_s18, 1 }
   0x6   : > { %s5379_s22 = scalar_select %p40_p0, %s5319_s16, %s42_s21  }
   0x7   : > { %p51_p4 = por %p50_p2, %p49_p1  ;;  %p5381_p5 = por %p131_p3, %p49_p1 }
   0x8   : > { %p4290_p6 = scmp.ge.s32.totalorder %s5323_s17, 2 }
   0xa   : > { %156 = sbr.rel (%p4290_p6) target bundleno = 191 (0xbf), region = 20 }
  0x11   : > { %159 = sbr.rel (!%p51_p4) target bundleno = 191 (0xbf), region = 24  ;;  %s161_s24 = sand.u32 (%p51_p4), 1, %s5319_s16  }
  0x12   : > { %s4292_s25 = sshll.u32 (%p51_p4), %s5323_s17, 2  ;;  %s4291_s26 = sshll.u32 (%p51_p4), %s161_s24, 10 }
  0x13   : > { %s5391_s29 = scalar_lea.vmem (%p51_p4), %s6757_s1, %s4292_s25  ;;  %s5395_s30 = scalar_lea.vmem (%p51_p4), [#allocation2], %s4291_s26 }
  0x14   : > { %v181_v0 = vld [vmem:[%s5391_s29] sm:$0xf] (%p51_p4)  ;;  %v183_v1 = vld [vmem:[%s5391_s29 + $0x8] sm:$0xf] (%p51_p4)  ;;  %v185_v2 = vld [vmem:[%s5391_s29 + $0x10] sm:$0xf] (%p51_p4) }
  0x15   : > { %182 = vst [vmem:[%s5395_s30] sm:$0xf] (%p51_p4), %v181_v0  ;;  %184 = vst [vmem:[%s5395_s30 + $0x4] sm:$0xf] (%p51_p4), %v183_v1  ;;  %v187_v3 = vld [vmem:[%s5391_s29 + $0x18] sm:$0xf] (%p51_p4) }
  0x16   : > { %v189_v4 = vld [vmem:[%s5391_s29 + $0x20] sm:$0xf] (%p51_p4)  ;;  %186 = vst [vmem:[%s5395_s30 + $0x8] sm:$0xf] (%p51_p4), %v185_v2  ;;  %188 = vst [vmem:[%s5395_s30 + $0xc] sm:$0xf] (%p51_p4), %v187_v3 }
  0x17   : > { %190 = vst [vmem:[%s5395_s30 + $0x10] sm:$0xf] (%p51_p4), %v189_v4  ;;  %v191_v5 = vld [vmem:[%s5391_s29 + $0x28] sm:$0xf] (%p51_p4)  ;;  %v193_v6 = vld [vmem:[%s5391_s29 + $0x30] sm:$0xf] (%p51_p4) }
  0x18   : > { %v195_v7 = vld [vmem:[%s5391_s29 + $0x38] sm:$0xf]  ;;  %192 = vst [vmem:[%s5395_s30 + $0x14] sm:$0xf] %v191_v5  ;;  %194 = vst [vmem:[%s5395_s30 + $0x18] sm:$0xf] %v193_v6 }
  0x19   : > { %196 = vst [vmem:[%s5395_s30 + $0x1c] sm:$0xf] %v195_v7  ;;  %v197_v8 = vld [vmem:[%s5391_s29 + $0x40] sm:$0xf]  ;;  %v199_v9 = vld [vmem:[%s5391_s29 + $0x48] sm:$0xf] }
  0x1a   : > { %v201_v10 = vld [vmem:[%s5391_s29 + $0x50] sm:$0xf]  ;;  %198 = vst [vmem:[%s5395_s30 + $0x20] sm:$0xf] %v197_v8  ;;  %200 = vst [vmem:[%s5395_s30 + $0x24] sm:$0xf] %v199_v9 }
  0x1b   : > { %202 = vst [vmem:[%s5395_s30 + $0x28] sm:$0xf] %v201_v10  ;;  %v203_v11 = vld [vmem:[%s5391_s29 + $0x58] sm:$0xf]  ;;  %v205_v12 = vld [vmem:[%s5391_s29 + $0x60] sm:$0xf] }
  0x1c   : > { %v207_v13 = vld [vmem:[%s5391_s29 + $0x68] sm:$0xf]  ;;  %204 = vst [vmem:[%s5395_s30 + $0x2c] sm:$0xf] %v203_v11  ;;  %206 = vst [vmem:[%s5395_s30 + $0x30] sm:$0xf] %v205_v12 }
  0x1d   : > { %208 = vst [vmem:[%s5395_s30 + $0x34] sm:$0xf] %v207_v13  ;;  %v209_v14 = vld [vmem:[%s5391_s29 + $0x70] sm:$0xf]  ;;  %v211_v15 = vld [vmem:[%s5391_s29 + $0x78] sm:$0xf] }
  0x1e   : > { %v213_v16 = vld [vmem:[%s5391_s29 + $0x80] sm:$0xf]  ;;  %210 = vst [vmem:[%s5395_s30 + $0x38] sm:$0xf] %v209_v14  ;;  %212 = vst [vmem:[%s5395_s30 + $0x3c] sm:$0xf] %v211_v15 }
  0x1f   : > { %214 = vst [vmem:[%s5395_s30 + $0x40] sm:$0xf] %v213_v16  ;;  %v215_v17 = vld [vmem:[%s5391_s29 + $0x88] sm:$0xf]  ;;  %v217_v18 = vld [vmem:[%s5391_s29 + $0x90] sm:$0xf] }
  0x20   : > { %v219_v19 = vld [vmem:[%s5391_s29 + $0x98] sm:$0xf]  ;;  %216 = vst [vmem:[%s5395_s30 + $0x44] sm:$0xf] %v215_v17  ;;  %218 = vst [vmem:[%s5395_s30 + $0x48] sm:$0xf] %v217_v18 }
  0x21   : > { %220 = vst [vmem:[%s5395_s30 + $0x4c] sm:$0xf] %v219_v19  ;;  %v221_v20 = vld [vmem:[%s5391_s29 + $0xa0] sm:$0xf]  ;;  %v223_v21 = vld [vmem:[%s5391_s29 + $0xa8] sm:$0xf] }
  0x22   : > { %v225_v22 = vld [vmem:[%s5391_s29 + $0xb0] sm:$0xf]  ;;  %222 = vst [vmem:[%s5395_s30 + $0x50] sm:$0xf] %v221_v20  ;;  %224 = vst [vmem:[%s5395_s30 + $0x54] sm:$0xf] %v223_v21 }
  0x23   : > { %226 = vst [vmem:[%s5395_s30 + $0x58] sm:$0xf] %v225_v22  ;;  %v227_v23 = vld [vmem:[%s5391_s29 + $0xb8] sm:$0xf]  ;;  %v229_v24 = vld [vmem:[%s5391_s29 + $0xc0] sm:$0xf] }
  0x24   : > { %v231_v25 = vld [vmem:[%s5391_s29 + $0xc8] sm:$0xf]  ;;  %228 = vst [vmem:[%s5395_s30 + $0x5c] sm:$0xf] %v227_v23  ;;  %230 = vst [vmem:[%s5395_s30 + $0x60] sm:$0xf] %v229_v24 }
  0x25   : > { %232 = vst [vmem:[%s5395_s30 + $0x64] sm:$0xf] %v231_v25  ;;  %v233_v26 = vld [vmem:[%s5391_s29 + $0xd0] sm:$0xf]  ;;  %v235_v27 = vld [vmem:[%s5391_s29 + $0xd8] sm:$0xf] }
  0x26   : > { %v237_v28 = vld [vmem:[%s5391_s29 + $0xe0] sm:$0xf]  ;;  %234 = vst [vmem:[%s5395_s30 + $0x68] sm:$0xf] %v233_v26  ;;  %236 = vst [vmem:[%s5395_s30 + $0x6c] sm:$0xf] %v235_v27 }
  0x27   : > { %238 = vst [vmem:[%s5395_s30 + $0x70] sm:$0xf] %v237_v28  ;;  %v239_v29 = vld [vmem:[%s5391_s29 + $0xe8] sm:$0xf]  ;;  %v241_v30 = vld [vmem:[%s5391_s29 + $0xf0] sm:$0xf] }
  0x28   : > { %v243_v31 = vld [vmem:[%s5391_s29 + $0xf8] sm:$0xf]  ;;  %240 = vst [vmem:[%s5395_s30 + $0x74] sm:$0xf] %v239_v29  ;;  %242 = vst [vmem:[%s5395_s30 + $0x78] sm:$0xf] %v241_v30 }
  0x29   : > { %244 = vst [vmem:[%s5395_s30 + $0x7c] sm:$0xf] %v243_v31  ;;  %v245_v32 = vld [vmem:[%s5391_s29 + $0x100] sm:$0xf]  ;;  %v247_v33 = vld [vmem:[%s5391_s29 + $0x108] sm:$0xf] }
  0x2a   : > { %v249_v34 = vld [vmem:[%s5391_s29 + $0x110] sm:$0xf]  ;;  %246 = vst [vmem:[%s5395_s30 + $0x80] sm:$0xf] %v245_v32  ;;  %248 = vst [vmem:[%s5395_s30 + $0x84] sm:$0xf] %v247_v33 }
  0x2b   : > { %250 = vst [vmem:[%s5395_s30 + $0x88] sm:$0xf] %v249_v34  ;;  %v251_v35 = vld [vmem:[%s5391_s29 + $0x118] sm:$0xf]  ;;  %v253_v36 = vld [vmem:[%s5391_s29 + $0x120] sm:$0xf] }
  0x2c   : > { %v255_v37 = vld [vmem:[%s5391_s29 + $0x128] sm:$0xf]  ;;  %252 = vst [vmem:[%s5395_s30 + $0x8c] sm:$0xf] %v251_v35  ;;  %254 = vst [vmem:[%s5395_s30 + $0x90] sm:$0xf] %v253_v36 }
  0x2d   : > { %256 = vst [vmem:[%s5395_s30 + $0x94] sm:$0xf] %v255_v37  ;;  %v257_v38 = vld [vmem:[%s5391_s29 + $0x130] sm:$0xf]  ;;  %v259_v39 = vld [vmem:[%s5391_s29 + $0x138] sm:$0xf] }
  0x2e   : > { %v261_v40 = vld [vmem:[%s5391_s29 + $0x140] sm:$0xf]  ;;  %258 = vst [vmem:[%s5395_s30 + $0x98] sm:$0xf] %v257_v38  ;;  %260 = vst [vmem:[%s5395_s30 + $0x9c] sm:$0xf] %v259_v39 }
  0x2f   : > { %262 = vst [vmem:[%s5395_s30 + $0xa0] sm:$0xf] %v261_v40  ;;  %v263_v41 = vld [vmem:[%s5391_s29 + $0x148] sm:$0xf]  ;;  %v265_v42 = vld [vmem:[%s5391_s29 + $0x150] sm:$0xf] }
  0x30   : > { %v267_v43 = vld [vmem:[%s5391_s29 + $0x158] sm:$0xf]  ;;  %264 = vst [vmem:[%s5395_s30 + $0xa4] sm:$0xf] %v263_v41  ;;  %266 = vst [vmem:[%s5395_s30 + $0xa8] sm:$0xf] %v265_v42 }
  0x31   : > { %268 = vst [vmem:[%s5395_s30 + $0xac] sm:$0xf] %v267_v43  ;;  %v269_v44 = vld [vmem:[%s5391_s29 + $0x160] sm:$0xf]  ;;  %v271_v45 = vld [vmem:[%s5391_s29 + $0x168] sm:$0xf] }
  0x32   : > { %v273_v46 = vld [vmem:[%s5391_s29 + $0x170] sm:$0xf]  ;;  %270 = vst [vmem:[%s5395_s30 + $0xb0] sm:$0xf] %v269_v44  ;;  %272 = vst [vmem:[%s5395_s30 + $0xb4] sm:$0xf] %v271_v45 }
  0x33   : > { %274 = vst [vmem:[%s5395_s30 + $0xb8] sm:$0xf] %v273_v46  ;;  %v275_v47 = vld [vmem:[%s5391_s29 + $0x178] sm:$0xf]  ;;  %v277_v48 = vld [vmem:[%s5391_s29 + $0x180] sm:$0xf] }
  0x34   : > { %v279_v49 = vld [vmem:[%s5391_s29 + $0x188] sm:$0xf]  ;;  %276 = vst [vmem:[%s5395_s30 + $0xbc] sm:$0xf] %v275_v47  ;;  %278 = vst [vmem:[%s5395_s30 + $0xc0] sm:$0xf] %v277_v48 }
  0x35   : > { %280 = vst [vmem:[%s5395_s30 + $0xc4] sm:$0xf] %v279_v49  ;;  %v281_v50 = vld [vmem:[%s5391_s29 + $0x190] sm:$0xf]  ;;  %v283_v51 = vld [vmem:[%s5391_s29 + $0x198] sm:$0xf] }
  0x36   : > { %v285_v52 = vld [vmem:[%s5391_s29 + $0x1a0] sm:$0xf]  ;;  %282 = vst [vmem:[%s5395_s30 + $0xc8] sm:$0xf] %v281_v50  ;;  %284 = vst [vmem:[%s5395_s30 + $0xcc] sm:$0xf] %v283_v51 }
  0x37   : > { %286 = vst [vmem:[%s5395_s30 + $0xd0] sm:$0xf] %v285_v52  ;;  %v287_v53 = vld [vmem:[%s5391_s29 + $0x1a8] sm:$0xf]  ;;  %v289_v54 = vld [vmem:[%s5391_s29 + $0x1b0] sm:$0xf] }
  0x38   : > { %v291_v55 = vld [vmem:[%s5391_s29 + $0x1b8] sm:$0xf]  ;;  %288 = vst [vmem:[%s5395_s30 + $0xd4] sm:$0xf] %v287_v53  ;;  %290 = vst [vmem:[%s5395_s30 + $0xd8] sm:$0xf] %v289_v54 }
  0x39   : > { %292 = vst [vmem:[%s5395_s30 + $0xdc] sm:$0xf] %v291_v55  ;;  %v293_v56 = vld [vmem:[%s5391_s29 + $0x1c0] sm:$0xf]  ;;  %v295_v57 = vld [vmem:[%s5391_s29 + $0x1c8] sm:$0xf] }
  0x3a   : > { %v297_v58 = vld [vmem:[%s5391_s29 + $0x1d0] sm:$0xf]  ;;  %294 = vst [vmem:[%s5395_s30 + $0xe0] sm:$0xf] %v293_v56  ;;  %296 = vst [vmem:[%s5395_s30 + $0xe4] sm:$0xf] %v295_v57 }
  0x3b   : > { %298 = vst [vmem:[%s5395_s30 + $0xe8] sm:$0xf] %v297_v58  ;;  %v299_v59 = vld [vmem:[%s5391_s29 + $0x1d8] sm:$0xf]  ;;  %v301_v60 = vld [vmem:[%s5391_s29 + $0x1e0] sm:$0xf] }
  0x3c   : > { %v303_v61 = vld [vmem:[%s5391_s29 + $0x1e8] sm:$0xf]  ;;  %300 = vst [vmem:[%s5395_s30 + $0xec] sm:$0xf] %v299_v59  ;;  %302 = vst [vmem:[%s5395_s30 + $0xf0] sm:$0xf] %v301_v60 }
  0x3d   : > { %304 = vst [vmem:[%s5395_s30 + $0xf4] sm:$0xf] %v303_v61  ;;  %v305_v62 = vld [vmem:[%s5391_s29 + $0x1f0] sm:$0xf]  ;;  %v307_v63 = vld [vmem:[%s5391_s29 + $0x1f8] sm:$0xf] }
  0x3e   : > { %v309_v0 = vld [vmem:[%s5391_s29 + $0x200] sm:$0xf]  ;;  %306 = vst [vmem:[%s5395_s30 + $0xf8] sm:$0xf] %v305_v62  ;;  %308 = vst [vmem:[%s5395_s30 + $0xfc] sm:$0xf] %v307_v63 }
  0x3f   : > { %310 = vst [vmem:[%s5395_s30 + $0x100] sm:$0xf] %v309_v0  ;;  %v311_v1 = vld [vmem:[%s5391_s29 + $0x208] sm:$0xf]  ;;  %v313_v2 = vld [vmem:[%s5391_s29 + $0x210] sm:$0xf] }
  0x40   : > { %v315_v3 = vld [vmem:[%s5391_s29 + $0x218] sm:$0xf]  ;;  %312 = vst [vmem:[%s5395_s30 + $0x104] sm:$0xf] %v311_v1  ;;  %314 = vst [vmem:[%s5395_s30 + $0x108] sm:$0xf] %v313_v2 }
  0x41   : > { %316 = vst [vmem:[%s5395_s30 + $0x10c] sm:$0xf] %v315_v3  ;;  %v317_v4 = vld [vmem:[%s5391_s29 + $0x220] sm:$0xf]  ;;  %v319_v5 = vld [vmem:[%s5391_s29 + $0x228] sm:$0xf] }
  0x42   : > { %v321_v6 = vld [vmem:[%s5391_s29 + $0x230] sm:$0xf]  ;;  %318 = vst [vmem:[%s5395_s30 + $0x110] sm:$0xf] %v317_v4  ;;  %320 = vst [vmem:[%s5395_s30 + $0x114] sm:$0xf] %v319_v5 }
  0x43   : > { %322 = vst [vmem:[%s5395_s30 + $0x118] sm:$0xf] %v321_v6  ;;  %v323_v7 = vld [vmem:[%s5391_s29 + $0x238] sm:$0xf]  ;;  %v325_v8 = vld [vmem:[%s5391_s29 + $0x240] sm:$0xf] }
  0x44   : > { %v327_v9 = vld [vmem:[%s5391_s29 + $0x248] sm:$0xf]  ;;  %324 = vst [vmem:[%s5395_s30 + $0x11c] sm:$0xf] %v323_v7  ;;  %326 = vst [vmem:[%s5395_s30 + $0x120] sm:$0xf] %v325_v8 }
  0x45   : > { %328 = vst [vmem:[%s5395_s30 + $0x124] sm:$0xf] %v327_v9  ;;  %v329_v10 = vld [vmem:[%s5391_s29 + $0x250] sm:$0xf]  ;;  %v331_v11 = vld [vmem:[%s5391_s29 + $0x258] sm:$0xf] }
  0x46   : > { %v333_v12 = vld [vmem:[%s5391_s29 + $0x260] sm:$0xf]  ;;  %330 = vst [vmem:[%s5395_s30 + $0x128] sm:$0xf] %v329_v10  ;;  %332 = vst [vmem:[%s5395_s30 + $0x12c] sm:$0xf] %v331_v11 }
  0x47   : > { %334 = vst [vmem:[%s5395_s30 + $0x130] sm:$0xf] %v333_v12  ;;  %v335_v13 = vld [vmem:[%s5391_s29 + $0x268] sm:$0xf]  ;;  %v337_v14 = vld [vmem:[%s5391_s29 + $0x270] sm:$0xf] }
  0x48   : > { %v339_v15 = vld [vmem:[%s5391_s29 + $0x278] sm:$0xf]  ;;  %336 = vst [vmem:[%s5395_s30 + $0x134] sm:$0xf] %v335_v13  ;;  %338 = vst [vmem:[%s5395_s30 + $0x138] sm:$0xf] %v337_v14 }
  0x49   : > { %340 = vst [vmem:[%s5395_s30 + $0x13c] sm:$0xf] %v339_v15  ;;  %v341_v16 = vld [vmem:[%s5391_s29 + $0x280] sm:$0xf]  ;;  %v343_v17 = vld [vmem:[%s5391_s29 + $0x288] sm:$0xf] }
  0x4a   : > { %v345_v18 = vld [vmem:[%s5391_s29 + $0x290] sm:$0xf]  ;;  %342 = vst [vmem:[%s5395_s30 + $0x140] sm:$0xf] %v341_v16  ;;  %344 = vst [vmem:[%s5395_s30 + $0x144] sm:$0xf] %v343_v17 }
  0x4b   : > { %346 = vst [vmem:[%s5395_s30 + $0x148] sm:$0xf] %v345_v18  ;;  %v347_v19 = vld [vmem:[%s5391_s29 + $0x298] sm:$0xf]  ;;  %v349_v20 = vld [vmem:[%s5391_s29 + $0x2a0] sm:$0xf] }
  0x4c   : > { %v351_v21 = vld [vmem:[%s5391_s29 + $0x2a8] sm:$0xf]  ;;  %348 = vst [vmem:[%s5395_s30 + $0x14c] sm:$0xf] %v347_v19  ;;  %350 = vst [vmem:[%s5395_s30 + $0x150] sm:$0xf] %v349_v20 }
  0x4d   : > { %352 = vst [vmem:[%s5395_s30 + $0x154] sm:$0xf] %v351_v21  ;;  %v353_v22 = vld [vmem:[%s5391_s29 + $0x2b0] sm:$0xf]  ;;  %v355_v23 = vld [vmem:[%s5391_s29 + $0x2b8] sm:$0xf] }
  0x4e   : > { %v357_v24 = vld [vmem:[%s5391_s29 + $0x2c0] sm:$0xf]  ;;  %354 = vst [vmem:[%s5395_s30 + $0x158] sm:$0xf] %v353_v22  ;;  %356 = vst [vmem:[%s5395_s30 + $0x15c] sm:$0xf] %v355_v23 }
  0x4f   : > { %358 = vst [vmem:[%s5395_s30 + $0x160] sm:$0xf] %v357_v24  ;;  %v359_v25 = vld [vmem:[%s5391_s29 + $0x2c8] sm:$0xf]  ;;  %v361_v26 = vld [vmem:[%s5391_s29 + $0x2d0] sm:$0xf] }
  0x50   : > { %v363_v27 = vld [vmem:[%s5391_s29 + $0x2d8] sm:$0xf]  ;;  %360 = vst [vmem:[%s5395_s30 + $0x164] sm:$0xf] %v359_v25  ;;  %362 = vst [vmem:[%s5395_s30 + $0x168] sm:$0xf] %v361_v26 }
  0x51   : > { %364 = vst [vmem:[%s5395_s30 + $0x16c] sm:$0xf] %v363_v27  ;;  %v365_v28 = vld [vmem:[%s5391_s29 + $0x2e0] sm:$0xf]  ;;  %v367_v29 = vld [vmem:[%s5391_s29 + $0x2e8] sm:$0xf] }
  0x52   : > { %v369_v30 = vld [vmem:[%s5391_s29 + $0x2f0] sm:$0xf]  ;;  %366 = vst [vmem:[%s5395_s30 + $0x170] sm:$0xf] %v365_v28  ;;  %368 = vst [vmem:[%s5395_s30 + $0x174] sm:$0xf] %v367_v29 }
  0x53   : > { %370 = vst [vmem:[%s5395_s30 + $0x178] sm:$0xf] %v369_v30  ;;  %v371_v31 = vld [vmem:[%s5391_s29 + $0x2f8] sm:$0xf]  ;;  %v373_v32 = vld [vmem:[%s5391_s29 + $0x300] sm:$0xf] }
  0x54   : > { %v375_v33 = vld [vmem:[%s5391_s29 + $0x308] sm:$0xf]  ;;  %372 = vst [vmem:[%s5395_s30 + $0x17c] sm:$0xf] %v371_v31  ;;  %374 = vst [vmem:[%s5395_s30 + $0x180] sm:$0xf] %v373_v32 }
  0x55   : > { %376 = vst [vmem:[%s5395_s30 + $0x184] sm:$0xf] %v375_v33  ;;  %v377_v34 = vld [vmem:[%s5391_s29 + $0x310] sm:$0xf]  ;;  %v379_v35 = vld [vmem:[%s5391_s29 + $0x318] sm:$0xf] }
  0x56   : > { %v381_v36 = vld [vmem:[%s5391_s29 + $0x320] sm:$0xf]  ;;  %378 = vst [vmem:[%s5395_s30 + $0x188] sm:$0xf] %v377_v34  ;;  %380 = vst [vmem:[%s5395_s30 + $0x18c] sm:$0xf] %v379_v35 }
  0x57   : > { %382 = vst [vmem:[%s5395_s30 + $0x190] sm:$0xf] %v381_v36  ;;  %v383_v37 = vld [vmem:[%s5391_s29 + $0x328] sm:$0xf]  ;;  %v385_v38 = vld [vmem:[%s5391_s29 + $0x330] sm:$0xf] }
  0x58   : > { %v387_v39 = vld [vmem:[%s5391_s29 + $0x338] sm:$0xf]  ;;  %384 = vst [vmem:[%s5395_s30 + $0x194] sm:$0xf] %v383_v37  ;;  %386 = vst [vmem:[%s5395_s30 + $0x198] sm:$0xf] %v385_v38 }
  0x59   : > { %388 = vst [vmem:[%s5395_s30 + $0x19c] sm:$0xf] %v387_v39  ;;  %v389_v40 = vld [vmem:[%s5391_s29 + $0x340] sm:$0xf]  ;;  %v391_v41 = vld [vmem:[%s5391_s29 + $0x348] sm:$0xf] }
  0x5a   : > { %v393_v42 = vld [vmem:[%s5391_s29 + $0x350] sm:$0xf]  ;;  %390 = vst [vmem:[%s5395_s30 + $0x1a0] sm:$0xf] %v389_v40  ;;  %392 = vst [vmem:[%s5395_s30 + $0x1a4] sm:$0xf] %v391_v41 }
  0x5b   : > { %394 = vst [vmem:[%s5395_s30 + $0x1a8] sm:$0xf] %v393_v42  ;;  %v395_v43 = vld [vmem:[%s5391_s29 + $0x358] sm:$0xf]  ;;  %v397_v44 = vld [vmem:[%s5391_s29 + $0x360] sm:$0xf] }
  0x5c   : > { %v399_v45 = vld [vmem:[%s5391_s29 + $0x368] sm:$0xf]  ;;  %396 = vst [vmem:[%s5395_s30 + $0x1ac] sm:$0xf] %v395_v43  ;;  %398 = vst [vmem:[%s5395_s30 + $0x1b0] sm:$0xf] %v397_v44 }
  0x5d   : > { %400 = vst [vmem:[%s5395_s30 + $0x1b4] sm:$0xf] %v399_v45  ;;  %v401_v46 = vld [vmem:[%s5391_s29 + $0x370] sm:$0xf]  ;;  %v403_v47 = vld [vmem:[%s5391_s29 + $0x378] sm:$0xf] }
  0x5e   : > { %v405_v48 = vld [vmem:[%s5391_s29 + $0x380] sm:$0xf]  ;;  %402 = vst [vmem:[%s5395_s30 + $0x1b8] sm:$0xf] %v401_v46  ;;  %404 = vst [vmem:[%s5395_s30 + $0x1bc] sm:$0xf] %v403_v47 }
  0x5f   : > { %406 = vst [vmem:[%s5395_s30 + $0x1c0] sm:$0xf] %v405_v48  ;;  %v407_v49 = vld [vmem:[%s5391_s29 + $0x388] sm:$0xf]  ;;  %v409_v50 = vld [vmem:[%s5391_s29 + $0x390] sm:$0xf] }
  0x60   : > { %v411_v51 = vld [vmem:[%s5391_s29 + $0x398] sm:$0xf]  ;;  %408 = vst [vmem:[%s5395_s30 + $0x1c4] sm:$0xf] %v407_v49  ;;  %410 = vst [vmem:[%s5395_s30 + $0x1c8] sm:$0xf] %v409_v50 }
  0x61   : > { %412 = vst [vmem:[%s5395_s30 + $0x1cc] sm:$0xf] %v411_v51  ;;  %v413_v52 = vld [vmem:[%s5391_s29 + $0x3a0] sm:$0xf]  ;;  %v415_v53 = vld [vmem:[%s5391_s29 + $0x3a8] sm:$0xf] }
  0x62   : > { %v417_v54 = vld [vmem:[%s5391_s29 + $0x3b0] sm:$0xf]  ;;  %414 = vst [vmem:[%s5395_s30 + $0x1d0] sm:$0xf] %v413_v52  ;;  %416 = vst [vmem:[%s5395_s30 + $0x1d4] sm:$0xf] %v415_v53 }
  0x63   : > { %418 = vst [vmem:[%s5395_s30 + $0x1d8] sm:$0xf] %v417_v54  ;;  %v419_v55 = vld [vmem:[%s5391_s29 + $0x3b8] sm:$0xf]  ;;  %v421_v56 = vld [vmem:[%s5391_s29 + $0x3c0] sm:$0xf] }
  0x64   : > { %v423_v57 = vld [vmem:[%s5391_s29 + $0x3c8] sm:$0xf]  ;;  %420 = vst [vmem:[%s5395_s30 + $0x1dc] sm:$0xf] %v419_v55  ;;  %422 = vst [vmem:[%s5395_s30 + $0x1e0] sm:$0xf] %v421_v56 }
  0x65   : > { %424 = vst [vmem:[%s5395_s30 + $0x1e4] sm:$0xf] %v423_v57  ;;  %v425_v58 = vld [vmem:[%s5391_s29 + $0x3d0] sm:$0xf]  ;;  %v427_v59 = vld [vmem:[%s5391_s29 + $0x3d8] sm:$0xf] }
  0x66   : > { %v429_v60 = vld [vmem:[%s5391_s29 + $0x3e0] sm:$0xf]  ;;  %426 = vst [vmem:[%s5395_s30 + $0x1e8] sm:$0xf] %v425_v58  ;;  %428 = vst [vmem:[%s5395_s30 + $0x1ec] sm:$0xf] %v427_v59 }
  0x67   : > { %430 = vst [vmem:[%s5395_s30 + $0x1f0] sm:$0xf] %v429_v60  ;;  %v431_v61 = vld [vmem:[%s5391_s29 + $0x3e8] sm:$0xf]  ;;  %v433_v62 = vld [vmem:[%s5391_s29 + $0x3f0] sm:$0xf] }
  0x68   : > { %v435_v63 = vld [vmem:[%s5391_s29 + $0x3f8] sm:$0xf]  ;;  %432 = vst [vmem:[%s5395_s30 + $0x1f4] sm:$0xf] %v431_v61  ;;  %434 = vst [vmem:[%s5395_s30 + $0x1f8] sm:$0xf] %v433_v62 }
  0x69   : > { %436 = vst [vmem:[%s5395_s30 + $0x1fc] sm:$0xf] %v435_v63  ;;  %v437_v0 = vld [vmem:[%s5391_s29 + $0x400] sm:$0xf]  ;;  %v439_v1 = vld [vmem:[%s5391_s29 + $0x408] sm:$0xf] }
  0x6a   : > { %v441_v2 = vld [vmem:[%s5391_s29 + $0x410] sm:$0xf]  ;;  %438 = vst [vmem:[%s5395_s30 + $0x200] sm:$0xf] %v437_v0  ;;  %440 = vst [vmem:[%s5395_s30 + $0x204] sm:$0xf] %v439_v1 }
  0x6b   : > { %442 = vst [vmem:[%s5395_s30 + $0x208] sm:$0xf] %v441_v2  ;;  %v443_v3 = vld [vmem:[%s5391_s29 + $0x418] sm:$0xf]  ;;  %v445_v4 = vld [vmem:[%s5391_s29 + $0x420] sm:$0xf] }
  0x6c   : > { %v447_v5 = vld [vmem:[%s5391_s29 + $0x428] sm:$0xf]  ;;  %444 = vst [vmem:[%s5395_s30 + $0x20c] sm:$0xf] %v443_v3  ;;  %446 = vst [vmem:[%s5395_s30 + $0x210] sm:$0xf] %v445_v4 }
  0x6d   : > { %448 = vst [vmem:[%s5395_s30 + $0x214] sm:$0xf] %v447_v5  ;;  %v449_v6 = vld [vmem:[%s5391_s29 + $0x430] sm:$0xf]  ;;  %v451_v7 = vld [vmem:[%s5391_s29 + $0x438] sm:$0xf] }
  0x6e   : > { %v453_v8 = vld [vmem:[%s5391_s29 + $0x440] sm:$0xf]  ;;  %450 = vst [vmem:[%s5395_s30 + $0x218] sm:$0xf] %v449_v6  ;;  %452 = vst [vmem:[%s5395_s30 + $0x21c] sm:$0xf] %v451_v7 }
  0x6f   : > { %454 = vst [vmem:[%s5395_s30 + $0x220] sm:$0xf] %v453_v8  ;;  %v455_v9 = vld [vmem:[%s5391_s29 + $0x448] sm:$0xf]  ;;  %v457_v10 = vld [vmem:[%s5391_s29 + $0x450] sm:$0xf] }
  0x70   : > { %v459_v11 = vld [vmem:[%s5391_s29 + $0x458] sm:$0xf]  ;;  %456 = vst [vmem:[%s5395_s30 + $0x224] sm:$0xf] %v455_v9  ;;  %458 = vst [vmem:[%s5395_s30 + $0x228] sm:$0xf] %v457_v10 }
  0x71   : > { %460 = vst [vmem:[%s5395_s30 + $0x22c] sm:$0xf] %v459_v11  ;;  %v461_v12 = vld [vmem:[%s5391_s29 + $0x460] sm:$0xf]  ;;  %v463_v13 = vld [vmem:[%s5391_s29 + $0x468] sm:$0xf] }
  0x72   : > { %v465_v14 = vld [vmem:[%s5391_s29 + $0x470] sm:$0xf]  ;;  %462 = vst [vmem:[%s5395_s30 + $0x230] sm:$0xf] %v461_v12  ;;  %464 = vst [vmem:[%s5395_s30 + $0x234] sm:$0xf] %v463_v13 }
  0x73   : > { %466 = vst [vmem:[%s5395_s30 + $0x238] sm:$0xf] %v465_v14  ;;  %v467_v15 = vld [vmem:[%s5391_s29 + $0x478] sm:$0xf]  ;;  %v469_v16 = vld [vmem:[%s5391_s29 + $0x480] sm:$0xf] }
  0x74   : > { %v471_v17 = vld [vmem:[%s5391_s29 + $0x488] sm:$0xf]  ;;  %468 = vst [vmem:[%s5395_s30 + $0x23c] sm:$0xf] %v467_v15  ;;  %470 = vst [vmem:[%s5395_s30 + $0x240] sm:$0xf] %v469_v16 }
  0x75   : > { %472 = vst [vmem:[%s5395_s30 + $0x244] sm:$0xf] %v471_v17  ;;  %v473_v18 = vld [vmem:[%s5391_s29 + $0x490] sm:$0xf]  ;;  %v475_v19 = vld [vmem:[%s5391_s29 + $0x498] sm:$0xf] }
  0x76   : > { %v477_v20 = vld [vmem:[%s5391_s29 + $0x4a0] sm:$0xf]  ;;  %474 = vst [vmem:[%s5395_s30 + $0x248] sm:$0xf] %v473_v18  ;;  %476 = vst [vmem:[%s5395_s30 + $0x24c] sm:$0xf] %v475_v19 }
  0x77   : > { %478 = vst [vmem:[%s5395_s30 + $0x250] sm:$0xf] %v477_v20  ;;  %v479_v21 = vld [vmem:[%s5391_s29 + $0x4a8] sm:$0xf]  ;;  %v481_v22 = vld [vmem:[%s5391_s29 + $0x4b0] sm:$0xf] }
  0x78   : > { %v483_v23 = vld [vmem:[%s5391_s29 + $0x4b8] sm:$0xf]  ;;  %480 = vst [vmem:[%s5395_s30 + $0x254] sm:$0xf] %v479_v21  ;;  %482 = vst [vmem:[%s5395_s30 + $0x258] sm:$0xf] %v481_v22 }
  0x79   : > { %484 = vst [vmem:[%s5395_s30 + $0x25c] sm:$0xf] %v483_v23  ;;  %v485_v24 = vld [vmem:[%s5391_s29 + $0x4c0] sm:$0xf]  ;;  %v487_v25 = vld [vmem:[%s5391_s29 + $0x4c8] sm:$0xf] }
  0x7a   : > { %v489_v26 = vld [vmem:[%s5391_s29 + $0x4d0] sm:$0xf]  ;;  %486 = vst [vmem:[%s5395_s30 + $0x260] sm:$0xf] %v485_v24  ;;  %488 = vst [vmem:[%s5395_s30 + $0x264] sm:$0xf] %v487_v25 }
  0x7b   : > { %490 = vst [vmem:[%s5395_s30 + $0x268] sm:$0xf] %v489_v26  ;;  %v491_v27 = vld [vmem:[%s5391_s29 + $0x4d8] sm:$0xf]  ;;  %v493_v28 = vld [vmem:[%s5391_s29 + $0x4e0] sm:$0xf] }
  0x7c   : > { %v495_v29 = vld [vmem:[%s5391_s29 + $0x4e8] sm:$0xf]  ;;  %492 = vst [vmem:[%s5395_s30 + $0x26c] sm:$0xf] %v491_v27  ;;  %494 = vst [vmem:[%s5395_s30 + $0x270] sm:$0xf] %v493_v28 }
  0x7d   : > { %496 = vst [vmem:[%s5395_s30 + $0x274] sm:$0xf] %v495_v29  ;;  %v497_v30 = vld [vmem:[%s5391_s29 + $0x4f0] sm:$0xf]  ;;  %v499_v31 = vld [vmem:[%s5391_s29 + $0x4f8] sm:$0xf] }
  0x7e   : > { %v501_v32 = vld [vmem:[%s5391_s29 + $0x500] sm:$0xf]  ;;  %498 = vst [vmem:[%s5395_s30 + $0x278] sm:$0xf] %v497_v30  ;;  %500 = vst [vmem:[%s5395_s30 + $0x27c] sm:$0xf] %v499_v31 }
  0x7f   : > { %502 = vst [vmem:[%s5395_s30 + $0x280] sm:$0xf] %v501_v32  ;;  %v503_v33 = vld [vmem:[%s5391_s29 + $0x508] sm:$0xf]  ;;  %v505_v34 = vld [vmem:[%s5391_s29 + $0x510] sm:$0xf] }
  0x80   : > { %v507_v35 = vld [vmem:[%s5391_s29 + $0x518] sm:$0xf]  ;;  %504 = vst [vmem:[%s5395_s30 + $0x284] sm:$0xf] %v503_v33  ;;  %506 = vst [vmem:[%s5395_s30 + $0x288] sm:$0xf] %v505_v34 }
  0x81   : > { %508 = vst [vmem:[%s5395_s30 + $0x28c] sm:$0xf] %v507_v35  ;;  %v509_v36 = vld [vmem:[%s5391_s29 + $0x520] sm:$0xf]  ;;  %v511_v37 = vld [vmem:[%s5391_s29 + $0x528] sm:$0xf] }
  0x82   : > { %v513_v38 = vld [vmem:[%s5391_s29 + $0x530] sm:$0xf]  ;;  %510 = vst [vmem:[%s5395_s30 + $0x290] sm:$0xf] %v509_v36  ;;  %512 = vst [vmem:[%s5395_s30 + $0x294] sm:$0xf] %v511_v37 }
  0x83   : > { %514 = vst [vmem:[%s5395_s30 + $0x298] sm:$0xf] %v513_v38  ;;  %v515_v39 = vld [vmem:[%s5391_s29 + $0x538] sm:$0xf]  ;;  %v517_v40 = vld [vmem:[%s5391_s29 + $0x540] sm:$0xf] }
  0x84   : > { %v519_v41 = vld [vmem:[%s5391_s29 + $0x548] sm:$0xf]  ;;  %516 = vst [vmem:[%s5395_s30 + $0x29c] sm:$0xf] %v515_v39  ;;  %518 = vst [vmem:[%s5395_s30 + $0x2a0] sm:$0xf] %v517_v40 }
  0x85   : > { %520 = vst [vmem:[%s5395_s30 + $0x2a4] sm:$0xf] %v519_v41  ;;  %v521_v42 = vld [vmem:[%s5391_s29 + $0x550] sm:$0xf]  ;;  %v523_v43 = vld [vmem:[%s5391_s29 + $0x558] sm:$0xf] }
  0x86   : > { %v525_v44 = vld [vmem:[%s5391_s29 + $0x560] sm:$0xf]  ;;  %522 = vst [vmem:[%s5395_s30 + $0x2a8] sm:$0xf] %v521_v42  ;;  %524 = vst [vmem:[%s5395_s30 + $0x2ac] sm:$0xf] %v523_v43 }
  0x87   : > { %526 = vst [vmem:[%s5395_s30 + $0x2b0] sm:$0xf] %v525_v44  ;;  %v527_v45 = vld [vmem:[%s5391_s29 + $0x568] sm:$0xf]  ;;  %v529_v46 = vld [vmem:[%s5391_s29 + $0x570] sm:$0xf] }
  0x88   : > { %v531_v47 = vld [vmem:[%s5391_s29 + $0x578] sm:$0xf]  ;;  %528 = vst [vmem:[%s5395_s30 + $0x2b4] sm:$0xf] %v527_v45  ;;  %530 = vst [vmem:[%s5395_s30 + $0x2b8] sm:$0xf] %v529_v46 }
  0x89   : > { %532 = vst [vmem:[%s5395_s30 + $0x2bc] sm:$0xf] %v531_v47  ;;  %v533_v48 = vld [vmem:[%s5391_s29 + $0x580] sm:$0xf]  ;;  %v535_v49 = vld [vmem:[%s5391_s29 + $0x588] sm:$0xf] }
  0x8a   : > { %v537_v50 = vld [vmem:[%s5391_s29 + $0x590] sm:$0xf]  ;;  %534 = vst [vmem:[%s5395_s30 + $0x2c0] sm:$0xf] %v533_v48  ;;  %536 = vst [vmem:[%s5395_s30 + $0x2c4] sm:$0xf] %v535_v49 }
  0x8b   : > { %538 = vst [vmem:[%s5395_s30 + $0x2c8] sm:$0xf] %v537_v50  ;;  %v539_v51 = vld [vmem:[%s5391_s29 + $0x598] sm:$0xf]  ;;  %v541_v52 = vld [vmem:[%s5391_s29 + $0x5a0] sm:$0xf] }
  0x8c   : > { %v543_v53 = vld [vmem:[%s5391_s29 + $0x5a8] sm:$0xf]  ;;  %540 = vst [vmem:[%s5395_s30 + $0x2cc] sm:$0xf] %v539_v51  ;;  %542 = vst [vmem:[%s5395_s30 + $0x2d0] sm:$0xf] %v541_v52 }
  0x8d   : > { %544 = vst [vmem:[%s5395_s30 + $0x2d4] sm:$0xf] %v543_v53  ;;  %v545_v54 = vld [vmem:[%s5391_s29 + $0x5b0] sm:$0xf]  ;;  %v547_v55 = vld [vmem:[%s5391_s29 + $0x5b8] sm:$0xf] }
  0x8e   : > { %v549_v56 = vld [vmem:[%s5391_s29 + $0x5c0] sm:$0xf]  ;;  %546 = vst [vmem:[%s5395_s30 + $0x2d8] sm:$0xf] %v545_v54  ;;  %548 = vst [vmem:[%s5395_s30 + $0x2dc] sm:$0xf] %v547_v55 }
  0x8f   : > { %550 = vst [vmem:[%s5395_s30 + $0x2e0] sm:$0xf] %v549_v56  ;;  %v551_v57 = vld [vmem:[%s5391_s29 + $0x5c8] sm:$0xf]  ;;  %v553_v58 = vld [vmem:[%s5391_s29 + $0x5d0] sm:$0xf] }
  0x90   : > { %v555_v59 = vld [vmem:[%s5391_s29 + $0x5d8] sm:$0xf]  ;;  %552 = vst [vmem:[%s5395_s30 + $0x2e4] sm:$0xf] %v551_v57  ;;  %554 = vst [vmem:[%s5395_s30 + $0x2e8] sm:$0xf] %v553_v58 }
  0x91   : > { %556 = vst [vmem:[%s5395_s30 + $0x2ec] sm:$0xf] %v555_v59  ;;  %v557_v60 = vld [vmem:[%s5391_s29 + $0x5e0] sm:$0xf]  ;;  %v559_v61 = vld [vmem:[%s5391_s29 + $0x5e8] sm:$0xf] }
  0x92   : > { %v561_v62 = vld [vmem:[%s5391_s29 + $0x5f0] sm:$0xf]  ;;  %558 = vst [vmem:[%s5395_s30 + $0x2f0] sm:$0xf] %v557_v60  ;;  %560 = vst [vmem:[%s5395_s30 + $0x2f4] sm:$0xf] %v559_v61 }
  0x93   : > { %562 = vst [vmem:[%s5395_s30 + $0x2f8] sm:$0xf] %v561_v62  ;;  %v563_v63 = vld [vmem:[%s5391_s29 + $0x5f8] sm:$0xf]  ;;  %v565_v0 = vld [vmem:[%s5391_s29 + $0x600] sm:$0xf] }
  0x94   : > { %v567_v1 = vld [vmem:[%s5391_s29 + $0x608] sm:$0xf]  ;;  %564 = vst [vmem:[%s5395_s30 + $0x2fc] sm:$0xf] %v563_v63  ;;  %566 = vst [vmem:[%s5395_s30 + $0x300] sm:$0xf] %v565_v0 }
  0x95   : > { %568 = vst [vmem:[%s5395_s30 + $0x304] sm:$0xf] %v567_v1  ;;  %v569_v2 = vld [vmem:[%s5391_s29 + $0x610] sm:$0xf]  ;;  %v571_v3 = vld [vmem:[%s5391_s29 + $0x618] sm:$0xf] }
  0x96   : > { %v573_v4 = vld [vmem:[%s5391_s29 + $0x620] sm:$0xf]  ;;  %570 = vst [vmem:[%s5395_s30 + $0x308] sm:$0xf] %v569_v2  ;;  %572 = vst [vmem:[%s5395_s30 + $0x30c] sm:$0xf] %v571_v3 }
  0x97   : > { %574 = vst [vmem:[%s5395_s30 + $0x310] sm:$0xf] %v573_v4  ;;  %v575_v5 = vld [vmem:[%s5391_s29 + $0x628] sm:$0xf]  ;;  %v577_v6 = vld [vmem:[%s5391_s29 + $0x630] sm:$0xf] }
  0x98   : > { %v579_v7 = vld [vmem:[%s5391_s29 + $0x638] sm:$0xf]  ;;  %576 = vst [vmem:[%s5395_s30 + $0x314] sm:$0xf] %v575_v5  ;;  %578 = vst [vmem:[%s5395_s30 + $0x318] sm:$0xf] %v577_v6 }
  0x99   : > { %580 = vst [vmem:[%s5395_s30 + $0x31c] sm:$0xf] %v579_v7  ;;  %v581_v8 = vld [vmem:[%s5391_s29 + $0x640] sm:$0xf]  ;;  %v583_v9 = vld [vmem:[%s5391_s29 + $0x648] sm:$0xf] }
  0x9a   : > { %v585_v10 = vld [vmem:[%s5391_s29 + $0x650] sm:$0xf]  ;;  %582 = vst [vmem:[%s5395_s30 + $0x320] sm:$0xf] %v581_v8  ;;  %584 = vst [vmem:[%s5395_s30 + $0x324] sm:$0xf] %v583_v9 }
  0x9b   : > { %586 = vst [vmem:[%s5395_s30 + $0x328] sm:$0xf] %v585_v10  ;;  %v587_v11 = vld [vmem:[%s5391_s29 + $0x658] sm:$0xf]  ;;  %v589_v12 = vld [vmem:[%s5391_s29 + $0x660] sm:$0xf] }
  0x9c   : > { %v591_v13 = vld [vmem:[%s5391_s29 + $0x668] sm:$0xf]  ;;  %588 = vst [vmem:[%s5395_s30 + $0x32c] sm:$0xf] %v587_v11  ;;  %590 = vst [vmem:[%s5395_s30 + $0x330] sm:$0xf] %v589_v12 }
  0x9d   : > { %592 = vst [vmem:[%s5395_s30 + $0x334] sm:$0xf] %v591_v13  ;;  %v593_v14 = vld [vmem:[%s5391_s29 + $0x670] sm:$0xf]  ;;  %v595_v15 = vld [vmem:[%s5391_s29 + $0x678] sm:$0xf] }
  0x9e   : > { %v597_v16 = vld [vmem:[%s5391_s29 + $0x680] sm:$0xf]  ;;  %594 = vst [vmem:[%s5395_s30 + $0x338] sm:$0xf] %v593_v14  ;;  %596 = vst [vmem:[%s5395_s30 + $0x33c] sm:$0xf] %v595_v15 }
  0x9f   : > { %598 = vst [vmem:[%s5395_s30 + $0x340] sm:$0xf] %v597_v16  ;;  %v599_v17 = vld [vmem:[%s5391_s29 + $0x688] sm:$0xf]  ;;  %v601_v18 = vld [vmem:[%s5391_s29 + $0x690] sm:$0xf] }
  0xa0   : > { %v603_v19 = vld [vmem:[%s5391_s29 + $0x698] sm:$0xf]  ;;  %600 = vst [vmem:[%s5395_s30 + $0x344] sm:$0xf] %v599_v17  ;;  %602 = vst [vmem:[%s5395_s30 + $0x348] sm:$0xf] %v601_v18 }
  0xa1   : > { %604 = vst [vmem:[%s5395_s30 + $0x34c] sm:$0xf] %v603_v19  ;;  %v605_v20 = vld [vmem:[%s5391_s29 + $0x6a0] sm:$0xf]  ;;  %v607_v21 = vld [vmem:[%s5391_s29 + $0x6a8] sm:$0xf] }
  0xa2   : > { %v609_v22 = vld [vmem:[%s5391_s29 + $0x6b0] sm:$0xf]  ;;  %606 = vst [vmem:[%s5395_s30 + $0x350] sm:$0xf] %v605_v20  ;;  %608 = vst [vmem:[%s5395_s30 + $0x354] sm:$0xf] %v607_v21 }
  0xa3   : > { %610 = vst [vmem:[%s5395_s30 + $0x358] sm:$0xf] %v609_v22  ;;  %v611_v23 = vld [vmem:[%s5391_s29 + $0x6b8] sm:$0xf]  ;;  %v613_v24 = vld [vmem:[%s5391_s29 + $0x6c0] sm:$0xf] }
  0xa4   : > { %v615_v25 = vld [vmem:[%s5391_s29 + $0x6c8] sm:$0xf]  ;;  %612 = vst [vmem:[%s5395_s30 + $0x35c] sm:$0xf] %v611_v23  ;;  %614 = vst [vmem:[%s5395_s30 + $0x360] sm:$0xf] %v613_v24 }
  0xa5   : > { %616 = vst [vmem:[%s5395_s30 + $0x364] sm:$0xf] %v615_v25  ;;  %v617_v26 = vld [vmem:[%s5391_s29 + $0x6d0] sm:$0xf]  ;;  %v619_v27 = vld [vmem:[%s5391_s29 + $0x6d8] sm:$0xf] }
  0xa6   : > { %v621_v28 = vld [vmem:[%s5391_s29 + $0x6e0] sm:$0xf]  ;;  %618 = vst [vmem:[%s5395_s30 + $0x368] sm:$0xf] %v617_v26  ;;  %620 = vst [vmem:[%s5395_s30 + $0x36c] sm:$0xf] %v619_v27 }
  0xa7   : > { %622 = vst [vmem:[%s5395_s30 + $0x370] sm:$0xf] %v621_v28  ;;  %v623_v29 = vld [vmem:[%s5391_s29 + $0x6e8] sm:$0xf]  ;;  %v625_v30 = vld [vmem:[%s5391_s29 + $0x6f0] sm:$0xf] }
  0xa8   : > { %v627_v31 = vld [vmem:[%s5391_s29 + $0x6f8] sm:$0xf]  ;;  %624 = vst [vmem:[%s5395_s30 + $0x374] sm:$0xf] %v623_v29  ;;  %626 = vst [vmem:[%s5395_s30 + $0x378] sm:$0xf] %v625_v30 }
  0xa9   : > { %628 = vst [vmem:[%s5395_s30 + $0x37c] sm:$0xf] %v627_v31  ;;  %v629_v32 = vld [vmem:[%s5391_s29 + $0x700] sm:$0xf]  ;;  %v631_v33 = vld [vmem:[%s5391_s29 + $0x708] sm:$0xf] }
  0xaa   : > { %v633_v34 = vld [vmem:[%s5391_s29 + $0x710] sm:$0xf]  ;;  %630 = vst [vmem:[%s5395_s30 + $0x380] sm:$0xf] %v629_v32  ;;  %632 = vst [vmem:[%s5395_s30 + $0x384] sm:$0xf] %v631_v33 }
  0xab   : > { %634 = vst [vmem:[%s5395_s30 + $0x388] sm:$0xf] %v633_v34  ;;  %v635_v35 = vld [vmem:[%s5391_s29 + $0x718] sm:$0xf]  ;;  %v637_v36 = vld [vmem:[%s5391_s29 + $0x720] sm:$0xf] }
  0xac   : > { %v639_v37 = vld [vmem:[%s5391_s29 + $0x728] sm:$0xf]  ;;  %636 = vst [vmem:[%s5395_s30 + $0x38c] sm:$0xf] %v635_v35  ;;  %638 = vst [vmem:[%s5395_s30 + $0x390] sm:$0xf] %v637_v36 }
  0xad   : > { %640 = vst [vmem:[%s5395_s30 + $0x394] sm:$0xf] %v639_v37  ;;  %v641_v38 = vld [vmem:[%s5391_s29 + $0x730] sm:$0xf]  ;;  %v643_v39 = vld [vmem:[%s5391_s29 + $0x738] sm:$0xf] }
  0xae   : > { %v645_v40 = vld [vmem:[%s5391_s29 + $0x740] sm:$0xf]  ;;  %642 = vst [vmem:[%s5395_s30 + $0x398] sm:$0xf] %v641_v38  ;;  %644 = vst [vmem:[%s5395_s30 + $0x39c] sm:$0xf] %v643_v39 }
  0xaf   : > { %646 = vst [vmem:[%s5395_s30 + $0x3a0] sm:$0xf] %v645_v40  ;;  %v647_v41 = vld [vmem:[%s5391_s29 + $0x748] sm:$0xf]  ;;  %v649_v42 = vld [vmem:[%s5391_s29 + $0x750] sm:$0xf] }
  0xb0   : > { %v651_v43 = vld [vmem:[%s5391_s29 + $0x758] sm:$0xf]  ;;  %648 = vst [vmem:[%s5395_s30 + $0x3a4] sm:$0xf] %v647_v41  ;;  %650 = vst [vmem:[%s5395_s30 + $0x3a8] sm:$0xf] %v649_v42 }
  0xb1   : > { %652 = vst [vmem:[%s5395_s30 + $0x3ac] sm:$0xf] %v651_v43  ;;  %v653_v44 = vld [vmem:[%s5391_s29 + $0x760] sm:$0xf]  ;;  %v655_v45 = vld [vmem:[%s5391_s29 + $0x768] sm:$0xf] }
  0xb2   : > { %v657_v46 = vld [vmem:[%s5391_s29 + $0x770] sm:$0xf]  ;;  %654 = vst [vmem:[%s5395_s30 + $0x3b0] sm:$0xf] %v653_v44  ;;  %656 = vst [vmem:[%s5395_s30 + $0x3b4] sm:$0xf] %v655_v45 }
  0xb3   : > { %658 = vst [vmem:[%s5395_s30 + $0x3b8] sm:$0xf] %v657_v46  ;;  %v659_v47 = vld [vmem:[%s5391_s29 + $0x778] sm:$0xf]  ;;  %v661_v48 = vld [vmem:[%s5391_s29 + $0x780] sm:$0xf] }
  0xb4   : > { %v663_v49 = vld [vmem:[%s5391_s29 + $0x788] sm:$0xf]  ;;  %660 = vst [vmem:[%s5395_s30 + $0x3bc] sm:$0xf] %v659_v47  ;;  %662 = vst [vmem:[%s5395_s30 + $0x3c0] sm:$0xf] %v661_v48 }
  0xb5   : > { %664 = vst [vmem:[%s5395_s30 + $0x3c4] sm:$0xf] %v663_v49  ;;  %v665_v50 = vld [vmem:[%s5391_s29 + $0x790] sm:$0xf]  ;;  %v667_v51 = vld [vmem:[%s5391_s29 + $0x798] sm:$0xf] }
  0xb6   : > { %v669_v52 = vld [vmem:[%s5391_s29 + $0x7a0] sm:$0xf]  ;;  %666 = vst [vmem:[%s5395_s30 + $0x3c8] sm:$0xf] %v665_v50  ;;  %668 = vst [vmem:[%s5395_s30 + $0x3cc] sm:$0xf] %v667_v51 }
  0xb7   : > { %670 = vst [vmem:[%s5395_s30 + $0x3d0] sm:$0xf] %v669_v52  ;;  %v671_v53 = vld [vmem:[%s5391_s29 + $0x7a8] sm:$0xf]  ;;  %v673_v54 = vld [vmem:[%s5391_s29 + $0x7b0] sm:$0xf] }
  0xb8   : > { %v675_v55 = vld [vmem:[%s5391_s29 + $0x7b8] sm:$0xf]  ;;  %672 = vst [vmem:[%s5395_s30 + $0x3d4] sm:$0xf] %v671_v53  ;;  %674 = vst [vmem:[%s5395_s30 + $0x3d8] sm:$0xf] %v673_v54 }
  0xb9   : > { %676 = vst [vmem:[%s5395_s30 + $0x3dc] sm:$0xf] %v675_v55  ;;  %v677_v56 = vld [vmem:[%s5391_s29 + $0x7c0] sm:$0xf]  ;;  %v679_v57 = vld [vmem:[%s5391_s29 + $0x7c8] sm:$0xf] }
  0xba   : > { %v681_v58 = vld [vmem:[%s5391_s29 + $0x7d0] sm:$0xf]  ;;  %678 = vst [vmem:[%s5395_s30 + $0x3e0] sm:$0xf] %v677_v56  ;;  %680 = vst [vmem:[%s5395_s30 + $0x3e4] sm:$0xf] %v679_v57 }
  0xbb   : > { %682 = vst [vmem:[%s5395_s30 + $0x3e8] sm:$0xf] %v681_v58  ;;  %v683_v59 = vld [vmem:[%s5391_s29 + $0x7d8] sm:$0xf]  ;;  %v685_v60 = vld [vmem:[%s5391_s29 + $0x7e0] sm:$0xf] }
  0xbc   : > { %v687_v61 = vld [vmem:[%s5391_s29 + $0x7e8] sm:$0xf]  ;;  %684 = vst [vmem:[%s5395_s30 + $0x3ec] sm:$0xf] %v683_v59  ;;  %686 = vst [vmem:[%s5395_s30 + $0x3f0] sm:$0xf] %v685_v60 }
  0xbd   : > { %688 = vst [vmem:[%s5395_s30 + $0x3f4] sm:$0xf] %v687_v61  ;;  %v689_v62 = vld [vmem:[%s5391_s29 + $0x7f0] sm:$0xf]  ;;  %v691_v63 = vld [vmem:[%s5391_s29 + $0x7f8] sm:$0xf] }
  0xbe   : > { %690 = vst [vmem:[%s5395_s30 + $0x3f8] sm:$0xf] %v689_v62  ;;  %692 = vst [vmem:[%s5395_s30 + $0x3fc] sm:$0xf] %v691_v63 }
  0xbf PF: > { %p4293_p7 = scmp.ge.s32.totalorder %s5323_s17, 1  ;;  %p1238_p8 = scmp.lt.s32.totalorder %s5323_s17, 3 }
  0xc1   : > { %p1239_p9 = pnand %p4293_p7, %p1238_p8 }
  0xc2   : > { %s1245_s5 = sand.u32 (!%p1239_p9), 1, %s5315_s15   ;;  %v5913_v0 = vld [vmem:[%s6756_s0] sm:$0xff] (!%p1239_p9)  ;;  %v5923_v2 = vld [vmem:[%s6756_s0 + $0x8] sm:$0xff] (!%p1239_p9)  ;;  %p1275_p10 = scmp.lt.s32.totalorder (!%p1239_p9), %s5366_s18, 1 }
  0xc3   : > { %1242 = sbr.rel (%p1239_p9) target bundleno = 822 (0x336), region = 73  ;;  %v5918_v1 = vld [vmem:[%s6756_s0 + $0x40] sm:$0xff] (!%p1239_p9)  ;;  %s4294_s12 = sshll.u32 (!%p1239_p9), %s1245_s5, 10  ;;  %v5932_v4 = vld [vmem:[%s6756_s0 + $0x48] sm:$0xff] (!%p1239_p9) }
  0xc4   : > { %v4297_v3 = vcombine.high (!%p1239_p9), %v5913_v0, %v5918_v1  ;;  %v4299_v5 = vcombine.high (!%p1239_p9), %v5923_v2, %v5932_v4  ;;  %s5936_s17 = scalar_lea.vmem (!%p1239_p9), [#allocation2], %s4294_s12  ;;  %v1298_v35 = vld [vmem:[%s6756_s0 + $0x80] sm:$0xff] (!%p1239_p9)  ;;  %v1299_v38 = vld [vmem:[%s6756_s0 + $0x88] sm:$0xff] (!%p1239_p9)  ;;  %v4296_v42 = vcombine.low (!%p1239_p9), %v5913_v0, %v5918_v1  ;;  %v4298_v43 = vcombine.low (!%p1239_p9), %v5923_v2, %v5932_v4  ;;  %s6695_s13 = sshll.u32 (!%p1239_p9), %s1245_s5, 6 }
  0xc5   : > { %v5171_v6 = vld [vmem:[%s5936_s17 + $0x40] sm:$0xff] (!%p1239_p9)   ;;  %v5175_v10 = vld [vmem:[%s5936_s17 + $0x48] sm:$0xff] (!%p1239_p9)   ;;  %v5179_v14 = vld [vmem:[%s5936_s17 + $0x50] sm:$0xff] (!%p1239_p9)   ;;  %s6714_s15 = scalar_lea.vmem (!%p1239_p9), [#allocation3], %s6695_s13 }
  0xc6   : > { %3106 = vmatprep.mubr.bf16.mxu0 (!%p1239_p9), %v4297_v3  ;;  %v5172_v7 = vld [vmem:[%s5936_s17 + $0xc0] sm:$0xff] (!%p1239_p9)   ;;  %3203 = vmatprep.mubr.bf16.mxu1 (!%p1239_p9), %v4299_v5  ;;  %v5176_v11 = vld [vmem:[%s5936_s17 + $0xc8] sm:$0xff] (!%p1239_p9)   ;;  %v5180_v15 = vld [vmem:[%s5936_s17 + $0xd0] sm:$0xff] (!%p1239_p9)  }
  0xc7   : > { %4635 = vmatprep.subr.bf16.mxu0 (!%p1239_p9), %v5171_v6  ;;  %v5173_v8 = vld [vmem:[%s5936_s17] sm:$0xff] (!%p1239_p9)   ;;  %4699 = vmatprep.subr.bf16.mxu1 (!%p1239_p9), %v5172_v7  ;;  %v5177_v12 = vld [vmem:[%s5936_s17 + $0x8] sm:$0xff] (!%p1239_p9)   ;;  %v5181_v16 = vld [vmem:[%s5936_s17 + $0x10] sm:$0xff] (!%p1239_p9)  }
  0xc8   : > { %v5174_v9 = vld [vmem:[%s5936_s17 + $0x80] sm:$0xff] (!%p1239_p9)   ;;  %4636 = vmatpush3.bf16.msra.mxu0 (!%p1239_p9), %v5173_v8  ;;  %v5178_v13 = vld [vmem:[%s5936_s17 + $0x88] sm:$0xff] (!%p1239_p9)   ;;  %v5182_v17 = vld [vmem:[%s5936_s17 + $0x90] sm:$0xff] (!%p1239_p9)  }
  0xc9   : > { %4700 = vmatpush3.bf16.msra.mxu1 (!%p1239_p9), %v5174_v9  ;;  %4637 = vmatprep.subr.bf16.mxu0 (!%p1239_p9), %v5175_v10  ;;  %v5183_v18 = vld [vmem:[%s5936_s17 + $0x58] sm:$0xff] (!%p1239_p9)   ;;  %v5187_v22 = vld [vmem:[%s5936_s17 + $0x60] sm:$0xff] (!%p1239_p9)   ;;  %v5191_v26 = vld [vmem:[%s5936_s17 + $0x68] sm:$0xff] (!%p1239_p9)  }
  0xca   : > { %4701 = vmatprep.subr.bf16.mxu1 %v5176_v11  ;;  %v5184_v19 = vld [vmem:[%s5936_s17 + $0xd8] sm:$0xff]   ;;  %v5188_v23 = vld [vmem:[%s5936_s17 + $0xe0] sm:$0xff]   ;;  %v5192_v27 = vld [vmem:[%s5936_s17 + $0xe8] sm:$0xff]   ;;  %s4569_s5 = sshll.u32 (%p5381_p5), %s5366_s18, 2 }
  0xcb   : > { %v5185_v20 = vld [vmem:[%s5936_s17 + $0x18] sm:$0xff]   ;;  %v5189_v24 = vld [vmem:[%s5936_s17 + $0x20] sm:$0xff]   ;;  %v5193_v28 = vld [vmem:[%s5936_s17 + $0x28] sm:$0xff]   ;;  %s4113_s21 = scalar_lea.vmem (%p5381_p5), %s6760_s4, %s4569_s5 }
  0xcc   : > { %4638 = vmatpush3.bf16.msra.mxu0 %v5177_v12  ;;  %v5186_v21 = vld [vmem:[%s5936_s17 + $0x98] sm:$0xff]   ;;  %v5190_v25 = vld [vmem:[%s5936_s17 + $0xa0] sm:$0xff]   ;;  %v5194_v29 = vld [vmem:[%s5936_s17 + $0xa8] sm:$0xff]  }
  0xcd   : > { %4702 = vmatpush3.bf16.msra.mxu1 %v5178_v13  ;;  %4639 = vmatprep.subr.bf16.mxu0 %v5179_v14  ;;  %v5195_v30 = vld [vmem:[%s5936_s17 + $0x70] sm:$0xff]   ;;  %v5199_v34 = vld [vmem:[%s5936_s17 + $0x78] sm:$0xff]   ;;  %v1306_v36 = vld [vmem:[%s6756_s0 + $0xc0] sm:$0xff] }
  0xce   : > { %4703 = vmatprep.subr.bf16.mxu1 %v5180_v15  ;;  %v5196_v31 = vld [vmem:[%s5936_s17 + $0xf0] sm:$0xff]   ;;  %v5200_v37 = vld [vmem:[%s5936_s17 + $0xf8] sm:$0xff]   ;;  %v1307_v39 = vld [vmem:[%s6756_s0 + $0xc8] sm:$0xff]  ;;  %v4313_v46 = vcombine.high %v1298_v35, %v1306_v36  ;;  %v4312_v54 = vcombine.low %v1298_v35, %v1306_v36 }
  0xcf   : > { %v5197_v32 = vld [vmem:[%s5936_s17 + $0x30] sm:$0xff]   ;;  %v5201_v40 = vld [vmem:[%s5936_s17 + $0x38] sm:$0xff]   ;;  %v5203_v44 = vld [vmem:[%s5936_s17 + $0x140] sm:$0xff]   ;;  %v4315_v48 = vcombine.high %v1299_v38, %v1307_v39  ;;  %v4314_v56 = vcombine.low %v1299_v38, %v1307_v39 }
  0xd0   : > { %4640 = vmatpush3.bf16.msra.mxu0 %v5181_v16  ;;  %v5198_v33 = vld [vmem:[%s5936_s17 + $0xb0] sm:$0xff]   ;;  %v5202_v41 = vld [vmem:[%s5936_s17 + $0xb8] sm:$0xff]   ;;  %v5204_v45 = vld [vmem:[%s5936_s17 + $0x100] sm:$0xff]  }
  0xd1   : > { %4704 = vmatpush3.bf16.msra.mxu1 %v5182_v17  ;;  %4641 = vmatprep.subr.bf16.mxu0 %v5183_v18  ;;  %v5205_v47 = vld [vmem:[%s5936_s17 + $0x1c0] sm:$0xff]   ;;  %v5207_v50 = vld [vmem:[%s5936_s17 + $0x148] sm:$0xff]   ;;  %v5211_v62 = vld [vmem:[%s5936_s17 + $0x150] sm:$0xff]  }
  0xd2   : > { %4705 = vmatprep.subr.bf16.mxu1 %v5184_v19  ;;  %v5206_v49 = vld [vmem:[%s5936_s17 + $0x180] sm:$0xff]   ;;  %v5208_v52 = vld [vmem:[%s5936_s17 + $0x108] sm:$0xff]   ;;  %v5212_v63 = vld [vmem:[%s5936_s17 + $0x110] sm:$0xff]  }
  0xd3   : > { %v1314_v51 = vld [vmem:[%s6756_s0 + $0x100] sm:$0xff]  ;;  %v5209_v53 = vld [vmem:[%s5936_s17 + $0x1c8] sm:$0xff]   ;;  %v5213_v0 = vld [vmem:[%s5936_s17 + $0x1d0] sm:$0xff]  }
  0xd4   : > { %4642 = vmatpush3.bf16.msra.mxu0 %v5185_v20  ;;  %v5210_v55 = vld [vmem:[%s5936_s17 + $0x188] sm:$0xff]   ;;  %v1322_v57 = vld [vmem:[%s6756_s0 + $0x140] sm:$0xff]  ;;  %v5214_v1 = vld [vmem:[%s5936_s17 + $0x190] sm:$0xff]  }
  0xd5   : > { %4706 = vmatpush3.bf16.msra.mxu1 %v5186_v21  ;;  %4643 = vmatprep.subr.bf16.mxu0 %v5187_v22  ;;  %v1315_v58 = vld [vmem:[%s6756_s0 + $0x108] sm:$0xff]  ;;  %v4329_v60 = vcombine.high %v1314_v51, %v1322_v57  ;;  %v1330_v2 = vld [vmem:[%s6756_s0 + $0x180] sm:$0xff]  ;;  %v4328_v6 = vcombine.low %v1314_v51, %v1322_v57  ;;  %v5215_v7 = vld [vmem:[%s5936_s17 + $0x158] sm:$0xff]  }
  0xd6   : > { %4707 = vmatprep.subr.bf16.mxu1 %v5188_v23  ;;  %v1323_v59 = vld [vmem:[%s6756_s0 + $0x148] sm:$0xff]  ;;  %v1338_v3 = vld [vmem:[%s6756_s0 + $0x1c0] sm:$0xff]  ;;  %v5216_v10 = vld [vmem:[%s5936_s17 + $0x118] sm:$0xff]  }
  0xd7   : > { %v4331_v61 = vcombine.high %v1315_v58, %v1323_v59  ;;  %v1331_v4 = vld [vmem:[%s6756_s0 + $0x188] sm:$0xff]  ;;  %v4330_v8 = vcombine.low %v1315_v58, %v1323_v59  ;;  %v4345_v9 = vcombine.high %v1330_v2, %v1338_v3  ;;  %v5217_v12 = vld [vmem:[%s5936_s17 + $0x1d8] sm:$0xff]   ;;  %v1346_v14 = vld [vmem:[%s6756_s0 + $0x200] sm:$0xff]  ;;  %v4344_v21 = vcombine.low %v1330_v2, %v1338_v3 }
  0xd8   : > { %4644 = vmatpush3.bf16.msra.mxu0 %v5189_v24  ;;  %v1339_v5 = vld [vmem:[%s6756_s0 + $0x1c8] sm:$0xff]  ;;  %v5218_v13 = vld [vmem:[%s5936_s17 + $0x198] sm:$0xff]   ;;  %v1354_v15 = vld [vmem:[%s6756_s0 + $0x240] sm:$0xff] }
  0xd9   : > { %4708 = vmatpush3.bf16.msra.mxu1 %v5190_v25  ;;  %4645 = vmatprep.subr.bf16.mxu0 %v5191_v26  ;;  %v4347_v11 = vcombine.high %v1331_v4, %v1339_v5  ;;  %v1347_v16 = vld [vmem:[%s6756_s0 + $0x208] sm:$0xff]  ;;  %v5219_v18 = vld [vmem:[%s5936_s17 + $0x160] sm:$0xff]   ;;  %v4346_v23 = vcombine.low %v1331_v4, %v1339_v5  ;;  %v4361_v24 = vcombine.high %v1346_v14, %v1354_v15  ;;  %v5227_v35 = vld [vmem:[%s5936_s17 + $0x170] sm:$0xff]  }
  0xda   : > { %4709 = vmatprep.subr.bf16.mxu1 %v5192_v27  ;;  %v1355_v17 = vld [vmem:[%s6756_s0 + $0x248] sm:$0xff]  ;;  %v5220_v19 = vld [vmem:[%s5936_s17 + $0x120] sm:$0xff]   ;;  %v5228_v38 = vld [vmem:[%s5936_s17 + $0x130] sm:$0xff]  }
  0xdb   : > { %v5221_v20 = vld [vmem:[%s5936_s17 + $0x1e0] sm:$0xff]   ;;  %v4363_v25 = vcombine.high %v1347_v16, %v1355_v17  ;;  %v5223_v26 = vld [vmem:[%s5936_s17 + $0x168] sm:$0xff]   ;;  %v4362_v36 = vcombine.low %v1347_v16, %v1355_v17  ;;  %v1285_v2 = vld [vmem:[%s6756_s0 + $0x18] sm:$0xff] }
  0xdc   : > { %4646 = vmatpush3.bf16.msra.mxu0 %v5193_v28  ;;  %v5222_v22 = vld [vmem:[%s5936_s17 + $0x1a0] sm:$0xff]   ;;  %v5224_v27 = vld [vmem:[%s5936_s17 + $0x128] sm:$0xff]   ;;  %v1293_v3 = vld [vmem:[%s6756_s0 + $0x58] sm:$0xff] }
  0xdd   : > { %4710 = vmatpush3.bf16.msra.mxu1 %v5194_v29  ;;  %4647 = vmatprep.subr.bf16.mxu0 %v5195_v30  ;;  %v5225_v28 = vld [vmem:[%s5936_s17 + $0x1e8] sm:$0xff]   ;;  %v1362_v30 = vld [vmem:[%s6756_s0 + $0x280] sm:$0xff] }
  0xde   : > { %4711 = vmatprep.subr.bf16.mxu1 %v5196_v31  ;;  %v5226_v29 = vld [vmem:[%s5936_s17 + $0x1a8] sm:$0xff]   ;;  %v1370_v31 = vld [vmem:[%s6756_s0 + $0x2c0] sm:$0xff] }
  0xdf   : > { %v1402_v57 = vld [vmem:[%s6756_s0 + $0x3c0] sm:$0xff]  ;;  %v1395_v58 = vld [vmem:[%s6756_s0 + $0x388] sm:$0xff] }
  0xe0   : > { %4648 = vmatpush3.bf16.msra.mxu0 %v5197_v32  ;;  %v1363_v32 = vld [vmem:[%s6756_s0 + $0x288] sm:$0xff] }
  0xe1   : > { %4712 = vmatpush3.bf16.msra.mxu1 %v5198_v33  ;;  %4649 = vmatprep.subr.bf16.mxu0 %v5199_v34  ;;  %v1371_v33 = vld [vmem:[%s6756_s0 + $0x2c8] sm:$0xff]  ;;  %v4360_v34 = vcombine.low %v1346_v14, %v1354_v15  ;;  %v5236_v14 = vld [vmem:[%s5936_s17 + $0x200] sm:$0xff]  }
  0xe2   : > { %4713 = vmatprep.subr.bf16.mxu1 %v5200_v37  ;;  %v4377_v37 = vcombine.high %v1362_v30, %v1370_v31  ;;  %v4379_v39 = vcombine.high %v1363_v32, %v1371_v33  ;;  %v4378_v51 = vcombine.low %v1363_v32, %v1371_v33  ;;  %v1403_v59 = vld [vmem:[%s6756_s0 + $0x3c8] sm:$0xff]  ;;  %v5238_v15 = vld [vmem:[%s5936_s17 + $0x280] sm:$0xff]   ;;  %v5246_v33 = vld [vmem:[%s5936_s17 + $0x290] sm:$0xff]  }
  0xe3   : > { %v4410_v5 = vcombine.low %v1395_v58, %v1403_v59 }
  0xe4   : > { %4650 = vmatpush3.bf16.msra.mxu0 %v5201_v40  ;;  %v5229_v40 = vld [vmem:[%s5936_s17 + $0x1f0] sm:$0xff]  }
  0xe5   : > { %4714 = vmatpush3.bf16.msra.mxu1 %v5202_v41  ;;  %4763 = vmatprep.subr.bf16.mxu0 %v5203_v44  ;;  %v5230_v41 = vld [vmem:[%s5936_s17 + $0x1b0] sm:$0xff]   ;;  %v1379_v44 = vld [vmem:[%s6756_s0 + $0x308] sm:$0xff] }
  0xe6   : > { %4827 = vmatprep.subr.bf16.mxu1 %v5205_v47  ;;  %v5232_v47 = vld [vmem:[%s5936_s17 + $0x138] sm:$0xff]  }
  0xe7   : > { %3107 = vmatmul.mubr.bf16.vlgmr.msra.gmra.mrb[0].mxu0 %v4296_v42  ;;  %v1378_v42 = vld [vmem:[%s6756_s0 + $0x300] sm:$0xff] }
  0xe8   : > { %3204 = vmatmul.mubr.bf16.vlgmr.msra.gmra.mrb[0].mxu1 %v4298_v43  ;;  %4764 = vmatpush3.bf16.msra.mxu0 %v5204_v45  ;;  %v1386_v43 = vld [vmem:[%s6756_s0 + $0x340] sm:$0xff]  ;;  %v1387_v45 = vld [vmem:[%s6756_s0 + $0x348] sm:$0xff] }
  0xe9   : > { %3114 = vmatprep.mubr.bf16.mxu0 %v4313_v46  ;;  %4828 = vmatpush3.bf16.msra.mxu1 %v5206_v49  ;;  %v5231_v46 = vld [vmem:[%s5936_s17 + $0x178] sm:$0xff]   ;;  %v4376_v49 = vcombine.low %v1362_v30, %v1370_v31  ;;  %v5244_v31 = vld [vmem:[%s5936_s17 + $0x210] sm:$0xff]  }
  0xea   : > { %3211 = vmatprep.mubr.bf16.mxu1 %v4315_v48  ;;  %4765 = vmatprep.subr.bf16.mxu0 %v5207_v50  ;;  %v5233_v48 = vld [vmem:[%s5936_s17 + $0x1f8] sm:$0xff]  }
  0xeb   : > { %4829 = vmatprep.subr.bf16.mxu1 %v5209_v53  ;;  %v5234_v50 = vld [vmem:[%s5936_s17 + $0x1b8] sm:$0xff]   ;;  %v4395_v53 = vcombine.high %v1379_v44, %v1387_v45 }
  0xec   : > { %4766 = vmatpush3.bf16.msra.mxu0 %v5208_v52  ;;  %v4393_v52 = vcombine.high %v1378_v42, %v1386_v43 }
  0xed   : > { %4830 = vmatpush3.bf16.msra.mxu1 %v5210_v55  ;;  %4767 = vmatprep.subr.bf16.mxu0 %v5211_v62  ;;  %v5237_v55 = vld [vmem:[%s5936_s17 + $0x2c0] sm:$0xff]  }
  0xee   : > { %4831 = vmatprep.subr.bf16.mxu1 %v5213_v0  ;;  %v1284_v0 = vld [vmem:[%s6756_s0 + $0x10] sm:$0xff] }
  0xef   : > { %3115 = vmatmul.mubr.bf16.gmra.mrb[4].mxu0 %v4312_v54  ;;  %v5235_v54 = vld [vmem:[%s5936_s17 + $0x240] sm:$0xff]  }
  0xf0   : > { %3212 = vmatmul.mubr.bf16.gmra.mrb[4].mxu1 %v4314_v56  ;;  %3122 = vmatprep.mubr.bf16.mxu0 %v4329_v60  ;;  %v1394_v56 = vld [vmem:[%s6756_s0 + $0x380] sm:$0xff]  ;;  %v4392_v60 = vcombine.low %v1378_v42, %v1386_v43 }
  0xf1   : > { %3219 = vmatprep.mubr.bf16.mxu1 %v4331_v61  ;;  %4768 = vmatpush3.bf16.msra.mxu0 %v5212_v63  ;;  %v4394_v61 = vcombine.low %v1379_v44, %v1387_v45  ;;  %v4409_v62 = vcombine.high %v1394_v56, %v1402_v57  ;;  %v4411_v63 = vcombine.high %v1395_v58, %v1403_v59  ;;  %v5251_v42 = vld [vmem:[%s5936_s17 + $0x260] sm:$0xff]   ;;  %v5259_v58 = vld [vmem:[%s5936_s17 + $0x270] sm:$0xff]  }
  0xf2   : > { %4832 = vmatpush3.bf16.msra.mxu1 %v5214_v1  ;;  %4769 = vmatprep.subr.bf16.mxu0 %v5215_v7  ;;  %v1292_v1 = vld [vmem:[%s6756_s0 + $0x50] sm:$0xff]  ;;  %v4408_v4 = vcombine.low %v1394_v56, %v1402_v57  ;;  %v4303_v7 = vcombine.high %v1285_v2, %v1293_v3  ;;  %v5253_v44 = vld [vmem:[%s5936_s17 + $0x2e0] sm:$0xff]   ;;  %v5256_v56 = vld [vmem:[%s5936_s17 + $0x228] sm:$0xff]  }
  0xf3   : > { %4833 = vmatprep.subr.bf16.mxu1 %v5217_v12  ;;  %v1309_v12 = vld [vmem:[%s6756_s0 + $0xd8] sm:$0xff]  ;;  %v5258_v57 = vld [vmem:[%s5936_s17 + $0x2a8] sm:$0xff]  }
  0xf5   : > { %4770 = vmatpush3.bf16.msra.mxu0 %v5216_v10  ;;  %v1301_v10 = vld [vmem:[%s6756_s0 + $0x98] sm:$0xff] }
  0xf6   : > { %4834 = vmatpush3.bf16.msra.mxu1 %v5218_v13  ;;  %4771 = vmatprep.subr.bf16.mxu0 %v5219_v18  ;;  %v4302_v13 = vcombine.low %v1285_v2, %v1293_v3  ;;  %v4319_v17 = vcombine.high %v1301_v10, %v1309_v12  ;;  %v5239_v18 = vld [vmem:[%s5936_s17 + $0x248] sm:$0xff]   ;;  %v5263_v2 = vld [vmem:[%s5936_s17 + $0x278] sm:$0xff]   ;;  %v1364_v3 = vld [vmem:[%s6756_s0 + $0x290] sm:$0xff] }
  0xf7   : > { %3123 = vmatmul.mubr.bf16.gmra.mrb[8].mxu0 %v4328_v6  ;;  %4835 = vmatprep.subr.bf16.mxu1 %v5221_v20  ;;  %v4301_v6 = vcombine.high %v1284_v0, %v1292_v1  ;;  %v5241_v20 = vld [vmem:[%s5936_s17 + $0x2c8] sm:$0xff]  }
  0xf8   : > { %3220 = vmatmul.mubr.bf16.gmra.mrb[8].mxu1 %v4330_v8  ;;  %3130 = vmatprep.mubr.bf16.mxu0 %v4345_v9  ;;  %v1300_v8 = vld [vmem:[%s6756_s0 + $0x90] sm:$0xff] }
  0xf9   : > { %3227 = vmatprep.mubr.bf16.mxu1 %v4347_v11  ;;  %4772 = vmatpush3.bf16.msra.mxu0 %v5220_v19  ;;  %v1308_v9 = vld [vmem:[%s6756_s0 + $0xd0] sm:$0xff]  ;;  %v4300_v11 = vcombine.low %v1284_v0, %v1292_v1  ;;  %v5240_v19 = vld [vmem:[%s5936_s17 + $0x208] sm:$0xff]  }
  0xfa   : > { %4836 = vmatpush3.bf16.msra.mxu1 %v5222_v22  ;;  %4773 = vmatprep.subr.bf16.mxu0 %v5223_v26  ;;  %v4317_v16 = vcombine.high %v1300_v8, %v1308_v9  ;;  %v1316_v22 = vld [vmem:[%s6756_s0 + $0x110] sm:$0xff] }
  0xfb   : > { %4837 = vmatprep.subr.bf16.mxu1 %v5225_v28  ;;  %v5243_v26 = vld [vmem:[%s5936_s17 + $0x250] sm:$0xff]   ;;  %v4316_v28 = vcombine.low %v1300_v8, %v1308_v9  ;;  %v5264_v8 = vld [vmem:[%s5936_s17 + $0x238] sm:$0xff]  }
  0xfc   : > { %v5262_v1 = vld [vmem:[%s5936_s17 + $0x2b0] sm:$0xff]   ;;  %v5266_v9 = vld [vmem:[%s5936_s17 + $0x2b8] sm:$0xff]  }
  0xfd   : > { %4774 = vmatpush3.bf16.msra.mxu0 %v5224_v27  ;;  %v5245_v27 = vld [vmem:[%s5936_s17 + $0x2d0] sm:$0xff]  }
  0xfe   : > { %4838 = vmatpush3.bf16.msra.mxu1 %v5226_v29  ;;  %4775 = vmatprep.subr.bf16.mxu0 %v5227_v35  ;;  %v4318_v29 = vcombine.low %v1301_v10, %v1309_v12  ;;  %v1332_v35 = vld [vmem:[%s6756_s0 + $0x190] sm:$0xff]  ;;  %v5267_v10 = vld [vmem:[%s5936_s17 + $0x340] sm:$0xff]  }
  0xff   : > { %3131 = vmatmul.mubr.bf16.gmra.mrb[12].mxu0 %v4344_v21  ;;  %4839 = vmatprep.subr.bf16.mxu1 %v5229_v40  ;;  %v5242_v21 = vld [vmem:[%s5936_s17 + $0x288] sm:$0xff]   ;;  %v5248_v40 = vld [vmem:[%s5936_s17 + $0x218] sm:$0xff]   ;;  %v5269_v12 = vld [vmem:[%s5936_s17 + $0x3c0] sm:$0xff]  }
 0x100   : > { %3228 = vmatmul.mubr.bf16.gmra.mrb[12].mxu1 %v4346_v23  ;;  %3138 = vmatprep.mubr.bf16.mxu0 %v4361_v24  ;;  %v1324_v23 = vld [vmem:[%s6756_s0 + $0x150] sm:$0xff]  ;;  %v1317_v24 = vld [vmem:[%s6756_s0 + $0x118] sm:$0xff] }
 0x101   : > { %3235 = vmatprep.mubr.bf16.mxu1 %v4363_v25  ;;  %4776 = vmatpush3.bf16.msra.mxu0 %v5228_v38  ;;  %v1325_v25 = vld [vmem:[%s6756_s0 + $0x158] sm:$0xff]  ;;  %v4333_v30 = vcombine.high %v1316_v22, %v1324_v23  ;;  %v4332_v43 = vcombine.low %v1316_v22, %v1324_v23 }
 0x102   : > { %4840 = vmatpush3.bf16.msra.mxu1 %v5230_v41  ;;  %4777 = vmatprep.subr.bf16.mxu0 %v5231_v46  ;;  %v4335_v32 = vcombine.high %v1317_v24, %v1325_v25  ;;  %v1333_v38 = vld [vmem:[%s6756_s0 + $0x198] sm:$0xff]  ;;  %v4334_v45 = vcombine.low %v1317_v24, %v1325_v25  ;;  %v1396_v24 = vld [vmem:[%s6756_s0 + $0x390] sm:$0xff] }
 0x103   : > { %4841 = vmatprep.subr.bf16.mxu1 %v5233_v48  ;;  %v5250_v41 = vld [vmem:[%s5936_s17 + $0x298] sm:$0xff]   ;;  %v5252_v48 = vld [vmem:[%s5936_s17 + $0x220] sm:$0xff]   ;;  %v1404_v25 = vld [vmem:[%s6756_s0 + $0x3d0] sm:$0xff] }
 0x105   : > { %4778 = vmatpush3.bf16.msra.mxu0 %v5232_v47 }
 0x106   : > { %4842 = vmatpush3.bf16.msra.mxu1 %v5234_v50  ;;  %4891 = vmatprep.subr.bf16.mxu0 %v5235_v54  ;;  %v5255_v50 = vld [vmem:[%s5936_s17 + $0x268] sm:$0xff]   ;;  %v1349_v54 = vld [vmem:[%s6756_s0 + $0x218] sm:$0xff] }
 0x107   : > { %3139 = vmatmul.mubr.bf16.gmra.mrb[16].mxu0 %v4360_v34  ;;  %4955 = vmatprep.subr.bf16.mxu1 %v5237_v55  ;;  %v5247_v34 = vld [vmem:[%s5936_s17 + $0x258] sm:$0xff]  }
 0x108   : > { %3236 = vmatmul.mubr.bf16.gmra.mrb[16].mxu1 %v4362_v36  ;;  %3146 = vmatprep.mubr.bf16.mxu0 %v4377_v37  ;;  %v1340_v36 = vld [vmem:[%s6756_s0 + $0x1d0] sm:$0xff]  ;;  %v5249_v37 = vld [vmem:[%s5936_s17 + $0x2d8] sm:$0xff]  }
 0x109   : > { %3243 = vmatprep.mubr.bf16.mxu1 %v4379_v39  ;;  %v1341_v39 = vld [vmem:[%s6756_s0 + $0x1d8] sm:$0xff]  ;;  %v4349_v46 = vcombine.high %v1332_v35, %v1340_v36  ;;  %v4348_v59 = vcombine.low %v1332_v35, %v1340_v36  ;;  %v1295_v35 = vld [vmem:[%s6756_s0 + $0x68] sm:$0xff]  ;;  %v4412_v36 = vcombine.low %v1396_v24, %v1404_v25 }
 0x10a   : > { %v4351_v47 = vcombine.high %v1333_v38, %v1341_v39  ;;  %v1357_v55 = vld [vmem:[%s6756_s0 + $0x258] sm:$0xff] }
 0x10b   : > { %v4367_v0 = vcombine.high %v1349_v54, %v1357_v55 }
 0x10f   : > { %3147 = vmatmul.mubr.bf16.gmra.mrb[20].mxu0 %v4376_v49  ;;  %v5254_v49 = vld [vmem:[%s5936_s17 + $0x2a0] sm:$0xff]  }
 0x110   : > { %3244 = vmatmul.mubr.bf16.gmra.mrb[20].mxu1 %v4378_v51  ;;  %3154 = vmatprep.mubr.bf16.mxu0 %v4393_v52  ;;  %v1348_v51 = vld [vmem:[%s6756_s0 + $0x210] sm:$0xff] }
 0x111   : > { %3251 = vmatprep.mubr.bf16.mxu1 %v4395_v53  ;;  %v1356_v52 = vld [vmem:[%s6756_s0 + $0x250] sm:$0xff]  ;;  %v5257_v53 = vld [vmem:[%s5936_s17 + $0x2e8] sm:$0xff]  }
 0x117   : > { %3155 = vmatmul.mubr.bf16.gmra.mrb[24].mxu0 %v4392_v60  ;;  %v5261_v60 = vld [vmem:[%s5936_s17 + $0x2f0] sm:$0xff]  }
 0x118   : > { %3252 = vmatmul.mubr.bf16.gmra.mrb[24].mxu1 %v4394_v61  ;;  %3162 = vmatprep.mubr.bf16.mxu0 %v4409_v62  ;;  %v4350_v61 = vcombine.low %v1333_v38, %v1341_v39  ;;  %v4365_v62 = vcombine.high %v1348_v51, %v1356_v52 }
 0x119   : > { %3259 = vmatprep.mubr.bf16.mxu1 %v4411_v63  ;;  %v5260_v63 = vld [vmem:[%s5936_s17 + $0x230] sm:$0xff]  }
 0x11f   : > { %3163 = vmatmul.mubr.bf16.gmra.mrb[28].mxu0 %v4408_v4  ;;  %v1372_v4 = vld [vmem:[%s6756_s0 + $0x2d0] sm:$0xff] }
 0x120   : > { %3260 = vmatmul.mubr.bf16.gmra.mrb[28].mxu1 %v4410_v5  ;;  %3300 = vmatprep.mubr.bf16.mxu0 %v4301_v6  ;;  %v5265_v5 = vld [vmem:[%s5936_s17 + $0x2f8] sm:$0xff]  }
 0x121   : > { %3397 = vmatprep.mubr.bf16.mxu1 %v4303_v7  ;;  %v1365_v6 = vld [vmem:[%s6756_s0 + $0x298] sm:$0xff] }
 0x122   : > { %v1373_v7 = vld [vmem:[%s6756_s0 + $0x2d8] sm:$0xff] }
 0x127   : > { %3301 = vmatmul.mubr.bf16.vlgmr.msra.gmra.mrb[32].mxu0 %v4300_v11  ;;  %v4364_v11 = vcombine.low %v1348_v51, %v1356_v52  ;;  %v5273_v51 = vld [vmem:[%s5936_s17 + $0x3c8] sm:$0xff]  }
 0x128   : > { %3398 = vmatmul.mubr.bf16.vlgmr.msra.gmra.mrb[32].mxu1 %v4302_v13  ;;  %4892 = vmatpush3.bf16.msra.mxu0 %v5236_v14  ;;  %v4366_v13 = vcombine.low %v1349_v54, %v1357_v55  ;;  %v4381_v14 = vcombine.high %v1364_v3, %v1372_v4  ;;  %v5272_v52 = vld [vmem:[%s5936_s17 + $0x308] sm:$0xff]   ;;  %v1318_v54 = vld [vmem:[%s6756_s0 + $0x120] sm:$0xff] }
 0x129   : > { %4956 = vmatpush3.bf16.msra.mxu1 %v5238_v15  ;;  %3308 = vmatprep.mubr.bf16.mxu0 %v4317_v16  ;;  %v4383_v15 = vcombine.high %v1365_v6, %v1373_v7  ;;  %v1380_v16 = vld [vmem:[%s6756_s0 + $0x310] sm:$0xff]  ;;  %v1326_v55 = vld [vmem:[%s6756_s0 + $0x160] sm:$0xff] }
 0x12a   : > { %3405 = vmatprep.mubr.bf16.mxu1 %v4319_v17  ;;  %4893 = vmatprep.subr.bf16.mxu0 %v5239_v18  ;;  %v1388_v17 = vld [vmem:[%s6756_s0 + $0x350] sm:$0xff]  ;;  %v1381_v18 = vld [vmem:[%s6756_s0 + $0x318] sm:$0xff] }
 0x12b   : > { %4957 = vmatprep.subr.bf16.mxu1 %v5241_v20  ;;  %v4380_v20 = vcombine.low %v1364_v3, %v1372_v4  ;;  %v4397_v22 = vcombine.high %v1380_v16, %v1388_v17  ;;  %v5281_v3 = vld [vmem:[%s5936_s17 + $0x3d8] sm:$0xff]   ;;  %v1334_v4 = vld [vmem:[%s6756_s0 + $0x1a0] sm:$0xff] }
 0x12c   : > { %4894 = vmatpush3.bf16.msra.mxu0 %v5240_v19  ;;  %v1389_v19 = vld [vmem:[%s6756_s0 + $0x358] sm:$0xff] }
 0x12d   : > { %4958 = vmatpush3.bf16.msra.mxu1 %v5242_v21  ;;  %4895 = vmatprep.subr.bf16.mxu0 %v5243_v26  ;;  %v4382_v21 = vcombine.low %v1365_v6, %v1373_v7  ;;  %v4399_v23 = vcombine.high %v1381_v18, %v1389_v19  ;;  %v1397_v26 = vld [vmem:[%s6756_s0 + $0x398] sm:$0xff]  ;;  %v1335_v6 = vld [vmem:[%s6756_s0 + $0x1a8] sm:$0xff] }
 0x12e   : > { %4959 = vmatprep.subr.bf16.mxu1 %v5245_v27  ;;  %v1405_v27 = vld [vmem:[%s6756_s0 + $0x3d8] sm:$0xff] }
 0x12f   : > { %3309 = vmatmul.mubr.bf16.gmra.mrb[36].mxu0 %v4316_v28  ;;  %v4396_v28 = vcombine.low %v1380_v16, %v1388_v17  ;;  %v5280_v7 = vld [vmem:[%s5936_s17 + $0x318] sm:$0xff]   ;;  %v5284_v16 = vld [vmem:[%s5936_s17 + $0x320] sm:$0xff]  }
 0x130   : > { %3406 = vmatmul.mubr.bf16.gmra.mrb[36].mxu1 %v4318_v29  ;;  %3316 = vmatprep.mubr.bf16.mxu0 %v4333_v30  ;;  %v4398_v29 = vcombine.low %v1381_v18, %v1389_v19  ;;  %v4413_v30 = vcombine.high %v1396_v24, %v1404_v25  ;;  %v5286_v17 = vld [vmem:[%s5936_s17 + $0x3a0] sm:$0xff]   ;;  %v5287_v18 = vld [vmem:[%s5936_s17 + $0x368] sm:$0xff]  }
 0x131   : > { %3413 = vmatprep.mubr.bf16.mxu1 %v4335_v32  ;;  %4896 = vmatpush3.bf16.msra.mxu0 %v5244_v31  ;;  %v4415_v31 = vcombine.high %v1397_v26, %v1405_v27  ;;  %v1286_v32 = vld [vmem:[%s6756_s0 + $0x20] sm:$0xff]  ;;  %v5289_v19 = vld [vmem:[%s5936_s17 + $0x3e8] sm:$0xff]  }
 0x132   : > { %4960 = vmatpush3.bf16.msra.mxu1 %v5246_v33  ;;  %4897 = vmatprep.subr.bf16.mxu0 %v5247_v34  ;;  %v1294_v33 = vld [vmem:[%s6756_s0 + $0x60] sm:$0xff]  ;;  %v1287_v34 = vld [vmem:[%s6756_s0 + $0x28] sm:$0xff] }
 0x133   : > { %4961 = vmatprep.subr.bf16.mxu1 %v5249_v37  ;;  %v4414_v37 = vcombine.low %v1397_v26, %v1405_v27  ;;  %v4305_v38 = vcombine.high %v1286_v32, %v1294_v33  ;;  %v4307_v39 = vcombine.high %v1287_v34, %v1295_v35  ;;  %v1359_v24 = vld [vmem:[%s6756_s0 + $0x268] sm:$0xff]  ;;  %v5291_v26 = vld [vmem:[%s5936_s17 + $0x370] sm:$0xff]  }
 0x134   : > { %v5290_v25 = vld [vmem:[%s5936_s17 + $0x3a8] sm:$0xff]  }
 0x135   : > { %4898 = vmatpush3.bf16.msra.mxu0 %v5248_v40  ;;  %v1302_v40 = vld [vmem:[%s6756_s0 + $0xa0] sm:$0xff] }
 0x136   : > { %4962 = vmatpush3.bf16.msra.mxu1 %v5250_v41  ;;  %4899 = vmatprep.subr.bf16.mxu0 %v5251_v42  ;;  %v1310_v41 = vld [vmem:[%s6756_s0 + $0xe0] sm:$0xff]  ;;  %v4304_v42 = vcombine.low %v1286_v32, %v1294_v33  ;;  %v5292_v32 = vld [vmem:[%s5936_s17 + $0x330] sm:$0xff]  }
 0x137   : > { %3317 = vmatmul.mubr.bf16.gmra.mrb[40].mxu0 %v4332_v43  ;;  %4963 = vmatprep.subr.bf16.mxu1 %v5253_v44  ;;  %v1303_v43 = vld [vmem:[%s6756_s0 + $0xa8] sm:$0xff]  ;;  %v5294_v33 = vld [vmem:[%s5936_s17 + $0x3b0] sm:$0xff]  }
 0x138   : > { %3414 = vmatmul.mubr.bf16.gmra.mrb[40].mxu1 %v4334_v45  ;;  %3324 = vmatprep.mubr.bf16.mxu0 %v4349_v46  ;;  %v1311_v44 = vld [vmem:[%s6756_s0 + $0xe8] sm:$0xff]  ;;  %v4306_v45 = vcombine.low %v1287_v34, %v1295_v35  ;;  %v5268_v46 = vld [vmem:[%s5936_s17 + $0x300] sm:$0xff]   ;;  %v5295_v34 = vld [vmem:[%s5936_s17 + $0x378] sm:$0xff]  }
 0x139   : > { %3421 = vmatprep.mubr.bf16.mxu1 %v4351_v47  ;;  %4900 = vmatpush3.bf16.msra.mxu0 %v5252_v48  ;;  %v5270_v47 = vld [vmem:[%s5936_s17 + $0x380] sm:$0xff]   ;;  %v4321_v48 = vcombine.high %v1302_v40, %v1310_v41  ;;  %v5297_v35 = vld [vmem:[%s5936_s17 + $0x3f8] sm:$0xff]  }
 0x13a   : > { %4964 = vmatpush3.bf16.msra.mxu1 %v5254_v49  ;;  %4901 = vmatprep.subr.bf16.mxu0 %v5255_v50  ;;  %v4323_v49 = vcombine.high %v1303_v43, %v1311_v44  ;;  %v5271_v50 = vld [vmem:[%s5936_s17 + $0x348] sm:$0xff]  }
 0x13b   : > { %4965 = vmatprep.subr.bf16.mxu1 %v5257_v53  ;;  %v5274_v53 = vld [vmem:[%s5936_s17 + $0x388] sm:$0xff]  }
 0x13d   : > { %4902 = vmatpush3.bf16.msra.mxu0 %v5256_v56  ;;  %v5275_v56 = vld [vmem:[%s5936_s17 + $0x350] sm:$0xff]  }
 0x13e   : > { %4966 = vmatpush3.bf16.msra.mxu1 %v5258_v57  ;;  %4903 = vmatprep.subr.bf16.mxu0 %v5259_v58  ;;  %v1319_v57 = vld [vmem:[%s6756_s0 + $0x128] sm:$0xff] }
 0x13f   : > { %3325 = vmatmul.mubr.bf16.gmra.mrb[44].mxu0 %v4348_v59  ;;  %4967 = vmatprep.subr.bf16.mxu1 %v5261_v60  ;;  %v1327_v58 = vld [vmem:[%s6756_s0 + $0x168] sm:$0xff]  ;;  %v5277_v59 = vld [vmem:[%s5936_s17 + $0x3d0] sm:$0xff]   ;;  %v4320_v60 = vcombine.low %v1302_v40, %v1310_v41  ;;  %v5298_v41 = vld [vmem:[%s5936_s17 + $0x3b8] sm:$0xff]  }
 0x140   : > { %3422 = vmatmul.mubr.bf16.gmra.mrb[44].mxu1 %v4350_v61  ;;  %3332 = vmatprep.mubr.bf16.mxu0 %v4365_v62  ;;  %v4322_v61 = vcombine.low %v1303_v43, %v1311_v44  ;;  %v4337_v62 = vcombine.high %v1318_v54, %v1326_v55  ;;  %v1375_v40 = vld [vmem:[%s6756_s0 + $0x2e8] sm:$0xff] }
 0x141   : > { %3429 = vmatprep.mubr.bf16.mxu1 %v4367_v0  ;;  %4904 = vmatpush3.bf16.msra.mxu0 %v5260_v63  ;;  %v4339_v63 = vcombine.high %v1319_v57, %v1327_v58  ;;  %v5276_v0 = vld [vmem:[%s5936_s17 + $0x310] sm:$0xff]  }
 0x142   : > { %4968 = vmatpush3.bf16.msra.mxu1 %v5262_v1  ;;  %4905 = vmatprep.subr.bf16.mxu0 %v5263_v2  ;;  %v5278_v1 = vld [vmem:[%s5936_s17 + $0x390] sm:$0xff]   ;;  %v5279_v2 = vld [vmem:[%s5936_s17 + $0x358] sm:$0xff]  }
 0x143   : > { %4969 = vmatprep.subr.bf16.mxu1 %v5265_v5  ;;  %v1342_v5 = vld [vmem:[%s6756_s0 + $0x1e0] sm:$0xff] }
 0x144   : > { %v4352_v27 = vcombine.low %v1334_v4, %v1342_v5 }
 0x145   : > { %4906 = vmatpush3.bf16.msra.mxu0 %v5264_v8  ;;  %v1343_v8 = vld [vmem:[%s6756_s0 + $0x1e8] sm:$0xff] }
 0x146   : > { %4970 = vmatpush3.bf16.msra.mxu1 %v5266_v9  ;;  %5019 = vmatprep.subr.bf16.mxu0 %v5267_v10  ;;  %v5282_v9 = vld [vmem:[%s5936_s17 + $0x398] sm:$0xff]   ;;  %v5283_v10 = vld [vmem:[%s5936_s17 + $0x360] sm:$0xff]  }
 0x147   : > { %3333 = vmatmul.mubr.bf16.gmra.mrb[48].mxu0 %v4364_v11  ;;  %5083 = vmatprep.subr.bf16.mxu1 %v5269_v12  ;;  %v4336_v11 = vcombine.low %v1318_v54, %v1326_v55  ;;  %v5285_v12 = vld [vmem:[%s5936_s17 + $0x3e0] sm:$0xff]  }
 0x148   : > { %3430 = vmatmul.mubr.bf16.gmra.mrb[48].mxu1 %v4366_v13  ;;  %3340 = vmatprep.mubr.bf16.mxu0 %v4381_v14  ;;  %v4338_v13 = vcombine.low %v1319_v57, %v1327_v58  ;;  %v4353_v14 = vcombine.high %v1334_v4, %v1342_v5  ;;  %v1398_v54 = vld [vmem:[%s6756_s0 + $0x3a0] sm:$0xff]  ;;  %v1407_v57 = vld [vmem:[%s6756_s0 + $0x3e8] sm:$0xff] }
 0x149   : > { %3437 = vmatprep.mubr.bf16.mxu1 %v4383_v15  ;;  %v4355_v15 = vcombine.high %v1335_v6, %v1343_v8  ;;  %v1406_v55 = vld [vmem:[%s6756_s0 + $0x3e0] sm:$0xff] }
 0x14f   : > { %3341 = vmatmul.mubr.bf16.gmra.mrb[52].mxu0 %v4380_v20  ;;  %v1350_v20 = vld [vmem:[%s6756_s0 + $0x220] sm:$0xff] }
 0x150   : > { %3438 = vmatmul.mubr.bf16.gmra.mrb[52].mxu1 %v4382_v21  ;;  %3348 = vmatprep.mubr.bf16.mxu0 %v4397_v22  ;;  %v1358_v21 = vld [vmem:[%s6756_s0 + $0x260] sm:$0xff]  ;;  %v1351_v22 = vld [vmem:[%s6756_s0 + $0x228] sm:$0xff] }
 0x151   : > { %3445 = vmatprep.mubr.bf16.mxu1 %v4399_v23  ;;  %v5288_v23 = vld [vmem:[%s5936_s17 + $0x328] sm:$0xff]   ;;  %v4370_v43 = vcombine.low %v1351_v22, %v1359_v24 }
 0x157   : > { %3349 = vmatmul.mubr.bf16.gmra.mrb[56].mxu0 %v4396_v28  ;;  %v5293_v28 = vld [vmem:[%s5936_s17 + $0x3f0] sm:$0xff]  }
 0x158   : > { %3446 = vmatmul.mubr.bf16.gmra.mrb[56].mxu1 %v4398_v29  ;;  %3356 = vmatprep.mubr.bf16.mxu0 %v4413_v30  ;;  %v4354_v29 = vcombine.low %v1335_v6, %v1343_v8  ;;  %v4369_v30 = vcombine.high %v1350_v20, %v1358_v21  ;;  %v1304_v6 = vld [vmem:[%s6756_s0 + $0xb0] sm:$0xff]  ;;  %v1305_v8 = vld [vmem:[%s6756_s0 + $0xb8] sm:$0xff] }
 0x159   : > { %3453 = vmatprep.mubr.bf16.mxu1 %v4415_v31  ;;  %v4371_v31 = vcombine.high %v1351_v22, %v1359_v24  ;;  %v1336_v22 = vld [vmem:[%s6756_s0 + $0x1b0] sm:$0xff]  ;;  %v1337_v24 = vld [vmem:[%s6756_s0 + $0x1b8] sm:$0xff] }
 0x15f   : > { %3357 = vmatmul.mubr.bf16.gmra.mrb[60].mxu0 %v4412_v36  ;;  %v1366_v36 = vld [vmem:[%s6756_s0 + $0x2a0] sm:$0xff] }
 0x160   : > { %3454 = vmatmul.mubr.bf16.gmra.mrb[60].mxu1 %v4414_v37  ;;  %3494 = vmatprep.mubr.bf16.mxu0 %v4305_v38  ;;  %v1374_v37 = vld [vmem:[%s6756_s0 + $0x2e0] sm:$0xff]  ;;  %v5296_v38 = vld [vmem:[%s5936_s17 + $0x338] sm:$0xff]   ;;  %s1276_s17 = scalar_select %p1275_p10, %s5366_s18, 1 }
 0x161   : > { %3591 = vmatprep.mubr.bf16.mxu1 %v4307_v39  ;;  %v1367_v39 = vld [vmem:[%s6756_s0 + $0x2a8] sm:$0xff]  ;;  %v4385_v44 = vcombine.high %v1366_v36, %v1374_v37 }
 0x162   : > { %s1277_s9 = scalar_lea.vmem %s6758_s2, %s1276_s17  ;;  %s1280_s12 = scalar_lea.vmem %s6759_s3, %s1276_s17 }
 0x167   : > { %3495 = vmatmul.mubr.bf16.vlgmr.msra.gmra.mrb[64].mxu0 %v4304_v42  ;;  %v4368_v42 = vcombine.low %v1350_v20, %v1358_v21 }
 0x168   : > { %3592 = vmatmul.mubr.bf16.vlgmr.msra.gmra.mrb[64].mxu1 %v4306_v45  ;;  %5020 = vmatpush3.bf16.msra.mxu0 %v5268_v46  ;;  %v4387_v45 = vcombine.high %v1367_v39, %v1375_v40  ;;  %v1382_v46 = vld [vmem:[%s6756_s0 + $0x320] sm:$0xff] }
 0x169   : > { %5084 = vmatpush3.bf16.msra.mxu1 %v5270_v47  ;;  %3502 = vmatprep.mubr.bf16.mxu0 %v4321_v48  ;;  %v1390_v47 = vld [vmem:[%s6756_s0 + $0x360] sm:$0xff]  ;;  %v1383_v48 = vld [vmem:[%s6756_s0 + $0x328] sm:$0xff] }
 0x16a   : > { %3599 = vmatprep.mubr.bf16.mxu1 %v4323_v49  ;;  %5021 = vmatprep.subr.bf16.mxu0 %v5271_v50  ;;  %v1391_v49 = vld [vmem:[%s6756_s0 + $0x368] sm:$0xff]  ;;  %v4384_v50 = vcombine.low %v1366_v36, %v1374_v37  ;;  %v4400_v58 = vcombine.low %v1382_v46, %v1390_v47 }
 0x16b   : > { %5085 = vmatprep.subr.bf16.mxu1 %v5273_v51  ;;  %v4386_v51 = vcombine.low %v1367_v39, %v1375_v40 }
 0x16c   : > { %5022 = vmatpush3.bf16.msra.mxu0 %v5272_v52  ;;  %v4401_v52 = vcombine.high %v1382_v46, %v1390_v47 }
 0x16d   : > { %5086 = vmatpush3.bf16.msra.mxu1 %v5274_v53  ;;  %5023 = vmatprep.subr.bf16.mxu0 %v5275_v56  ;;  %v4403_v53 = vcombine.high %v1383_v48, %v1391_v49  ;;  %v1399_v56 = vld [vmem:[%s6756_s0 + $0x3a8] sm:$0xff] }
 0x16e   : > { %5087 = vmatprep.subr.bf16.mxu1 %v5277_v59  ;;  %v4402_v59 = vcombine.low %v1383_v48, %v1391_v49 }
 0x16f   : > { %3503 = vmatmul.mubr.bf16.gmra.mrb[68].mxu0 %v4320_v60  ;;  %v4417_v60 = vcombine.high %v1398_v54, %v1406_v55 }
 0x170   : > { %3600 = vmatmul.mubr.bf16.gmra.mrb[68].mxu1 %v4322_v61  ;;  %3510 = vmatprep.mubr.bf16.mxu0 %v4337_v62  ;;  %v4419_v61 = vcombine.high %v1399_v56, %v1407_v57  ;;  %v1288_v62 = vld [vmem:[%s6756_s0 + $0x30] sm:$0xff] }
 0x171   : > { %3607 = vmatprep.mubr.bf16.mxu1 %v4339_v63  ;;  %5024 = vmatpush3.bf16.msra.mxu0 %v5276_v0  ;;  %v1296_v63 = vld [vmem:[%s6756_s0 + $0x70] sm:$0xff]  ;;  %v1289_v0 = vld [vmem:[%s6756_s0 + $0x38] sm:$0xff] }
 0x172   : > { %5088 = vmatpush3.bf16.msra.mxu1 %v5278_v1  ;;  %5025 = vmatprep.subr.bf16.mxu0 %v5279_v2  ;;  %v1297_v1 = vld [vmem:[%s6756_s0 + $0x78] sm:$0xff]  ;;  %v4416_v2 = vcombine.low %v1398_v54, %v1406_v55  ;;  %v4309_v4 = vcombine.high %v1288_v62, %v1296_v63 }
 0x173   : > { %5089 = vmatprep.subr.bf16.mxu1 %v5281_v3  ;;  %v4418_v3 = vcombine.low %v1399_v56, %v1407_v57  ;;  %v4311_v5 = vcombine.high %v1289_v0, %v1297_v1  ;;  %v1369_v55 = vld [vmem:[%s6756_s0 + $0x2b8] sm:$0xff] }
 0x174   : > { %v1377_v56 = vld [vmem:[%s6756_s0 + $0x2f8] sm:$0xff] }
 0x175   : > { %5026 = vmatpush3.bf16.msra.mxu0 %v5280_v7  ;;  %v1312_v7 = vld [vmem:[%s6756_s0 + $0xf0] sm:$0xff] }
 0x176   : > { %5090 = vmatpush3.bf16.msra.mxu1 %v5282_v9  ;;  %5027 = vmatprep.subr.bf16.mxu0 %v5283_v10  ;;  %v1313_v9 = vld [vmem:[%s6756_s0 + $0xf8] sm:$0xff]  ;;  %v4308_v10 = vcombine.low %v1288_v62, %v1296_v63 }
 0x177   : > { %3511 = vmatmul.mubr.bf16.gmra.mrb[72].mxu0 %v4336_v11  ;;  %5091 = vmatprep.subr.bf16.mxu1 %v5285_v12  ;;  %v4310_v11 = vcombine.low %v1289_v0, %v1297_v1  ;;  %v4325_v12 = vcombine.high %v1304_v6, %v1312_v7 }
 0x178   : > { %3608 = vmatmul.mubr.bf16.gmra.mrb[72].mxu1 %v4338_v13  ;;  %3518 = vmatprep.mubr.bf16.mxu0 %v4353_v14  ;;  %v4327_v13 = vcombine.high %v1305_v8, %v1313_v9  ;;  %v1320_v14 = vld [vmem:[%s6756_s0 + $0x130] sm:$0xff] }
 0x179   : > { %3615 = vmatprep.mubr.bf16.mxu1 %v4355_v15  ;;  %5028 = vmatpush3.bf16.msra.mxu0 %v5284_v16  ;;  %v1328_v15 = vld [vmem:[%s6756_s0 + $0x170] sm:$0xff]  ;;  %v1321_v16 = vld [vmem:[%s6756_s0 + $0x138] sm:$0xff] }
 0x17a   : > { %5092 = vmatpush3.bf16.msra.mxu1 %v5286_v17  ;;  %5029 = vmatprep.subr.bf16.mxu0 %v5287_v18  ;;  %v1329_v17 = vld [vmem:[%s6756_s0 + $0x178] sm:$0xff]  ;;  %v4324_v18 = vcombine.low %v1304_v6, %v1312_v7  ;;  %v4341_v20 = vcombine.high %v1320_v14, %v1328_v15 }
 0x17b   : > { %5093 = vmatprep.subr.bf16.mxu1 %v5289_v19  ;;  %v4326_v19 = vcombine.low %v1305_v8, %v1313_v9  ;;  %v4343_v21 = vcombine.high %v1321_v16, %v1329_v17 }
 0x17d   : > { %5030 = vmatpush3.bf16.msra.mxu0 %v5288_v23  ;;  %v1344_v23 = vld [vmem:[%s6756_s0 + $0x1f0] sm:$0xff] }
 0x17e   : > { %5094 = vmatpush3.bf16.msra.mxu1 %v5290_v25  ;;  %5031 = vmatprep.subr.bf16.mxu0 %v5291_v26  ;;  %v1345_v25 = vld [vmem:[%s6756_s0 + $0x1f8] sm:$0xff]  ;;  %v4340_v26 = vcombine.low %v1320_v14, %v1328_v15  ;;  %v4356_v37 = vcombine.low %v1336_v22, %v1344_v23 }
 0x17f   : > { %3519 = vmatmul.mubr.bf16.gmra.mrb[76].mxu0 %v4352_v27  ;;  %5095 = vmatprep.subr.bf16.mxu1 %v5293_v28  ;;  %v4342_v27 = vcombine.low %v1321_v16, %v1329_v17  ;;  %v4357_v28 = vcombine.high %v1336_v22, %v1344_v23  ;;  %v1393_v14 = vld [vmem:[%s6756_s0 + $0x378] sm:$0xff] }
 0x180   : > { %3616 = vmatmul.mubr.bf16.gmra.mrb[76].mxu1 %v4354_v29  ;;  %3526 = vmatprep.mubr.bf16.mxu0 %v4369_v30  ;;  %v4359_v29 = vcombine.high %v1337_v24, %v1345_v25  ;;  %v1352_v30 = vld [vmem:[%s6756_s0 + $0x230] sm:$0xff] }
 0x181   : > { %3623 = vmatprep.mubr.bf16.mxu1 %v4371_v31  ;;  %5032 = vmatpush3.bf16.msra.mxu0 %v5292_v32  ;;  %v1360_v31 = vld [vmem:[%s6756_s0 + $0x270] sm:$0xff] }
 0x182   : > { %5096 = vmatpush3.bf16.msra.mxu1 %v5294_v33  ;;  %5033 = vmatprep.subr.bf16.mxu0 %v5295_v34  ;;  %v1353_v33 = vld [vmem:[%s6756_s0 + $0x238] sm:$0xff] }
 0x183   : > { %5097 = vmatprep.subr.bf16.mxu1 %v5297_v35  ;;  %v1361_v34 = vld [vmem:[%s6756_s0 + $0x278] sm:$0xff] }
 0x184   : > { %v4375_v46 = vcombine.high %v1353_v33, %v1361_v34  ;;  %v4374_v63 = vcombine.low %v1353_v33, %v1361_v34  ;;  %v1408_v33 = vld [vmem:[%s6756_s0 + $0x3f0] sm:$0xff] }
 0x185   : > { %5034 = vmatpush3.bf16.msra.mxu0 %v5296_v38 }
 0x186   : > { %5098 = vmatpush3.bf16.msra.mxu1 %v5298_v41  ;;  %v4358_v41 = vcombine.low %v1337_v24, %v1345_v25 }
 0x187   : > { %3527 = vmatmul.mubr.bf16.gmra.mrb[80].mxu0 %v4368_v42  ;;  %v4373_v42 = vcombine.high %v1352_v30, %v1360_v31 }
 0x188   : > { %3624 = vmatmul.mubr.bf16.gmra.mrb[80].mxu1 %v4370_v43  ;;  %3534 = vmatprep.mubr.bf16.mxu0 %v4385_v44 }
 0x189   : > { %3631 = vmatprep.mubr.bf16.mxu1 %v4387_v45 }
 0x18f   : > { %3535 = vmatmul.mubr.bf16.gmra.mrb[84].mxu0 %v4384_v50 }
 0x190   : > { %3632 = vmatmul.mubr.bf16.gmra.mrb[84].mxu1 %v4386_v51  ;;  %3542 = vmatprep.mubr.bf16.mxu0 %v4401_v52  ;;  %v1368_v52 = vld [vmem:[%s6756_s0 + $0x2b0] sm:$0xff] }
 0x191   : > { %3639 = vmatprep.mubr.bf16.mxu1 %v4403_v53  ;;  %v1376_v53 = vld [vmem:[%s6756_s0 + $0x2f0] sm:$0xff] }
 0x192   : > { %v4389_v0 = vcombine.high %v1368_v52, %v1376_v53  ;;  %v4388_v17 = vcombine.low %v1368_v52, %v1376_v53 }
 0x197   : > { %3543 = vmatmul.mubr.bf16.gmra.mrb[88].mxu0 %v4400_v58 }
 0x198   : > { %3640 = vmatmul.mubr.bf16.gmra.mrb[88].mxu1 %v4402_v59  ;;  %3550 = vmatprep.mubr.bf16.mxu0 %v4417_v60  ;;  %v4372_v59 = vcombine.low %v1352_v30, %v1360_v31 }
 0x199   : > { %3647 = vmatprep.mubr.bf16.mxu1 %v4419_v61 }
 0x19f   : > { %3551 = vmatmul.mubr.bf16.gmra.mrb[92].mxu0 %v4416_v2 }
 0x1a0   : > { %3648 = vmatmul.mubr.bf16.gmra.mrb[92].mxu1 %v4418_v3  ;;  %3688 = vmatprep.mubr.bf16.mxu0 %v4309_v4  ;;  %v4391_v4 = vcombine.high %v1369_v55, %v1377_v56 }
 0x1a1   : > { %3785 = vmatprep.mubr.bf16.mxu1 %v4311_v5 }
 0x1a7   : > { %3689 = vmatmul.mubr.bf16.vlgmr.msra.gmra.mrb[96].mxu0 %v4308_v10  ;;  %v1384_v10 = vld [vmem:[%s6756_s0 + $0x330] sm:$0xff] }
 0x1a8   : > { %3786 = vmatmul.mubr.bf16.vlgmr.msra.gmra.mrb[96].mxu1 %v4310_v11  ;;  %3696 = vmatprep.mubr.bf16.mxu0 %v4325_v12  ;;  %v1392_v11 = vld [vmem:[%s6756_s0 + $0x370] sm:$0xff] }
 0x1a9   : > { %3793 = vmatprep.mubr.bf16.mxu1 %v4327_v13  ;;  %v1385_v13 = vld [vmem:[%s6756_s0 + $0x338] sm:$0xff]  ;;  %v4405_v22 = vcombine.high %v1384_v10, %v1392_v11 }
 0x1af   : > { %3697 = vmatmul.mubr.bf16.gmra.mrb[100].mxu0 %v4324_v18 }
 0x1b0   : > { %3794 = vmatmul.mubr.bf16.gmra.mrb[100].mxu1 %v4326_v19  ;;  %3704 = vmatprep.mubr.bf16.mxu0 %v4341_v20 }
 0x1b1   : > { %3801 = vmatprep.mubr.bf16.mxu1 %v4343_v21  ;;  %v4390_v21 = vcombine.low %v1369_v55, %v1377_v56 }
 0x1b7   : > { %3705 = vmatmul.mubr.bf16.gmra.mrb[104].mxu0 %v4340_v26  ;;  %v4407_v26 = vcombine.high %v1385_v13, %v1393_v14 }
 0x1b8   : > { %3802 = vmatmul.mubr.bf16.gmra.mrb[104].mxu1 %v4342_v27  ;;  %3712 = vmatprep.mubr.bf16.mxu0 %v4357_v28 }
 0x1b9   : > { %3809 = vmatprep.mubr.bf16.mxu1 %v4359_v29 }
 0x1ba   : > { %v4651_v32 = vpop.f32.mrb[0].mxu0 }
 0x1bb   : > { %v4715_v35 = vpop.f32.mrb[0].mxu1  ;;  %v4652_v36 = vpop.f32.mrb[1].mxu0 }
 0x1bc   : > { %v4653_v38 = vadd.f32 %v4652_v36, %v4651_v32  ;;  %v4716_v39 = vpop.f32.mrb[1].mxu1  ;;  %v4654_v40 = vpop.f32.mrb[2].mxu0  ;;  %v1400_v32 = vld [vmem:[%s6756_s0 + $0x3b0] sm:$0xff]  ;;  %v1409_v36 = vld [vmem:[%s6756_s0 + $0x3f8] sm:$0xff] }
 0x1bd   : > { %v4717_v43 = vadd.f32 %v4716_v39, %v4715_v35  ;;  %v4718_v44 = vpop.f32.mrb[2].mxu1  ;;  %v4655_v45 = vpop.f32.mrb[3].mxu0  ;;  %v1401_v35 = vld [vmem:[%s6756_s0 + $0x3b8] sm:$0xff]  ;;  %v4404_v39 = vcombine.low %v1384_v10, %v1392_v11 }
 0x1be   : > { %v4656_v47 = vadd.f32 %v4655_v45, %v4654_v40  ;;  %v4719_v48 = vpop.f32.mrb[3].mxu1 }
 0x1bf   : > { %v6406_v49 = vadd.f32 %v4717_v43, %v4653_v38  ;;  %v4720_v50 = vadd.f32 %v4719_v48, %v4718_v44  ;;  %3713 = vmatmul.mubr.bf16.gmra.mrb[108].mxu0 %v4356_v37  ;;  %v4406_v43 = vcombine.low %v1385_v13, %v1393_v14  ;;  %v4421_v44 = vcombine.high %v1400_v32, %v1408_v33 }
 0x1c0   : > { %3810 = vmatmul.mubr.bf16.gmra.mrb[108].mxu1 %v4358_v41  ;;  %3720 = vmatprep.mubr.bf16.mxu0 %v4373_v42  ;;  %v4423_v48 = vcombine.high %v1401_v35, %v1409_v36 }
 0x1c1   : > { %v6408_v51 = vadd.f32 %v4720_v50, %v4656_v47  ;;  %3817 = vmatprep.mubr.bf16.mxu1 %v4375_v46 }
 0x1c2   : > { %v4657_v54 = vpop.f32.mrb[4].mxu0 }
 0x1c3   : > { %v4721_v57 = vpop.f32.mrb[4].mxu1  ;;  %v4658_v58 = vpop.f32.mrb[5].mxu0 }
 0x1c4   : > { %v4659_v60 = vadd.f32 %v4658_v58, %v4657_v54  ;;  %v4722_v61 = vpop.f32.mrb[5].mxu1  ;;  %v4660_v62 = vpop.f32.mrb[6].mxu0 }
 0x1c5   : > { %v4723_v1 = vadd.f32 %v4722_v61, %v4721_v57  ;;  %v4724_v2 = vpop.f32.mrb[6].mxu1  ;;  %v4661_v3 = vpop.f32.mrb[7].mxu0 }
 0x1c6   : > { %v4662_v5 = vadd.f32 %v4661_v3, %v4660_v62  ;;  %v4725_v6 = vpop.f32.mrb[7].mxu1 }
 0x1c7   : > { %v6422_v7 = vadd.f32 %v4723_v1, %v4659_v60  ;;  %v4726_v8 = vadd.f32 %v4725_v6, %v4724_v2  ;;  %3721 = vmatmul.mubr.bf16.gmra.mrb[112].mxu0 %v4372_v59  ;;  %v4420_v59 = vcombine.low %v1400_v32, %v1408_v33 }
 0x1c8   : > { %3818 = vmatmul.mubr.bf16.gmra.mrb[112].mxu1 %v4374_v63  ;;  %3728 = vmatprep.mubr.bf16.mxu0 %v4389_v0  ;;  %v4422_v63 = vcombine.low %v1401_v35, %v1409_v36 }
 0x1c9   : > { %v6424_v9 = vadd.f32 %v4726_v8, %v4662_v5  ;;  %3825 = vmatprep.mubr.bf16.mxu1 %v4391_v4 }
 0x1ca   : > { %v4663_v12 = vpop.f32.mrb[8].mxu0 }
 0x1cb   : > { %v4727_v15 = vpop.f32.mrb[8].mxu1  ;;  %v4664_v16 = vpop.f32.mrb[9].mxu0 }
 0x1cc   : > { %v4665_v18 = vadd.f32 %v4664_v16, %v4663_v12  ;;  %v4728_v19 = vpop.f32.mrb[9].mxu1  ;;  %v4666_v20 = vpop.f32.mrb[10].mxu0 }
 0x1cd   : > { %v4729_v23 = vadd.f32 %v4728_v19, %v4727_v15  ;;  %v4730_v24 = vpop.f32.mrb[10].mxu1  ;;  %v4667_v25 = vpop.f32.mrb[11].mxu0 }
 0x1ce   : > { %v4668_v27 = vadd.f32 %v4667_v25, %v4666_v20  ;;  %v4731_v28 = vpop.f32.mrb[11].mxu1 }
 0x1cf   : > { %v6438_v29 = vadd.f32 %v4729_v23, %v4665_v18  ;;  %v4732_v30 = vadd.f32 %v4731_v28, %v4730_v24  ;;  %3729 = vmatmul.mubr.bf16.gmra.mrb[116].mxu0 %v4388_v17 }
 0x1d0   : > { %3826 = vmatmul.mubr.bf16.gmra.mrb[116].mxu1 %v4390_v21  ;;  %3736 = vmatprep.mubr.bf16.mxu0 %v4405_v22 }
 0x1d1   : > { %v6440_v31 = vadd.f32 %v4732_v30, %v4668_v27  ;;  %3833 = vmatprep.mubr.bf16.mxu1 %v4407_v26 }
 0x1d2   : > { %v4669_v34 = vpop.f32.mrb[12].mxu0 }
 0x1d3   : > { %v4733_v37 = vpop.f32.mrb[12].mxu1  ;;  %v4670_v38 = vpop.f32.mrb[13].mxu0 }
 0x1d4   : > { %v4671_v40 = vadd.f32 %v4670_v38, %v4669_v34  ;;  %v4734_v41 = vpop.f32.mrb[13].mxu1  ;;  %v4672_v42 = vpop.f32.mrb[14].mxu0 }
 0x1d5   : > { %v4735_v45 = vadd.f32 %v4734_v41, %v4733_v37  ;;  %v4736_v46 = vpop.f32.mrb[14].mxu1  ;;  %v4673_v47 = vpop.f32.mrb[15].mxu0 }
 0x1d6   : > { %v4674_v50 = vadd.f32 %v4673_v47, %v4672_v42  ;;  %v4737_v52 = vpop.f32.mrb[15].mxu1 }
 0x1d7   : > { %v6454_v53 = vadd.f32 %v4735_v45, %v4671_v40  ;;  %v4738_v54 = vadd.f32 %v4737_v52, %v4736_v46  ;;  %3737 = vmatmul.mubr.bf16.gmra.mrb[120].mxu0 %v4404_v39 }
 0x1d8   : > { %3834 = vmatmul.mubr.bf16.gmra.mrb[120].mxu1 %v4406_v43  ;;  %3744 = vmatprep.mubr.bf16.mxu0 %v4421_v44 }
 0x1d9   : > { %v6456_v55 = vadd.f32 %v4738_v54, %v4674_v50  ;;  %3841 = vmatprep.mubr.bf16.mxu1 %v4423_v48 }
 0x1da   : > { %v4675_v56 = vpop.f32.mrb[16].mxu0 }
 0x1db   : > { %v4739_v57 = vpop.f32.mrb[16].mxu1  ;;  %v4676_v58 = vpop.f32.mrb[17].mxu0 }
 0x1dc   : > { %v4677_v60 = vadd.f32 %v4676_v58, %v4675_v56  ;;  %v4740_v61 = vpop.f32.mrb[17].mxu1  ;;  %v4678_v62 = vpop.f32.mrb[18].mxu0 }
 0x1dd   : > { %v4741_v0 = vadd.f32 %v4740_v61, %v4739_v57  ;;  %v4742_v1 = vpop.f32.mrb[18].mxu1  ;;  %v4679_v2 = vpop.f32.mrb[19].mxu0 }
 0x1de   : > { %v4680_v3 = vadd.f32 %v4679_v2, %v4678_v62  ;;  %v4743_v4 = vpop.f32.mrb[19].mxu1 }
 0x1df   : > { %v6458_v5 = vadd.f32 %v4741_v0, %v4677_v60  ;;  %v4744_v6 = vadd.f32 %v4743_v4, %v4742_v1  ;;  %3745 = vmatmul.mubr.bf16.gmra.mrb[124].mxu0 %v4420_v59 }
 0x1e0   : > { %3842 = vmatmul.mubr.bf16.gmra.mrb[124].mxu1 %v4422_v63 }
 0x1e1   : > { %v6460_v8 = vadd.f32 %v4744_v6, %v4680_v3 }
 0x1e2   : > { %v4681_v10 = vpop.f32.mrb[20].mxu0 }
 0x1e3   : > { %v4745_v11 = vpop.f32.mrb[20].mxu1  ;;  %v4682_v12 = vpop.f32.mrb[21].mxu0 }
 0x1e4   : > { %v4683_v13 = vadd.f32 %v4682_v12, %v4681_v10  ;;  %v4746_v14 = vpop.f32.mrb[21].mxu1  ;;  %v4684_v15 = vpop.f32.mrb[22].mxu0 }
 0x1e5   : > { %v4747_v16 = vadd.f32 %v4746_v14, %v4745_v11  ;;  %v4748_v17 = vpop.f32.mrb[22].mxu1  ;;  %v4685_v18 = vpop.f32.mrb[23].mxu0 }
 0x1e6   : > { %v4686_v19 = vadd.f32 %v4685_v18, %v4684_v15  ;;  %v4749_v20 = vpop.f32.mrb[23].mxu1 }
 0x1e7   : > { %v6462_v21 = vadd.f32 %v4747_v16, %v4683_v13  ;;  %v4750_v22 = vadd.f32 %v4749_v20, %v4748_v17 }
 0x1e9   : > { %v6464_v23 = vadd.f32 %v4750_v22, %v4686_v19 }
 0x1ea   : > { %v4687_v24 = vpop.f32.mrb[24].mxu0 }
 0x1eb   : > { %v4751_v25 = vpop.f32.mrb[24].mxu1  ;;  %v4688_v26 = vpop.f32.mrb[25].mxu0 }
 0x1ec   : > { %v4689_v27 = vadd.f32 %v4688_v26, %v4687_v24  ;;  %v4752_v28 = vpop.f32.mrb[25].mxu1  ;;  %v4690_v30 = vpop.f32.mrb[26].mxu0 }
 0x1ed   : > { %v4753_v32 = vadd.f32 %v4752_v28, %v4751_v25  ;;  %v4754_v33 = vpop.f32.mrb[26].mxu1  ;;  %v4691_v34 = vpop.f32.mrb[27].mxu0 }
 0x1ee   : > { %v4692_v35 = vadd.f32 %v4691_v34, %v4690_v30  ;;  %v4755_v36 = vpop.f32.mrb[27].mxu1 }
 0x1ef   : > { %v6466_v37 = vadd.f32 %v4753_v32, %v4689_v27  ;;  %v4756_v38 = vadd.f32 %v4755_v36, %v4754_v33 }
 0x1f1   : > { %v6468_v39 = vadd.f32 %v4756_v38, %v4692_v35 }
 0x1f2   : > { %v4693_v40 = vpop.f32.mrb[28].mxu0 }
 0x1f3   : > { %v4757_v41 = vpop.f32.mrb[28].mxu1  ;;  %v4694_v42 = vpop.f32.mrb[29].mxu0 }
 0x1f4   : > { %v4695_v43 = vadd.f32 %v4694_v42, %v4693_v40  ;;  %v4758_v44 = vpop.f32.mrb[29].mxu1  ;;  %v4696_v45 = vpop.f32.mrb[30].mxu0 }
 0x1f5   : > { %v4759_v46 = vadd.f32 %v4758_v44, %v4757_v41  ;;  %v4760_v47 = vpop.f32.mrb[30].mxu1  ;;  %v4697_v48 = vpop.f32.mrb[31].mxu0 }
 0x1f6   : > { %v4698_v50 = vadd.f32 %v4697_v48, %v4696_v45  ;;  %v4761_v52 = vpop.f32.mrb[31].mxu1 }
 0x1f7   : > { %v6470_v54 = vadd.f32 %v4759_v46, %v4695_v43  ;;  %v4762_v56 = vadd.f32 %v4761_v52, %v4760_v47 }
 0x1f9   : > { %v6472_v57 = vadd.f32 %v4762_v56, %v4698_v50 }
 0x1fa   : > { %v4779_v58 = vpop.f32.mrb[32].mxu0 }
 0x1fb   : > { %v4843_v59 = vpop.f32.mrb[32].mxu1  ;;  %v4780_v60 = vpop.f32.mrb[33].mxu0 }
 0x1fc   : > { %v4781_v61 = vadd.f32 %v4780_v60, %v4779_v58  ;;  %v4844_v62 = vpop.f32.mrb[33].mxu1  ;;  %v4782_v63 = vpop.f32.mrb[34].mxu0 }
 0x1fd   : > { %v4845_v0 = vadd.f32 %v4844_v62, %v4843_v59  ;;  %v4846_v1 = vpop.f32.mrb[34].mxu1  ;;  %v4783_v2 = vpop.f32.mrb[35].mxu0 }
 0x1fe   : > { %v3303_v3 = vadd.f32 %v4781_v61, %v6406_v49  ;;  %v4784_v4 = vadd.f32 %v4783_v2, %v4782_v63  ;;  %v4847_v6 = vpop.f32.mrb[35].mxu1 }
 0x1ff   : > { %v4848_v10 = vadd.f32 %v4847_v6, %v4846_v1 }
 0x200   : > { %v6475_v11 = vadd.f32 %v4845_v0, %v3303_v3  ;;  %v3306_v12 = vadd.f32 %v4784_v4, %v6408_v51 }
 0x202   : > { %v6478_v13 = vadd.f32 %v4848_v10, %v3306_v12  ;;  %v4785_v14 = vpop.f32.mrb[36].mxu0 }
 0x203   : > { %v4849_v15 = vpop.f32.mrb[36].mxu1  ;;  %v4786_v16 = vpop.f32.mrb[37].mxu0 }
 0x204   : > { %v4787_v17 = vadd.f32 %v4786_v16, %v4785_v14  ;;  %v4850_v18 = vpop.f32.mrb[37].mxu1  ;;  %v4788_v19 = vpop.f32.mrb[38].mxu0 }
 0x205   : > { %v4851_v20 = vadd.f32 %v4850_v18, %v4849_v15  ;;  %v4852_v22 = vpop.f32.mrb[38].mxu1  ;;  %v4789_v24 = vpop.f32.mrb[39].mxu0 }
 0x206   : > { %v3311_v49 = vadd.f32 %v4787_v17, %v6422_v7  ;;  %v4790_v25 = vadd.f32 %v4789_v24, %v4788_v19  ;;  %v4853_v26 = vpop.f32.mrb[39].mxu1 }
 0x207   : > { %v4854_v27 = vadd.f32 %v4853_v26, %v4852_v22 }
 0x208   : > { %v6481_v28 = vadd.f32 %v4851_v20, %v3311_v49  ;;  %v3314_v51 = vadd.f32 %v4790_v25, %v6424_v9 }
 0x20a   : > { %v6484_v30 = vadd.f32 %v4854_v27, %v3314_v51  ;;  %v4791_v32 = vpop.f32.mrb[40].mxu0 }
 0x20b   : > { %v4855_v33 = vpop.f32.mrb[40].mxu1  ;;  %v4792_v34 = vpop.f32.mrb[41].mxu0 }
 0x20c   : > { %v4793_v35 = vadd.f32 %v4792_v34, %v4791_v32  ;;  %v4856_v36 = vpop.f32.mrb[41].mxu1  ;;  %v4794_v38 = vpop.f32.mrb[42].mxu0 }
 0x20d   : > { %v4857_v40 = vadd.f32 %v4856_v36, %v4855_v33  ;;  %v4858_v41 = vpop.f32.mrb[42].mxu1  ;;  %v4795_v42 = vpop.f32.mrb[43].mxu0 }
 0x20e   : > { %v3319_v7 = vadd.f32 %v4793_v35, %v6438_v29  ;;  %v4796_v43 = vadd.f32 %v4795_v42, %v4794_v38  ;;  %v4859_v44 = vpop.f32.mrb[43].mxu1 }
 0x20f   : > { %v4860_v45 = vadd.f32 %v4859_v44, %v4858_v41 }
 0x210   : > { %v6487_v46 = vadd.f32 %v4857_v40, %v3319_v7  ;;  %v3322_v9 = vadd.f32 %v4796_v43, %v6440_v31 }
 0x212   : > { %v6490_v47 = vadd.f32 %v4860_v45, %v3322_v9  ;;  %v4797_v48 = vpop.f32.mrb[44].mxu0 }
 0x213   : > { %v4861_v50 = vpop.f32.mrb[44].mxu1  ;;  %v4798_v52 = vpop.f32.mrb[45].mxu0 }
 0x214   : > { %v4799_v56 = vadd.f32 %v4798_v52, %v4797_v48  ;;  %v4862_v58 = vpop.f32.mrb[45].mxu1  ;;  %v4800_v59 = vpop.f32.mrb[46].mxu0 }
 0x215   : > { %v4863_v60 = vadd.f32 %v4862_v58, %v4861_v50  ;;  %v4864_v61 = vpop.f32.mrb[46].mxu1  ;;  %v4801_v62 = vpop.f32.mrb[47].mxu0 }
 0x216   : > { %v3327_v29 = vadd.f32 %v4799_v56, %v6454_v53  ;;  %v4802_v63 = vadd.f32 %v4801_v62, %v4800_v59  ;;  %v4865_v0 = vpop.f32.mrb[47].mxu1 }
 0x217   : > { %v4866_v1 = vadd.f32 %v4865_v0, %v4864_v61 }
 0x218   : > { %v6493_v2 = vadd.f32 %v4863_v60, %v3327_v29  ;;  %v3330_v31 = vadd.f32 %v4802_v63, %v6456_v55 }
 0x21a   : > { %v6496_v3 = vadd.f32 %v4866_v1, %v3330_v31  ;;  %v4803_v4 = vpop.f32.mrb[48].mxu0 }
 0x21b   : > { %v4867_v6 = vpop.f32.mrb[48].mxu1  ;;  %v4804_v10 = vpop.f32.mrb[49].mxu0 }
 0x21c   : > { %v4805_v12 = vadd.f32 %v4804_v10, %v4803_v4  ;;  %v4868_v14 = vpop.f32.mrb[49].mxu1  ;;  %v4806_v15 = vpop.f32.mrb[50].mxu0 }
 0x21d   : > { %v4869_v16 = vadd.f32 %v4868_v14, %v4867_v6  ;;  %v4870_v17 = vpop.f32.mrb[50].mxu1  ;;  %v4807_v18 = vpop.f32.mrb[51].mxu0 }
 0x21e   : > { %v3335_v53 = vadd.f32 %v4805_v12, %v6458_v5  ;;  %v4808_v19 = vadd.f32 %v4807_v18, %v4806_v15  ;;  %v4871_v20 = vpop.f32.mrb[51].mxu1 }
 0x21f   : > { %v4872_v22 = vadd.f32 %v4871_v20, %v4870_v17 }
 0x220   : > { %v6499_v24 = vadd.f32 %v4869_v16, %v3335_v53  ;;  %v3338_v55 = vadd.f32 %v4808_v19, %v6460_v8 }
 0x222   : > { %v6502_v49 = vadd.f32 %v4872_v22, %v3338_v55  ;;  %v4809_v25 = vpop.f32.mrb[52].mxu0 }
 0x223   : > { %v4873_v26 = vpop.f32.mrb[52].mxu1  ;;  %v4810_v27 = vpop.f32.mrb[53].mxu0 }
 0x224   : > { %v4811_v51 = vadd.f32 %v4810_v27, %v4809_v25  ;;  %v4874_v32 = vpop.f32.mrb[53].mxu1  ;;  %v4812_v33 = vpop.f32.mrb[54].mxu0 }
 0x225   : > { %v4875_v34 = vadd.f32 %v4874_v32, %v4873_v26  ;;  %v4876_v35 = vpop.f32.mrb[54].mxu1  ;;  %v4813_v36 = vpop.f32.mrb[55].mxu0 }
 0x226   : > { %v3343_v5 = vadd.f32 %v4811_v51, %v6462_v21  ;;  %v4814_v38 = vadd.f32 %v4813_v36, %v4812_v33  ;;  %v4877_v40 = vpop.f32.mrb[55].mxu1 }
 0x227   : > { %v4878_v41 = vadd.f32 %v4877_v40, %v4876_v35 }
 0x228   : > { %v6505_v42 = vadd.f32 %v4875_v34, %v3343_v5  ;;  %v3346_v8 = vadd.f32 %v4814_v38, %v6464_v23 }
 0x22a   : > { %v6508_v7 = vadd.f32 %v4878_v41, %v3346_v8  ;;  %v4815_v43 = vpop.f32.mrb[56].mxu0 }
 0x22b   : > { %v4879_v44 = vpop.f32.mrb[56].mxu1  ;;  %v4816_v45 = vpop.f32.mrb[57].mxu0 }
 0x22c   : > { %v4817_v9 = vadd.f32 %v4816_v45, %v4815_v43  ;;  %v4880_v48 = vpop.f32.mrb[57].mxu1  ;;  %v4818_v50 = vpop.f32.mrb[58].mxu0 }
 0x22d   : > { %v4881_v52 = vadd.f32 %v4880_v48, %v4879_v44  ;;  %v4882_v56 = vpop.f32.mrb[58].mxu1  ;;  %v4819_v58 = vpop.f32.mrb[59].mxu0 }
 0x22e   : > { %v3351_v21 = vadd.f32 %v4817_v9, %v6466_v37  ;;  %v4820_v59 = vadd.f32 %v4819_v58, %v4818_v50  ;;  %v4883_v60 = vpop.f32.mrb[59].mxu1 }
 0x22f   : > { %v4884_v61 = vadd.f32 %v4883_v60, %v4882_v56 }
 0x230   : > { %v6511_v62 = vadd.f32 %v4881_v52, %v3351_v21  ;;  %v3354_v23 = vadd.f32 %v4820_v59, %v6468_v39 }
 0x232   : > { %v6514_v29 = vadd.f32 %v4884_v61, %v3354_v23  ;;  %v4821_v63 = vpop.f32.mrb[60].mxu0 }
 0x233   : > { %v4885_v0 = vpop.f32.mrb[60].mxu1  ;;  %v4822_v1 = vpop.f32.mrb[61].mxu0 }
 0x234   : > { %v4823_v31 = vadd.f32 %v4822_v1, %v4821_v63  ;;  %v4886_v4 = vpop.f32.mrb[61].mxu1  ;;  %v4824_v6 = vpop.f32.mrb[62].mxu0 }
 0x235   : > { %v4887_v10 = vadd.f32 %v4886_v4, %v4885_v0  ;;  %v4888_v12 = vpop.f32.mrb[62].mxu1  ;;  %v4825_v14 = vpop.f32.mrb[63].mxu0 }
 0x236   : > { %v3359_v37 = vadd.f32 %v4823_v31, %v6470_v54  ;;  %v4826_v15 = vadd.f32 %v4825_v14, %v4824_v6  ;;  %v4889_v16 = vpop.f32.mrb[63].mxu1 }
 0x237   : > { %v4890_v17 = vadd.f32 %v4889_v16, %v4888_v12 }
 0x238   : > { %v6517_v18 = vadd.f32 %v4887_v10, %v3359_v37  ;;  %v3362_v39 = vadd.f32 %v4826_v15, %v6472_v57 }
 0x23a   : > { %v6520_v53 = vadd.f32 %v4890_v17, %v3362_v39  ;;  %v4907_v19 = vpop.f32.mrb[64].mxu0 }
 0x23b   : > { %v4971_v20 = vpop.f32.mrb[64].mxu1  ;;  %v4908_v22 = vpop.f32.mrb[65].mxu0 }
 0x23c   : > { %v4909_v55 = vadd.f32 %v4908_v22, %v4907_v19  ;;  %v4972_v25 = vpop.f32.mrb[65].mxu1  ;;  %v4910_v26 = vpop.f32.mrb[66].mxu0 }
 0x23d   : > { %v4973_v27 = vadd.f32 %v4972_v25, %v4971_v20  ;;  %v4974_v51 = vpop.f32.mrb[66].mxu1  ;;  %v4911_v32 = vpop.f32.mrb[67].mxu0 }
 0x23e   : > { %v3497_v54 = vadd.f32 %v4909_v55, %v6475_v11  ;;  %v4912_v33 = vadd.f32 %v4911_v32, %v4910_v26  ;;  %v4975_v34 = vpop.f32.mrb[67].mxu1 }
 0x23f   : > { %v4976_v35 = vadd.f32 %v4975_v34, %v4974_v51 }
 0x240   : > { %v6523_v36 = vadd.f32 %v4973_v27, %v3497_v54  ;;  %v3500_v57 = vadd.f32 %v4912_v33, %v6478_v13 }
 0x242   : > { %v6526_v5 = vadd.f32 %v4976_v35, %v3500_v57  ;;  %v4913_v38 = vpop.f32.mrb[68].mxu0 }
 0x243   : > { %v4977_v40 = vpop.f32.mrb[68].mxu1  ;;  %v4914_v41 = vpop.f32.mrb[69].mxu0 }
 0x244   : > { %v4915_v8 = vadd.f32 %v4914_v41, %v4913_v38  ;;  %v4978_v43 = vpop.f32.mrb[69].mxu1  ;;  %v4916_v44 = vpop.f32.mrb[70].mxu0 }
 0x245   : > { %v4979_v45 = vadd.f32 %v4978_v43, %v4977_v40  ;;  %v4980_v9 = vpop.f32.mrb[70].mxu1  ;;  %v4917_v48 = vpop.f32.mrb[71].mxu0 }
 0x246   : > { %v3505_v11 = vadd.f32 %v4915_v8, %v6481_v28  ;;  %v4918_v50 = vadd.f32 %v4917_v48, %v4916_v44  ;;  %v4981_v52 = vpop.f32.mrb[71].mxu1 }
 0x247   : > { %v4982_v56 = vadd.f32 %v4981_v52, %v4980_v9 }
 0x248   : > { %v6529_v58 = vadd.f32 %v4979_v45, %v3505_v11  ;;  %v3508_v13 = vadd.f32 %v4918_v50, %v6484_v30 }
 0x24a   : > { %v6532_v21 = vadd.f32 %v4982_v56, %v3508_v13  ;;  %v4919_v59 = vpop.f32.mrb[72].mxu0 }
 0x24b   : > { %v4983_v60 = vpop.f32.mrb[72].mxu1  ;;  %v4920_v61 = vpop.f32.mrb[73].mxu0 }
 0x24c   : > { %v4921_v23 = vadd.f32 %v4920_v61, %v4919_v59  ;;  %v4984_v63 = vpop.f32.mrb[73].mxu1  ;;  %v4922_v0 = vpop.f32.mrb[74].mxu0 }
 0x24d   : > { %v4985_v1 = vadd.f32 %v4984_v63, %v4983_v60  ;;  %v4986_v31 = vpop.f32.mrb[74].mxu1  ;;  %v4923_v4 = vpop.f32.mrb[75].mxu0 }
 0x24e   : > { %v3513_v28 = vadd.f32 %v4921_v23, %v6487_v46  ;;  %v4924_v6 = vadd.f32 %v4923_v4, %v4922_v0  ;;  %v4987_v10 = vpop.f32.mrb[75].mxu1 }
 0x24f   : > { %v4988_v12 = vadd.f32 %v4987_v10, %v4986_v31 }
 0x250   : > { %v6535_v14 = vadd.f32 %v4985_v1, %v3513_v28  ;;  %v3516_v30 = vadd.f32 %v4924_v6, %v6490_v47 }
 0x252   : > { %v6538_v37 = vadd.f32 %v4988_v12, %v3516_v30  ;;  %v4925_v15 = vpop.f32.mrb[76].mxu0 }
 0x253   : > { %v4989_v16 = vpop.f32.mrb[76].mxu1  ;;  %v4926_v17 = vpop.f32.mrb[77].mxu0 }
 0x254   : > { %v4927_v39 = vadd.f32 %v4926_v17, %v4925_v15  ;;  %v4990_v19 = vpop.f32.mrb[77].mxu1  ;;  %v4928_v20 = vpop.f32.mrb[78].mxu0 }
 0x255   : > { %v4991_v22 = vadd.f32 %v4990_v19, %v4989_v16  ;;  %v4992_v55 = vpop.f32.mrb[78].mxu1  ;;  %v4929_v25 = vpop.f32.mrb[79].mxu0 }
 0x256   : > { %v3521_v46 = vadd.f32 %v4927_v39, %v6493_v2  ;;  %v4930_v26 = vadd.f32 %v4929_v25, %v4928_v20  ;;  %v4993_v27 = vpop.f32.mrb[79].mxu1 }
 0x257   : > { %v4994_v51 = vadd.f32 %v4993_v27, %v4992_v55 }
 0x258   : > { %v6541_v32 = vadd.f32 %v4991_v22, %v3521_v46  ;;  %v3524_v47 = vadd.f32 %v4930_v26, %v6496_v3 }
 0x25a   : > { %v6544_v54 = vadd.f32 %v4994_v51, %v3524_v47  ;;  %v4931_v33 = vpop.f32.mrb[80].mxu0 }
 0x25b   : > { %v4995_v34 = vpop.f32.mrb[80].mxu1  ;;  %v4932_v35 = vpop.f32.mrb[81].mxu0 }
 0x25c   : > { %v4933_v57 = vadd.f32 %v4932_v35, %v4931_v33  ;;  %v4996_v38 = vpop.f32.mrb[81].mxu1  ;;  %v4934_v40 = vpop.f32.mrb[82].mxu0 }
 0x25d   : > { %v4997_v41 = vadd.f32 %v4996_v38, %v4995_v34  ;;  %v4998_v8 = vpop.f32.mrb[82].mxu1  ;;  %v4935_v43 = vpop.f32.mrb[83].mxu0 }
 0x25e   : > { %v3529_v2 = vadd.f32 %v4933_v57, %v6499_v24  ;;  %v4936_v44 = vadd.f32 %v4935_v43, %v4934_v40  ;;  %v4999_v45 = vpop.f32.mrb[83].mxu1 }
 0x25f   : > { %v5000_v9 = vadd.f32 %v4999_v45, %v4998_v8 }
 0x260   : > { %v6547_v48 = vadd.f32 %v4997_v41, %v3529_v2  ;;  %v3532_v3 = vadd.f32 %v4936_v44, %v6502_v49 }
 0x262   : > { %v6550_v11 = vadd.f32 %v5000_v9, %v3532_v3  ;;  %v4937_v50 = vpop.f32.mrb[84].mxu0 }
 0x263   : > { %v5001_v52 = vpop.f32.mrb[84].mxu1  ;;  %v4938_v56 = vpop.f32.mrb[85].mxu0 }
 0x264   : > { %v4939_v13 = vadd.f32 %v4938_v56, %v4937_v50  ;;  %v5002_v59 = vpop.f32.mrb[85].mxu1  ;;  %v4940_v60 = vpop.f32.mrb[86].mxu0 }
 0x265   : > { %v5003_v61 = vadd.f32 %v5002_v59, %v5001_v52  ;;  %v5004_v23 = vpop.f32.mrb[86].mxu1  ;;  %v4941_v63 = vpop.f32.mrb[87].mxu0 }
 0x266   : > { %v3537_v24 = vadd.f32 %v4939_v13, %v6505_v42  ;;  %v4942_v0 = vadd.f32 %v4941_v63, %v4940_v60  ;;  %v5005_v1 = vpop.f32.mrb[87].mxu1 }
 0x267   : > { %v5006_v31 = vadd.f32 %v5005_v1, %v5004_v23 }
 0x268   : > { %v6553_v4 = vadd.f32 %v5003_v61, %v3537_v24  ;;  %v3540_v49 = vadd.f32 %v4942_v0, %v6508_v7 }
 0x26a   : > { %v6556_v28 = vadd.f32 %v5006_v31, %v3540_v49  ;;  %v4943_v6 = vpop.f32.mrb[88].mxu0 }
 0x26b   : > { %v5007_v10 = vpop.f32.mrb[88].mxu1  ;;  %v4944_v12 = vpop.f32.mrb[89].mxu0 }
 0x26c   : > { %v4945_v30 = vadd.f32 %v4944_v12, %v4943_v6  ;;  %v5008_v15 = vpop.f32.mrb[89].mxu1  ;;  %v4946_v16 = vpop.f32.mrb[90].mxu0 }
 0x26d   : > { %v5009_v17 = vadd.f32 %v5008_v15, %v5007_v10  ;;  %v5010_v39 = vpop.f32.mrb[90].mxu1  ;;  %v4947_v19 = vpop.f32.mrb[91].mxu0 }
 0x26e   : > { %v3545_v42 = vadd.f32 %v4945_v30, %v6511_v62  ;;  %v4948_v20 = vadd.f32 %v4947_v19, %v4946_v16  ;;  %v5011_v22 = vpop.f32.mrb[91].mxu1 }
 0x26f   : > { %v5012_v55 = vadd.f32 %v5011_v22, %v5010_v39 }
 0x270   : > { %v6559_v25 = vadd.f32 %v5009_v17, %v3545_v42  ;;  %v3548_v7 = vadd.f32 %v4948_v20, %v6514_v29 }
 0x272   : > { %v6562_v46 = vadd.f32 %v5012_v55, %v3548_v7  ;;  %v4949_v26 = vpop.f32.mrb[92].mxu0 }
 0x273   : > { %v5013_v27 = vpop.f32.mrb[92].mxu1  ;;  %v4950_v51 = vpop.f32.mrb[93].mxu0 }
 0x274   : > { %v4951_v47 = vadd.f32 %v4950_v51, %v4949_v26  ;;  %v5014_v33 = vpop.f32.mrb[93].mxu1  ;;  %v4952_v34 = vpop.f32.mrb[94].mxu0 }
 0x275   : > { %v5015_v35 = vadd.f32 %v5014_v33, %v5013_v27  ;;  %v5016_v57 = vpop.f32.mrb[94].mxu1  ;;  %v4953_v38 = vpop.f32.mrb[95].mxu0 }
 0x276   : > { %v3553_v62 = vadd.f32 %v4951_v47, %v6517_v18  ;;  %v4954_v40 = vadd.f32 %v4953_v38, %v4952_v34  ;;  %v5017_v41 = vpop.f32.mrb[95].mxu1 }
 0x277   : > { %v5018_v8 = vadd.f32 %v5017_v41, %v5016_v57 }
 0x278   : > { %v6565_v43 = vadd.f32 %v5015_v35, %v3553_v62  ;;  %v3556_v29 = vadd.f32 %v4954_v40, %v6520_v53 }
 0x27a   : > { %v6568_v2 = vadd.f32 %v5018_v8, %v3556_v29  ;;  %v5035_v44 = vpop.f32.mrb[96].mxu0 }
 0x27b   : > { %v5099_v45 = vpop.f32.mrb[96].mxu1  ;;  %v5036_v9 = vpop.f32.mrb[97].mxu0 }
 0x27c   : > { %v5037_v3 = vadd.f32 %v5036_v9, %v5035_v44  ;;  %v5100_v50 = vpop.f32.mrb[97].mxu1  ;;  %v5038_v52 = vpop.f32.mrb[98].mxu0 }
 0x27d   : > { %v5101_v56 = vadd.f32 %v5100_v50, %v5099_v45  ;;  %v5102_v13 = vpop.f32.mrb[98].mxu1  ;;  %v5039_v59 = vpop.f32.mrb[99].mxu0 }
 0x27e   : > { %v3691_v18 = vadd.f32 %v5037_v3, %v6523_v36  ;;  %v5040_v60 = vadd.f32 %v5039_v59, %v5038_v52  ;;  %v5103_v61 = vpop.f32.mrb[99].mxu1 }
 0x27f   : > { %v5104_v23 = vadd.f32 %v5103_v61, %v5102_v13 }
 0x280   : > { %v6571_v63 = vadd.f32 %v5101_v56, %v3691_v18  ;;  %v3694_v53 = vadd.f32 %v5040_v60, %v6526_v5 }
 0x282   : > { %v6574_v24 = vadd.f32 %v5104_v23, %v3694_v53  ;;  %v5041_v0 = vpop.f32.mrb[100].mxu0 }
 0x283   : > { %v5105_v1 = vpop.f32.mrb[100].mxu1  ;;  %v5042_v31 = vpop.f32.mrb[101].mxu0 }
 0x284   : > { %v5043_v49 = vadd.f32 %v5042_v31, %v5041_v0  ;;  %v5106_v6 = vpop.f32.mrb[101].mxu1  ;;  %v5044_v10 = vpop.f32.mrb[102].mxu0  ;;  %v3850_v29 = vadd.f32 %v6574_v24, %v6571_v63 }
 0x285   : > { %v5107_v12 = vadd.f32 %v5106_v6, %v5105_v1  ;;  %v5108_v30 = vpop.f32.mrb[102].mxu1  ;;  %v5045_v15 = vpop.f32.mrb[103].mxu0 }
 0x286   : > { %v3699_v36 = vadd.f32 %v5043_v49, %v6529_v58  ;;  %v5046_v16 = vadd.f32 %v5045_v15, %v5044_v10  ;;  %v5109_v17 = vpop.f32.mrb[103].mxu1 }
 0x287   : > { %v5110_v39 = vadd.f32 %v5109_v17, %v5108_v30 }
 0x288   : > { %v6577_v19 = vadd.f32 %v5107_v12, %v3699_v36  ;;  %v3702_v5 = vadd.f32 %v5046_v16, %v6532_v21 }
 0x28a   : > { %v6580_v42 = vadd.f32 %v5110_v39, %v3702_v5  ;;  %v5047_v20 = vpop.f32.mrb[104].mxu0  ;;  %v3851_v52 = vadd.f32 %v3850_v29, %v6577_v19 }
 0x28b   : > { %v5111_v22 = vpop.f32.mrb[104].mxu1  ;;  %v5048_v55 = vpop.f32.mrb[105].mxu0 }
 0x28c   : > { %v5049_v7 = vadd.f32 %v5048_v55, %v5047_v20  ;;  %v5112_v26 = vpop.f32.mrb[105].mxu1  ;;  %v5050_v27 = vpop.f32.mrb[106].mxu0  ;;  %v3852_v61 = vadd.f32 %v3851_v52, %v6580_v42 }
 0x28d   : > { %v5113_v51 = vadd.f32 %v5112_v26, %v5111_v22  ;;  %v5114_v47 = vpop.f32.mrb[106].mxu1  ;;  %v5051_v33 = vpop.f32.mrb[107].mxu0 }
 0x28e   : > { %v3707_v58 = vadd.f32 %v5049_v7, %v6535_v14  ;;  %v5052_v34 = vadd.f32 %v5051_v33, %v5050_v27  ;;  %v5115_v35 = vpop.f32.mrb[107].mxu1 }
 0x28f   : > { %v5116_v57 = vadd.f32 %v5115_v35, %v5114_v47 }
 0x290   : > { %v6583_v38 = vadd.f32 %v5113_v51, %v3707_v58  ;;  %v3710_v21 = vadd.f32 %v5052_v34, %v6538_v37 }
 0x292   : > { %v6586_v62 = vadd.f32 %v5116_v57, %v3710_v21  ;;  %v5053_v40 = vpop.f32.mrb[108].mxu0  ;;  %v3853_v31 = vadd.f32 %v3852_v61, %v6583_v38 }
 0x293   : > { %v5117_v41 = vpop.f32.mrb[108].mxu1  ;;  %v5054_v8 = vpop.f32.mrb[109].mxu0 }
 0x294   : > { %v5055_v44 = vadd.f32 %v5054_v8, %v5053_v40  ;;  %v5118_v45 = vpop.f32.mrb[109].mxu1  ;;  %v5056_v9 = vpop.f32.mrb[110].mxu0  ;;  %v3854_v17 = vadd.f32 %v3853_v31, %v6586_v62 }
 0x295   : > { %v5119_v3 = vadd.f32 %v5118_v45, %v5117_v41  ;;  %v5120_v14 = vpop.f32.mrb[110].mxu1  ;;  %v5057_v50 = vpop.f32.mrb[111].mxu0 }
 0x296   : > { %v3715_v56 = vadd.f32 %v5055_v44, %v6541_v32  ;;  %v5058_v13 = vadd.f32 %v5057_v50, %v5056_v9  ;;  %v5121_v37 = vpop.f32.mrb[111].mxu1 }
 0x297   : > { %v5122_v59 = vadd.f32 %v5121_v37, %v5120_v14 }
 0x298   : > { %v6592_v18 = vadd.f32 %v5119_v3, %v3715_v56  ;;  %v3718_v60 = vadd.f32 %v5058_v13, %v6544_v54 }
 0x29a   : > { %v6596_v23 = vadd.f32 %v5122_v59, %v3718_v60  ;;  %v5059_v53 = vpop.f32.mrb[112].mxu0  ;;  %v3855_v20 = vadd.f32 %v3854_v17, %v6592_v18 }
 0x29b   : > { %v5123_v0 = vpop.f32.mrb[112].mxu1  ;;  %v5060_v1 = vpop.f32.mrb[113].mxu0 }
 0x29c   : > { %v5061_v49 = vadd.f32 %v5060_v1, %v5059_v53  ;;  %v5124_v6 = vpop.f32.mrb[113].mxu1  ;;  %v5062_v10 = vpop.f32.mrb[114].mxu0  ;;  %v3856_v34 = vadd.f32 %v3855_v20, %v6596_v23 }
 0x29d   : > { %v5125_v32 = vadd.f32 %v5124_v6, %v5123_v0  ;;  %v5126_v12 = vpop.f32.mrb[114].mxu1  ;;  %v5063_v30 = vpop.f32.mrb[115].mxu0 }
 0x29e   : > { %v3723_v15 = vadd.f32 %v5061_v49, %v6547_v48  ;;  %v5064_v36 = vadd.f32 %v5063_v30, %v5062_v10  ;;  %v5127_v16 = vpop.f32.mrb[115].mxu1 }
 0x29f   : > { %v5128_v54 = vadd.f32 %v5127_v16, %v5126_v12 }
 0x2a0   : > { %v6601_v39 = vadd.f32 %v5125_v32, %v3723_v15  ;;  %v3726_v5 = vadd.f32 %v5064_v36, %v6550_v11 }
 0x2a2   : > { %v6605_v22 = vadd.f32 %v5128_v54, %v3726_v5  ;;  %v5065_v55 = vpop.f32.mrb[116].mxu0  ;;  %v3857_v40 = vadd.f32 %v3856_v34, %v6601_v39 }
 0x2a3   : > { %v5129_v7 = vpop.f32.mrb[116].mxu1  ;;  %v5066_v26 = vpop.f32.mrb[117].mxu0 }
 0x2a4   : > { %v5067_v27 = vadd.f32 %v5066_v26, %v5065_v55  ;;  %v5130_v51 = vpop.f32.mrb[117].mxu1  ;;  %v5068_v47 = vpop.f32.mrb[118].mxu0  ;;  %v3858_v3 = vadd.f32 %v3857_v40, %v6605_v22 }
 0x2a5   : > { %v5131_v48 = vadd.f32 %v5130_v51, %v5129_v7  ;;  %v5132_v33 = vpop.f32.mrb[118].mxu1  ;;  %v5069_v58 = vpop.f32.mrb[119].mxu0 }
 0x2a6   : > { %v3731_v35 = vadd.f32 %v5067_v27, %v6553_v4  ;;  %v5070_v57 = vadd.f32 %v5069_v58, %v5068_v47  ;;  %v5133_v21 = vpop.f32.mrb[119].mxu1 }
 0x2a7   : > { %v5134_v11 = vadd.f32 %v5133_v21, %v5132_v33 }
 0x2a8   : > { %v6610_v41 = vadd.f32 %v5131_v48, %v3731_v35  ;;  %v3734_v8 = vadd.f32 %v5070_v57, %v6556_v28 }
 0x2aa   : > { %v6613_v29 = vadd.f32 %v5134_v11, %v3734_v8  ;;  %v5071_v44 = vpop.f32.mrb[120].mxu0  ;;  %v3859_v37 = vadd.f32 %v3858_v3, %v6610_v41 }
 0x2ab   : > { %v5135_v45 = vpop.f32.mrb[120].mxu1  ;;  %v5072_v9 = vpop.f32.mrb[121].mxu0 }
 0x2ac   : > { %v5073_v14 = vadd.f32 %v5072_v9, %v5071_v44  ;;  %v5136_v50 = vpop.f32.mrb[121].mxu1  ;;  %v5074_v52 = vpop.f32.mrb[122].mxu0  ;;  %v3860_v1 = vadd.f32 %v3859_v37, %v6613_v29 }
 0x2ad   : > { %v5137_v4 = vadd.f32 %v5136_v50, %v5135_v45  ;;  %v5138_v56 = vpop.f32.mrb[122].mxu1  ;;  %v5075_v13 = vpop.f32.mrb[123].mxu0 }
 0x2ae   : > { %v3739_v59 = vadd.f32 %v5073_v14, %v6559_v25  ;;  %v5076_v60 = vadd.f32 %v5075_v13, %v5074_v52  ;;  %v5139_v61 = vpop.f32.mrb[123].mxu1 }
 0x2af   : > { %v5140_v28 = vadd.f32 %v5139_v61, %v5138_v56 }
 0x2b0   : > { %v6618_v53 = vadd.f32 %v5137_v4, %v3739_v59  ;;  %v3742_v0 = vadd.f32 %v5076_v60, %v6562_v46 }
 0x2b2   : > { %v6622_v31 = vadd.f32 %v5140_v28, %v3742_v0  ;;  %v5077_v49 = vpop.f32.mrb[124].mxu0  ;;  %v3861_v32 = vadd.f32 %v3860_v1, %v6618_v53 }
 0x2b3   : > { %v5141_v6 = vpop.f32.mrb[124].mxu1  ;;  %v5078_v10 = vpop.f32.mrb[125].mxu0 }
 0x2b4   : > { %v5079_v12 = vadd.f32 %v5078_v10, %v5077_v49  ;;  %v5142_v30 = vpop.f32.mrb[125].mxu1  ;;  %v5080_v15 = vpop.f32.mrb[126].mxu0  ;;  %v3862_v20 = vadd.f32 %v3861_v32, %v6622_v31 }
 0x2b5   : > { %v5143_v25 = vadd.f32 %v5142_v30, %v5141_v6  ;;  %v5144_v36 = vpop.f32.mrb[126].mxu1  ;;  %v5081_v16 = vpop.f32.mrb[127].mxu0 }
 0x2b6   : > { %v3747_v54 = vadd.f32 %v5079_v12, %v6565_v43  ;;  %v5082_v17 = vadd.f32 %v5081_v16, %v5080_v15  ;;  %v5145_v5 = vpop.f32.mrb[127].mxu1 }
 0x2b7   : > { %v5146_v46 = vadd.f32 %v5145_v5, %v5144_v36 }
 0x2b8   : > { %v6627_v55 = vadd.f32 %v5143_v25, %v3747_v54  ;;  %v3750_v7 = vadd.f32 %v5082_v17, %v6568_v2 }
 0x2ba   : > { %v3863_v26 = vadd.f32 %v3862_v20, %v6627_v55  ;;  %v6631_v27 = vadd.f32 %v5146_v46, %v3750_v7 }
 0x2bc   : > { %v3864_v51 = vadd.f32 %v3863_v26, %v6631_v27 }
 0x2be   : > { %v3865_v47 = vrot.slane %v3864_v51, 4 }
 0x2c0   : > { %v3866_v48 = vadd.f32 %v3865_v47, %v3864_v51 }
 0x2c2   : > { %v3867_v33 = vrot.slane %v3866_v48, 2 }
 0x2c4   : > { %v3868_v58 = vadd.f32 %v3867_v33, %v3866_v48 }
 0x2c6   : > { %v3869_v43 = vrot.slane %v3868_v58, 1 }
 0x2c8   : > { %v3870_v34 = vadd.f32 %v3869_v43, %v3868_v58 }
 0x2ca   : > { %v6634_v35 = vmul.f32 0.0078125, %v3870_v34 }
 0x2cc   : > { %v3872_v57 = vsub.f32 %v6571_v63, %v6634_v35  ;;  %v3873_v2 = vsub.f32 %v6574_v24, %v6634_v35  ;;  %v3874_v21 = vsub.f32 %v6577_v19, %v6634_v35  ;;  %v3875_v8 = vsub.f32 %v6580_v42, %v6634_v35 }
 0x2cd   : > { %v3876_v44 = vsub.f32 %v6583_v38, %v6634_v35  ;;  %v3877_v3 = vsub.f32 %v6586_v62, %v6634_v35  ;;  %v3878_v52 = vsub.f32 %v6592_v18, %v6634_v35  ;;  %v3879_v13 = vsub.f32 %v6596_v23, %v6634_v35 }
 0x2ce   : > { %v3888_v11 = vmul.f32 %v3872_v57, %v3872_v57  ;;  %v3889_v40 = vmul.f32 %v3873_v2, %v3873_v2  ;;  %v3890_v45 = vmul.f32 %v3874_v21, %v3874_v21  ;;  %v3891_v14 = vmul.f32 %v3875_v8, %v3875_v8 }
 0x2cf   : > { %v3892_v4 = vmul.f32 %v3876_v44, %v3876_v44  ;;  %v3893_v37 = vmul.f32 %v3877_v3, %v3877_v3  ;;  %v3880_v60 = vsub.f32 %v6601_v39, %v6634_v35  ;;  %v3894_v61 = vmul.f32 %v3878_v52, %v3878_v52 }
 0x2d0   : > { %v3904_v9 = vadd.f32 %v3889_v40, %v3888_v11  ;;  %v3881_v0 = vsub.f32 %v6605_v22, %v6634_v35  ;;  %v3895_v1 = vmul.f32 %v3879_v13, %v3879_v13  ;;  %v3882_v6 = vsub.f32 %v6610_v41, %v6634_v35 }
 0x2d1   : > { %v3896_v10 = vmul.f32 %v3880_v60, %v3880_v60  ;;  %v3883_v12 = vsub.f32 %v6613_v29, %v6634_v35  ;;  %v3884_v25 = vsub.f32 %v6618_v53, %v6634_v35  ;;  %v3885_v54 = vsub.f32 %v6622_v31, %v6634_v35 }
 0x2d2   : > { %v3905_v50 = vadd.f32 %v3904_v9, %v3890_v45  ;;  %v3897_v30 = vmul.f32 %v3881_v0, %v3881_v0  ;;  %v3898_v36 = vmul.f32 %v3882_v6, %v3882_v6  ;;  %v3886_v46 = vsub.f32 %v6627_v55, %v6634_v35 }
 0x2d3   : > { %v3899_v17 = vmul.f32 %v3883_v12, %v3883_v12  ;;  %v3900_v20 = vmul.f32 %v3884_v25, %v3884_v25  ;;  %v3887_v26 = vsub.f32 %v6631_v27, %v6634_v35  ;;  %v3901_v51 = vmul.f32 %v3885_v54, %v3885_v54 }
 0x2d4   : > { %v3906_v56 = vadd.f32 %v3905_v50, %v3891_v14  ;;  %v3902_v48 = vmul.f32 %v3886_v46, %v3886_v46  ;;  %v3934_v9 = vlaneseq  ;;  %v3926_v14 = vld [vmem:[%s1277_s9] sm:$0x1] }
 0x2d5   : > { %v3903_v58 = vmul.f32 %v3887_v26, %v3887_v26 }
 0x2d6   : > { %v3907_v59 = vadd.f32 %v3906_v56, %v3892_v4  ;;  %v3935_v3 = vshrl.u32 %v3934_v9, 7  ;;  %v3930_v56 = vld [vmem:[%s1280_s12] sm:$0x1] }
 0x2d8   : > { %v3908_v28 = vadd.f32 %v3907_v59, %v3893_v37  ;;  %v3936_v50 = vsub.s32 0, %v3935_v3 }
 0x2da   : > { %v3909_v49 = vadd.f32 %v3908_v28, %v3894_v61 }
 0x2dc   : > { %v3910_v32 = vadd.f32 %v3909_v49, %v3895_v1 }
 0x2de   : > { %v3911_v15 = vadd.f32 %v3910_v32, %v3896_v10 }
 0x2e0   : > { %v3912_v16 = vadd.f32 %v3911_v15, %v3897_v30 }
 0x2e2   : > { %v3913_v5 = vadd.f32 %v3912_v16, %v3898_v36 }
 0x2e4   : > { %v3914_v7 = vadd.f32 %v3913_v5, %v3899_v17 }
 0x2e6   : > { %v3915_v47 = vadd.f32 %v3914_v7, %v3900_v20 }
 0x2e8   : > { %v3916_v33 = vadd.f32 %v3915_v47, %v3901_v51 }
 0x2ea   : > { %v3917_v43 = vadd.f32 %v3916_v33, %v3902_v48 }
 0x2ec   : > { %v3918_v34 = vadd.f32 %v3917_v43, %v3903_v58 }
 0x2ee   : > { %v3919_v57 = vrot.slane %v3918_v34, 4 }
 0x2f0   : > { %v3920_v2 = vadd.f32 %v3919_v57, %v3918_v34 }
 0x2f2   : > { %v3921_v21 = vrot.slane %v3920_v2, 2 }
 0x2f4   : > { %v3922_v11 = vadd.f32 %v3921_v21, %v3920_v2 }
 0x2f6   : > { %v3923_v40 = vrot.slane %v3922_v11, 1 }
 0x2f8   : > { %v3924_v8 = vadd.f32 %v3923_v40, %v3922_v11 }
 0x2fa   : > { %v3925_v44 = vmul.f32 0.0078125, %v3924_v8 }
 0x2fc   : > { %v3927_v45 = vadd.f32 1e-05, %v3925_v44 }
 0x2fe   : > { %5299 = vrsqrt.f32 %v3927_v45 }
 0x308   : > { %v5300_v52 = vpop.eup %5299 }
 0x309   : > { %v3929_v4 = vmul.f32 %v5300_v52, %v3926_v14 }
 0x30b   : > { %v3931_v13 = vmul.f32 %v3929_v4, %v6634_v35  ;;  %v3937_v37 = vrot.slane %v3929_v4, %v3936_v50 }
 0x30d   : > { %v3932_v59 = vsub.f32 %v3930_v56, %v3931_v13  ;;  %v3939_v60 = vmul.f32 %v3937_v37, %v6571_v63  ;;  %v3940_v61 = vmul.f32 %v3937_v37, %v6574_v24  ;;  %v3941_v28 = vmul.f32 %v3937_v37, %v6577_v19 }
 0x30e   : > { %v3942_v0 = vmul.f32 %v3937_v37, %v6580_v42  ;;  %v3943_v1 = vmul.f32 %v3937_v37, %v6583_v38  ;;  %v3944_v49 = vmul.f32 %v3937_v37, %v6586_v62  ;;  %v3945_v6 = vmul.f32 %v3937_v37, %v6592_v18 }
 0x30f   : > { %v3946_v10 = vmul.f32 %v3937_v37, %v6596_v23  ;;  %v3947_v35 = vmul.f32 %v3937_v37, %v6601_v39  ;;  %v3948_v32 = vmul.f32 %v3937_v37, %v6605_v22  ;;  %v3949_v63 = vmul.f32 %v3937_v37, %v6610_v41 }
 0x310   : > { %v3950_v24 = vmul.f32 %v3937_v37, %v6613_v29  ;;  %v3959_v12 = vrot.slane %v3932_v59, %v3936_v50  ;;  %v3951_v19 = vmul.f32 %v3937_v37, %v6618_v53  ;;  %v3952_v42 = vmul.f32 %v3937_v37, %v6622_v31 }
 0x311   : > { %v3953_v38 = vmul.f32 %v3937_v37, %v6627_v55  ;;  %v3954_v62 = vmul.f32 %v3937_v37, %v6631_v27 }
 0x312   : > { %v3961_v18 = vadd.f32 %v3959_v12, %v3939_v60  ;;  %v3962_v30 = vadd.f32 %v3959_v12, %v3940_v61  ;;  %v3963_v23 = vadd.f32 %v3959_v12, %v3941_v28  ;;  %v3964_v15 = vadd.f32 %v3959_v12, %v3942_v0 }
 0x313   : > { %v3965_v39 = vadd.f32 %v3959_v12, %v3943_v1  ;;  %v3966_v25 = vadd.f32 %v3959_v12, %v3944_v49  ;;  %v3967_v22 = vadd.f32 %v3959_v12, %v3945_v6  ;;  %v3968_v36 = vadd.f32 %v3959_v12, %v3946_v10 }
 0x314   : > { %v3969_v41 = vadd.f32 %v3959_v12, %v3947_v35  ;;  %v3970_v16 = vadd.f32 %v3959_v12, %v3948_v32  ;;  %v3971_v29 = vadd.f32 %v3959_v12, %v3949_v63  ;;  %v3972_v54 = vadd.f32 %v3959_v12, %v3950_v24 }
 0x315   : > { %v3973_v17 = vadd.f32 %v3959_v12, %v3951_v19  ;;  %v3974_v53 = vadd.f32 %v3959_v12, %v3952_v42  ;;  %v3975_v31 = vadd.f32 %v3959_v12, %v3953_v38  ;;  %v3976_v5 = vadd.f32 %v3959_v12, %v3954_v62 }
 0x316   : > { %vm3977_vm0 = vcmp.gt.f32.partialorder %v3961_v18, 0.0  ;;  %vm3978_vm1 = vcmp.gt.f32.partialorder %v3962_v30, 0.0  ;;  %vm3979_vm2 = vcmp.gt.f32.partialorder %v3963_v23, 0.0  ;;  %vm3980_vm3 = vcmp.gt.f32.partialorder %v3964_v15, 0.0 }
 0x317   : > { %vm3981_vm4 = vcmp.gt.f32.partialorder %v3965_v39, 0.0  ;;  %vm3982_vm5 = vcmp.gt.f32.partialorder %v3966_v25, 0.0  ;;  %vm3983_vm6 = vcmp.gt.f32.partialorder %v3967_v22, 0.0  ;;  %vm3984_vm7 = vcmp.gt.f32.partialorder %v3968_v36, 0.0 }
 0x318   : > { %vm3985_vm8 = vcmp.gt.f32.partialorder %v3969_v41, 0.0  ;;  %vm3986_vm9 = vcmp.gt.f32.partialorder %v3970_v16, 0.0  ;;  %vm3987_vm10 = vcmp.gt.f32.partialorder %v3971_v29, 0.0  ;;  %vm3988_vm11 = vcmp.gt.f32.partialorder %v3972_v54, 0.0 }
 0x319   : > { %vm3989_vm12 = vcmp.gt.f32.partialorder %v3973_v17, 0.0  ;;  %vm3990_vm13 = vcmp.gt.f32.partialorder %v3974_v53, 0.0  ;;  %vm3991_vm14 = vcmp.gt.f32.partialorder %v3975_v31, 0.0  ;;  %vm3992_vm15 = vcmp.gt.f32.partialorder %v3976_v5, 0.0 }
 0x31a   : > { %v3993_v55 = vmul.f32 0.2, %v3961_v18  ;;  %v3994_v27 = vmul.f32 0.2, %v3962_v30  ;;  %v3995_v46 = vmul.f32 0.2, %v3963_v23 }
 0x31b   : > { %v3996_v20 = vmul.f32 0.2, %v3964_v15  ;;  %v3997_v7 = vmul.f32 0.2, %v3965_v39  ;;  %v3998_v26 = vmul.f32 0.2, %v3966_v25 }
 0x31c   : > { %v3999_v51 = vmul.f32 0.2, %v3967_v22  ;;  %v4000_v47 = vmul.f32 0.2, %v3968_v36  ;;  %v4001_v48 = vmul.f32 0.2, %v3969_v41  ;;  %v4009_v33 = vsel %vm3977_vm0, %v3961_v18, %v3993_v55 }
 0x31d   : > { %v4002_v58 = vmul.f32 0.2, %v3970_v16  ;;  %v4003_v43 = vmul.f32 0.2, %v3971_v29  ;;  %v4004_v34 = vmul.f32 0.2, %v3972_v54  ;;  %v4010_v57 = vsel %vm3978_vm1, %v3962_v30, %v3994_v27 }
 0x31e   : > { %v4005_v2 = vmul.f32 0.2, %v3973_v17  ;;  %v4006_v21 = vmul.f32 0.2, %v3974_v53  ;;  %v4007_v11 = vmul.f32 0.2, %v3975_v31  ;;  %v4011_v40 = vsel %vm3979_vm2, %v3963_v23, %v3995_v46 }
 0x31f   : > { %v4008_v8 = vmul.f32 0.2, %v3976_v5  ;;  %v4012_v44 = vsel %vm3980_vm3, %v3964_v15, %v3996_v20  ;;  %v4013_v45 = vsel %vm3981_vm4, %v3965_v39, %v3997_v7  ;;  %v4014_v9 = vsel %vm3982_vm5, %v3966_v25, %v3998_v26 }
 0x320   : > { %v4015_v3 = vsel %vm3983_vm6, %v3967_v22, %v3999_v51  ;;  %v4016_v14 = vsel %vm3984_vm7, %v3968_v36, %v4000_v47  ;;  %v4017_v50 = vsel %vm3985_vm8, %v3969_v41, %v4001_v48  ;;  %v4018_v52 = vsel %vm3986_vm9, %v3970_v16, %v4002_v58 }
 0x321   : > { %v4019_v4 = vsel %vm3987_vm10, %v3971_v29, %v4003_v43  ;;  %v4020_v56 = vsel %vm3988_vm11, %v3972_v54, %v4004_v34  ;;  %v4021_v13 = vsel %vm3989_vm12, %v3973_v17, %v4005_v2  ;;  %v4022_v37 = vsel %vm3990_vm13, %v3974_v53, %v4006_v21  ;;  %4111 = sbr.rel (!%p5381_p5) target bundleno = 822 (0x336), region = 81 }
 0x322   : > { %v4023_v59 = vsel %vm3991_vm14, %v3975_v31, %v4007_v11  ;;  %v4024_v60 = vsel %vm3992_vm15, %v3976_v5, %v4008_v8  ;;  %v4591_v61 = vpack.c.bf16 %v4010_v57, %v4009_v33  ;;  %v4596_v28 = vpack.c.bf16 %v4012_v44, %v4011_v40 }
 0x323   : > { %v4601_v0 = vpack.c.bf16 %v4014_v9, %v4013_v45  ;;  %v4606_v1 = vpack.c.bf16 %v4016_v14, %v4015_v3  ;;  %v4611_v49 = vpack.c.bf16 %v4018_v52, %v4017_v50  ;;  %v4616_v6 = vpack.c.bf16 %v4020_v56, %v4019_v4 }
 0x324   : > { %4592 = vst [vmem:[%s6714_s15] sm:$0xff] %v4591_v61   ;;  %4628 = vst [vmem:[%s6714_s15 + $0x8] sm:$0xff] %v4596_v28   ;;  %v4621_v10 = vpack.c.bf16 %v4022_v37, %v4021_v13  ;;  %v4626_v35 = vpack.c.bf16 %v4024_v60, %v4023_v59 }
 0x325   : > { %4629 = vst [vmem:[%s6714_s15 + $0x10] sm:$0xff] %v4601_v0   ;;  %4630 = vst [vmem:[%s6714_s15 + $0x18] sm:$0xff] %v4606_v1  }
 0x326   : > { %4631 = vst [vmem:[%s6714_s15 + $0x20] sm:$0xff] %v4611_v49   ;;  %4632 = vst [vmem:[%s6714_s15 + $0x28] sm:$0xff] %v4616_v6  }
 0x327   : > { %4633 = vst [vmem:[%s6714_s15 + $0x30] sm:$0xff] %v4621_v10   ;;  %4634 = vst [vmem:[%s6714_s15 + $0x38] sm:$0xff] %v4626_v35  }
 0x32b   : > { %v4129_v32 = vld [vmem:[%s6714_s15] sm:$0xf]  ;;  %v4131_v63 = vld [vmem:[%s6714_s15 + $0x4] sm:$0xf]  ;;  %v4133_v24 = vld [vmem:[%s6714_s15 + $0x8] sm:$0xf] }
 0x32c   : > { %v4135_v12 = vld [vmem:[%s6714_s15 + $0xc] sm:$0xf]  ;;  %v4137_v19 = vld [vmem:[%s6714_s15 + $0x10] sm:$0xf]  ;;  %4130 = vst [vmem:[%s4113_s21] sm:$0xf] %v4129_v32 }
 0x32d   : > { %4132 = vst [vmem:[%s4113_s21 + $0x8] sm:$0xf] %v4131_v63  ;;  %4134 = vst [vmem:[%s4113_s21 + $0x10] sm:$0xf] %v4133_v24  ;;  %v4139_v42 = vld [vmem:[%s6714_s15 + $0x14] sm:$0xf] }
 0x32e   : > { %4136 = vst [vmem:[%s4113_s21 + $0x18] sm:$0xf] %v4135_v12  ;;  %4138 = vst [vmem:[%s4113_s21 + $0x20] sm:$0xf] %v4137_v19  ;;  %v4141_v38 = vld [vmem:[%s6714_s15 + $0x18] sm:$0xf] }
 0x32f   : > { %v4143_v62 = vld [vmem:[%s6714_s15 + $0x1c] sm:$0xf]  ;;  %4140 = vst [vmem:[%s4113_s21 + $0x28] sm:$0xf] %v4139_v42  ;;  %4142 = vst [vmem:[%s4113_s21 + $0x30] sm:$0xf] %v4141_v38 }
 0x330   : > { %4144 = vst [vmem:[%s4113_s21 + $0x38] sm:$0xf] %v4143_v62  ;;  %v4145_v18 = vld [vmem:[%s6714_s15 + $0x20] sm:$0xf]  ;;  %v4147_v30 = vld [vmem:[%s6714_s15 + $0x24] sm:$0xf] }
 0x331   : > { %v4149_v23 = vld [vmem:[%s6714_s15 + $0x28] sm:$0xf]  ;;  %4146 = vst [vmem:[%s4113_s21 + $0x40] sm:$0xf] %v4145_v18  ;;  %4148 = vst [vmem:[%s4113_s21 + $0x48] sm:$0xf] %v4147_v30 }
 0x332   : > { %4150 = vst [vmem:[%s4113_s21 + $0x50] sm:$0xf] %v4149_v23  ;;  %v4151_v15 = vld [vmem:[%s6714_s15 + $0x2c] sm:$0xf]  ;;  %v4153_v39 = vld [vmem:[%s6714_s15 + $0x30] sm:$0xf] }
 0x333   : > { %v4155_v25 = vld [vmem:[%s6714_s15 + $0x34] sm:$0xf]  ;;  %4152 = vst [vmem:[%s4113_s21 + $0x58] sm:$0xf] %v4151_v15  ;;  %4154 = vst [vmem:[%s4113_s21 + $0x60] sm:$0xf] %v4153_v39 }
 0x334   : > { %4156 = vst [vmem:[%s4113_s21 + $0x68] sm:$0xf] %v4155_v25  ;;  %v4157_v22 = vld [vmem:[%s6714_s15 + $0x38] sm:$0xf]  ;;  %v4159_v36 = vld [vmem:[%s6714_s15 + $0x3c] sm:$0xf] }
 0x335   : > { %4158 = vst [vmem:[%s4113_s21 + $0x70] sm:$0xf] %v4157_v22  ;;  %4160 = vst [vmem:[%s4113_s21 + $0x78] sm:$0xf] %v4159_v36 }
 0x336 PF: > { %p11_p11 = scmp.ge.s32.totalorder %s5369_s19, 4   ;;  %s6762_s15 = smov %s5319_s16 }
 0x337   : > { %s6763_s16 = smov %s5379_s22  ;;  %s6764_s17 = smov %s5369_s19 }
 0x338   :  { %13 = sbr.rel (!%p11_p11) target bundleno = 2 (0x2), region = 159 }

// kernel: discriminator_forward.7
= control target key start
LH: loop header
LB: loop body
LE: loop exit
PB: predicated region body
PF: predicated region fallthrough
CT: control target
= control target key end

     0   :  { %s8960_s15 = smov 0   ;;  %s8962_s16 = smov 0   ;;  %s10543_s0 = inlined_call_operand.vmem [shape: bf16[32,4096], index: 0, kind: input, shape index: {}]   ;;  %s10544_s1 = inlined_call_operand.vmem [shape: bf16[4096,512], index: 1, kind: input, shape index: {}]   ;;  %s10545_s2 = inlined_call_operand.vmem [shape: f32[1,512], index: 2, kind: input, shape index: {}]   ;;  %s10546_s3 = inlined_call_operand.vmem [shape: f32[1,512], index: 3, kind: input, shape index: {}]   ;;  %s10547_s4 = inlined_call_operand.vmem [shape: bf16[32,512], index: 4, kind: output, shape index: {}]  }
   0x1   :  { %s8964_s17 = smov 0  }
   0x2 LB: > { %s8976_s18 = sadd.s32 4294967295, %s8933_s17   ;;  %s8979_s19 = sadd.s32 1, %s8933_s17   ;;  %s8933_s17 = sphi %s8964_s17, %s10551_s17   ;;  %s8929_s16 = sphi %s8962_s16, %s10550_s16   ;;  %s8925_s15 = sphi %s8960_s15, %s10549_s15  }
   0x3   : > { %s39_s20 = ssub.s32 %s8933_s17, %s8979_s19  ;;  %s42_s21 = sadd.s32 1, %s8929_s16 }
   0x4   : > { %p40_p0 = scmp.eq.s32.totalorder %s39_s20, 0  ;;  %p49_p1 = scmp.ne.s32.totalorder %s8929_s16, %s8925_s15 }
   0x5   : > { %p50_p2 = scmp.eq.s32.totalorder %s8933_s17, 0  ;;  %p131_p3 = scmp.eq.s32.totalorder %s8976_s18, 3 }
   0x6   : > { %s8989_s22 = scalar_select %p40_p0, %s8929_s16, %s42_s21  }
   0x7   : > { %p51_p4 = por %p50_p2, %p49_p1  ;;  %p8991_p5 = por %p131_p3, %p49_p1 }
   0x8   : > { %p7832_p6 = scmp.ge.s32.totalorder %s8933_s17, 4 }
   0xa   : > { %156 = sbr.rel (%p7832_p6) target bundleno = 362 (0x16a), region = 20 }
  0x11   : > { %159 = sbr.rel (!%p51_p4) target bundleno = 362 (0x16a), region = 24  ;;  %s161_s24 = sand.u32 (%p51_p4), 1, %s8929_s16  }
  0x12   : > { %s7834_s25 = sshll.u32 (%p51_p4), %s8933_s17, 2  ;;  %s7833_s26 = sshll.u32 (%p51_p4), %s161_s24, 11 }
  0x13   : > { %s9001_s29 = scalar_lea.vmem (%p51_p4), %s10544_s1, %s7834_s25  ;;  %s9005_s30 = scalar_lea.vmem (%p51_p4), [#allocation2], %s7833_s26 }
  0x14   : > { %v181_v0 = vld [vmem:[%s9001_s29] sm:$0xf] (%p51_p4)  ;;  %v183_v1 = vld [vmem:[%s9001_s29 + $0x10] sm:$0xf] (%p51_p4) }
  0x15   : > { %182 = vst [vmem:[%s9005_s30] sm:$0xf] (%p51_p4), %v181_v0  ;;  %184 = vst [vmem:[%s9005_s30 + $0x4] sm:$0xf] (%p51_p4), %v183_v1  ;;  %v185_v2 = vld [vmem:[%s9001_s29 + $0x20] sm:$0xf] (%p51_p4) }
  0x16   : > { %v187_v3 = vld [vmem:[%s9001_s29 + $0x30] sm:$0xf] (%p51_p4)  ;;  %v189_v4 = vld [vmem:[%s9001_s29 + $0x40] sm:$0xf] (%p51_p4)  ;;  %186 = vst [vmem:[%s9005_s30 + $0x8] sm:$0xf] (%p51_p4), %v185_v2 }
  0x17   : > { %188 = vst [vmem:[%s9005_s30 + $0xc] sm:$0xf] (%p51_p4), %v187_v3  ;;  %190 = vst [vmem:[%s9005_s30 + $0x10] sm:$0xf] (%p51_p4), %v189_v4  ;;  %v191_v5 = vld [vmem:[%s9001_s29 + $0x50] sm:$0xf] (%p51_p4) }
  0x18   : > { %v193_v6 = vld [vmem:[%s9001_s29 + $0x60] sm:$0xf]  ;;  %v195_v7 = vld [vmem:[%s9001_s29 + $0x70] sm:$0xf]  ;;  %192 = vst [vmem:[%s9005_s30 + $0x14] sm:$0xf] %v191_v5 }
  0x19   : > { %194 = vst [vmem:[%s9005_s30 + $0x18] sm:$0xf] %v193_v6  ;;  %196 = vst [vmem:[%s9005_s30 + $0x1c] sm:$0xf] %v195_v7  ;;  %v197_v8 = vld [vmem:[%s9001_s29 + $0x80] sm:$0xf] }
  0x1a   : > { %v199_v9 = vld [vmem:[%s9001_s29 + $0x90] sm:$0xf]  ;;  %v201_v10 = vld [vmem:[%s9001_s29 + $0xa0] sm:$0xf]  ;;  %198 = vst [vmem:[%s9005_s30 + $0x20] sm:$0xf] %v197_v8 }
  0x1b   : > { %200 = vst [vmem:[%s9005_s30 + $0x24] sm:$0xf] %v199_v9  ;;  %202 = vst [vmem:[%s9005_s30 + $0x28] sm:$0xf] %v201_v10  ;;  %v203_v11 = vld [vmem:[%s9001_s29 + $0xb0] sm:$0xf] }
  0x1c   : > { %v205_v12 = vld [vmem:[%s9001_s29 + $0xc0] sm:$0xf]  ;;  %v207_v13 = vld [vmem:[%s9001_s29 + $0xd0] sm:$0xf]  ;;  %204 = vst [vmem:[%s9005_s30 + $0x2c] sm:$0xf] %v203_v11 }
  0x1d   : > { %206 = vst [vmem:[%s9005_s30 + $0x30] sm:$0xf] %v205_v12  ;;  %208 = vst [vmem:[%s9005_s30 + $0x34] sm:$0xf] %v207_v13  ;;  %v209_v14 = vld [vmem:[%s9001_s29 + $0xe0] sm:$0xf] }
  0x1e   : > { %v211_v15 = vld [vmem:[%s9001_s29 + $0xf0] sm:$0xf]  ;;  %v213_v16 = vld [vmem:[%s9001_s29 + $0x100] sm:$0xf]  ;;  %210 = vst [vmem:[%s9005_s30 + $0x38] sm:$0xf] %v209_v14 }
  0x1f   : > { %212 = vst [vmem:[%s9005_s30 + $0x3c] sm:$0xf] %v211_v15  ;;  %214 = vst [vmem:[%s9005_s30 + $0x40] sm:$0xf] %v213_v16  ;;  %v215_v17 = vld [vmem:[%s9001_s29 + $0x110] sm:$0xf] }
  0x20   : > { %v217_v18 = vld [vmem:[%s9001_s29 + $0x120] sm:$0xf]  ;;  %v219_v19 = vld [vmem:[%s9001_s29 + $0x130] sm:$0xf]  ;;  %216 = vst [vmem:[%s9005_s30 + $0x44] sm:$0xf] %v215_v17 }
  0x21   : > { %218 = vst [vmem:[%s9005_s30 + $0x48] sm:$0xf] %v217_v18  ;;  %220 = vst [vmem:[%s9005_s30 + $0x4c] sm:$0xf] %v219_v19  ;;  %v221_v20 = vld [vmem:[%s9001_s29 + $0x140] sm:$0xf] }
  0x22   : > { %v223_v21 = vld [vmem:[%s9001_s29 + $0x150] sm:$0xf]  ;;  %v225_v22 = vld [vmem:[%s9001_s29 + $0x160] sm:$0xf]  ;;  %222 = vst [vmem:[%s9005_s30 + $0x50] sm:$0xf] %v221_v20 }
  0x23   : > { %224 = vst [vmem:[%s9005_s30 + $0x54] sm:$0xf] %v223_v21  ;;  %226 = vst [vmem:[%s9005_s30 + $0x58] sm:$0xf] %v225_v22  ;;  %v227_v23 = vld [vmem:[%s9001_s29 + $0x170] sm:$0xf] }
  0x24   : > { %v229_v24 = vld [vmem:[%s9001_s29 + $0x180] sm:$0xf]  ;;  %v231_v25 = vld [vmem:[%s9001_s29 + $0x190] sm:$0xf]  ;;  %228 = vst [vmem:[%s9005_s30 + $0x5c] sm:$0xf] %v227_v23 }
  0x25   : > { %230 = vst [vmem:[%s9005_s30 + $0x60] sm:$0xf] %v229_v24  ;;  %232 = vst [vmem:[%s9005_s30 + $0x64] sm:$0xf] %v231_v25  ;;  %v233_v26 = vld [vmem:[%s9001_s29 + $0x1a0] sm:$0xf] }
  0x26   : > { %v235_v27 = vld [vmem:[%s9001_s29 + $0x1b0] sm:$0xf]  ;;  %v237_v28 = vld [vmem:[%s9001_s29 + $0x1c0] sm:$0xf]  ;;  %234 = vst [vmem:[%s9005_s30 + $0x68] sm:$0xf] %v233_v26 }
  0x27   : > { %236 = vst [vmem:[%s9005_s30 + $0x6c] sm:$0xf] %v235_v27  ;;  %238 = vst [vmem:[%s9005_s30 + $0x70] sm:$0xf] %v237_v28  ;;  %v239_v29 = vld [vmem:[%s9001_s29 + $0x1d0] sm:$0xf] }
  0x28   : > { %v241_v30 = vld [vmem:[%s9001_s29 + $0x1e0] sm:$0xf]  ;;  %v243_v31 = vld [vmem:[%s9001_s29 + $0x1f0] sm:$0xf]  ;;  %240 = vst [vmem:[%s9005_s30 + $0x74] sm:$0xf] %v239_v29 }
  0x29   : > { %242 = vst [vmem:[%s9005_s30 + $0x78] sm:$0xf] %v241_v30  ;;  %244 = vst [vmem:[%s9005_s30 + $0x7c] sm:$0xf] %v243_v31  ;;  %v245_v32 = vld [vmem:[%s9001_s29 + $0x200] sm:$0xf] }
  0x2a   : > { %v247_v33 = vld [vmem:[%s9001_s29 + $0x210] sm:$0xf]  ;;  %v249_v34 = vld [vmem:[%s9001_s29 + $0x220] sm:$0xf]  ;;  %246 = vst [vmem:[%s9005_s30 + $0x80] sm:$0xf] %v245_v32 }
  0x2b   : > { %248 = vst [vmem:[%s9005_s30 + $0x84] sm:$0xf] %v247_v33  ;;  %250 = vst [vmem:[%s9005_s30 + $0x88] sm:$0xf] %v249_v34  ;;  %v251_v35 = vld [vmem:[%s9001_s29 + $0x230] sm:$0xf] }
  0x2c   : > { %v253_v36 = vld [vmem:[%s9001_s29 + $0x240] sm:$0xf]  ;;  %v255_v37 = vld [vmem:[%s9001_s29 + $0x250] sm:$0xf]  ;;  %252 = vst [vmem:[%s9005_s30 + $0x8c] sm:$0xf] %v251_v35 }
  0x2d   : > { %254 = vst [vmem:[%s9005_s30 + $0x90] sm:$0xf] %v253_v36  ;;  %256 = vst [vmem:[%s9005_s30 + $0x94] sm:$0xf] %v255_v37  ;;  %v257_v38 = vld [vmem:[%s9001_s29 + $0x260] sm:$0xf] }
  0x2e   : > { %v259_v39 = vld [vmem:[%s9001_s29 + $0x270] sm:$0xf]  ;;  %v261_v40 = vld [vmem:[%s9001_s29 + $0x280] sm:$0xf]  ;;  %258 = vst [vmem:[%s9005_s30 + $0x98] sm:$0xf] %v257_v38 }
  0x2f   : > { %260 = vst [vmem:[%s9005_s30 + $0x9c] sm:$0xf] %v259_v39  ;;  %262 = vst [vmem:[%s9005_s30 + $0xa0] sm:$0xf] %v261_v40  ;;  %v263_v41 = vld [vmem:[%s9001_s29 + $0x290] sm:$0xf] }
  0x30   : > { %v265_v42 = vld [vmem:[%s9001_s29 + $0x2a0] sm:$0xf]  ;;  %v267_v43 = vld [vmem:[%s9001_s29 + $0x2b0] sm:$0xf]  ;;  %264 = vst [vmem:[%s9005_s30 + $0xa4] sm:$0xf] %v263_v41 }
  0x31   : > { %266 = vst [vmem:[%s9005_s30 + $0xa8] sm:$0xf] %v265_v42  ;;  %268 = vst [vmem:[%s9005_s30 + $0xac] sm:$0xf] %v267_v43  ;;  %v269_v44 = vld [vmem:[%s9001_s29 + $0x2c0] sm:$0xf] }
  0x32   : > { %v271_v45 = vld [vmem:[%s9001_s29 + $0x2d0] sm:$0xf]  ;;  %v273_v46 = vld [vmem:[%s9001_s29 + $0x2e0] sm:$0xf]  ;;  %270 = vst [vmem:[%s9005_s30 + $0xb0] sm:$0xf] %v269_v44 }
  0x33   : > { %272 = vst [vmem:[%s9005_s30 + $0xb4] sm:$0xf] %v271_v45  ;;  %274 = vst [vmem:[%s9005_s30 + $0xb8] sm:$0xf] %v273_v46  ;;  %v275_v47 = vld [vmem:[%s9001_s29 + $0x2f0] sm:$0xf] }
  0x34   : > { %v277_v48 = vld [vmem:[%s9001_s29 + $0x300] sm:$0xf]  ;;  %v279_v49 = vld [vmem:[%s9001_s29 + $0x310] sm:$0xf]  ;;  %276 = vst [vmem:[%s9005_s30 + $0xbc] sm:$0xf] %v275_v47 }
  0x35   : > { %278 = vst [vmem:[%s9005_s30 + $0xc0] sm:$0xf] %v277_v48  ;;  %280 = vst [vmem:[%s9005_s30 + $0xc4] sm:$0xf] %v279_v49  ;;  %v281_v50 = vld [vmem:[%s9001_s29 + $0x320] sm:$0xf] }
  0x36   : > { %v283_v51 = vld [vmem:[%s9001_s29 + $0x330] sm:$0xf]  ;;  %v285_v52 = vld [vmem:[%s9001_s29 + $0x340] sm:$0xf]  ;;  %282 = vst [vmem:[%s9005_s30 + $0xc8] sm:$0xf] %v281_v50 }
  0x37   : > { %284 = vst [vmem:[%s9005_s30 + $0xcc] sm:$0xf] %v283_v51  ;;  %286 = vst [vmem:[%s9005_s30 + $0xd0] sm:$0xf] %v285_v52  ;;  %v287_v53 = vld [vmem:[%s9001_s29 + $0x350] sm:$0xf] }
  0x38   : > { %v289_v54 = vld [vmem:[%s9001_s29 + $0x360] sm:$0xf]  ;;  %v291_v55 = vld [vmem:[%s9001_s29 + $0x370] sm:$0xf]  ;;  %288 = vst [vmem:[%s9005_s30 + $0xd4] sm:$0xf] %v287_v53 }
  0x39   : > { %290 = vst [vmem:[%s9005_s30 + $0xd8] sm:$0xf] %v289_v54  ;;  %292 = vst [vmem:[%s9005_s30 + $0xdc] sm:$0xf] %v291_v55  ;;  %v293_v56 = vld [vmem:[%s9001_s29 + $0x380] sm:$0xf] }
  0x3a   : > { %v295_v57 = vld [vmem:[%s9001_s29 + $0x390] sm:$0xf]  ;;  %v297_v58 = vld [vmem:[%s9001_s29 + $0x3a0] sm:$0xf]  ;;  %294 = vst [vmem:[%s9005_s30 + $0xe0] sm:$0xf] %v293_v56 }
  0x3b   : > { %296 = vst [vmem:[%s9005_s30 + $0xe4] sm:$0xf] %v295_v57  ;;  %298 = vst [vmem:[%s9005_s30 + $0xe8] sm:$0xf] %v297_v58  ;;  %v299_v59 = vld [vmem:[%s9001_s29 + $0x3b0] sm:$0xf] }
  0x3c   : > { %v301_v60 = vld [vmem:[%s9001_s29 + $0x3c0] sm:$0xf]  ;;  %v303_v61 = vld [vmem:[%s9001_s29 + $0x3d0] sm:$0xf]  ;;  %300 = vst [vmem:[%s9005_s30 + $0xec] sm:$0xf] %v299_v59 }
  0x3d   : > { %302 = vst [vmem:[%s9005_s30 + $0xf0] sm:$0xf] %v301_v60  ;;  %304 = vst [vmem:[%s9005_s30 + $0xf4] sm:$0xf] %v303_v61  ;;  %v305_v62 = vld [vmem:[%s9001_s29 + $0x3e0] sm:$0xf] }
  0x3e   : > { %v307_v63 = vld [vmem:[%s9001_s29 + $0x3f0] sm:$0xf]  ;;  %v309_v0 = vld [vmem:[%s9001_s29 + $0x400] sm:$0xf]  ;;  %306 = vst [vmem:[%s9005_s30 + $0xf8] sm:$0xf] %v305_v62 }
  0x3f   : > { %308 = vst [vmem:[%s9005_s30 + $0xfc] sm:$0xf] %v307_v63  ;;  %310 = vst [vmem:[%s9005_s30 + $0x100] sm:$0xf] %v309_v0  ;;  %v311_v1 = vld [vmem:[%s9001_s29 + $0x410] sm:$0xf] }
  0x40   : > { %v313_v2 = vld [vmem:[%s9001_s29 + $0x420] sm:$0xf]  ;;  %v315_v3 = vld [vmem:[%s9001_s29 + $0x430] sm:$0xf]  ;;  %312 = vst [vmem:[%s9005_s30 + $0x104] sm:$0xf] %v311_v1 }
  0x41   : > { %314 = vst [vmem:[%s9005_s30 + $0x108] sm:$0xf] %v313_v2  ;;  %316 = vst [vmem:[%s9005_s30 + $0x10c] sm:$0xf] %v315_v3  ;;  %v317_v4 = vld [vmem:[%s9001_s29 + $0x440] sm:$0xf] }
  0x42   : > { %v319_v5 = vld [vmem:[%s9001_s29 + $0x450] sm:$0xf]  ;;  %v321_v6 = vld [vmem:[%s9001_s29 + $0x460] sm:$0xf]  ;;  %318 = vst [vmem:[%s9005_s30 + $0x110] sm:$0xf] %v317_v4 }
  0x43   : > { %320 = vst [vmem:[%s9005_s30 + $0x114] sm:$0xf] %v319_v5  ;;  %322 = vst [vmem:[%s9005_s30 + $0x118] sm:$0xf] %v321_v6  ;;  %v323_v7 = vld [vmem:[%s9001_s29 + $0x470] sm:$0xf] }
  0x44   : > { %v325_v8 = vld [vmem:[%s9001_s29 + $0x480] sm:$0xf]  ;;  %v327_v9 = vld [vmem:[%s9001_s29 + $0x490] sm:$0xf]  ;;  %324 = vst [vmem:[%s9005_s30 + $0x11c] sm:$0xf] %v323_v7 }
  0x45   : > { %326 = vst [vmem:[%s9005_s30 + $0x120] sm:$0xf] %v325_v8  ;;  %328 = vst [vmem:[%s9005_s30 + $0x124] sm:$0xf] %v327_v9  ;;  %v329_v10 = vld [vmem:[%s9001_s29 + $0x4a0] sm:$0xf] }
  0x46   : > { %v331_v11 = vld [vmem:[%s9001_s29 + $0x4b0] sm:$0xf]  ;;  %v333_v12 = vld [vmem:[%s9001_s29 + $0x4c0] sm:$0xf]  ;;  %330 = vst [vmem:[%s9005_s30 + $0x128] sm:$0xf] %v329_v10 }
  0x47   : > { %332 = vst [vmem:[%s9005_s30 + $0x12c] sm:$0xf] %v331_v11  ;;  %334 = vst [vmem:[%s9005_s30 + $0x130] sm:$0xf] %v333_v12  ;;  %v335_v13 = vld [vmem:[%s9001_s29 + $0x4d0] sm:$0xf] }
  0x48   : > { %v337_v14 = vld [vmem:[%s9001_s29 + $0x4e0] sm:$0xf]  ;;  %v339_v15 = vld [vmem:[%s9001_s29 + $0x4f0] sm:$0xf]  ;;  %336 = vst [vmem:[%s9005_s30 + $0x134] sm:$0xf] %v335_v13 }
  0x49   : > { %338 = vst [vmem:[%s9005_s30 + $0x138] sm:$0xf] %v337_v14  ;;  %340 = vst [vmem:[%s9005_s30 + $0x13c] sm:$0xf] %v339_v15  ;;  %v341_v16 = vld [vmem:[%s9001_s29 + $0x500] sm:$0xf] }
  0x4a   : > { %v343_v17 = vld [vmem:[%s9001_s29 + $0x510] sm:$0xf]  ;;  %v345_v18 = vld [vmem:[%s9001_s29 + $0x520] sm:$0xf]  ;;  %342 = vst [vmem:[%s9005_s30 + $0x140] sm:$0xf] %v341_v16 }
  0x4b   : > { %344 = vst [vmem:[%s9005_s30 + $0x144] sm:$0xf] %v343_v17  ;;  %346 = vst [vmem:[%s9005_s30 + $0x148] sm:$0xf] %v345_v18  ;;  %v347_v19 = vld [vmem:[%s9001_s29 + $0x530] sm:$0xf] }
  0x4c   : > { %v349_v20 = vld [vmem:[%s9001_s29 + $0x540] sm:$0xf]  ;;  %v351_v21 = vld [vmem:[%s9001_s29 + $0x550] sm:$0xf]  ;;  %348 = vst [vmem:[%s9005_s30 + $0x14c] sm:$0xf] %v347_v19 }
  0x4d   : > { %350 = vst [vmem:[%s9005_s30 + $0x150] sm:$0xf] %v349_v20  ;;  %352 = vst [vmem:[%s9005_s30 + $0x154] sm:$0xf] %v351_v21  ;;  %v353_v22 = vld [vmem:[%s9001_s29 + $0x560] sm:$0xf] }
  0x4e   : > { %v355_v23 = vld [vmem:[%s9001_s29 + $0x570] sm:$0xf]  ;;  %v357_v24 = vld [vmem:[%s9001_s29 + $0x580] sm:$0xf]  ;;  %354 = vst [vmem:[%s9005_s30 + $0x158] sm:$0xf] %v353_v22 }
  0x4f   : > { %356 = vst [vmem:[%s9005_s30 + $0x15c] sm:$0xf] %v355_v23  ;;  %358 = vst [vmem:[%s9005_s30 + $0x160] sm:$0xf] %v357_v24  ;;  %v359_v25 = vld [vmem:[%s9001_s29 + $0x590] sm:$0xf] }
  0x50   : > { %v361_v26 = vld [vmem:[%s9001_s29 + $0x5a0] sm:$0xf]  ;;  %v363_v27 = vld [vmem:[%s9001_s29 + $0x5b0] sm:$0xf]  ;;  %360 = vst [vmem:[%s9005_s30 + $0x164] sm:$0xf] %v359_v25 }
  0x51   : > { %362 = vst [vmem:[%s9005_s30 + $0x168] sm:$0xf] %v361_v26  ;;  %364 = vst [vmem:[%s9005_s30 + $0x16c] sm:$0xf] %v363_v27  ;;  %v365_v28 = vld [vmem:[%s9001_s29 + $0x5c0] sm:$0xf] }
  0x52   : > { %v367_v29 = vld [vmem:[%s9001_s29 + $0x5d0] sm:$0xf]  ;;  %v369_v30 = vld [vmem:[%s9001_s29 + $0x5e0] sm:$0xf]  ;;  %366 = vst [vmem:[%s9005_s30 + $0x170] sm:$0xf] %v365_v28 }
  0x53   : > { %368 = vst [vmem:[%s9005_s30 + $0x174] sm:$0xf] %v367_v29  ;;  %370 = vst [vmem:[%s9005_s30 + $0x178] sm:$0xf] %v369_v30  ;;  %v371_v31 = vld [vmem:[%s9001_s29 + $0x5f0] sm:$0xf] }
  0x54   : > { %v373_v32 = vld [vmem:[%s9001_s29 + $0x600] sm:$0xf]  ;;  %v375_v33 = vld [vmem:[%s9001_s29 + $0x610] sm:$0xf]  ;;  %372 = vst [vmem:[%s9005_s30 + $0x17c] sm:$0xf] %v371_v31 }
  0x55   : > { %374 = vst [vmem:[%s9005_s30 + $0x180] sm:$0xf] %v373_v32  ;;  %376 = vst [vmem:[%s9005_s30 + $0x184] sm:$0xf] %v375_v33  ;;  %v377_v34 = vld [vmem:[%s9001_s29 + $0x620] sm:$0xf] }
  0x56   : > { %v379_v35 = vld [vmem:[%s9001_s29 + $0x630] sm:$0xf]  ;;  %v381_v36 = vld [vmem:[%s9001_s29 + $0x640] sm:$0xf]  ;;  %378 = vst [vmem:[%s9005_s30 + $0x188] sm:$0xf] %v377_v34 }
  0x57   : > { %380 = vst [vmem:[%s9005_s30 + $0x18c] sm:$0xf] %v379_v35  ;;  %382 = vst [vmem:[%s9005_s30 + $0x190] sm:$0xf] %v381_v36  ;;  %v383_v37 = vld [vmem:[%s9001_s29 + $0x650] sm:$0xf] }
  0x58   : > { %v385_v38 = vld [vmem:[%s9001_s29 + $0x660] sm:$0xf]  ;;  %v387_v39 = vld [vmem:[%s9001_s29 + $0x670] sm:$0xf]  ;;  %384 = vst [vmem:[%s9005_s30 + $0x194] sm:$0xf] %v383_v37 }
  0x59   : > { %386 = vst [vmem:[%s9005_s30 + $0x198] sm:$0xf] %v385_v38  ;;  %388 = vst [vmem:[%s9005_s30 + $0x19c] sm:$0xf] %v387_v39  ;;  %v389_v40 = vld [vmem:[%s9001_s29 + $0x680] sm:$0xf] }
  0x5a   : > { %v391_v41 = vld [vmem:[%s9001_s29 + $0x690] sm:$0xf]  ;;  %v393_v42 = vld [vmem:[%s9001_s29 + $0x6a0] sm:$0xf]  ;;  %390 = vst [vmem:[%s9005_s30 + $0x1a0] sm:$0xf] %v389_v40 }
  0x5b   : > { %392 = vst [vmem:[%s9005_s30 + $0x1a4] sm:$0xf] %v391_v41  ;;  %394 = vst [vmem:[%s9005_s30 + $0x1a8] sm:$0xf] %v393_v42  ;;  %v395_v43 = vld [vmem:[%s9001_s29 + $0x6b0] sm:$0xf] }
  0x5c   : > { %v397_v44 = vld [vmem:[%s9001_s29 + $0x6c0] sm:$0xf]  ;;  %v399_v45 = vld [vmem:[%s9001_s29 + $0x6d0] sm:$0xf]  ;;  %396 = vst [vmem:[%s9005_s30 + $0x1ac] sm:$0xf] %v395_v43 }
  0x5d   : > { %398 = vst [vmem:[%s9005_s30 + $0x1b0] sm:$0xf] %v397_v44  ;;  %400 = vst [vmem:[%s9005_s30 + $0x1b4] sm:$0xf] %v399_v45  ;;  %v401_v46 = vld [vmem:[%s9001_s29 + $0x6e0] sm:$0xf] }
  0x5e   : > { %v403_v47 = vld [vmem:[%s9001_s29 + $0x6f0] sm:$0xf]  ;;  %v405_v48 = vld [vmem:[%s9001_s29 + $0x700] sm:$0xf]  ;;  %402 = vst [vmem:[%s9005_s30 + $0x1b8] sm:$0xf] %v401_v46 }
  0x5f   : > { %404 = vst [vmem:[%s9005_s30 + $0x1bc] sm:$0xf] %v403_v47  ;;  %406 = vst [vmem:[%s9005_s30 + $0x1c0] sm:$0xf] %v405_v48  ;;  %v407_v49 = vld [vmem:[%s9001_s29 + $0x710] sm:$0xf] }
  0x60   : > { %v409_v50 = vld [vmem:[%s9001_s29 + $0x720] sm:$0xf]  ;;  %v411_v51 = vld [vmem:[%s9001_s29 + $0x730] sm:$0xf]  ;;  %408 = vst [vmem:[%s9005_s30 + $0x1c4] sm:$0xf] %v407_v49 }
  0x61   : > { %410 = vst [vmem:[%s9005_s30 + $0x1c8] sm:$0xf] %v409_v50  ;;  %412 = vst [vmem:[%s9005_s30 + $0x1cc] sm:$0xf] %v411_v51  ;;  %v413_v52 = vld [vmem:[%s9001_s29 + $0x740] sm:$0xf] }
  0x62   : > { %v415_v53 = vld [vmem:[%s9001_s29 + $0x750] sm:$0xf]  ;;  %v417_v54 = vld [vmem:[%s9001_s29 + $0x760] sm:$0xf]  ;;  %414 = vst [vmem:[%s9005_s30 + $0x1d0] sm:$0xf] %v413_v52 }
  0x63   : > { %416 = vst [vmem:[%s9005_s30 + $0x1d4] sm:$0xf] %v415_v53  ;;  %418 = vst [vmem:[%s9005_s30 + $0x1d8] sm:$0xf] %v417_v54  ;;  %v419_v55 = vld [vmem:[%s9001_s29 + $0x770] sm:$0xf] }
  0x64   : > { %v421_v56 = vld [vmem:[%s9001_s29 + $0x780] sm:$0xf]  ;;  %v423_v57 = vld [vmem:[%s9001_s29 + $0x790] sm:$0xf]  ;;  %420 = vst [vmem:[%s9005_s30 + $0x1dc] sm:$0xf] %v419_v55 }
  0x65   : > { %422 = vst [vmem:[%s9005_s30 + $0x1e0] sm:$0xf] %v421_v56  ;;  %424 = vst [vmem:[%s9005_s30 + $0x1e4] sm:$0xf] %v423_v57  ;;  %v425_v58 = vld [vmem:[%s9001_s29 + $0x7a0] sm:$0xf] }
  0x66   : > { %v427_v59 = vld [vmem:[%s9001_s29 + $0x7b0] sm:$0xf]  ;;  %v429_v60 = vld [vmem:[%s9001_s29 + $0x7c0] sm:$0xf]  ;;  %426 = vst [vmem:[%s9005_s30 + $0x1e8] sm:$0xf] %v425_v58 }
  0x67   : > { %428 = vst [vmem:[%s9005_s30 + $0x1ec] sm:$0xf] %v427_v59  ;;  %430 = vst [vmem:[%s9005_s30 + $0x1f0] sm:$0xf] %v429_v60  ;;  %v431_v61 = vld [vmem:[%s9001_s29 + $0x7d0] sm:$0xf] }
  0x68   : > { %v433_v62 = vld [vmem:[%s9001_s29 + $0x7e0] sm:$0xf]  ;;  %v435_v63 = vld [vmem:[%s9001_s29 + $0x7f0] sm:$0xf]  ;;  %432 = vst [vmem:[%s9005_s30 + $0x1f4] sm:$0xf] %v431_v61 }
  0x69   : > { %434 = vst [vmem:[%s9005_s30 + $0x1f8] sm:$0xf] %v433_v62  ;;  %436 = vst [vmem:[%s9005_s30 + $0x1fc] sm:$0xf] %v435_v63  ;;  %v437_v0 = vld [vmem:[%s9001_s29 + $0x800] sm:$0xf] }
  0x6a   : > { %v439_v1 = vld [vmem:[%s9001_s29 + $0x810] sm:$0xf]  ;;  %v441_v2 = vld [vmem:[%s9001_s29 + $0x820] sm:$0xf]  ;;  %438 = vst [vmem:[%s9005_s30 + $0x200] sm:$0xf] %v437_v0 }
  0x6b   : > { %440 = vst [vmem:[%s9005_s30 + $0x204] sm:$0xf] %v439_v1  ;;  %442 = vst [vmem:[%s9005_s30 + $0x208] sm:$0xf] %v441_v2  ;;  %v443_v3 = vld [vmem:[%s9001_s29 + $0x830] sm:$0xf] }
  0x6c   : > { %v445_v4 = vld [vmem:[%s9001_s29 + $0x840] sm:$0xf]  ;;  %v447_v5 = vld [vmem:[%s9001_s29 + $0x850] sm:$0xf]  ;;  %444 = vst [vmem:[%s9005_s30 + $0x20c] sm:$0xf] %v443_v3 }
  0x6d   : > { %446 = vst [vmem:[%s9005_s30 + $0x210] sm:$0xf] %v445_v4  ;;  %448 = vst [vmem:[%s9005_s30 + $0x214] sm:$0xf] %v447_v5  ;;  %v449_v6 = vld [vmem:[%s9001_s29 + $0x860] sm:$0xf] }
  0x6e   : > { %v451_v7 = vld [vmem:[%s9001_s29 + $0x870] sm:$0xf]  ;;  %v453_v8 = vld [vmem:[%s9001_s29 + $0x880] sm:$0xf]  ;;  %450 = vst [vmem:[%s9005_s30 + $0x218] sm:$0xf] %v449_v6 }
  0x6f   : > { %452 = vst [vmem:[%s9005_s30 + $0x21c] sm:$0xf] %v451_v7  ;;  %454 = vst [vmem:[%s9005_s30 + $0x220] sm:$0xf] %v453_v8  ;;  %v455_v9 = vld [vmem:[%s9001_s29 + $0x890] sm:$0xf] }
  0x70   : > { %v457_v10 = vld [vmem:[%s9001_s29 + $0x8a0] sm:$0xf]  ;;  %v459_v11 = vld [vmem:[%s9001_s29 + $0x8b0] sm:$0xf]  ;;  %456 = vst [vmem:[%s9005_s30 + $0x224] sm:$0xf] %v455_v9 }
  0x71   : > { %458 = vst [vmem:[%s9005_s30 + $0x228] sm:$0xf] %v457_v10  ;;  %460 = vst [vmem:[%s9005_s30 + $0x22c] sm:$0xf] %v459_v11  ;;  %v461_v12 = vld [vmem:[%s9001_s29 + $0x8c0] sm:$0xf] }
  0x72   : > { %v463_v13 = vld [vmem:[%s9001_s29 + $0x8d0] sm:$0xf]  ;;  %v465_v14 = vld [vmem:[%s9001_s29 + $0x8e0] sm:$0xf]  ;;  %462 = vst [vmem:[%s9005_s30 + $0x230] sm:$0xf] %v461_v12 }
  0x73   : > { %464 = vst [vmem:[%s9005_s30 + $0x234] sm:$0xf] %v463_v13  ;;  %466 = vst [vmem:[%s9005_s30 + $0x238] sm:$0xf] %v465_v14  ;;  %v467_v15 = vld [vmem:[%s9001_s29 + $0x8f0] sm:$0xf] }
  0x74   : > { %v469_v16 = vld [vmem:[%s9001_s29 + $0x900] sm:$0xf]  ;;  %v471_v17 = vld [vmem:[%s9001_s29 + $0x910] sm:$0xf]  ;;  %468 = vst [vmem:[%s9005_s30 + $0x23c] sm:$0xf] %v467_v15 }
  0x75   : > { %470 = vst [vmem:[%s9005_s30 + $0x240] sm:$0xf] %v469_v16  ;;  %472 = vst [vmem:[%s9005_s30 + $0x244] sm:$0xf] %v471_v17  ;;  %v473_v18 = vld [vmem:[%s9001_s29 + $0x920] sm:$0xf] }
  0x76   : > { %v475_v19 = vld [vmem:[%s9001_s29 + $0x930] sm:$0xf]  ;;  %v477_v20 = vld [vmem:[%s9001_s29 + $0x940] sm:$0xf]  ;;  %474 = vst [vmem:[%s9005_s30 + $0x248] sm:$0xf] %v473_v18 }
  0x77   : > { %476 = vst [vmem:[%s9005_s30 + $0x24c] sm:$0xf] %v475_v19  ;;  %478 = vst [vmem:[%s9005_s30 + $0x250] sm:$0xf] %v477_v20  ;;  %v479_v21 = vld [vmem:[%s9001_s29 + $0x950] sm:$0xf] }
  0x78   : > { %v481_v22 = vld [vmem:[%s9001_s29 + $0x960] sm:$0xf]  ;;  %v483_v23 = vld [vmem:[%s9001_s29 + $0x970] sm:$0xf]  ;;  %480 = vst [vmem:[%s9005_s30 + $0x254] sm:$0xf] %v479_v21 }
  0x79   : > { %482 = vst [vmem:[%s9005_s30 + $0x258] sm:$0xf] %v481_v22  ;;  %484 = vst [vmem:[%s9005_s30 + $0x25c] sm:$0xf] %v483_v23  ;;  %v485_v24 = vld [vmem:[%s9001_s29 + $0x980] sm:$0xf] }
  0x7a   : > { %v487_v25 = vld [vmem:[%s9001_s29 + $0x990] sm:$0xf]  ;;  %v489_v26 = vld [vmem:[%s9001_s29 + $0x9a0] sm:$0xf]  ;;  %486 = vst [vmem:[%s9005_s30 + $0x260] sm:$0xf] %v485_v24 }
  0x7b   : > { %488 = vst [vmem:[%s9005_s30 + $0x264] sm:$0xf] %v487_v25  ;;  %490 = vst [vmem:[%s9005_s30 + $0x268] sm:$0xf] %v489_v26  ;;  %v491_v27 = vld [vmem:[%s9001_s29 + $0x9b0] sm:$0xf] }
  0x7c   : > { %v493_v28 = vld [vmem:[%s9001_s29 + $0x9c0] sm:$0xf]  ;;  %v495_v29 = vld [vmem:[%s9001_s29 + $0x9d0] sm:$0xf]  ;;  %492 = vst [vmem:[%s9005_s30 + $0x26c] sm:$0xf] %v491_v27 }
  0x7d   : > { %494 = vst [vmem:[%s9005_s30 + $0x270] sm:$0xf] %v493_v28  ;;  %496 = vst [vmem:[%s9005_s30 + $0x274] sm:$0xf] %v495_v29  ;;  %v497_v30 = vld [vmem:[%s9001_s29 + $0x9e0] sm:$0xf] }
  0x7e   : > { %v499_v31 = vld [vmem:[%s9001_s29 + $0x9f0] sm:$0xf]  ;;  %v501_v32 = vld [vmem:[%s9001_s29 + $0xa00] sm:$0xf]  ;;  %498 = vst [vmem:[%s9005_s30 + $0x278] sm:$0xf] %v497_v30 }
  0x7f   : > { %500 = vst [vmem:[%s9005_s30 + $0x27c] sm:$0xf] %v499_v31  ;;  %502 = vst [vmem:[%s9005_s30 + $0x280] sm:$0xf] %v501_v32  ;;  %v503_v33 = vld [vmem:[%s9001_s29 + $0xa10] sm:$0xf] }
  0x80   : > { %v505_v34 = vld [vmem:[%s9001_s29 + $0xa20] sm:$0xf]  ;;  %v507_v35 = vld [vmem:[%s9001_s29 + $0xa30] sm:$0xf]  ;;  %504 = vst [vmem:[%s9005_s30 + $0x284] sm:$0xf] %v503_v33 }
  0x81   : > { %506 = vst [vmem:[%s9005_s30 + $0x288] sm:$0xf] %v505_v34  ;;  %508 = vst [vmem:[%s9005_s30 + $0x28c] sm:$0xf] %v507_v35  ;;  %v509_v36 = vld [vmem:[%s9001_s29 + $0xa40] sm:$0xf] }
  0x82   : > { %v511_v37 = vld [vmem:[%s9001_s29 + $0xa50] sm:$0xf]  ;;  %v513_v38 = vld [vmem:[%s9001_s29 + $0xa60] sm:$0xf]  ;;  %510 = vst [vmem:[%s9005_s30 + $0x290] sm:$0xf] %v509_v36 }
  0x83   : > { %512 = vst [vmem:[%s9005_s30 + $0x294] sm:$0xf] %v511_v37  ;;  %514 = vst [vmem:[%s9005_s30 + $0x298] sm:$0xf] %v513_v38  ;;  %v515_v39 = vld [vmem:[%s9001_s29 + $0xa70] sm:$0xf] }
  0x84   : > { %v517_v40 = vld [vmem:[%s9001_s29 + $0xa80] sm:$0xf]  ;;  %v519_v41 = vld [vmem:[%s9001_s29 + $0xa90] sm:$0xf]  ;;  %516 = vst [vmem:[%s9005_s30 + $0x29c] sm:$0xf] %v515_v39 }
  0x85   : > { %518 = vst [vmem:[%s9005_s30 + $0x2a0] sm:$0xf] %v517_v40  ;;  %520 = vst [vmem:[%s9005_s30 + $0x2a4] sm:$0xf] %v519_v41  ;;  %v521_v42 = vld [vmem:[%s9001_s29 + $0xaa0] sm:$0xf] }
  0x86   : > { %v523_v43 = vld [vmem:[%s9001_s29 + $0xab0] sm:$0xf]  ;;  %v525_v44 = vld [vmem:[%s9001_s29 + $0xac0] sm:$0xf]  ;;  %522 = vst [vmem:[%s9005_s30 + $0x2a8] sm:$0xf] %v521_v42 }
  0x87   : > { %524 = vst [vmem:[%s9005_s30 + $0x2ac] sm:$0xf] %v523_v43  ;;  %526 = vst [vmem:[%s9005_s30 + $0x2b0] sm:$0xf] %v525_v44  ;;  %v527_v45 = vld [vmem:[%s9001_s29 + $0xad0] sm:$0xf] }
  0x88   : > { %v529_v46 = vld [vmem:[%s9001_s29 + $0xae0] sm:$0xf]  ;;  %v531_v47 = vld [vmem:[%s9001_s29 + $0xaf0] sm:$0xf]  ;;  %528 = vst [vmem:[%s9005_s30 + $0x2b4] sm:$0xf] %v527_v45 }
  0x89   : > { %530 = vst [vmem:[%s9005_s30 + $0x2b8] sm:$0xf] %v529_v46  ;;  %532 = vst [vmem:[%s9005_s30 + $0x2bc] sm:$0xf] %v531_v47  ;;  %v533_v48 = vld [vmem:[%s9001_s29 + $0xb00] sm:$0xf] }
  0x8a   : > { %v535_v49 = vld [vmem:[%s9001_s29 + $0xb10] sm:$0xf]  ;;  %v537_v50 = vld [vmem:[%s9001_s29 + $0xb20] sm:$0xf]  ;;  %534 = vst [vmem:[%s9005_s30 + $0x2c0] sm:$0xf] %v533_v48 }
  0x8b   : > { %536 = vst [vmem:[%s9005_s30 + $0x2c4] sm:$0xf] %v535_v49  ;;  %538 = vst [vmem:[%s9005_s30 + $0x2c8] sm:$0xf] %v537_v50  ;;  %v539_v51 = vld [vmem:[%s9001_s29 + $0xb30] sm:$0xf] }
  0x8c   : > { %v541_v52 = vld [vmem:[%s9001_s29 + $0xb40] sm:$0xf]  ;;  %v543_v53 = vld [vmem:[%s9001_s29 + $0xb50] sm:$0xf]  ;;  %540 = vst [vmem:[%s9005_s30 + $0x2cc] sm:$0xf] %v539_v51 }
  0x8d   : > { %542 = vst [vmem:[%s9005_s30 + $0x2d0] sm:$0xf] %v541_v52  ;;  %544 = vst [vmem:[%s9005_s30 + $0x2d4] sm:$0xf] %v543_v53  ;;  %v545_v54 = vld [vmem:[%s9001_s29 + $0xb60] sm:$0xf] }
  0x8e   : > { %v547_v55 = vld [vmem:[%s9001_s29 + $0xb70] sm:$0xf]  ;;  %v549_v56 = vld [vmem:[%s9001_s29 + $0xb80] sm:$0xf]  ;;  %546 = vst [vmem:[%s9005_s30 + $0x2d8] sm:$0xf] %v545_v54 }
  0x8f   : > { %548 = vst [vmem:[%s9005_s30 + $0x2dc] sm:$0xf] %v547_v55  ;;  %550 = vst [vmem:[%s9005_s30 + $0x2e0] sm:$0xf] %v549_v56  ;;  %v551_v57 = vld [vmem:[%s9001_s29 + $0xb90] sm:$0xf] }
  0x90   : > { %v553_v58 = vld [vmem:[%s9001_s29 + $0xba0] sm:$0xf]  ;;  %v555_v59 = vld [vmem:[%s9001_s29 + $0xbb0] sm:$0xf]  ;;  %552 = vst [vmem:[%s9005_s30 + $0x2e4] sm:$0xf] %v551_v57 }
  0x91   : > { %554 = vst [vmem:[%s9005_s30 + $0x2e8] sm:$0xf] %v553_v58  ;;  %556 = vst [vmem:[%s9005_s30 + $0x2ec] sm:$0xf] %v555_v59  ;;  %v557_v60 = vld [vmem:[%s9001_s29 + $0xbc0] sm:$0xf] }
  0x92   : > { %v559_v61 = vld [vmem:[%s9001_s29 + $0xbd0] sm:$0xf]  ;;  %v561_v62 = vld [vmem:[%s9001_s29 + $0xbe0] sm:$0xf]  ;;  %558 = vst [vmem:[%s9005_s30 + $0x2f0] sm:$0xf] %v557_v60 }
  0x93   : > { %560 = vst [vmem:[%s9005_s30 + $0x2f4] sm:$0xf] %v559_v61  ;;  %562 = vst [vmem:[%s9005_s30 + $0x2f8] sm:$0xf] %v561_v62  ;;  %v563_v63 = vld [vmem:[%s9001_s29 + $0xbf0] sm:$0xf] }
  0x94   : > { %v565_v0 = vld [vmem:[%s9001_s29 + $0xc00] sm:$0xf]  ;;  %v567_v1 = vld [vmem:[%s9001_s29 + $0xc10] sm:$0xf]  ;;  %564 = vst [vmem:[%s9005_s30 + $0x2fc] sm:$0xf] %v563_v63 }
  0x95   : > { %566 = vst [vmem:[%s9005_s30 + $0x300] sm:$0xf] %v565_v0  ;;  %568 = vst [vmem:[%s9005_s30 + $0x304] sm:$0xf] %v567_v1  ;;  %v569_v2 = vld [vmem:[%s9001_s29 + $0xc20] sm:$0xf] }
  0x96   : > { %v571_v3 = vld [vmem:[%s9001_s29 + $0xc30] sm:$0xf]  ;;  %v573_v4 = vld [vmem:[%s9001_s29 + $0xc40] sm:$0xf]  ;;  %570 = vst [vmem:[%s9005_s30 + $0x308] sm:$0xf] %v569_v2 }
  0x97   : > { %572 = vst [vmem:[%s9005_s30 + $0x30c] sm:$0xf] %v571_v3  ;;  %574 = vst [vmem:[%s9005_s30 + $0x310] sm:$0xf] %v573_v4  ;;  %v575_v5 = vld [vmem:[%s9001_s29 + $0xc50] sm:$0xf] }
  0x98   : > { %v577_v6 = vld [vmem:[%s9001_s29 + $0xc60] sm:$0xf]  ;;  %v579_v7 = vld [vmem:[%s9001_s29 + $0xc70] sm:$0xf]  ;;  %576 = vst [vmem:[%s9005_s30 + $0x314] sm:$0xf] %v575_v5 }
  0x99   : > { %578 = vst [vmem:[%s9005_s30 + $0x318] sm:$0xf] %v577_v6  ;;  %580 = vst [vmem:[%s9005_s30 + $0x31c] sm:$0xf] %v579_v7  ;;  %v581_v8 = vld [vmem:[%s9001_s29 + $0xc80] sm:$0xf] }
  0x9a   : > { %v583_v9 = vld [vmem:[%s9001_s29 + $0xc90] sm:$0xf]  ;;  %v585_v10 = vld [vmem:[%s9001_s29 + $0xca0] sm:$0xf]  ;;  %582 = vst [vmem:[%s9005_s30 + $0x320] sm:$0xf] %v581_v8 }
  0x9b   : > { %584 = vst [vmem:[%s9005_s30 + $0x324] sm:$0xf] %v583_v9  ;;  %586 = vst [vmem:[%s9005_s30 + $0x328] sm:$0xf] %v585_v10  ;;  %v587_v11 = vld [vmem:[%s9001_s29 + $0xcb0] sm:$0xf] }
  0x9c   : > { %v589_v12 = vld [vmem:[%s9001_s29 + $0xcc0] sm:$0xf]  ;;  %v591_v13 = vld [vmem:[%s9001_s29 + $0xcd0] sm:$0xf]  ;;  %588 = vst [vmem:[%s9005_s30 + $0x32c] sm:$0xf] %v587_v11 }
  0x9d   : > { %590 = vst [vmem:[%s9005_s30 + $0x330] sm:$0xf] %v589_v12  ;;  %592 = vst [vmem:[%s9005_s30 + $0x334] sm:$0xf] %v591_v13  ;;  %v593_v14 = vld [vmem:[%s9001_s29 + $0xce0] sm:$0xf] }
  0x9e   : > { %v595_v15 = vld [vmem:[%s9001_s29 + $0xcf0] sm:$0xf]  ;;  %v597_v16 = vld [vmem:[%s9001_s29 + $0xd00] sm:$0xf]  ;;  %594 = vst [vmem:[%s9005_s30 + $0x338] sm:$0xf] %v593_v14 }
  0x9f   : > { %596 = vst [vmem:[%s9005_s30 + $0x33c] sm:$0xf] %v595_v15  ;;  %598 = vst [vmem:[%s9005_s30 + $0x340] sm:$0xf] %v597_v16  ;;  %v599_v17 = vld [vmem:[%s9001_s29 + $0xd10] sm:$0xf] }
  0xa0   : > { %v601_v18 = vld [vmem:[%s9001_s29 + $0xd20] sm:$0xf]  ;;  %v603_v19 = vld [vmem:[%s9001_s29 + $0xd30] sm:$0xf]  ;;  %600 = vst [vmem:[%s9005_s30 + $0x344] sm:$0xf] %v599_v17 }
  0xa1   : > { %602 = vst [vmem:[%s9005_s30 + $0x348] sm:$0xf] %v601_v18  ;;  %604 = vst [vmem:[%s9005_s30 + $0x34c] sm:$0xf] %v603_v19  ;;  %v605_v20 = vld [vmem:[%s9001_s29 + $0xd40] sm:$0xf] }
  0xa2   : > { %v607_v21 = vld [vmem:[%s9001_s29 + $0xd50] sm:$0xf]  ;;  %v609_v22 = vld [vmem:[%s9001_s29 + $0xd60] sm:$0xf]  ;;  %606 = vst [vmem:[%s9005_s30 + $0x350] sm:$0xf] %v605_v20 }
  0xa3   : > { %608 = vst [vmem:[%s9005_s30 + $0x354] sm:$0xf] %v607_v21  ;;  %610 = vst [vmem:[%s9005_s30 + $0x358] sm:$0xf] %v609_v22  ;;  %v611_v23 = vld [vmem:[%s9001_s29 + $0xd70] sm:$0xf] }
  0xa4   : > { %v613_v24 = vld [vmem:[%s9001_s29 + $0xd80] sm:$0xf]  ;;  %v615_v25 = vld [vmem:[%s9001_s29 + $0xd90] sm:$0xf]  ;;  %612 = vst [vmem:[%s9005_s30 + $0x35c] sm:$0xf] %v611_v23 }
  0xa5   : > { %614 = vst [vmem:[%s9005_s30 + $0x360] sm:$0xf] %v613_v24  ;;  %616 = vst [vmem:[%s9005_s30 + $0x364] sm:$0xf] %v615_v25  ;;  %v617_v26 = vld [vmem:[%s9001_s29 + $0xda0] sm:$0xf] }
  0xa6   : > { %v619_v27 = vld [vmem:[%s9001_s29 + $0xdb0] sm:$0xf]  ;;  %v621_v28 = vld [vmem:[%s9001_s29 + $0xdc0] sm:$0xf]  ;;  %618 = vst [vmem:[%s9005_s30 + $0x368] sm:$0xf] %v617_v26 }
  0xa7   : > { %620 = vst [vmem:[%s9005_s30 + $0x36c] sm:$0xf] %v619_v27  ;;  %622 = vst [vmem:[%s9005_s30 + $0x370] sm:$0xf] %v621_v28  ;;  %v623_v29 = vld [vmem:[%s9001_s29 + $0xdd0] sm:$0xf] }
  0xa8   : > { %v625_v30 = vld [vmem:[%s9001_s29 + $0xde0] sm:$0xf]  ;;  %v627_v31 = vld [vmem:[%s9001_s29 + $0xdf0] sm:$0xf]  ;;  %624 = vst [vmem:[%s9005_s30 + $0x374] sm:$0xf] %v623_v29 }
  0xa9   : > { %626 = vst [vmem:[%s9005_s30 + $0x378] sm:$0xf] %v625_v30  ;;  %628 = vst [vmem:[%s9005_s30 + $0x37c] sm:$0xf] %v627_v31  ;;  %v629_v32 = vld [vmem:[%s9001_s29 + $0xe00] sm:$0xf] }
  0xaa   : > { %v631_v33 = vld [vmem:[%s9001_s29 + $0xe10] sm:$0xf]  ;;  %v633_v34 = vld [vmem:[%s9001_s29 + $0xe20] sm:$0xf]  ;;  %630 = vst [vmem:[%s9005_s30 + $0x380] sm:$0xf] %v629_v32 }
  0xab   : > { %632 = vst [vmem:[%s9005_s30 + $0x384] sm:$0xf] %v631_v33  ;;  %634 = vst [vmem:[%s9005_s30 + $0x388] sm:$0xf] %v633_v34  ;;  %v635_v35 = vld [vmem:[%s9001_s29 + $0xe30] sm:$0xf] }
  0xac   : > { %v637_v36 = vld [vmem:[%s9001_s29 + $0xe40] sm:$0xf]  ;;  %v639_v37 = vld [vmem:[%s9001_s29 + $0xe50] sm:$0xf]  ;;  %636 = vst [vmem:[%s9005_s30 + $0x38c] sm:$0xf] %v635_v35 }
  0xad   : > { %638 = vst [vmem:[%s9005_s30 + $0x390] sm:$0xf] %v637_v36  ;;  %640 = vst [vmem:[%s9005_s30 + $0x394] sm:$0xf] %v639_v37  ;;  %v641_v38 = vld [vmem:[%s9001_s29 + $0xe60] sm:$0xf] }
  0xae   : > { %v643_v39 = vld [vmem:[%s9001_s29 + $0xe70] sm:$0xf]  ;;  %v645_v40 = vld [vmem:[%s9001_s29 + $0xe80] sm:$0xf]  ;;  %642 = vst [vmem:[%s9005_s30 + $0x398] sm:$0xf] %v641_v38 }
  0xaf   : > { %644 = vst [vmem:[%s9005_s30 + $0x39c] sm:$0xf] %v643_v39  ;;  %646 = vst [vmem:[%s9005_s30 + $0x3a0] sm:$0xf] %v645_v40  ;;  %v647_v41 = vld [vmem:[%s9001_s29 + $0xe90] sm:$0xf] }
  0xb0   : > { %v649_v42 = vld [vmem:[%s9001_s29 + $0xea0] sm:$0xf]  ;;  %v651_v43 = vld [vmem:[%s9001_s29 + $0xeb0] sm:$0xf]  ;;  %648 = vst [vmem:[%s9005_s30 + $0x3a4] sm:$0xf] %v647_v41 }
  0xb1   : > { %650 = vst [vmem:[%s9005_s30 + $0x3a8] sm:$0xf] %v649_v42  ;;  %652 = vst [vmem:[%s9005_s30 + $0x3ac] sm:$0xf] %v651_v43  ;;  %v653_v44 = vld [vmem:[%s9001_s29 + $0xec0] sm:$0xf] }
  0xb2   : > { %v655_v45 = vld [vmem:[%s9001_s29 + $0xed0] sm:$0xf]  ;;  %v657_v46 = vld [vmem:[%s9001_s29 + $0xee0] sm:$0xf]  ;;  %654 = vst [vmem:[%s9005_s30 + $0x3b0] sm:$0xf] %v653_v44 }
  0xb3   : > { %656 = vst [vmem:[%s9005_s30 + $0x3b4] sm:$0xf] %v655_v45  ;;  %658 = vst [vmem:[%s9005_s30 + $0x3b8] sm:$0xf] %v657_v46  ;;  %v659_v47 = vld [vmem:[%s9001_s29 + $0xef0] sm:$0xf] }
  0xb4   : > { %v661_v48 = vld [vmem:[%s9001_s29 + $0xf00] sm:$0xf]  ;;  %v663_v49 = vld [vmem:[%s9001_s29 + $0xf10] sm:$0xf]  ;;  %660 = vst [vmem:[%s9005_s30 + $0x3bc] sm:$0xf] %v659_v47 }
  0xb5   : > { %662 = vst [vmem:[%s9005_s30 + $0x3c0] sm:$0xf] %v661_v48  ;;  %664 = vst [vmem:[%s9005_s30 + $0x3c4] sm:$0xf] %v663_v49  ;;  %v665_v50 = vld [vmem:[%s9001_s29 + $0xf20] sm:$0xf] }
  0xb6   : > { %v667_v51 = vld [vmem:[%s9001_s29 + $0xf30] sm:$0xf]  ;;  %v669_v52 = vld [vmem:[%s9001_s29 + $0xf40] sm:$0xf]  ;;  %666 = vst [vmem:[%s9005_s30 + $0x3c8] sm:$0xf] %v665_v50 }
  0xb7   : > { %668 = vst [vmem:[%s9005_s30 + $0x3cc] sm:$0xf] %v667_v51  ;;  %670 = vst [vmem:[%s9005_s30 + $0x3d0] sm:$0xf] %v669_v52  ;;  %v671_v53 = vld [vmem:[%s9001_s29 + $0xf50] sm:$0xf] }
  0xb8   : > { %v673_v54 = vld [vmem:[%s9001_s29 + $0xf60] sm:$0xf]  ;;  %v675_v55 = vld [vmem:[%s9001_s29 + $0xf70] sm:$0xf]  ;;  %672 = vst [vmem:[%s9005_s30 + $0x3d4] sm:$0xf] %v671_v53 }
  0xb9   : > { %674 = vst [vmem:[%s9005_s30 + $0x3d8] sm:$0xf] %v673_v54  ;;  %676 = vst [vmem:[%s9005_s30 + $0x3dc] sm:$0xf] %v675_v55  ;;  %v677_v56 = vld [vmem:[%s9001_s29 + $0xf80] sm:$0xf] }
  0xba   : > { %v679_v57 = vld [vmem:[%s9001_s29 + $0xf90] sm:$0xf]  ;;  %v681_v58 = vld [vmem:[%s9001_s29 + $0xfa0] sm:$0xf]  ;;  %678 = vst [vmem:[%s9005_s30 + $0x3e0] sm:$0xf] %v677_v56 }
  0xbb   : > { %680 = vst [vmem:[%s9005_s30 + $0x3e4] sm:$0xf] %v679_v57  ;;  %682 = vst [vmem:[%s9005_s30 + $0x3e8] sm:$0xf] %v681_v58  ;;  %v683_v59 = vld [vmem:[%s9001_s29 + $0xfb0] sm:$0xf] }
  0xbc   : > { %v685_v60 = vld [vmem:[%s9001_s29 + $0xfc0] sm:$0xf]  ;;  %v687_v61 = vld [vmem:[%s9001_s29 + $0xfd0] sm:$0xf]  ;;  %684 = vst [vmem:[%s9005_s30 + $0x3ec] sm:$0xf] %v683_v59 }
  0xbd   : > { %686 = vst [vmem:[%s9005_s30 + $0x3f0] sm:$0xf] %v685_v60  ;;  %688 = vst [vmem:[%s9005_s30 + $0x3f4] sm:$0xf] %v687_v61  ;;  %v689_v62 = vld [vmem:[%s9001_s29 + $0xfe0] sm:$0xf] }
  0xbe   : > { %v691_v63 = vld [vmem:[%s9001_s29 + $0xff0] sm:$0xf]  ;;  %v693_v0 = vld [vmem:[%s9001_s29 + $0x1000] sm:$0xf]  ;;  %690 = vst [vmem:[%s9005_s30 + $0x3f8] sm:$0xf] %v689_v62 }
  0xbf   : > { %692 = vst [vmem:[%s9005_s30 + $0x3fc] sm:$0xf] %v691_v63  ;;  %694 = vst [vmem:[%s9005_s30 + $0x400] sm:$0xf] %v693_v0  ;;  %v695_v1 = vld [vmem:[%s9001_s29 + $0x1010] sm:$0xf] }
  0xc0   : > { %v697_v2 = vld [vmem:[%s9001_s29 + $0x1020] sm:$0xf]  ;;  %v699_v3 = vld [vmem:[%s9001_s29 + $0x1030] sm:$0xf]  ;;  %696 = vst [vmem:[%s9005_s30 + $0x404] sm:$0xf] %v695_v1 }
  0xc1   : > { %698 = vst [vmem:[%s9005_s30 + $0x408] sm:$0xf] %v697_v2  ;;  %700 = vst [vmem:[%s9005_s30 + $0x40c] sm:$0xf] %v699_v3  ;;  %v701_v4 = vld [vmem:[%s9001_s29 + $0x1040] sm:$0xf] }
  0xc2   : > { %v703_v5 = vld [vmem:[%s9001_s29 + $0x1050] sm:$0xf]  ;;  %v705_v6 = vld [vmem:[%s9001_s29 + $0x1060] sm:$0xf]  ;;  %702 = vst [vmem:[%s9005_s30 + $0x410] sm:$0xf] %v701_v4 }
  0xc3   : > { %704 = vst [vmem:[%s9005_s30 + $0x414] sm:$0xf] %v703_v5  ;;  %706 = vst [vmem:[%s9005_s30 + $0x418] sm:$0xf] %v705_v6  ;;  %v707_v7 = vld [vmem:[%s9001_s29 + $0x1070] sm:$0xf] }
  0xc4   : > { %v709_v8 = vld [vmem:[%s9001_s29 + $0x1080] sm:$0xf]  ;;  %v711_v9 = vld [vmem:[%s9001_s29 + $0x1090] sm:$0xf]  ;;  %708 = vst [vmem:[%s9005_s30 + $0x41c] sm:$0xf] %v707_v7 }
  0xc5   : > { %710 = vst [vmem:[%s9005_s30 + $0x420] sm:$0xf] %v709_v8  ;;  %712 = vst [vmem:[%s9005_s30 + $0x424] sm:$0xf] %v711_v9  ;;  %v713_v10 = vld [vmem:[%s9001_s29 + $0x10a0] sm:$0xf] }
  0xc6   : > { %v715_v11 = vld [vmem:[%s9001_s29 + $0x10b0] sm:$0xf]  ;;  %v717_v12 = vld [vmem:[%s9001_s29 + $0x10c0] sm:$0xf]  ;;  %714 = vst [vmem:[%s9005_s30 + $0x428] sm:$0xf] %v713_v10 }
  0xc7   : > { %716 = vst [vmem:[%s9005_s30 + $0x42c] sm:$0xf] %v715_v11  ;;  %718 = vst [vmem:[%s9005_s30 + $0x430] sm:$0xf] %v717_v12  ;;  %v719_v13 = vld [vmem:[%s9001_s29 + $0x10d0] sm:$0xf] }
  0xc8   : > { %v721_v14 = vld [vmem:[%s9001_s29 + $0x10e0] sm:$0xf]  ;;  %v723_v15 = vld [vmem:[%s9001_s29 + $0x10f0] sm:$0xf]  ;;  %720 = vst [vmem:[%s9005_s30 + $0x434] sm:$0xf] %v719_v13 }
  0xc9   : > { %722 = vst [vmem:[%s9005_s30 + $0x438] sm:$0xf] %v721_v14  ;;  %724 = vst [vmem:[%s9005_s30 + $0x43c] sm:$0xf] %v723_v15  ;;  %v725_v16 = vld [vmem:[%s9001_s29 + $0x1100] sm:$0xf] }
  0xca   : > { %v727_v17 = vld [vmem:[%s9001_s29 + $0x1110] sm:$0xf]  ;;  %v729_v18 = vld [vmem:[%s9001_s29 + $0x1120] sm:$0xf]  ;;  %726 = vst [vmem:[%s9005_s30 + $0x440] sm:$0xf] %v725_v16 }
  0xcb   : > { %728 = vst [vmem:[%s9005_s30 + $0x444] sm:$0xf] %v727_v17  ;;  %730 = vst [vmem:[%s9005_s30 + $0x448] sm:$0xf] %v729_v18  ;;  %v731_v19 = vld [vmem:[%s9001_s29 + $0x1130] sm:$0xf] }
  0xcc   : > { %v733_v20 = vld [vmem:[%s9001_s29 + $0x1140] sm:$0xf]  ;;  %v735_v21 = vld [vmem:[%s9001_s29 + $0x1150] sm:$0xf]  ;;  %732 = vst [vmem:[%s9005_s30 + $0x44c] sm:$0xf] %v731_v19 }
  0xcd   : > { %734 = vst [vmem:[%s9005_s30 + $0x450] sm:$0xf] %v733_v20  ;;  %736 = vst [vmem:[%s9005_s30 + $0x454] sm:$0xf] %v735_v21  ;;  %v737_v22 = vld [vmem:[%s9001_s29 + $0x1160] sm:$0xf] }
  0xce   : > { %v739_v23 = vld [vmem:[%s9001_s29 + $0x1170] sm:$0xf]  ;;  %v741_v24 = vld [vmem:[%s9001_s29 + $0x1180] sm:$0xf]  ;;  %738 = vst [vmem:[%s9005_s30 + $0x458] sm:$0xf] %v737_v22 }
  0xcf   : > { %740 = vst [vmem:[%s9005_s30 + $0x45c] sm:$0xf] %v739_v23  ;;  %742 = vst [vmem:[%s9005_s30 + $0x460] sm:$0xf] %v741_v24  ;;  %v743_v25 = vld [vmem:[%s9001_s29 + $0x1190] sm:$0xf] }
  0xd0   : > { %v745_v26 = vld [vmem:[%s9001_s29 + $0x11a0] sm:$0xf]  ;;  %v747_v27 = vld [vmem:[%s9001_s29 + $0x11b0] sm:$0xf]  ;;  %744 = vst [vmem:[%s9005_s30 + $0x464] sm:$0xf] %v743_v25 }
  0xd1   : > { %746 = vst [vmem:[%s9005_s30 + $0x468] sm:$0xf] %v745_v26  ;;  %748 = vst [vmem:[%s9005_s30 + $0x46c] sm:$0xf] %v747_v27  ;;  %v749_v28 = vld [vmem:[%s9001_s29 + $0x11c0] sm:$0xf] }
  0xd2   : > { %v751_v29 = vld [vmem:[%s9001_s29 + $0x11d0] sm:$0xf]  ;;  %v753_v30 = vld [vmem:[%s9001_s29 + $0x11e0] sm:$0xf]  ;;  %750 = vst [vmem:[%s9005_s30 + $0x470] sm:$0xf] %v749_v28 }
  0xd3   : > { %752 = vst [vmem:[%s9005_s30 + $0x474] sm:$0xf] %v751_v29  ;;  %754 = vst [vmem:[%s9005_s30 + $0x478] sm:$0xf] %v753_v30  ;;  %v755_v31 = vld [vmem:[%s9001_s29 + $0x11f0] sm:$0xf] }
  0xd4   : > { %v757_v32 = vld [vmem:[%s9001_s29 + $0x1200] sm:$0xf]  ;;  %v759_v33 = vld [vmem:[%s9001_s29 + $0x1210] sm:$0xf]  ;;  %756 = vst [vmem:[%s9005_s30 + $0x47c] sm:$0xf] %v755_v31 }
  0xd5   : > { %758 = vst [vmem:[%s9005_s30 + $0x480] sm:$0xf] %v757_v32  ;;  %760 = vst [vmem:[%s9005_s30 + $0x484] sm:$0xf] %v759_v33  ;;  %v761_v34 = vld [vmem:[%s9001_s29 + $0x1220] sm:$0xf] }
  0xd6   : > { %v763_v35 = vld [vmem:[%s9001_s29 + $0x1230] sm:$0xf]  ;;  %v765_v36 = vld [vmem:[%s9001_s29 + $0x1240] sm:$0xf]  ;;  %762 = vst [vmem:[%s9005_s30 + $0x488] sm:$0xf] %v761_v34 }
  0xd7   : > { %764 = vst [vmem:[%s9005_s30 + $0x48c] sm:$0xf] %v763_v35  ;;  %766 = vst [vmem:[%s9005_s30 + $0x490] sm:$0xf] %v765_v36  ;;  %v767_v37 = vld [vmem:[%s9001_s29 + $0x1250] sm:$0xf] }
  0xd8   : > { %v769_v38 = vld [vmem:[%s9001_s29 + $0x1260] sm:$0xf]  ;;  %v771_v39 = vld [vmem:[%s9001_s29 + $0x1270] sm:$0xf]  ;;  %768 = vst [vmem:[%s9005_s30 + $0x494] sm:$0xf] %v767_v37 }
  0xd9   : > { %770 = vst [vmem:[%s9005_s30 + $0x498] sm:$0xf] %v769_v38  ;;  %772 = vst [vmem:[%s9005_s30 + $0x49c] sm:$0xf] %v771_v39  ;;  %v773_v40 = vld [vmem:[%s9001_s29 + $0x1280] sm:$0xf] }
  0xda   : > { %v775_v41 = vld [vmem:[%s9001_s29 + $0x1290] sm:$0xf]  ;;  %v777_v42 = vld [vmem:[%s9001_s29 + $0x12a0] sm:$0xf]  ;;  %774 = vst [vmem:[%s9005_s30 + $0x4a0] sm:$0xf] %v773_v40 }
  0xdb   : > { %776 = vst [vmem:[%s9005_s30 + $0x4a4] sm:$0xf] %v775_v41  ;;  %778 = vst [vmem:[%s9005_s30 + $0x4a8] sm:$0xf] %v777_v42  ;;  %v779_v43 = vld [vmem:[%s9001_s29 + $0x12b0] sm:$0xf] }
  0xdc   : > { %v781_v44 = vld [vmem:[%s9001_s29 + $0x12c0] sm:$0xf]  ;;  %v783_v45 = vld [vmem:[%s9001_s29 + $0x12d0] sm:$0xf]  ;;  %780 = vst [vmem:[%s9005_s30 + $0x4ac] sm:$0xf] %v779_v43 }
  0xdd   : > { %782 = vst [vmem:[%s9005_s30 + $0x4b0] sm:$0xf] %v781_v44  ;;  %784 = vst [vmem:[%s9005_s30 + $0x4b4] sm:$0xf] %v783_v45  ;;  %v785_v46 = vld [vmem:[%s9001_s29 + $0x12e0] sm:$0xf] }
  0xde   : > { %v787_v47 = vld [vmem:[%s9001_s29 + $0x12f0] sm:$0xf]  ;;  %v789_v48 = vld [vmem:[%s9001_s29 + $0x1300] sm:$0xf]  ;;  %786 = vst [vmem:[%s9005_s30 + $0x4b8] sm:$0xf] %v785_v46 }
  0xdf   : > { %788 = vst [vmem:[%s9005_s30 + $0x4bc] sm:$0xf] %v787_v47  ;;  %790 = vst [vmem:[%s9005_s30 + $0x4c0] sm:$0xf] %v789_v48  ;;  %v791_v49 = vld [vmem:[%s9001_s29 + $0x1310] sm:$0xf] }
  0xe0   : > { %v793_v50 = vld [vmem:[%s9001_s29 + $0x1320] sm:$0xf]  ;;  %v795_v51 = vld [vmem:[%s9001_s29 + $0x1330] sm:$0xf]  ;;  %792 = vst [vmem:[%s9005_s30 + $0x4c4] sm:$0xf] %v791_v49 }
  0xe1   : > { %794 = vst [vmem:[%s9005_s30 + $0x4c8] sm:$0xf] %v793_v50  ;;  %796 = vst [vmem:[%s9005_s30 + $0x4cc] sm:$0xf] %v795_v51  ;;  %v797_v52 = vld [vmem:[%s9001_s29 + $0x1340] sm:$0xf] }
  0xe2   : > { %v799_v53 = vld [vmem:[%s9001_s29 + $0x1350] sm:$0xf]  ;;  %v801_v54 = vld [vmem:[%s9001_s29 + $0x1360] sm:$0xf]  ;;  %798 = vst [vmem:[%s9005_s30 + $0x4d0] sm:$0xf] %v797_v52 }
  0xe3   : > { %800 = vst [vmem:[%s9005_s30 + $0x4d4] sm:$0xf] %v799_v53  ;;  %802 = vst [vmem:[%s9005_s30 + $0x4d8] sm:$0xf] %v801_v54  ;;  %v803_v55 = vld [vmem:[%s9001_s29 + $0x1370] sm:$0xf] }
  0xe4   : > { %v805_v56 = vld [vmem:[%s9001_s29 + $0x1380] sm:$0xf]  ;;  %v807_v57 = vld [vmem:[%s9001_s29 + $0x1390] sm:$0xf]  ;;  %804 = vst [vmem:[%s9005_s30 + $0x4dc] sm:$0xf] %v803_v55 }
  0xe5   : > { %806 = vst [vmem:[%s9005_s30 + $0x4e0] sm:$0xf] %v805_v56  ;;  %808 = vst [vmem:[%s9005_s30 + $0x4e4] sm:$0xf] %v807_v57  ;;  %v809_v58 = vld [vmem:[%s9001_s29 + $0x13a0] sm:$0xf] }
  0xe6   : > { %v811_v59 = vld [vmem:[%s9001_s29 + $0x13b0] sm:$0xf]  ;;  %v813_v60 = vld [vmem:[%s9001_s29 + $0x13c0] sm:$0xf]  ;;  %810 = vst [vmem:[%s9005_s30 + $0x4e8] sm:$0xf] %v809_v58 }
  0xe7   : > { %812 = vst [vmem:[%s9005_s30 + $0x4ec] sm:$0xf] %v811_v59  ;;  %814 = vst [vmem:[%s9005_s30 + $0x4f0] sm:$0xf] %v813_v60  ;;  %v815_v61 = vld [vmem:[%s9001_s29 + $0x13d0] sm:$0xf] }
  0xe8   : > { %v817_v62 = vld [vmem:[%s9001_s29 + $0x13e0] sm:$0xf]  ;;  %v819_v63 = vld [vmem:[%s9001_s29 + $0x13f0] sm:$0xf]  ;;  %816 = vst [vmem:[%s9005_s30 + $0x4f4] sm:$0xf] %v815_v61 }
  0xe9   : > { %818 = vst [vmem:[%s9005_s30 + $0x4f8] sm:$0xf] %v817_v62  ;;  %820 = vst [vmem:[%s9005_s30 + $0x4fc] sm:$0xf] %v819_v63  ;;  %v821_v0 = vld [vmem:[%s9001_s29 + $0x1400] sm:$0xf] }
  0xea   : > { %v823_v1 = vld [vmem:[%s9001_s29 + $0x1410] sm:$0xf]  ;;  %v825_v2 = vld [vmem:[%s9001_s29 + $0x1420] sm:$0xf]  ;;  %822 = vst [vmem:[%s9005_s30 + $0x500] sm:$0xf] %v821_v0 }
  0xeb   : > { %824 = vst [vmem:[%s9005_s30 + $0x504] sm:$0xf] %v823_v1  ;;  %826 = vst [vmem:[%s9005_s30 + $0x508] sm:$0xf] %v825_v2  ;;  %v827_v3 = vld [vmem:[%s9001_s29 + $0x1430] sm:$0xf] }
  0xec   : > { %v829_v4 = vld [vmem:[%s9001_s29 + $0x1440] sm:$0xf]  ;;  %v831_v5 = vld [vmem:[%s9001_s29 + $0x1450] sm:$0xf]  ;;  %828 = vst [vmem:[%s9005_s30 + $0x50c] sm:$0xf] %v827_v3 }
  0xed   : > { %830 = vst [vmem:[%s9005_s30 + $0x510] sm:$0xf] %v829_v4  ;;  %832 = vst [vmem:[%s9005_s30 + $0x514] sm:$0xf] %v831_v5  ;;  %v833_v6 = vld [vmem:[%s9001_s29 + $0x1460] sm:$0xf] }
  0xee   : > { %v835_v7 = vld [vmem:[%s9001_s29 + $0x1470] sm:$0xf]  ;;  %v837_v8 = vld [vmem:[%s9001_s29 + $0x1480] sm:$0xf]  ;;  %834 = vst [vmem:[%s9005_s30 + $0x518] sm:$0xf] %v833_v6 }
  0xef   : > { %836 = vst [vmem:[%s9005_s30 + $0x51c] sm:$0xf] %v835_v7  ;;  %838 = vst [vmem:[%s9005_s30 + $0x520] sm:$0xf] %v837_v8  ;;  %v839_v9 = vld [vmem:[%s9001_s29 + $0x1490] sm:$0xf] }
  0xf0   : > { %v841_v10 = vld [vmem:[%s9001_s29 + $0x14a0] sm:$0xf]  ;;  %v843_v11 = vld [vmem:[%s9001_s29 + $0x14b0] sm:$0xf]  ;;  %840 = vst [vmem:[%s9005_s30 + $0x524] sm:$0xf] %v839_v9 }
  0xf1   : > { %842 = vst [vmem:[%s9005_s30 + $0x528] sm:$0xf] %v841_v10  ;;  %844 = vst [vmem:[%s9005_s30 + $0x52c] sm:$0xf] %v843_v11  ;;  %v845_v12 = vld [vmem:[%s9001_s29 + $0x14c0] sm:$0xf] }
  0xf2   : > { %v847_v13 = vld [vmem:[%s9001_s29 + $0x14d0] sm:$0xf]  ;;  %v849_v14 = vld [vmem:[%s9001_s29 + $0x14e0] sm:$0xf]  ;;  %846 = vst [vmem:[%s9005_s30 + $0x530] sm:$0xf] %v845_v12 }
  0xf3   : > { %848 = vst [vmem:[%s9005_s30 + $0x534] sm:$0xf] %v847_v13  ;;  %850 = vst [vmem:[%s9005_s30 + $0x538] sm:$0xf] %v849_v14  ;;  %v851_v15 = vld [vmem:[%s9001_s29 + $0x14f0] sm:$0xf] }
  0xf4   : > { %v853_v16 = vld [vmem:[%s9001_s29 + $0x1500] sm:$0xf]  ;;  %v855_v17 = vld [vmem:[%s9001_s29 + $0x1510] sm:$0xf]  ;;  %852 = vst [vmem:[%s9005_s30 + $0x53c] sm:$0xf] %v851_v15 }
  0xf5   : > { %854 = vst [vmem:[%s9005_s30 + $0x540] sm:$0xf] %v853_v16  ;;  %856 = vst [vmem:[%s9005_s30 + $0x544] sm:$0xf] %v855_v17  ;;  %v857_v18 = vld [vmem:[%s9001_s29 + $0x1520] sm:$0xf] }
  0xf6   : > { %v859_v19 = vld [vmem:[%s9001_s29 + $0x1530] sm:$0xf]  ;;  %v861_v20 = vld [vmem:[%s9001_s29 + $0x1540] sm:$0xf]  ;;  %858 = vst [vmem:[%s9005_s30 + $0x548] sm:$0xf] %v857_v18 }
  0xf7   : > { %860 = vst [vmem:[%s9005_s30 + $0x54c] sm:$0xf] %v859_v19  ;;  %862 = vst [vmem:[%s9005_s30 + $0x550] sm:$0xf] %v861_v20  ;;  %v863_v21 = vld [vmem:[%s9001_s29 + $0x1550] sm:$0xf] }
  0xf8   : > { %v865_v22 = vld [vmem:[%s9001_s29 + $0x1560] sm:$0xf]  ;;  %v867_v23 = vld [vmem:[%s9001_s29 + $0x1570] sm:$0xf]  ;;  %864 = vst [vmem:[%s9005_s30 + $0x554] sm:$0xf] %v863_v21 }
  0xf9   : > { %866 = vst [vmem:[%s9005_s30 + $0x558] sm:$0xf] %v865_v22  ;;  %868 = vst [vmem:[%s9005_s30 + $0x55c] sm:$0xf] %v867_v23  ;;  %v869_v24 = vld [vmem:[%s9001_s29 + $0x1580] sm:$0xf] }
  0xfa   : > { %v871_v25 = vld [vmem:[%s9001_s29 + $0x1590] sm:$0xf]  ;;  %v873_v26 = vld [vmem:[%s9001_s29 + $0x15a0] sm:$0xf]  ;;  %870 = vst [vmem:[%s9005_s30 + $0x560] sm:$0xf] %v869_v24 }
  0xfb   : > { %872 = vst [vmem:[%s9005_s30 + $0x564] sm:$0xf] %v871_v25  ;;  %874 = vst [vmem:[%s9005_s30 + $0x568] sm:$0xf] %v873_v26  ;;  %v875_v27 = vld [vmem:[%s9001_s29 + $0x15b0] sm:$0xf] }
  0xfc   : > { %v877_v28 = vld [vmem:[%s9001_s29 + $0x15c0] sm:$0xf]  ;;  %v879_v29 = vld [vmem:[%s9001_s29 + $0x15d0] sm:$0xf]  ;;  %876 = vst [vmem:[%s9005_s30 + $0x56c] sm:$0xf] %v875_v27 }
  0xfd   : > { %878 = vst [vmem:[%s9005_s30 + $0x570] sm:$0xf] %v877_v28  ;;  %880 = vst [vmem:[%s9005_s30 + $0x574] sm:$0xf] %v879_v29  ;;  %v881_v30 = vld [vmem:[%s9001_s29 + $0x15e0] sm:$0xf] }
  0xfe   : > { %v883_v31 = vld [vmem:[%s9001_s29 + $0x15f0] sm:$0xf]  ;;  %v885_v32 = vld [vmem:[%s9001_s29 + $0x1600] sm:$0xf]  ;;  %882 = vst [vmem:[%s9005_s30 + $0x578] sm:$0xf] %v881_v30 }
  0xff   : > { %884 = vst [vmem:[%s9005_s30 + $0x57c] sm:$0xf] %v883_v31  ;;  %886 = vst [vmem:[%s9005_s30 + $0x580] sm:$0xf] %v885_v32  ;;  %v887_v33 = vld [vmem:[%s9001_s29 + $0x1610] sm:$0xf] }
 0x100   : > { %v889_v34 = vld [vmem:[%s9001_s29 + $0x1620] sm:$0xf]  ;;  %v891_v35 = vld [vmem:[%s9001_s29 + $0x1630] sm:$0xf]  ;;  %888 = vst [vmem:[%s9005_s30 + $0x584] sm:$0xf] %v887_v33 }
 0x101   : > { %890 = vst [vmem:[%s9005_s30 + $0x588] sm:$0xf] %v889_v34  ;;  %892 = vst [vmem:[%s9005_s30 + $0x58c] sm:$0xf] %v891_v35  ;;  %v893_v36 = vld [vmem:[%s9001_s29 + $0x1640] sm:$0xf] }
 0x102   : > { %v895_v37 = vld [vmem:[%s9001_s29 + $0x1650] sm:$0xf]  ;;  %v897_v38 = vld [vmem:[%s9001_s29 + $0x1660] sm:$0xf]  ;;  %894 = vst [vmem:[%s9005_s30 + $0x590] sm:$0xf] %v893_v36 }
 0x103   : > { %896 = vst [vmem:[%s9005_s30 + $0x594] sm:$0xf] %v895_v37  ;;  %898 = vst [vmem:[%s9005_s30 + $0x598] sm:$0xf] %v897_v38  ;;  %v899_v39 = vld [vmem:[%s9001_s29 + $0x1670] sm:$0xf] }
 0x104   : > { %v901_v40 = vld [vmem:[%s9001_s29 + $0x1680] sm:$0xf]  ;;  %v903_v41 = vld [vmem:[%s9001_s29 + $0x1690] sm:$0xf]  ;;  %900 = vst [vmem:[%s9005_s30 + $0x59c] sm:$0xf] %v899_v39 }
 0x105   : > { %902 = vst [vmem:[%s9005_s30 + $0x5a0] sm:$0xf] %v901_v40  ;;  %904 = vst [vmem:[%s9005_s30 + $0x5a4] sm:$0xf] %v903_v41  ;;  %v905_v42 = vld [vmem:[%s9001_s29 + $0x16a0] sm:$0xf] }
 0x106   : > { %v907_v43 = vld [vmem:[%s9001_s29 + $0x16b0] sm:$0xf]  ;;  %v909_v44 = vld [vmem:[%s9001_s29 + $0x16c0] sm:$0xf]  ;;  %906 = vst [vmem:[%s9005_s30 + $0x5a8] sm:$0xf] %v905_v42 }
 0x107   : > { %908 = vst [vmem:[%s9005_s30 + $0x5ac] sm:$0xf] %v907_v43  ;;  %910 = vst [vmem:[%s9005_s30 + $0x5b0] sm:$0xf] %v909_v44  ;;  %v911_v45 = vld [vmem:[%s9001_s29 + $0x16d0] sm:$0xf] }
 0x108   : > { %v913_v46 = vld [vmem:[%s9001_s29 + $0x16e0] sm:$0xf]  ;;  %v915_v47 = vld [vmem:[%s9001_s29 + $0x16f0] sm:$0xf]  ;;  %912 = vst [vmem:[%s9005_s30 + $0x5b4] sm:$0xf] %v911_v45 }
 0x109   : > { %914 = vst [vmem:[%s9005_s30 + $0x5b8] sm:$0xf] %v913_v46  ;;  %916 = vst [vmem:[%s9005_s30 + $0x5bc] sm:$0xf] %v915_v47  ;;  %v917_v48 = vld [vmem:[%s9001_s29 + $0x1700] sm:$0xf] }
 0x10a   : > { %v919_v49 = vld [vmem:[%s9001_s29 + $0x1710] sm:$0xf]  ;;  %v921_v50 = vld [vmem:[%s9001_s29 + $0x1720] sm:$0xf]  ;;  %918 = vst [vmem:[%s9005_s30 + $0x5c0] sm:$0xf] %v917_v48 }
 0x10b   : > { %920 = vst [vmem:[%s9005_s30 + $0x5c4] sm:$0xf] %v919_v49  ;;  %922 = vst [vmem:[%s9005_s30 + $0x5c8] sm:$0xf] %v921_v50  ;;  %v923_v51 = vld [vmem:[%s9001_s29 + $0x1730] sm:$0xf] }
 0x10c   : > { %v925_v52 = vld [vmem:[%s9001_s29 + $0x1740] sm:$0xf]  ;;  %v927_v53 = vld [vmem:[%s9001_s29 + $0x1750] sm:$0xf]  ;;  %924 = vst [vmem:[%s9005_s30 + $0x5cc] sm:$0xf] %v923_v51 }
 0x10d   : > { %926 = vst [vmem:[%s9005_s30 + $0x5d0] sm:$0xf] %v925_v52  ;;  %928 = vst [vmem:[%s9005_s30 + $0x5d4] sm:$0xf] %v927_v53  ;;  %v929_v54 = vld [vmem:[%s9001_s29 + $0x1760] sm:$0xf] }
 0x10e   : > { %v931_v55 = vld [vmem:[%s9001_s29 + $0x1770] sm:$0xf]  ;;  %v933_v56 = vld [vmem:[%s9001_s29 + $0x1780] sm:$0xf]  ;;  %930 = vst [vmem:[%s9005_s30 + $0x5d8] sm:$0xf] %v929_v54 }
 0x10f   : > { %932 = vst [vmem:[%s9005_s30 + $0x5dc] sm:$0xf] %v931_v55  ;;  %934 = vst [vmem:[%s9005_s30 + $0x5e0] sm:$0xf] %v933_v56  ;;  %v935_v57 = vld [vmem:[%s9001_s29 + $0x1790] sm:$0xf] }
 0x110   : > { %v937_v58 = vld [vmem:[%s9001_s29 + $0x17a0] sm:$0xf]  ;;  %v939_v59 = vld [vmem:[%s9001_s29 + $0x17b0] sm:$0xf]  ;;  %936 = vst [vmem:[%s9005_s30 + $0x5e4] sm:$0xf] %v935_v57 }
 0x111   : > { %938 = vst [vmem:[%s9005_s30 + $0x5e8] sm:$0xf] %v937_v58  ;;  %940 = vst [vmem:[%s9005_s30 + $0x5ec] sm:$0xf] %v939_v59  ;;  %v941_v60 = vld [vmem:[%s9001_s29 + $0x17c0] sm:$0xf] }
 0x112   : > { %v943_v61 = vld [vmem:[%s9001_s29 + $0x17d0] sm:$0xf]  ;;  %v945_v62 = vld [vmem:[%s9001_s29 + $0x17e0] sm:$0xf]  ;;  %942 = vst [vmem:[%s9005_s30 + $0x5f0] sm:$0xf] %v941_v60 }
 0x113   : > { %944 = vst [vmem:[%s9005_s30 + $0x5f4] sm:$0xf] %v943_v61  ;;  %946 = vst [vmem:[%s9005_s30 + $0x5f8] sm:$0xf] %v945_v62  ;;  %v947_v63 = vld [vmem:[%s9001_s29 + $0x17f0] sm:$0xf] }
 0x114   : > { %v949_v0 = vld [vmem:[%s9001_s29 + $0x1800] sm:$0xf]  ;;  %v951_v1 = vld [vmem:[%s9001_s29 + $0x1810] sm:$0xf]  ;;  %948 = vst [vmem:[%s9005_s30 + $0x5fc] sm:$0xf] %v947_v63 }
 0x115   : > { %950 = vst [vmem:[%s9005_s30 + $0x600] sm:$0xf] %v949_v0  ;;  %952 = vst [vmem:[%s9005_s30 + $0x604] sm:$0xf] %v951_v1  ;;  %v953_v2 = vld [vmem:[%s9001_s29 + $0x1820] sm:$0xf] }
 0x116   : > { %v955_v3 = vld [vmem:[%s9001_s29 + $0x1830] sm:$0xf]  ;;  %v957_v4 = vld [vmem:[%s9001_s29 + $0x1840] sm:$0xf]  ;;  %954 = vst [vmem:[%s9005_s30 + $0x608] sm:$0xf] %v953_v2 }
 0x117   : > { %956 = vst [vmem:[%s9005_s30 + $0x60c] sm:$0xf] %v955_v3  ;;  %958 = vst [vmem:[%s9005_s30 + $0x610] sm:$0xf] %v957_v4  ;;  %v959_v5 = vld [vmem:[%s9001_s29 + $0x1850] sm:$0xf] }
 0x118   : > { %v961_v6 = vld [vmem:[%s9001_s29 + $0x1860] sm:$0xf]  ;;  %v963_v7 = vld [vmem:[%s9001_s29 + $0x1870] sm:$0xf]  ;;  %960 = vst [vmem:[%s9005_s30 + $0x614] sm:$0xf] %v959_v5 }
 0x119   : > { %962 = vst [vmem:[%s9005_s30 + $0x618] sm:$0xf] %v961_v6  ;;  %964 = vst [vmem:[%s9005_s30 + $0x61c] sm:$0xf] %v963_v7  ;;  %v965_v8 = vld [vmem:[%s9001_s29 + $0x1880] sm:$0xf] }
 0x11a   : > { %v967_v9 = vld [vmem:[%s9001_s29 + $0x1890] sm:$0xf]  ;;  %v969_v10 = vld [vmem:[%s9001_s29 + $0x18a0] sm:$0xf]  ;;  %966 = vst [vmem:[%s9005_s30 + $0x620] sm:$0xf] %v965_v8 }
 0x11b   : > { %968 = vst [vmem:[%s9005_s30 + $0x624] sm:$0xf] %v967_v9  ;;  %970 = vst [vmem:[%s9005_s30 + $0x628] sm:$0xf] %v969_v10  ;;  %v971_v11 = vld [vmem:[%s9001_s29 + $0x18b0] sm:$0xf] }
 0x11c   : > { %v973_v12 = vld [vmem:[%s9001_s29 + $0x18c0] sm:$0xf]  ;;  %v975_v13 = vld [vmem:[%s9001_s29 + $0x18d0] sm:$0xf]  ;;  %972 = vst [vmem:[%s9005_s30 + $0x62c] sm:$0xf] %v971_v11 }
 0x11d   : > { %974 = vst [vmem:[%s9005_s30 + $0x630] sm:$0xf] %v973_v12  ;;  %976 = vst [vmem:[%s9005_s30 + $0x634] sm:$0xf] %v975_v13  ;;  %v977_v14 = vld [vmem:[%s9001_s29 + $0x18e0] sm:$0xf] }
 0x11e   : > { %v979_v15 = vld [vmem:[%s9001_s29 + $0x18f0] sm:$0xf]  ;;  %v981_v16 = vld [vmem:[%s9001_s29 + $0x1900] sm:$0xf]  ;;  %978 = vst [vmem:[%s9005_s30 + $0x638] sm:$0xf] %v977_v14 }
 0x11f   : > { %980 = vst [vmem:[%s9005_s30 + $0x63c] sm:$0xf] %v979_v15  ;;  %982 = vst [vmem:[%s9005_s30 + $0x640] sm:$0xf] %v981_v16  ;;  %v983_v17 = vld [vmem:[%s9001_s29 + $0x1910] sm:$0xf] }
 0x120   : > { %v985_v18 = vld [vmem:[%s9001_s29 + $0x1920] sm:$0xf]  ;;  %v987_v19 = vld [vmem:[%s9001_s29 + $0x1930] sm:$0xf]  ;;  %984 = vst [vmem:[%s9005_s30 + $0x644] sm:$0xf] %v983_v17 }
 0x121   : > { %986 = vst [vmem:[%s9005_s30 + $0x648] sm:$0xf] %v985_v18  ;;  %988 = vst [vmem:[%s9005_s30 + $0x64c] sm:$0xf] %v987_v19  ;;  %v989_v20 = vld [vmem:[%s9001_s29 + $0x1940] sm:$0xf] }
 0x122   : > { %v991_v21 = vld [vmem:[%s9001_s29 + $0x1950] sm:$0xf]  ;;  %v993_v22 = vld [vmem:[%s9001_s29 + $0x1960] sm:$0xf]  ;;  %990 = vst [vmem:[%s9005_s30 + $0x650] sm:$0xf] %v989_v20 }
 0x123   : > { %992 = vst [vmem:[%s9005_s30 + $0x654] sm:$0xf] %v991_v21  ;;  %994 = vst [vmem:[%s9005_s30 + $0x658] sm:$0xf] %v993_v22  ;;  %v995_v23 = vld [vmem:[%s9001_s29 + $0x1970] sm:$0xf] }
 0x124   : > { %v997_v24 = vld [vmem:[%s9001_s29 + $0x1980] sm:$0xf]  ;;  %v999_v25 = vld [vmem:[%s9001_s29 + $0x1990] sm:$0xf]  ;;  %996 = vst [vmem:[%s9005_s30 + $0x65c] sm:$0xf] %v995_v23 }
 0x125   : > { %998 = vst [vmem:[%s9005_s30 + $0x660] sm:$0xf] %v997_v24  ;;  %1000 = vst [vmem:[%s9005_s30 + $0x664] sm:$0xf] %v999_v25  ;;  %v1001_v26 = vld [vmem:[%s9001_s29 + $0x19a0] sm:$0xf] }
 0x126   : > { %v1003_v27 = vld [vmem:[%s9001_s29 + $0x19b0] sm:$0xf]  ;;  %v1005_v28 = vld [vmem:[%s9001_s29 + $0x19c0] sm:$0xf]  ;;  %1002 = vst [vmem:[%s9005_s30 + $0x668] sm:$0xf] %v1001_v26 }
 0x127   : > { %1004 = vst [vmem:[%s9005_s30 + $0x66c] sm:$0xf] %v1003_v27  ;;  %1006 = vst [vmem:[%s9005_s30 + $0x670] sm:$0xf] %v1005_v28  ;;  %v1007_v29 = vld [vmem:[%s9001_s29 + $0x19d0] sm:$0xf] }
 0x128   : > { %v1009_v30 = vld [vmem:[%s9001_s29 + $0x19e0] sm:$0xf]  ;;  %v1011_v31 = vld [vmem:[%s9001_s29 + $0x19f0] sm:$0xf]  ;;  %1008 = vst [vmem:[%s9005_s30 + $0x674] sm:$0xf] %v1007_v29 }
 0x129   : > { %1010 = vst [vmem:[%s9005_s30 + $0x678] sm:$0xf] %v1009_v30  ;;  %1012 = vst [vmem:[%s9005_s30 + $0x67c] sm:$0xf] %v1011_v31  ;;  %v1013_v32 = vld [vmem:[%s9001_s29 + $0x1a00] sm:$0xf] }
 0x12a   : > { %v1015_v33 = vld [vmem:[%s9001_s29 + $0x1a10] sm:$0xf]  ;;  %v1017_v34 = vld [vmem:[%s9001_s29 + $0x1a20] sm:$0xf]  ;;  %1014 = vst [vmem:[%s9005_s30 + $0x680] sm:$0xf] %v1013_v32 }
 0x12b   : > { %1016 = vst [vmem:[%s9005_s30 + $0x684] sm:$0xf] %v1015_v33  ;;  %1018 = vst [vmem:[%s9005_s30 + $0x688] sm:$0xf] %v1017_v34  ;;  %v1019_v35 = vld [vmem:[%s9001_s29 + $0x1a30] sm:$0xf] }
 0x12c   : > { %v1021_v36 = vld [vmem:[%s9001_s29 + $0x1a40] sm:$0xf]  ;;  %v1023_v37 = vld [vmem:[%s9001_s29 + $0x1a50] sm:$0xf]  ;;  %1020 = vst [vmem:[%s9005_s30 + $0x68c] sm:$0xf] %v1019_v35 }
 0x12d   : > { %1022 = vst [vmem:[%s9005_s30 + $0x690] sm:$0xf] %v1021_v36  ;;  %1024 = vst [vmem:[%s9005_s30 + $0x694] sm:$0xf] %v1023_v37  ;;  %v1025_v38 = vld [vmem:[%s9001_s29 + $0x1a60] sm:$0xf] }
 0x12e   : > { %v1027_v39 = vld [vmem:[%s9001_s29 + $0x1a70] sm:$0xf]  ;;  %v1029_v40 = vld [vmem:[%s9001_s29 + $0x1a80] sm:$0xf]  ;;  %1026 = vst [vmem:[%s9005_s30 + $0x698] sm:$0xf] %v1025_v38 }
 0x12f   : > { %1028 = vst [vmem:[%s9005_s30 + $0x69c] sm:$0xf] %v1027_v39  ;;  %1030 = vst [vmem:[%s9005_s30 + $0x6a0] sm:$0xf] %v1029_v40  ;;  %v1031_v41 = vld [vmem:[%s9001_s29 + $0x1a90] sm:$0xf] }
 0x130   : > { %v1033_v42 = vld [vmem:[%s9001_s29 + $0x1aa0] sm:$0xf]  ;;  %v1035_v43 = vld [vmem:[%s9001_s29 + $0x1ab0] sm:$0xf]  ;;  %1032 = vst [vmem:[%s9005_s30 + $0x6a4] sm:$0xf] %v1031_v41 }
 0x131   : > { %1034 = vst [vmem:[%s9005_s30 + $0x6a8] sm:$0xf] %v1033_v42  ;;  %1036 = vst [vmem:[%s9005_s30 + $0x6ac] sm:$0xf] %v1035_v43  ;;  %v1037_v44 = vld [vmem:[%s9001_s29 + $0x1ac0] sm:$0xf] }
 0x132   : > { %v1039_v45 = vld [vmem:[%s9001_s29 + $0x1ad0] sm:$0xf]  ;;  %v1041_v46 = vld [vmem:[%s9001_s29 + $0x1ae0] sm:$0xf]  ;;  %1038 = vst [vmem:[%s9005_s30 + $0x6b0] sm:$0xf] %v1037_v44 }
 0x133   : > { %1040 = vst [vmem:[%s9005_s30 + $0x6b4] sm:$0xf] %v1039_v45  ;;  %1042 = vst [vmem:[%s9005_s30 + $0x6b8] sm:$0xf] %v1041_v46  ;;  %v1043_v47 = vld [vmem:[%s9001_s29 + $0x1af0] sm:$0xf] }
 0x134   : > { %v1045_v48 = vld [vmem:[%s9001_s29 + $0x1b00] sm:$0xf]  ;;  %v1047_v49 = vld [vmem:[%s9001_s29 + $0x1b10] sm:$0xf]  ;;  %1044 = vst [vmem:[%s9005_s30 + $0x6bc] sm:$0xf] %v1043_v47 }
 0x135   : > { %1046 = vst [vmem:[%s9005_s30 + $0x6c0] sm:$0xf] %v1045_v48  ;;  %1048 = vst [vmem:[%s9005_s30 + $0x6c4] sm:$0xf] %v1047_v49  ;;  %v1049_v50 = vld [vmem:[%s9001_s29 + $0x1b20] sm:$0xf] }
 0x136   : > { %v1051_v51 = vld [vmem:[%s9001_s29 + $0x1b30] sm:$0xf]  ;;  %v1053_v52 = vld [vmem:[%s9001_s29 + $0x1b40] sm:$0xf]  ;;  %1050 = vst [vmem:[%s9005_s30 + $0x6c8] sm:$0xf] %v1049_v50 }
 0x137   : > { %1052 = vst [vmem:[%s9005_s30 + $0x6cc] sm:$0xf] %v1051_v51  ;;  %1054 = vst [vmem:[%s9005_s30 + $0x6d0] sm:$0xf] %v1053_v52  ;;  %v1055_v53 = vld [vmem:[%s9001_s29 + $0x1b50] sm:$0xf] }
 0x138   : > { %v1057_v54 = vld [vmem:[%s9001_s29 + $0x1b60] sm:$0xf]  ;;  %v1059_v55 = vld [vmem:[%s9001_s29 + $0x1b70] sm:$0xf]  ;;  %1056 = vst [vmem:[%s9005_s30 + $0x6d4] sm:$0xf] %v1055_v53 }
 0x139   : > { %1058 = vst [vmem:[%s9005_s30 + $0x6d8] sm:$0xf] %v1057_v54  ;;  %1060 = vst [vmem:[%s9005_s30 + $0x6dc] sm:$0xf] %v1059_v55  ;;  %v1061_v56 = vld [vmem:[%s9001_s29 + $0x1b80] sm:$0xf] }
 0x13a   : > { %v1063_v57 = vld [vmem:[%s9001_s29 + $0x1b90] sm:$0xf]  ;;  %v1065_v58 = vld [vmem:[%s9001_s29 + $0x1ba0] sm:$0xf]  ;;  %1062 = vst [vmem:[%s9005_s30 + $0x6e0] sm:$0xf] %v1061_v56 }
 0x13b   : > { %1064 = vst [vmem:[%s9005_s30 + $0x6e4] sm:$0xf] %v1063_v57  ;;  %1066 = vst [vmem:[%s9005_s30 + $0x6e8] sm:$0xf] %v1065_v58  ;;  %v1067_v59 = vld [vmem:[%s9001_s29 + $0x1bb0] sm:$0xf] }
 0x13c   : > { %v1069_v60 = vld [vmem:[%s9001_s29 + $0x1bc0] sm:$0xf]  ;;  %v1071_v61 = vld [vmem:[%s9001_s29 + $0x1bd0] sm:$0xf]  ;;  %1068 = vst [vmem:[%s9005_s30 + $0x6ec] sm:$0xf] %v1067_v59 }
 0x13d   : > { %1070 = vst [vmem:[%s9005_s30 + $0x6f0] sm:$0xf] %v1069_v60  ;;  %1072 = vst [vmem:[%s9005_s30 + $0x6f4] sm:$0xf] %v1071_v61  ;;  %v1073_v62 = vld [vmem:[%s9001_s29 + $0x1be0] sm:$0xf] }
 0x13e   : > { %v1075_v63 = vld [vmem:[%s9001_s29 + $0x1bf0] sm:$0xf]  ;;  %v1077_v0 = vld [vmem:[%s9001_s29 + $0x1c00] sm:$0xf]  ;;  %1074 = vst [vmem:[%s9005_s30 + $0x6f8] sm:$0xf] %v1073_v62 }
 0x13f   : > { %1076 = vst [vmem:[%s9005_s30 + $0x6fc] sm:$0xf] %v1075_v63  ;;  %1078 = vst [vmem:[%s9005_s30 + $0x700] sm:$0xf] %v1077_v0  ;;  %v1079_v1 = vld [vmem:[%s9001_s29 + $0x1c10] sm:$0xf] }
 0x140   : > { %v1081_v2 = vld [vmem:[%s9001_s29 + $0x1c20] sm:$0xf]  ;;  %v1083_v3 = vld [vmem:[%s9001_s29 + $0x1c30] sm:$0xf]  ;;  %1080 = vst [vmem:[%s9005_s30 + $0x704] sm:$0xf] %v1079_v1 }
 0x141   : > { %1082 = vst [vmem:[%s9005_s30 + $0x708] sm:$0xf] %v1081_v2  ;;  %1084 = vst [vmem:[%s9005_s30 + $0x70c] sm:$0xf] %v1083_v3  ;;  %v1085_v4 = vld [vmem:[%s9001_s29 + $0x1c40] sm:$0xf] }
 0x142   : > { %v1087_v5 = vld [vmem:[%s9001_s29 + $0x1c50] sm:$0xf]  ;;  %v1089_v6 = vld [vmem:[%s9001_s29 + $0x1c60] sm:$0xf]  ;;  %1086 = vst [vmem:[%s9005_s30 + $0x710] sm:$0xf] %v1085_v4 }
 0x143   : > { %1088 = vst [vmem:[%s9005_s30 + $0x714] sm:$0xf] %v1087_v5  ;;  %1090 = vst [vmem:[%s9005_s30 + $0x718] sm:$0xf] %v1089_v6  ;;  %v1091_v7 = vld [vmem:[%s9001_s29 + $0x1c70] sm:$0xf] }
 0x144   : > { %v1093_v8 = vld [vmem:[%s9001_s29 + $0x1c80] sm:$0xf]  ;;  %v1095_v9 = vld [vmem:[%s9001_s29 + $0x1c90] sm:$0xf]  ;;  %1092 = vst [vmem:[%s9005_s30 + $0x71c] sm:$0xf] %v1091_v7 }
 0x145   : > { %1094 = vst [vmem:[%s9005_s30 + $0x720] sm:$0xf] %v1093_v8  ;;  %1096 = vst [vmem:[%s9005_s30 + $0x724] sm:$0xf] %v1095_v9  ;;  %v1097_v10 = vld [vmem:[%s9001_s29 + $0x1ca0] sm:$0xf] }
 0x146   : > { %v1099_v11 = vld [vmem:[%s9001_s29 + $0x1cb0] sm:$0xf]  ;;  %v1101_v12 = vld [vmem:[%s9001_s29 + $0x1cc0] sm:$0xf]  ;;  %1098 = vst [vmem:[%s9005_s30 + $0x728] sm:$0xf] %v1097_v10 }
 0x147   : > { %1100 = vst [vmem:[%s9005_s30 + $0x72c] sm:$0xf] %v1099_v11  ;;  %1102 = vst [vmem:[%s9005_s30 + $0x730] sm:$0xf] %v1101_v12  ;;  %v1103_v13 = vld [vmem:[%s9001_s29 + $0x1cd0] sm:$0xf] }
 0x148   : > { %v1105_v14 = vld [vmem:[%s9001_s29 + $0x1ce0] sm:$0xf]  ;;  %v1107_v15 = vld [vmem:[%s9001_s29 + $0x1cf0] sm:$0xf]  ;;  %1104 = vst [vmem:[%s9005_s30 + $0x734] sm:$0xf] %v1103_v13 }
 0x149   : > { %1106 = vst [vmem:[%s9005_s30 + $0x738] sm:$0xf] %v1105_v14  ;;  %1108 = vst [vmem:[%s9005_s30 + $0x73c] sm:$0xf] %v1107_v15  ;;  %v1109_v16 = vld [vmem:[%s9001_s29 + $0x1d00] sm:$0xf] }
 0x14a   : > { %v1111_v17 = vld [vmem:[%s9001_s29 + $0x1d10] sm:$0xf]  ;;  %v1113_v18 = vld [vmem:[%s9001_s29 + $0x1d20] sm:$0xf]  ;;  %1110 = vst [vmem:[%s9005_s30 + $0x740] sm:$0xf] %v1109_v16 }
 0x14b   : > { %1112 = vst [vmem:[%s9005_s30 + $0x744] sm:$0xf] %v1111_v17  ;;  %1114 = vst [vmem:[%s9005_s30 + $0x748] sm:$0xf] %v1113_v18  ;;  %v1115_v19 = vld [vmem:[%s9001_s29 + $0x1d30] sm:$0xf] }
 0x14c   : > { %v1117_v20 = vld [vmem:[%s9001_s29 + $0x1d40] sm:$0xf]  ;;  %v1119_v21 = vld [vmem:[%s9001_s29 + $0x1d50] sm:$0xf]  ;;  %1116 = vst [vmem:[%s9005_s30 + $0x74c] sm:$0xf] %v1115_v19 }
 0x14d   : > { %1118 = vst [vmem:[%s9005_s30 + $0x750] sm:$0xf] %v1117_v20  ;;  %1120 = vst [vmem:[%s9005_s30 + $0x754] sm:$0xf] %v1119_v21  ;;  %v1121_v22 = vld [vmem:[%s9001_s29 + $0x1d60] sm:$0xf] }
 0x14e   : > { %v1123_v23 = vld [vmem:[%s9001_s29 + $0x1d70] sm:$0xf]  ;;  %v1125_v24 = vld [vmem:[%s9001_s29 + $0x1d80] sm:$0xf]  ;;  %1122 = vst [vmem:[%s9005_s30 + $0x758] sm:$0xf] %v1121_v22 }
 0x14f   : > { %1124 = vst [vmem:[%s9005_s30 + $0x75c] sm:$0xf] %v1123_v23  ;;  %1126 = vst [vmem:[%s9005_s30 + $0x760] sm:$0xf] %v1125_v24  ;;  %v1127_v25 = vld [vmem:[%s9001_s29 + $0x1d90] sm:$0xf] }
 0x150   : > { %v1129_v26 = vld [vmem:[%s9001_s29 + $0x1da0] sm:$0xf]  ;;  %v1131_v27 = vld [vmem:[%s9001_s29 + $0x1db0] sm:$0xf]  ;;  %1128 = vst [vmem:[%s9005_s30 + $0x764] sm:$0xf] %v1127_v25 }
 0x151   : > { %1130 = vst [vmem:[%s9005_s30 + $0x768] sm:$0xf] %v1129_v26  ;;  %1132 = vst [vmem:[%s9005_s30 + $0x76c] sm:$0xf] %v1131_v27  ;;  %v1133_v28 = vld [vmem:[%s9001_s29 + $0x1dc0] sm:$0xf] }
 0x152   : > { %v1135_v29 = vld [vmem:[%s9001_s29 + $0x1dd0] sm:$0xf]  ;;  %v1137_v30 = vld [vmem:[%s9001_s29 + $0x1de0] sm:$0xf]  ;;  %1134 = vst [vmem:[%s9005_s30 + $0x770] sm:$0xf] %v1133_v28 }
 0x153   : > { %1136 = vst [vmem:[%s9005_s30 + $0x774] sm:$0xf] %v1135_v29  ;;  %1138 = vst [vmem:[%s9005_s30 + $0x778] sm:$0xf] %v1137_v30  ;;  %v1139_v31 = vld [vmem:[%s9001_s29 + $0x1df0] sm:$0xf] }
 0x154   : > { %v1141_v32 = vld [vmem:[%s9001_s29 + $0x1e00] sm:$0xf]  ;;  %v1143_v33 = vld [vmem:[%s9001_s29 + $0x1e10] sm:$0xf]  ;;  %1140 = vst [vmem:[%s9005_s30 + $0x77c] sm:$0xf] %v1139_v31 }
 0x155   : > { %1142 = vst [vmem:[%s9005_s30 + $0x780] sm:$0xf] %v1141_v32  ;;  %1144 = vst [vmem:[%s9005_s30 + $0x784] sm:$0xf] %v1143_v33  ;;  %v1145_v34 = vld [vmem:[%s9001_s29 + $0x1e20] sm:$0xf] }
 0x156   : > { %v1147_v35 = vld [vmem:[%s9001_s29 + $0x1e30] sm:$0xf]  ;;  %v1149_v36 = vld [vmem:[%s9001_s29 + $0x1e40] sm:$0xf]  ;;  %1146 = vst [vmem:[%s9005_s30 + $0x788] sm:$0xf] %v1145_v34 }
 0x157   : > { %1148 = vst [vmem:[%s9005_s30 + $0x78c] sm:$0xf] %v1147_v35  ;;  %1150 = vst [vmem:[%s9005_s30 + $0x790] sm:$0xf] %v1149_v36  ;;  %v1151_v37 = vld [vmem:[%s9001_s29 + $0x1e50] sm:$0xf] }
 0x158   : > { %v1153_v38 = vld [vmem:[%s9001_s29 + $0x1e60] sm:$0xf]  ;;  %v1155_v39 = vld [vmem:[%s9001_s29 + $0x1e70] sm:$0xf]  ;;  %1152 = vst [vmem:[%s9005_s30 + $0x794] sm:$0xf] %v1151_v37 }
 0x159   : > { %1154 = vst [vmem:[%s9005_s30 + $0x798] sm:$0xf] %v1153_v38  ;;  %1156 = vst [vmem:[%s9005_s30 + $0x79c] sm:$0xf] %v1155_v39  ;;  %v1157_v40 = vld [vmem:[%s9001_s29 + $0x1e80] sm:$0xf] }
 0x15a   : > { %v1159_v41 = vld [vmem:[%s9001_s29 + $0x1e90] sm:$0xf]  ;;  %v1161_v42 = vld [vmem:[%s9001_s29 + $0x1ea0] sm:$0xf]  ;;  %1158 = vst [vmem:[%s9005_s30 + $0x7a0] sm:$0xf] %v1157_v40 }
 0x15b   : > { %1160 = vst [vmem:[%s9005_s30 + $0x7a4] sm:$0xf] %v1159_v41  ;;  %1162 = vst [vmem:[%s9005_s30 + $0x7a8] sm:$0xf] %v1161_v42  ;;  %v1163_v43 = vld [vmem:[%s9001_s29 + $0x1eb0] sm:$0xf] }
 0x15c   : > { %v1165_v44 = vld [vmem:[%s9001_s29 + $0x1ec0] sm:$0xf]  ;;  %v1167_v45 = vld [vmem:[%s9001_s29 + $0x1ed0] sm:$0xf]  ;;  %1164 = vst [vmem:[%s9005_s30 + $0x7ac] sm:$0xf] %v1163_v43 }
 0x15d   : > { %1166 = vst [vmem:[%s9005_s30 + $0x7b0] sm:$0xf] %v1165_v44  ;;  %1168 = vst [vmem:[%s9005_s30 + $0x7b4] sm:$0xf] %v1167_v45  ;;  %v1169_v46 = vld [vmem:[%s9001_s29 + $0x1ee0] sm:$0xf] }
 0x15e   : > { %v1171_v47 = vld [vmem:[%s9001_s29 + $0x1ef0] sm:$0xf]  ;;  %v1173_v48 = vld [vmem:[%s9001_s29 + $0x1f00] sm:$0xf]  ;;  %1170 = vst [vmem:[%s9005_s30 + $0x7b8] sm:$0xf] %v1169_v46 }
 0x15f   : > { %1172 = vst [vmem:[%s9005_s30 + $0x7bc] sm:$0xf] %v1171_v47  ;;  %1174 = vst [vmem:[%s9005_s30 + $0x7c0] sm:$0xf] %v1173_v48  ;;  %v1175_v49 = vld [vmem:[%s9001_s29 + $0x1f10] sm:$0xf] }
 0x160   : > { %v1177_v50 = vld [vmem:[%s9001_s29 + $0x1f20] sm:$0xf]  ;;  %v1179_v51 = vld [vmem:[%s9001_s29 + $0x1f30] sm:$0xf]  ;;  %1176 = vst [vmem:[%s9005_s30 + $0x7c4] sm:$0xf] %v1175_v49 }
 0x161   : > { %1178 = vst [vmem:[%s9005_s30 + $0x7c8] sm:$0xf] %v1177_v50  ;;  %1180 = vst [vmem:[%s9005_s30 + $0x7cc] sm:$0xf] %v1179_v51  ;;  %v1181_v52 = vld [vmem:[%s9001_s29 + $0x1f40] sm:$0xf] }
 0x162   : > { %v1183_v53 = vld [vmem:[%s9001_s29 + $0x1f50] sm:$0xf]  ;;  %v1185_v54 = vld [vmem:[%s9001_s29 + $0x1f60] sm:$0xf]  ;;  %1182 = vst [vmem:[%s9005_s30 + $0x7d0] sm:$0xf] %v1181_v52 }
 0x163   : > { %1184 = vst [vmem:[%s9005_s30 + $0x7d4] sm:$0xf] %v1183_v53  ;;  %1186 = vst [vmem:[%s9005_s30 + $0x7d8] sm:$0xf] %v1185_v54  ;;  %v1187_v55 = vld [vmem:[%s9001_s29 + $0x1f70] sm:$0xf] }
 0x164   : > { %v1189_v56 = vld [vmem:[%s9001_s29 + $0x1f80] sm:$0xf]  ;;  %v1191_v57 = vld [vmem:[%s9001_s29 + $0x1f90] sm:$0xf]  ;;  %1188 = vst [vmem:[%s9005_s30 + $0x7dc] sm:$0xf] %v1187_v55 }
 0x165   : > { %1190 = vst [vmem:[%s9005_s30 + $0x7e0] sm:$0xf] %v1189_v56  ;;  %1192 = vst [vmem:[%s9005_s30 + $0x7e4] sm:$0xf] %v1191_v57  ;;  %v1193_v58 = vld [vmem:[%s9001_s29 + $0x1fa0] sm:$0xf] }
 0x166   : > { %v1195_v59 = vld [vmem:[%s9001_s29 + $0x1fb0] sm:$0xf]  ;;  %v1197_v60 = vld [vmem:[%s9001_s29 + $0x1fc0] sm:$0xf]  ;;  %1194 = vst [vmem:[%s9005_s30 + $0x7e8] sm:$0xf] %v1193_v58 }
 0x167   : > { %1196 = vst [vmem:[%s9005_s30 + $0x7ec] sm:$0xf] %v1195_v59  ;;  %1198 = vst [vmem:[%s9005_s30 + $0x7f0] sm:$0xf] %v1197_v60  ;;  %v1199_v61 = vld [vmem:[%s9001_s29 + $0x1fd0] sm:$0xf] }
 0x168   : > { %v1201_v62 = vld [vmem:[%s9001_s29 + $0x1fe0] sm:$0xf]  ;;  %v1203_v63 = vld [vmem:[%s9001_s29 + $0x1ff0] sm:$0xf]  ;;  %1200 = vst [vmem:[%s9005_s30 + $0x7f4] sm:$0xf] %v1199_v61 }
 0x169   : > { %1202 = vst [vmem:[%s9005_s30 + $0x7f8] sm:$0xf] %v1201_v62  ;;  %1204 = vst [vmem:[%s9005_s30 + $0x7fc] sm:$0xf] %v1203_v63 }
 0x16a PF: > { %p7835_p7 = scmp.ge.s32.totalorder %s8933_s17, 1  ;;  %p4340_p8 = scmp.lt.s32.totalorder %s8933_s17, 5 }
 0x16c   : > { %p4341_p9 = pnand %p7835_p7, %p4340_p8 }
 0x16d   : > { %s4347_s5 = sand.u32 (!%p4341_p9), 1, %s8925_s15   ;;  %v10035_v0 = vld [vmem:[%s10543_s0] sm:$0xff] (!%p4341_p9)  ;;  %v10045_v2 = vld [vmem:[%s10543_s0 + $0x8] sm:$0xff] (!%p4341_p9)  ;;  %p4377_p10 = scmp.lt.s32.totalorder (!%p4341_p9), %s8976_s18, 3 }
 0x16e   : > { %4344 = sbr.rel (%p4341_p9) target bundleno = 935 (0x3a7), region = 84  ;;  %v10040_v1 = vld [vmem:[%s10543_s0 + $0x80] sm:$0xff] (!%p4341_p9)  ;;  %s7836_s12 = sshll.u32 (!%p4341_p9), %s4347_s5, 11  ;;  %v10054_v4 = vld [vmem:[%s10543_s0 + $0x88] sm:$0xff] (!%p4341_p9) }
 0x16f   : > { %v7839_v3 = vcombine.high (!%p4341_p9), %v10035_v0, %v10040_v1  ;;  %v7841_v5 = vcombine.high (!%p4341_p9), %v10045_v2, %v10054_v4  ;;  %s10058_s17 = scalar_lea.vmem (!%p4341_p9), [#allocation2], %s7836_s12  ;;  %v4416_v35 = vld [vmem:[%s10543_s0 + $0x100] sm:$0xff] (!%p4341_p9)  ;;  %v4417_v38 = vld [vmem:[%s10543_s0 + $0x108] sm:$0xff] (!%p4341_p9)  ;;  %v7838_v42 = vcombine.low (!%p4341_p9), %v10035_v0, %v10040_v1  ;;  %v7840_v43 = vcombine.low (!%p4341_p9), %v10045_v2, %v10054_v4  ;;  %s7837_s20 = sshll.u32 (!%p4341_p9), %s4347_s5, 4 }
 0x170   : > { %v8653_v6 = vld [vmem:[%s10058_s17 + $0x40] sm:$0xff] (!%p4341_p9)   ;;  %v8657_v10 = vld [vmem:[%s10058_s17 + $0x48] sm:$0xff] (!%p4341_p9)   ;;  %v8661_v14 = vld [vmem:[%s10058_s17 + $0x50] sm:$0xff] (!%p4341_p9)   ;;  %s4376_s21 = scalar_lea.vmem (!%p4341_p9), [#allocation3], %s7837_s20 }
 0x171   : > { %6848 = vmatprep.mubr.bf16.mxu0 (!%p4341_p9), %v7839_v3  ;;  %v8654_v7 = vld [vmem:[%s10058_s17 + $0xc0] sm:$0xff] (!%p4341_p9)   ;;  %6897 = vmatprep.mubr.bf16.mxu1 (!%p4341_p9), %v7841_v5  ;;  %v8658_v11 = vld [vmem:[%s10058_s17 + $0xc8] sm:$0xff] (!%p4341_p9)   ;;  %v8662_v15 = vld [vmem:[%s10058_s17 + $0xd0] sm:$0xff] (!%p4341_p9)  }
 0x172   : > { %8181 = vmatprep.subr.bf16.mxu0 (!%p4341_p9), %v8653_v6  ;;  %v8655_v8 = vld [vmem:[%s10058_s17] sm:$0xff] (!%p4341_p9)   ;;  %8209 = vmatprep.subr.bf16.mxu1 (!%p4341_p9), %v8654_v7  ;;  %v8659_v12 = vld [vmem:[%s10058_s17 + $0x8] sm:$0xff] (!%p4341_p9)   ;;  %v8663_v16 = vld [vmem:[%s10058_s17 + $0x10] sm:$0xff] (!%p4341_p9)  }
 0x173   : > { %v8656_v9 = vld [vmem:[%s10058_s17 + $0x80] sm:$0xff] (!%p4341_p9)   ;;  %8182 = vmatpush3.bf16.msra.mxu0 (!%p4341_p9), %v8655_v8  ;;  %v8660_v13 = vld [vmem:[%s10058_s17 + $0x88] sm:$0xff] (!%p4341_p9)   ;;  %v8664_v17 = vld [vmem:[%s10058_s17 + $0x90] sm:$0xff] (!%p4341_p9)  }
 0x174   : > { %8210 = vmatpush3.bf16.msra.mxu1 (!%p4341_p9), %v8656_v9  ;;  %8183 = vmatprep.subr.bf16.mxu0 (!%p4341_p9), %v8657_v10  ;;  %v8665_v18 = vld [vmem:[%s10058_s17 + $0x58] sm:$0xff] (!%p4341_p9)   ;;  %v8669_v22 = vld [vmem:[%s10058_s17 + $0x60] sm:$0xff] (!%p4341_p9)   ;;  %v8673_v26 = vld [vmem:[%s10058_s17 + $0x68] sm:$0xff] (!%p4341_p9)  }
 0x175   : > { %8211 = vmatprep.subr.bf16.mxu1 %v8658_v11  ;;  %v8666_v19 = vld [vmem:[%s10058_s17 + $0xd8] sm:$0xff]   ;;  %v8670_v23 = vld [vmem:[%s10058_s17 + $0xe0] sm:$0xff]   ;;  %v8674_v27 = vld [vmem:[%s10058_s17 + $0xe8] sm:$0xff]   ;;  %s4378_s8 = scalar_select %p4377_p10, %s8976_s18, 3 }
 0x176   : > { %v8667_v20 = vld [vmem:[%s10058_s17 + $0x18] sm:$0xff]   ;;  %v8671_v24 = vld [vmem:[%s10058_s17 + $0x20] sm:$0xff]   ;;  %v8675_v28 = vld [vmem:[%s10058_s17 + $0x28] sm:$0xff]   ;;  %s8163_s15 = sshll.u32 (%p8991_p5), %s8976_s18, 2 }
 0x177   : > { %8184 = vmatpush3.bf16.msra.mxu0 %v8659_v12  ;;  %v8668_v21 = vld [vmem:[%s10058_s17 + $0x98] sm:$0xff]   ;;  %v8672_v25 = vld [vmem:[%s10058_s17 + $0xa0] sm:$0xff]   ;;  %v8676_v29 = vld [vmem:[%s10058_s17 + $0xa8] sm:$0xff]   ;;  %s4379_s11 = scalar_lea.vmem %s10545_s2, %s4378_s8  ;;  %s4382_s14 = scalar_lea.vmem %s10546_s3, %s4378_s8 }
 0x178   : > { %8212 = vmatpush3.bf16.msra.mxu1 %v8660_v13  ;;  %8185 = vmatprep.subr.bf16.mxu0 %v8661_v14  ;;  %v8677_v30 = vld [vmem:[%s10058_s17 + $0x70] sm:$0xff]   ;;  %v8681_v34 = vld [vmem:[%s10058_s17 + $0x78] sm:$0xff]   ;;  %v4432_v36 = vld [vmem:[%s10543_s0 + $0x180] sm:$0xff]  ;;  %s7695_s25 = scalar_lea.vmem (%p8991_p5), %s10547_s4, %s8163_s15 }
 0x179   : > { %8213 = vmatprep.subr.bf16.mxu1 %v8662_v15  ;;  %v8678_v31 = vld [vmem:[%s10058_s17 + $0xf0] sm:$0xff]   ;;  %v8682_v37 = vld [vmem:[%s10058_s17 + $0xf8] sm:$0xff]   ;;  %v4433_v39 = vld [vmem:[%s10543_s0 + $0x188] sm:$0xff]  ;;  %v7871_v46 = vcombine.high %v4416_v35, %v4432_v36  ;;  %v7870_v54 = vcombine.low %v4416_v35, %v4432_v36 }
 0x17a   : > { %v8679_v32 = vld [vmem:[%s10058_s17 + $0x30] sm:$0xff]   ;;  %v8683_v40 = vld [vmem:[%s10058_s17 + $0x38] sm:$0xff]   ;;  %v8685_v44 = vld [vmem:[%s10058_s17 + $0x140] sm:$0xff]   ;;  %v7873_v48 = vcombine.high %v4417_v38, %v4433_v39  ;;  %v7872_v56 = vcombine.low %v4417_v38, %v4433_v39 }
 0x17b   : > { %8186 = vmatpush3.bf16.msra.mxu0 %v8663_v16  ;;  %v8680_v33 = vld [vmem:[%s10058_s17 + $0xb0] sm:$0xff]   ;;  %v8684_v41 = vld [vmem:[%s10058_s17 + $0xb8] sm:$0xff]   ;;  %v8686_v45 = vld [vmem:[%s10058_s17 + $0x1c0] sm:$0xff]  }
 0x17c   : > { %8214 = vmatpush3.bf16.msra.mxu1 %v8664_v17  ;;  %8187 = vmatprep.subr.bf16.mxu0 %v8665_v18  ;;  %v8687_v47 = vld [vmem:[%s10058_s17 + $0x100] sm:$0xff]   ;;  %v8689_v50 = vld [vmem:[%s10058_s17 + $0x148] sm:$0xff]   ;;  %v8693_v55 = vld [vmem:[%s10058_s17 + $0x150] sm:$0xff]  }
 0x17d   : > { %8215 = vmatprep.subr.bf16.mxu1 %v8666_v19  ;;  %v8688_v49 = vld [vmem:[%s10058_s17 + $0x180] sm:$0xff]   ;;  %v8690_v51 = vld [vmem:[%s10058_s17 + $0x1c8] sm:$0xff]   ;;  %v8694_v57 = vld [vmem:[%s10058_s17 + $0x1d0] sm:$0xff]  }
 0x17e   : > { %v8691_v52 = vld [vmem:[%s10058_s17 + $0x108] sm:$0xff]   ;;  %v8695_v58 = vld [vmem:[%s10058_s17 + $0x110] sm:$0xff]   ;;  %v8697_v60 = vld [vmem:[%s10058_s17 + $0x158] sm:$0xff]  }
 0x17f   : > { %8188 = vmatpush3.bf16.msra.mxu0 %v8667_v20  ;;  %v8692_v53 = vld [vmem:[%s10058_s17 + $0x188] sm:$0xff]   ;;  %v8696_v59 = vld [vmem:[%s10058_s17 + $0x190] sm:$0xff]   ;;  %v8698_v61 = vld [vmem:[%s10058_s17 + $0x1d8] sm:$0xff]  }
 0x180   : > { %8216 = vmatpush3.bf16.msra.mxu1 %v8668_v21  ;;  %8189 = vmatprep.subr.bf16.mxu0 %v8669_v22  ;;  %v8699_v62 = vld [vmem:[%s10058_s17 + $0x118] sm:$0xff]   ;;  %v8701_v0 = vld [vmem:[%s10058_s17 + $0x160] sm:$0xff]   ;;  %v8705_v4 = vld [vmem:[%s10058_s17 + $0x168] sm:$0xff]  }
 0x181   : > { %8217 = vmatprep.subr.bf16.mxu1 %v8670_v23  ;;  %v8700_v63 = vld [vmem:[%s10058_s17 + $0x198] sm:$0xff]   ;;  %v8702_v1 = vld [vmem:[%s10058_s17 + $0x1e0] sm:$0xff]   ;;  %v8706_v5 = vld [vmem:[%s10058_s17 + $0x1e8] sm:$0xff]  }
 0x182   : > { %v8703_v2 = vld [vmem:[%s10058_s17 + $0x120] sm:$0xff]   ;;  %v8707_v6 = vld [vmem:[%s10058_s17 + $0x128] sm:$0xff]   ;;  %v8709_v8 = vld [vmem:[%s10058_s17 + $0x170] sm:$0xff]  }
 0x183   : > { %8190 = vmatpush3.bf16.msra.mxu0 %v8671_v24  ;;  %v8704_v3 = vld [vmem:[%s10058_s17 + $0x1a0] sm:$0xff]   ;;  %v8708_v7 = vld [vmem:[%s10058_s17 + $0x1a8] sm:$0xff]   ;;  %v8710_v9 = vld [vmem:[%s10058_s17 + $0x1f0] sm:$0xff]  }
 0x184   : > { %8218 = vmatpush3.bf16.msra.mxu1 %v8672_v25  ;;  %8191 = vmatprep.subr.bf16.mxu0 %v8673_v26  ;;  %v8711_v10 = vld [vmem:[%s10058_s17 + $0x130] sm:$0xff]   ;;  %v8713_v12 = vld [vmem:[%s10058_s17 + $0x178] sm:$0xff]   ;;  %v8717_v24 = vld [vmem:[%s10058_s17 + $0x240] sm:$0xff]  }
 0x185   : > { %8219 = vmatprep.subr.bf16.mxu1 %v8674_v27  ;;  %v8712_v11 = vld [vmem:[%s10058_s17 + $0x1b0] sm:$0xff]   ;;  %v8714_v14 = vld [vmem:[%s10058_s17 + $0x1f8] sm:$0xff]   ;;  %v8718_v25 = vld [vmem:[%s10058_s17 + $0x2c0] sm:$0xff]  }
 0x186   : > { %v4386_v13 = vld [vmem:[%s10543_s0 + $0x10] sm:$0xff]  ;;  %v8715_v15 = vld [vmem:[%s10058_s17 + $0x138] sm:$0xff]   ;;  %v8719_v26 = vld [vmem:[%s10058_s17 + $0x200] sm:$0xff]  }
 0x187   : > { %8192 = vmatpush3.bf16.msra.mxu0 %v8675_v28  ;;  %v8716_v16 = vld [vmem:[%s10058_s17 + $0x1b8] sm:$0xff]   ;;  %v4402_v17 = vld [vmem:[%s10543_s0 + $0x90] sm:$0xff]  ;;  %v8720_v27 = vld [vmem:[%s10058_s17 + $0x280] sm:$0xff]  }
 0x188   : > { %8220 = vmatpush3.bf16.msra.mxu1 %v8676_v29  ;;  %8193 = vmatprep.subr.bf16.mxu0 %v8677_v30  ;;  %v4387_v18 = vld [vmem:[%s10543_s0 + $0x18] sm:$0xff]  ;;  %v7842_v20 = vcombine.low %v4386_v13, %v4402_v17  ;;  %v7843_v21 = vcombine.high %v4386_v13, %v4402_v17  ;;  %v8721_v28 = vld [vmem:[%s10058_s17 + $0x248] sm:$0xff]   ;;  %v8725_v36 = vld [vmem:[%s10058_s17 + $0x250] sm:$0xff]  }
 0x189   : > { %8221 = vmatprep.subr.bf16.mxu1 %v8678_v31  ;;  %v4403_v19 = vld [vmem:[%s10543_s0 + $0x98] sm:$0xff]  ;;  %v8722_v29 = vld [vmem:[%s10058_s17 + $0x2c8] sm:$0xff]   ;;  %v4436_v17 = vld [vmem:[%s10543_s0 + $0x1a0] sm:$0xff] }
 0x18a   : > { %v7844_v22 = vcombine.low %v4387_v18, %v4403_v19  ;;  %v7845_v23 = vcombine.high %v4387_v18, %v4403_v19  ;;  %v8723_v30 = vld [vmem:[%s10058_s17 + $0x208] sm:$0xff]   ;;  %v4419_v38 = vld [vmem:[%s10543_s0 + $0x118] sm:$0xff] }
 0x18b   : > { %8194 = vmatpush3.bf16.msra.mxu0 %v8679_v32  ;;  %v8724_v31 = vld [vmem:[%s10058_s17 + $0x288] sm:$0xff]   ;;  %v4418_v32 = vld [vmem:[%s10543_s0 + $0x110] sm:$0xff]  ;;  %v4435_v39 = vld [vmem:[%s10543_s0 + $0x198] sm:$0xff] }
 0x18c   : > { %8222 = vmatpush3.bf16.msra.mxu1 %v8680_v33  ;;  %8195 = vmatprep.subr.bf16.mxu0 %v8681_v34  ;;  %v4434_v33 = vld [vmem:[%s10543_s0 + $0x190] sm:$0xff]  ;;  %v8754_v13 = vld [vmem:[%s10058_s17 + $0x3c8] sm:$0xff]  }
 0x18d   : > { %8223 = vmatprep.subr.bf16.mxu1 %v8682_v37  ;;  %v7875_v34 = vcombine.high %v4418_v32, %v4434_v33  ;;  %v7874_v35 = vcombine.low %v4418_v32, %v4434_v33  ;;  %v8726_v37 = vld [vmem:[%s10058_s17 + $0x2d0] sm:$0xff]   ;;  %v8765_v32 = vld [vmem:[%s10058_s17 + $0x360] sm:$0xff]  }
 0x18e   : > { %v8766_v33 = vld [vmem:[%s10058_s17 + $0x3e0] sm:$0xff]  }
 0x18f   : > { %8196 = vmatpush3.bf16.msra.mxu0 %v8683_v40  ;;  %v7877_v40 = vcombine.high %v4419_v38, %v4435_v39 }
 0x190   : > { %8224 = vmatpush3.bf16.msra.mxu1 %v8684_v41  ;;  %8237 = vmatprep.subr.bf16.mxu0 %v8685_v44  ;;  %v8727_v41 = vld [vmem:[%s10058_s17 + $0x210] sm:$0xff]   ;;  %v8729_v44 = vld [vmem:[%s10058_s17 + $0x258] sm:$0xff]  }
 0x191   : > { %8265 = vmatprep.subr.bf16.mxu1 %v8686_v45  ;;  %v8730_v45 = vld [vmem:[%s10058_s17 + $0x2d8] sm:$0xff]  }
 0x192   : > { %6849 = vmatmul.mubr.bf16.vlgmr.msra.gmra.mrb[0].mxu0 %v7838_v42  ;;  %v7876_v42 = vcombine.low %v4419_v38, %v4435_v39  ;;  %v8771_v38 = vld [vmem:[%s10058_s17 + $0x328] sm:$0xff]  }
 0x193   : > { %6898 = vmatmul.mubr.bf16.vlgmr.msra.gmra.mrb[0].mxu1 %v7840_v43  ;;  %8238 = vmatpush3.bf16.msra.mxu0 %v8687_v47  ;;  %v8728_v43 = vld [vmem:[%s10058_s17 + $0x290] sm:$0xff]   ;;  %v8732_v47 = vld [vmem:[%s10058_s17 + $0x298] sm:$0xff]   ;;  %v8772_v39 = vld [vmem:[%s10058_s17 + $0x3a8] sm:$0xff]  }
 0x194   : > { %8266 = vmatpush3.bf16.msra.mxu1 %v8688_v49  ;;  %6856 = vmatprep.mubr.bf16.mxu0 %v7871_v46  ;;  %v8731_v46 = vld [vmem:[%s10058_s17 + $0x218] sm:$0xff]   ;;  %v8734_v49 = vld [vmem:[%s10058_s17 + $0x2e0] sm:$0xff]  }
 0x195   : > { %8239 = vmatprep.subr.bf16.mxu0 %v8689_v50  ;;  %6905 = vmatprep.mubr.bf16.mxu1 %v7873_v48  ;;  %v8733_v48 = vld [vmem:[%s10058_s17 + $0x260] sm:$0xff]  }
 0x196   : > { %8267 = vmatprep.subr.bf16.mxu1 %v8690_v51  ;;  %v8735_v50 = vld [vmem:[%s10058_s17 + $0x220] sm:$0xff]  }
 0x197   : > { %8240 = vmatpush3.bf16.msra.mxu0 %v8691_v52  ;;  %v8736_v51 = vld [vmem:[%s10058_s17 + $0x2a0] sm:$0xff]   ;;  %v8737_v52 = vld [vmem:[%s10058_s17 + $0x268] sm:$0xff]  }
 0x198   : > { %8268 = vmatpush3.bf16.msra.mxu1 %v8692_v53  ;;  %8241 = vmatprep.subr.bf16.mxu0 %v8693_v55  ;;  %v8738_v53 = vld [vmem:[%s10058_s17 + $0x2e8] sm:$0xff]  }
 0x199   : > { %8269 = vmatprep.subr.bf16.mxu1 %v8694_v57  ;;  %v8740_v55 = vld [vmem:[%s10058_s17 + $0x2a8] sm:$0xff]   ;;  %v8742_v57 = vld [vmem:[%s10058_s17 + $0x2f0] sm:$0xff]  }
 0x19a   : > { %6857 = vmatmul.mubr.bf16.gmra.mrb[4].mxu0 %v7870_v54  ;;  %v8739_v54 = vld [vmem:[%s10058_s17 + $0x228] sm:$0xff]  }
 0x19b   : > { %8242 = vmatpush3.bf16.msra.mxu0 %v8695_v58  ;;  %6906 = vmatmul.mubr.bf16.gmra.mrb[4].mxu1 %v7872_v56  ;;  %v8741_v56 = vld [vmem:[%s10058_s17 + $0x270] sm:$0xff]  }
 0x19c   : > { %8270 = vmatpush3.bf16.msra.mxu1 %v8696_v59  ;;  %8243 = vmatprep.subr.bf16.mxu0 %v8697_v60  ;;  %v8743_v58 = vld [vmem:[%s10058_s17 + $0x230] sm:$0xff]   ;;  %v8745_v60 = vld [vmem:[%s10058_s17 + $0x278] sm:$0xff]  }
 0x19d   : > { %8271 = vmatprep.subr.bf16.mxu1 %v8698_v61  ;;  %6946 = vmatprep.mubr.bf16.mxu0 %v7843_v21  ;;  %v8744_v59 = vld [vmem:[%s10058_s17 + $0x2b0] sm:$0xff]   ;;  %v8746_v61 = vld [vmem:[%s10058_s17 + $0x2f8] sm:$0xff]  }
 0x19e   : > { %6995 = vmatprep.mubr.bf16.mxu1 %v7845_v23  ;;  %v8758_v21 = vld [vmem:[%s10058_s17 + $0x3d0] sm:$0xff]   ;;  %v4437_v23 = vld [vmem:[%s10543_s0 + $0x1a8] sm:$0xff] }
 0x19f   : > { %8244 = vmatpush3.bf16.msra.mxu0 %v8699_v62  ;;  %v8747_v62 = vld [vmem:[%s10058_s17 + $0x238] sm:$0xff]  }
 0x1a0   : > { %8272 = vmatpush3.bf16.msra.mxu1 %v8700_v63  ;;  %8245 = vmatprep.subr.bf16.mxu0 %v8701_v0  ;;  %v8748_v63 = vld [vmem:[%s10058_s17 + $0x2b8] sm:$0xff]   ;;  %v4388_v0 = vld [vmem:[%s10543_s0 + $0x20] sm:$0xff] }
 0x1a1   : > { %8273 = vmatprep.subr.bf16.mxu1 %v8702_v1  ;;  %v4404_v1 = vld [vmem:[%s10543_s0 + $0xa0] sm:$0xff] }
 0x1a3   : > { %8246 = vmatpush3.bf16.msra.mxu0 %v8703_v2  ;;  %v7846_v2 = vcombine.low %v4388_v0, %v4404_v1 }
 0x1a4   : > { %8274 = vmatpush3.bf16.msra.mxu1 %v8704_v3  ;;  %8247 = vmatprep.subr.bf16.mxu0 %v8705_v4  ;;  %v7847_v3 = vcombine.high %v4388_v0, %v4404_v1  ;;  %v4389_v4 = vld [vmem:[%s10543_s0 + $0x28] sm:$0xff]  ;;  %v4422_v0 = vld [vmem:[%s10543_s0 + $0x130] sm:$0xff] }
 0x1a5   : > { %8275 = vmatprep.subr.bf16.mxu1 %v8706_v5  ;;  %v4405_v5 = vld [vmem:[%s10543_s0 + $0xa8] sm:$0xff]  ;;  %v4438_v1 = vld [vmem:[%s10543_s0 + $0x1b0] sm:$0xff] }
 0x1a7   : > { %8248 = vmatpush3.bf16.msra.mxu0 %v8707_v6  ;;  %v7848_v6 = vcombine.low %v4389_v4, %v4405_v5 }
 0x1a8   : > { %8276 = vmatpush3.bf16.msra.mxu1 %v8708_v7  ;;  %8249 = vmatprep.subr.bf16.mxu0 %v8709_v8  ;;  %v7849_v7 = vcombine.high %v4389_v4, %v4405_v5  ;;  %v8749_v8 = vld [vmem:[%s10058_s17 + $0x340] sm:$0xff]   ;;  %v8789_v4 = vld [vmem:[%s10058_s17 + $0x450] sm:$0xff]  }
 0x1a9   : > { %8277 = vmatprep.subr.bf16.mxu1 %v8710_v9  ;;  %v8750_v9 = vld [vmem:[%s10058_s17 + $0x3c0] sm:$0xff]   ;;  %v8790_v5 = vld [vmem:[%s10058_s17 + $0x4d0] sm:$0xff]  }
 0x1ab   : > { %8250 = vmatpush3.bf16.msra.mxu0 %v8711_v10  ;;  %v8751_v10 = vld [vmem:[%s10058_s17 + $0x300] sm:$0xff]  }
 0x1ac   : > { %8278 = vmatpush3.bf16.msra.mxu1 %v8712_v11  ;;  %8251 = vmatprep.subr.bf16.mxu0 %v8713_v12  ;;  %v8752_v11 = vld [vmem:[%s10058_s17 + $0x380] sm:$0xff]   ;;  %v8753_v12 = vld [vmem:[%s10058_s17 + $0x348] sm:$0xff]  }
 0x1ad   : > { %8279 = vmatprep.subr.bf16.mxu1 %v8714_v14  ;;  %v8755_v14 = vld [vmem:[%s10058_s17 + $0x308] sm:$0xff]  }
 0x1af   : > { %8252 = vmatpush3.bf16.msra.mxu0 %v8715_v15  ;;  %v8756_v15 = vld [vmem:[%s10058_s17 + $0x388] sm:$0xff]  }
 0x1b0   : > { %8280 = vmatpush3.bf16.msra.mxu1 %v8716_v16  ;;  %8293 = vmatprep.subr.bf16.mxu0 %v8717_v24  ;;  %v4420_v16 = vld [vmem:[%s10543_s0 + $0x120] sm:$0xff] }
 0x1b1   : > { %8321 = vmatprep.subr.bf16.mxu1 %v8718_v25  ;;  %v7879_v18 = vcombine.high %v4420_v16, %v4436_v17  ;;  %v7878_v19 = vcombine.low %v4420_v16, %v4436_v17  ;;  %v8759_v25 = vld [vmem:[%s10058_s17 + $0x310] sm:$0xff]   ;;  %v8797_v16 = vld [vmem:[%s10058_s17 + $0x460] sm:$0xff]  }
 0x1b2   : > { %6947 = vmatmul.mubr.bf16.vlgmr.msra.gmra.mrb[8].mxu0 %v7842_v20  ;;  %v8757_v20 = vld [vmem:[%s10058_s17 + $0x350] sm:$0xff]   ;;  %v8798_v17 = vld [vmem:[%s10058_s17 + $0x4e0] sm:$0xff]  }
 0x1b3   : > { %6996 = vmatmul.mubr.bf16.vlgmr.msra.gmra.mrb[8].mxu1 %v7844_v22  ;;  %8294 = vmatpush3.bf16.msra.mxu0 %v8719_v26  ;;  %v4421_v22 = vld [vmem:[%s10543_s0 + $0x128] sm:$0xff] }
 0x1b4   : > { %8322 = vmatpush3.bf16.msra.mxu1 %v8720_v27  ;;  %8295 = vmatprep.subr.bf16.mxu0 %v8721_v28  ;;  %v7881_v24 = vcombine.high %v4421_v22, %v4437_v23  ;;  %v7880_v26 = vcombine.low %v4421_v22, %v4437_v23  ;;  %v8760_v27 = vld [vmem:[%s10058_s17 + $0x390] sm:$0xff]   ;;  %v8761_v28 = vld [vmem:[%s10058_s17 + $0x358] sm:$0xff]   ;;  %v8803_v22 = vld [vmem:[%s10058_s17 + $0x428] sm:$0xff]  }
 0x1b5   : > { %8323 = vmatprep.subr.bf16.mxu1 %v8722_v29  ;;  %6954 = vmatprep.mubr.bf16.mxu0 %v7875_v34  ;;  %v8762_v29 = vld [vmem:[%s10058_s17 + $0x3d8] sm:$0xff]   ;;  %v8767_v34 = vld [vmem:[%s10058_s17 + $0x320] sm:$0xff]   ;;  %v8804_v23 = vld [vmem:[%s10058_s17 + $0x4a8] sm:$0xff]  }
 0x1b6   : > { %7003 = vmatprep.mubr.bf16.mxu1 %v7877_v40  ;;  %v8773_v40 = vld [vmem:[%s10058_s17 + $0x370] sm:$0xff]  }
 0x1b7   : > { %8296 = vmatpush3.bf16.msra.mxu0 %v8723_v30  ;;  %v8763_v30 = vld [vmem:[%s10058_s17 + $0x318] sm:$0xff]  }
 0x1b8   : > { %8324 = vmatpush3.bf16.msra.mxu1 %v8724_v31  ;;  %8297 = vmatprep.subr.bf16.mxu0 %v8725_v36  ;;  %v8764_v31 = vld [vmem:[%s10058_s17 + $0x398] sm:$0xff]   ;;  %v8769_v36 = vld [vmem:[%s10058_s17 + $0x368] sm:$0xff]  }
 0x1b9   : > { %8325 = vmatprep.subr.bf16.mxu1 %v8726_v37  ;;  %v8770_v37 = vld [vmem:[%s10058_s17 + $0x3e8] sm:$0xff]  }
 0x1ba   : > { %6955 = vmatmul.mubr.bf16.gmra.mrb[12].mxu0 %v7874_v35  ;;  %v8768_v35 = vld [vmem:[%s10058_s17 + $0x3a0] sm:$0xff]  }
 0x1bb   : > { %8298 = vmatpush3.bf16.msra.mxu0 %v8727_v41  ;;  %7004 = vmatmul.mubr.bf16.gmra.mrb[12].mxu1 %v7876_v42  ;;  %v8774_v41 = vld [vmem:[%s10058_s17 + $0x3f0] sm:$0xff]  }
 0x1bc   : > { %8326 = vmatpush3.bf16.msra.mxu1 %v8728_v43  ;;  %8299 = vmatprep.subr.bf16.mxu0 %v8729_v44  ;;  %v8775_v42 = vld [vmem:[%s10058_s17 + $0x330] sm:$0xff]   ;;  %v8777_v44 = vld [vmem:[%s10058_s17 + $0x378] sm:$0xff]  }
 0x1bd   : > { %8327 = vmatprep.subr.bf16.mxu1 %v8730_v45  ;;  %7044 = vmatprep.mubr.bf16.mxu0 %v7847_v3  ;;  %v8776_v43 = vld [vmem:[%s10058_s17 + $0x3b0] sm:$0xff]   ;;  %v8778_v45 = vld [vmem:[%s10058_s17 + $0x3f8] sm:$0xff]   ;;  %v7882_v3 = vcombine.low %v4422_v0, %v4438_v1 }
 0x1be   : > { %7093 = vmatprep.mubr.bf16.mxu1 %v7849_v7  ;;  %v4439_v7 = vld [vmem:[%s10543_s0 + $0x1b8] sm:$0xff] }
 0x1bf   : > { %8300 = vmatpush3.bf16.msra.mxu0 %v8731_v46  ;;  %v8779_v46 = vld [vmem:[%s10058_s17 + $0x338] sm:$0xff]  }
 0x1c0   : > { %8328 = vmatpush3.bf16.msra.mxu1 %v8732_v47  ;;  %8301 = vmatprep.subr.bf16.mxu0 %v8733_v48  ;;  %v8780_v47 = vld [vmem:[%s10058_s17 + $0x3b8] sm:$0xff]   ;;  %v4390_v48 = vld [vmem:[%s10543_s0 + $0x30] sm:$0xff] }
 0x1c1   : > { %8329 = vmatprep.subr.bf16.mxu1 %v8734_v49  ;;  %v4406_v49 = vld [vmem:[%s10543_s0 + $0xb0] sm:$0xff] }
 0x1c3   : > { %8302 = vmatpush3.bf16.msra.mxu0 %v8735_v50  ;;  %v4391_v50 = vld [vmem:[%s10543_s0 + $0x38] sm:$0xff] }
 0x1c4   : > { %8330 = vmatpush3.bf16.msra.mxu1 %v8736_v51  ;;  %8303 = vmatprep.subr.bf16.mxu0 %v8737_v52  ;;  %v7850_v51 = vcombine.low %v4390_v48, %v4406_v49  ;;  %v7851_v52 = vcombine.high %v4390_v48, %v4406_v49  ;;  %v4424_v48 = vld [vmem:[%s10543_s0 + $0x140] sm:$0xff] }
 0x1c5   : > { %8331 = vmatprep.subr.bf16.mxu1 %v8738_v53  ;;  %v4407_v53 = vld [vmem:[%s10543_s0 + $0xb8] sm:$0xff]  ;;  %v4440_v49 = vld [vmem:[%s10543_s0 + $0x1c0] sm:$0xff] }
 0x1c7   : > { %8304 = vmatpush3.bf16.msra.mxu0 %v8739_v54  ;;  %v7852_v54 = vcombine.low %v4391_v50, %v4407_v53 }
 0x1c8   : > { %8332 = vmatpush3.bf16.msra.mxu1 %v8740_v55  ;;  %8305 = vmatprep.subr.bf16.mxu0 %v8741_v56  ;;  %v7853_v55 = vcombine.high %v4391_v50, %v4407_v53  ;;  %v8781_v56 = vld [vmem:[%s10058_s17 + $0x440] sm:$0xff]   ;;  %v7887_v50 = vcombine.high %v4424_v48, %v4440_v49  ;;  %v8822_v53 = vld [vmem:[%s10058_s17 + $0x5d0] sm:$0xff]  }
 0x1c9   : > { %8333 = vmatprep.subr.bf16.mxu1 %v8742_v57  ;;  %v8782_v57 = vld [vmem:[%s10058_s17 + $0x4c0] sm:$0xff]  }
 0x1cb   : > { %8306 = vmatpush3.bf16.msra.mxu0 %v8743_v58  ;;  %v8783_v58 = vld [vmem:[%s10058_s17 + $0x400] sm:$0xff]  }
 0x1cc   : > { %8334 = vmatpush3.bf16.msra.mxu1 %v8744_v59  ;;  %8307 = vmatprep.subr.bf16.mxu0 %v8745_v60  ;;  %v8784_v59 = vld [vmem:[%s10058_s17 + $0x480] sm:$0xff]   ;;  %v8785_v60 = vld [vmem:[%s10058_s17 + $0x448] sm:$0xff]  }
 0x1cd   : > { %8335 = vmatprep.subr.bf16.mxu1 %v8746_v61  ;;  %v8786_v61 = vld [vmem:[%s10058_s17 + $0x4c8] sm:$0xff]  }
 0x1cf   : > { %8308 = vmatpush3.bf16.msra.mxu0 %v8747_v62  ;;  %v8787_v62 = vld [vmem:[%s10058_s17 + $0x408] sm:$0xff]  }
 0x1d0   : > { %8336 = vmatpush3.bf16.msra.mxu1 %v8748_v63  ;;  %8349 = vmatprep.subr.bf16.mxu0 %v8749_v8  ;;  %v8788_v63 = vld [vmem:[%s10058_s17 + $0x488] sm:$0xff]  }
 0x1d1   : > { %8377 = vmatprep.subr.bf16.mxu1 %v8750_v9  ;;  %v8791_v9 = vld [vmem:[%s10058_s17 + $0x410] sm:$0xff]  }
 0x1d2   : > { %7045 = vmatmul.mubr.bf16.vlgmr.msra.gmra.mrb[16].mxu0 %v7846_v2  ;;  %v7883_v2 = vcombine.high %v4422_v0, %v4438_v1  ;;  %v8829_v0 = vld [vmem:[%s10058_s17 + $0x560] sm:$0xff]  }
 0x1d3   : > { %7094 = vmatmul.mubr.bf16.vlgmr.msra.gmra.mrb[16].mxu1 %v7848_v6  ;;  %8350 = vmatpush3.bf16.msra.mxu0 %v8751_v10  ;;  %v4423_v6 = vld [vmem:[%s10543_s0 + $0x138] sm:$0xff]  ;;  %v8830_v1 = vld [vmem:[%s10058_s17 + $0x5e0] sm:$0xff]  }
 0x1d4   : > { %8378 = vmatpush3.bf16.msra.mxu1 %v8752_v11  ;;  %8351 = vmatprep.subr.bf16.mxu0 %v8753_v12  ;;  %v7885_v8 = vcombine.high %v4423_v6, %v4439_v7  ;;  %v7884_v10 = vcombine.low %v4423_v6, %v4439_v7  ;;  %v8792_v11 = vld [vmem:[%s10058_s17 + $0x490] sm:$0xff]   ;;  %v8793_v12 = vld [vmem:[%s10058_s17 + $0x458] sm:$0xff]   ;;  %v8835_v6 = vld [vmem:[%s10058_s17 + $0x528] sm:$0xff]  }
 0x1d5   : > { %8379 = vmatprep.subr.bf16.mxu1 %v8754_v13  ;;  %7052 = vmatprep.mubr.bf16.mxu0 %v7879_v18  ;;  %v8794_v13 = vld [vmem:[%s10058_s17 + $0x4d8] sm:$0xff]   ;;  %v8799_v18 = vld [vmem:[%s10058_s17 + $0x420] sm:$0xff]   ;;  %v8836_v7 = vld [vmem:[%s10058_s17 + $0x5a8] sm:$0xff]  }
 0x1d6   : > { %7101 = vmatprep.mubr.bf16.mxu1 %v7881_v24  ;;  %v8805_v24 = vld [vmem:[%s10058_s17 + $0x470] sm:$0xff]  }
 0x1d7   : > { %8352 = vmatpush3.bf16.msra.mxu0 %v8755_v14  ;;  %v8795_v14 = vld [vmem:[%s10058_s17 + $0x418] sm:$0xff]  }
 0x1d8   : > { %8380 = vmatpush3.bf16.msra.mxu1 %v8756_v15  ;;  %8353 = vmatprep.subr.bf16.mxu0 %v8757_v20  ;;  %v8796_v15 = vld [vmem:[%s10058_s17 + $0x498] sm:$0xff]   ;;  %v8801_v20 = vld [vmem:[%s10058_s17 + $0x468] sm:$0xff]  }
 0x1d9   : > { %8381 = vmatprep.subr.bf16.mxu1 %v8758_v21  ;;  %v8802_v21 = vld [vmem:[%s10058_s17 + $0x4e8] sm:$0xff]  }
 0x1da   : > { %7053 = vmatmul.mubr.bf16.gmra.mrb[20].mxu0 %v7878_v19  ;;  %v8800_v19 = vld [vmem:[%s10058_s17 + $0x4a0] sm:$0xff]  }
 0x1db   : > { %8354 = vmatpush3.bf16.msra.mxu0 %v8759_v25  ;;  %7102 = vmatmul.mubr.bf16.gmra.mrb[20].mxu1 %v7880_v26  ;;  %v8806_v25 = vld [vmem:[%s10058_s17 + $0x4f0] sm:$0xff]  }
 0x1dc   : > { %8382 = vmatpush3.bf16.msra.mxu1 %v8760_v27  ;;  %8355 = vmatprep.subr.bf16.mxu0 %v8761_v28  ;;  %v8807_v26 = vld [vmem:[%s10058_s17 + $0x430] sm:$0xff]   ;;  %v8809_v28 = vld [vmem:[%s10058_s17 + $0x478] sm:$0xff]  }
 0x1dd   : > { %8383 = vmatprep.subr.bf16.mxu1 %v8762_v29  ;;  %7142 = vmatprep.mubr.bf16.mxu0 %v7851_v52  ;;  %v8808_v27 = vld [vmem:[%s10058_s17 + $0x4b0] sm:$0xff]   ;;  %v8810_v29 = vld [vmem:[%s10058_s17 + $0x4f8] sm:$0xff]  }
 0x1de   : > { %7191 = vmatprep.mubr.bf16.mxu1 %v7853_v55  ;;  %v8821_v52 = vld [vmem:[%s10058_s17 + $0x550] sm:$0xff]   ;;  %v4441_v55 = vld [vmem:[%s10543_s0 + $0x1c8] sm:$0xff] }
 0x1df   : > { %8356 = vmatpush3.bf16.msra.mxu0 %v8763_v30  ;;  %v8811_v30 = vld [vmem:[%s10058_s17 + $0x438] sm:$0xff]  }
 0x1e0   : > { %8384 = vmatpush3.bf16.msra.mxu1 %v8764_v31  ;;  %8357 = vmatprep.subr.bf16.mxu0 %v8765_v32  ;;  %v8812_v31 = vld [vmem:[%s10058_s17 + $0x4b8] sm:$0xff]   ;;  %v4392_v32 = vld [vmem:[%s10543_s0 + $0x40] sm:$0xff] }
 0x1e1   : > { %8385 = vmatprep.subr.bf16.mxu1 %v8766_v33  ;;  %v4408_v33 = vld [vmem:[%s10543_s0 + $0xc0] sm:$0xff] }
 0x1e3   : > { %8358 = vmatpush3.bf16.msra.mxu0 %v8767_v34  ;;  %v4393_v34 = vld [vmem:[%s10543_s0 + $0x48] sm:$0xff] }
 0x1e4   : > { %8386 = vmatpush3.bf16.msra.mxu1 %v8768_v35  ;;  %8359 = vmatprep.subr.bf16.mxu0 %v8769_v36  ;;  %v4409_v35 = vld [vmem:[%s10543_s0 + $0xc8] sm:$0xff]  ;;  %v7854_v36 = vcombine.low %v4392_v32, %v4408_v33 }
 0x1e5   : > { %8387 = vmatprep.subr.bf16.mxu1 %v8770_v37  ;;  %v7855_v37 = vcombine.high %v4392_v32, %v4408_v33  ;;  %v4426_v32 = vld [vmem:[%s10543_s0 + $0x150] sm:$0xff] }
 0x1e6   : > { %v4442_v33 = vld [vmem:[%s10543_s0 + $0x1d0] sm:$0xff] }
 0x1e7   : > { %8360 = vmatpush3.bf16.msra.mxu0 %v8771_v38  ;;  %v7856_v38 = vcombine.low %v4393_v34, %v4409_v35 }
 0x1e8   : > { %8388 = vmatpush3.bf16.msra.mxu1 %v8772_v39  ;;  %8361 = vmatprep.subr.bf16.mxu0 %v8773_v40  ;;  %v7857_v39 = vcombine.high %v4393_v34, %v4409_v35  ;;  %v8813_v40 = vld [vmem:[%s10058_s17 + $0x540] sm:$0xff]   ;;  %v7891_v34 = vcombine.high %v4426_v32, %v4442_v33  ;;  %v7890_v35 = vcombine.low %v4426_v32, %v4442_v33 }
 0x1e9   : > { %8389 = vmatprep.subr.bf16.mxu1 %v8774_v41  ;;  %v8814_v41 = vld [vmem:[%s10058_s17 + $0x5c0] sm:$0xff]  }
 0x1eb   : > { %8362 = vmatpush3.bf16.msra.mxu0 %v8775_v42  ;;  %v8815_v42 = vld [vmem:[%s10058_s17 + $0x500] sm:$0xff]  }
 0x1ec   : > { %8390 = vmatpush3.bf16.msra.mxu1 %v8776_v43  ;;  %8363 = vmatprep.subr.bf16.mxu0 %v8777_v44  ;;  %v8816_v43 = vld [vmem:[%s10058_s17 + $0x580] sm:$0xff]   ;;  %v8817_v44 = vld [vmem:[%s10058_s17 + $0x548] sm:$0xff]  }
 0x1ed   : > { %8391 = vmatprep.subr.bf16.mxu1 %v8778_v45  ;;  %v8818_v45 = vld [vmem:[%s10058_s17 + $0x5c8] sm:$0xff]  }
 0x1ef   : > { %8364 = vmatpush3.bf16.msra.mxu0 %v8779_v46  ;;  %v8819_v46 = vld [vmem:[%s10058_s17 + $0x508] sm:$0xff]  }
 0x1f0   : > { %8392 = vmatpush3.bf16.msra.mxu1 %v8780_v47  ;;  %8405 = vmatprep.subr.bf16.mxu0 %v8781_v56  ;;  %v8820_v47 = vld [vmem:[%s10058_s17 + $0x588] sm:$0xff]  }
 0x1f1   : > { %8433 = vmatprep.subr.bf16.mxu1 %v8782_v57  ;;  %v8823_v57 = vld [vmem:[%s10058_s17 + $0x510] sm:$0xff]  }
 0x1f2   : > { %7143 = vmatmul.mubr.bf16.vlgmr.msra.gmra.mrb[24].mxu0 %v7850_v51  ;;  %v7886_v51 = vcombine.low %v4424_v48, %v4440_v49  ;;  %v8861_v48 = vld [vmem:[%s10058_s17 + $0x660] sm:$0xff]  }
 0x1f3   : > { %7192 = vmatmul.mubr.bf16.vlgmr.msra.gmra.mrb[24].mxu1 %v7852_v54  ;;  %8406 = vmatpush3.bf16.msra.mxu0 %v8783_v58  ;;  %v4425_v54 = vld [vmem:[%s10543_s0 + $0x148] sm:$0xff]  ;;  %v8862_v49 = vld [vmem:[%s10058_s17 + $0x6e0] sm:$0xff]  }
 0x1f4   : > { %8434 = vmatpush3.bf16.msra.mxu1 %v8784_v59  ;;  %8407 = vmatprep.subr.bf16.mxu0 %v8785_v60  ;;  %v7889_v56 = vcombine.high %v4425_v54, %v4441_v55  ;;  %v7888_v58 = vcombine.low %v4425_v54, %v4441_v55  ;;  %v8824_v59 = vld [vmem:[%s10058_s17 + $0x590] sm:$0xff]   ;;  %v8825_v60 = vld [vmem:[%s10058_s17 + $0x558] sm:$0xff]   ;;  %v8867_v54 = vld [vmem:[%s10058_s17 + $0x628] sm:$0xff]  }
 0x1f5   : > { %8435 = vmatprep.subr.bf16.mxu1 %v8786_v61  ;;  %7150 = vmatprep.mubr.bf16.mxu0 %v7883_v2  ;;  %v8826_v61 = vld [vmem:[%s10058_s17 + $0x5d8] sm:$0xff]   ;;  %v8831_v2 = vld [vmem:[%s10058_s17 + $0x520] sm:$0xff]   ;;  %v8868_v55 = vld [vmem:[%s10058_s17 + $0x6a8] sm:$0xff]  }
 0x1f6   : > { %7199 = vmatprep.mubr.bf16.mxu1 %v7885_v8  ;;  %v8837_v8 = vld [vmem:[%s10058_s17 + $0x570] sm:$0xff]  }
 0x1f7   : > { %8408 = vmatpush3.bf16.msra.mxu0 %v8787_v62  ;;  %v8827_v62 = vld [vmem:[%s10058_s17 + $0x518] sm:$0xff]  }
 0x1f8   : > { %8436 = vmatpush3.bf16.msra.mxu1 %v8788_v63  ;;  %8409 = vmatprep.subr.bf16.mxu0 %v8789_v4  ;;  %v8828_v63 = vld [vmem:[%s10058_s17 + $0x598] sm:$0xff]   ;;  %v8833_v4 = vld [vmem:[%s10058_s17 + $0x568] sm:$0xff]  }
 0x1f9   : > { %8437 = vmatprep.subr.bf16.mxu1 %v8790_v5  ;;  %v8834_v5 = vld [vmem:[%s10058_s17 + $0x5e8] sm:$0xff]  }
 0x1fa   : > { %7151 = vmatmul.mubr.bf16.gmra.mrb[28].mxu0 %v7882_v3  ;;  %v8832_v3 = vld [vmem:[%s10058_s17 + $0x5a0] sm:$0xff]  }
 0x1fb   : > { %8410 = vmatpush3.bf16.msra.mxu0 %v8791_v9  ;;  %7200 = vmatmul.mubr.bf16.gmra.mrb[28].mxu1 %v7884_v10  ;;  %v8838_v9 = vld [vmem:[%s10058_s17 + $0x5f0] sm:$0xff]  }
 0x1fc   : > { %8438 = vmatpush3.bf16.msra.mxu1 %v8792_v11  ;;  %8411 = vmatprep.subr.bf16.mxu0 %v8793_v12  ;;  %v8839_v10 = vld [vmem:[%s10058_s17 + $0x530] sm:$0xff]   ;;  %v8841_v12 = vld [vmem:[%s10058_s17 + $0x578] sm:$0xff]  }
 0x1fd   : > { %8439 = vmatprep.subr.bf16.mxu1 %v8794_v13  ;;  %7240 = vmatprep.mubr.bf16.mxu0 %v7855_v37  ;;  %v8840_v11 = vld [vmem:[%s10058_s17 + $0x5b0] sm:$0xff]   ;;  %v8842_v13 = vld [vmem:[%s10058_s17 + $0x5f8] sm:$0xff]  }
 0x1fe   : > { %7289 = vmatprep.mubr.bf16.mxu1 %v7857_v39  ;;  %v8854_v37 = vld [vmem:[%s10058_s17 + $0x6d0] sm:$0xff]   ;;  %v4443_v39 = vld [vmem:[%s10543_s0 + $0x1d8] sm:$0xff] }
 0x1ff   : > { %8412 = vmatpush3.bf16.msra.mxu0 %v8795_v14  ;;  %v8843_v14 = vld [vmem:[%s10058_s17 + $0x538] sm:$0xff]  }
 0x200   : > { %8440 = vmatpush3.bf16.msra.mxu1 %v8796_v15  ;;  %8413 = vmatprep.subr.bf16.mxu0 %v8797_v16  ;;  %v8844_v15 = vld [vmem:[%s10058_s17 + $0x5b8] sm:$0xff]   ;;  %v4394_v16 = vld [vmem:[%s10543_s0 + $0x50] sm:$0xff] }
 0x201   : > { %8441 = vmatprep.subr.bf16.mxu1 %v8798_v17  ;;  %v4410_v17 = vld [vmem:[%s10543_s0 + $0xd0] sm:$0xff] }
 0x203   : > { %8414 = vmatpush3.bf16.msra.mxu0 %v8799_v18  ;;  %v7858_v18 = vcombine.low %v4394_v16, %v4410_v17 }
 0x204   : > { %8442 = vmatpush3.bf16.msra.mxu1 %v8800_v19  ;;  %8415 = vmatprep.subr.bf16.mxu0 %v8801_v20  ;;  %v7859_v19 = vcombine.high %v4394_v16, %v4410_v17  ;;  %v4395_v20 = vld [vmem:[%s10543_s0 + $0x58] sm:$0xff]  ;;  %v4428_v16 = vld [vmem:[%s10543_s0 + $0x160] sm:$0xff] }
 0x205   : > { %8443 = vmatprep.subr.bf16.mxu1 %v8802_v21  ;;  %v4411_v21 = vld [vmem:[%s10543_s0 + $0xd8] sm:$0xff]  ;;  %v4444_v17 = vld [vmem:[%s10543_s0 + $0x1e0] sm:$0xff] }
 0x207   : > { %8416 = vmatpush3.bf16.msra.mxu0 %v8803_v22  ;;  %v7860_v22 = vcombine.low %v4395_v20, %v4411_v21 }
 0x208   : > { %8444 = vmatpush3.bf16.msra.mxu1 %v8804_v23  ;;  %8417 = vmatprep.subr.bf16.mxu0 %v8805_v24  ;;  %v7861_v23 = vcombine.high %v4395_v20, %v4411_v21  ;;  %v8845_v24 = vld [vmem:[%s10058_s17 + $0x640] sm:$0xff]   ;;  %v7894_v20 = vcombine.low %v4428_v16, %v4444_v17  ;;  %v8885_v21 = vld [vmem:[%s10058_s17 + $0x750] sm:$0xff]  }
 0x209   : > { %8445 = vmatprep.subr.bf16.mxu1 %v8806_v25  ;;  %v8846_v25 = vld [vmem:[%s10058_s17 + $0x6c0] sm:$0xff]  }
 0x20b   : > { %8418 = vmatpush3.bf16.msra.mxu0 %v8807_v26  ;;  %v8847_v26 = vld [vmem:[%s10058_s17 + $0x600] sm:$0xff]  }
 0x20c   : > { %8446 = vmatpush3.bf16.msra.mxu1 %v8808_v27  ;;  %8419 = vmatprep.subr.bf16.mxu0 %v8809_v28  ;;  %v8848_v27 = vld [vmem:[%s10058_s17 + $0x680] sm:$0xff]   ;;  %v8849_v28 = vld [vmem:[%s10058_s17 + $0x648] sm:$0xff]  }
 0x20d   : > { %8447 = vmatprep.subr.bf16.mxu1 %v8810_v29  ;;  %v8850_v29 = vld [vmem:[%s10058_s17 + $0x6c8] sm:$0xff]  }
 0x20f   : > { %8420 = vmatpush3.bf16.msra.mxu0 %v8811_v30  ;;  %v8851_v30 = vld [vmem:[%s10058_s17 + $0x608] sm:$0xff]  }
 0x210   : > { %8448 = vmatpush3.bf16.msra.mxu1 %v8812_v31  ;;  %8461 = vmatprep.subr.bf16.mxu0 %v8813_v40  ;;  %v8852_v31 = vld [vmem:[%s10058_s17 + $0x688] sm:$0xff]  }
 0x211   : > { %8489 = vmatprep.subr.bf16.mxu1 %v8814_v41  ;;  %v8855_v41 = vld [vmem:[%s10058_s17 + $0x610] sm:$0xff]  }
 0x212   : > { %7241 = vmatmul.mubr.bf16.vlgmr.msra.gmra.mrb[32].mxu0 %v7854_v36  ;;  %v8853_v36 = vld [vmem:[%s10058_s17 + $0x650] sm:$0xff]  }
 0x213   : > { %7290 = vmatmul.mubr.bf16.vlgmr.msra.gmra.mrb[32].mxu1 %v7856_v38  ;;  %8462 = vmatpush3.bf16.msra.mxu0 %v8815_v42  ;;  %v4427_v38 = vld [vmem:[%s10543_s0 + $0x158] sm:$0xff] }
 0x214   : > { %8490 = vmatpush3.bf16.msra.mxu1 %v8816_v43  ;;  %8463 = vmatprep.subr.bf16.mxu0 %v8817_v44  ;;  %v7893_v40 = vcombine.high %v4427_v38, %v4443_v39  ;;  %v7892_v42 = vcombine.low %v4427_v38, %v4443_v39  ;;  %v8856_v43 = vld [vmem:[%s10058_s17 + $0x690] sm:$0xff]   ;;  %v8857_v44 = vld [vmem:[%s10058_s17 + $0x658] sm:$0xff]  }
 0x215   : > { %8491 = vmatprep.subr.bf16.mxu1 %v8818_v45  ;;  %7248 = vmatprep.mubr.bf16.mxu0 %v7887_v50  ;;  %v8858_v45 = vld [vmem:[%s10058_s17 + $0x6d8] sm:$0xff]   ;;  %v8863_v50 = vld [vmem:[%s10058_s17 + $0x620] sm:$0xff]  }
 0x216   : > { %7297 = vmatprep.mubr.bf16.mxu1 %v7889_v56  ;;  %v8869_v56 = vld [vmem:[%s10058_s17 + $0x670] sm:$0xff]  }
 0x217   : > { %8464 = vmatpush3.bf16.msra.mxu0 %v8819_v46  ;;  %v8859_v46 = vld [vmem:[%s10058_s17 + $0x618] sm:$0xff]  }
 0x218   : > { %8492 = vmatpush3.bf16.msra.mxu1 %v8820_v47  ;;  %8465 = vmatprep.subr.bf16.mxu0 %v8821_v52  ;;  %v8860_v47 = vld [vmem:[%s10058_s17 + $0x698] sm:$0xff]   ;;  %v8865_v52 = vld [vmem:[%s10058_s17 + $0x668] sm:$0xff]  }
 0x219   : > { %8493 = vmatprep.subr.bf16.mxu1 %v8822_v53  ;;  %v8866_v53 = vld [vmem:[%s10058_s17 + $0x6e8] sm:$0xff]  }
 0x21a   : > { %7249 = vmatmul.mubr.bf16.gmra.mrb[36].mxu0 %v7886_v51  ;;  %v8864_v51 = vld [vmem:[%s10058_s17 + $0x6a0] sm:$0xff]  }
 0x21b   : > { %8466 = vmatpush3.bf16.msra.mxu0 %v8823_v57  ;;  %7298 = vmatmul.mubr.bf16.gmra.mrb[36].mxu1 %v7888_v58  ;;  %v8870_v57 = vld [vmem:[%s10058_s17 + $0x6f0] sm:$0xff]  }
 0x21c   : > { %8494 = vmatpush3.bf16.msra.mxu1 %v8824_v59  ;;  %8467 = vmatprep.subr.bf16.mxu0 %v8825_v60  ;;  %v8871_v58 = vld [vmem:[%s10058_s17 + $0x630] sm:$0xff]   ;;  %v8873_v60 = vld [vmem:[%s10058_s17 + $0x678] sm:$0xff]  }
 0x21d   : > { %8495 = vmatprep.subr.bf16.mxu1 %v8826_v61  ;;  %7338 = vmatprep.mubr.bf16.mxu0 %v7859_v19  ;;  %v8872_v59 = vld [vmem:[%s10058_s17 + $0x6b0] sm:$0xff]   ;;  %v8874_v61 = vld [vmem:[%s10058_s17 + $0x6f8] sm:$0xff]   ;;  %v7895_v19 = vcombine.high %v4428_v16, %v4444_v17 }
 0x21e   : > { %7387 = vmatprep.mubr.bf16.mxu1 %v7861_v23  ;;  %v8886_v23 = vld [vmem:[%s10058_s17 + $0x7d0] sm:$0xff]  }
 0x21f   : > { %8468 = vmatpush3.bf16.msra.mxu0 %v8827_v62  ;;  %v8875_v62 = vld [vmem:[%s10058_s17 + $0x638] sm:$0xff]  }
 0x220   : > { %8496 = vmatpush3.bf16.msra.mxu1 %v8828_v63  ;;  %8469 = vmatprep.subr.bf16.mxu0 %v8829_v0  ;;  %v8876_v63 = vld [vmem:[%s10058_s17 + $0x6b8] sm:$0xff]   ;;  %v4396_v0 = vld [vmem:[%s10543_s0 + $0x60] sm:$0xff] }
 0x221   : > { %8497 = vmatprep.subr.bf16.mxu1 %v8830_v1  ;;  %v4412_v1 = vld [vmem:[%s10543_s0 + $0xe0] sm:$0xff] }
 0x223   : > { %8470 = vmatpush3.bf16.msra.mxu0 %v8831_v2  ;;  %v4397_v2 = vld [vmem:[%s10543_s0 + $0x68] sm:$0xff] }
 0x224   : > { %8498 = vmatpush3.bf16.msra.mxu1 %v8832_v3  ;;  %8471 = vmatprep.subr.bf16.mxu0 %v8833_v4  ;;  %v7862_v3 = vcombine.low %v4396_v0, %v4412_v1  ;;  %v7863_v4 = vcombine.high %v4396_v0, %v4412_v1  ;;  %v8899_v0 = vld [vmem:[%s10058_s17 + $0x728] sm:$0xff]  }
 0x225   : > { %8499 = vmatprep.subr.bf16.mxu1 %v8834_v5  ;;  %v4413_v5 = vld [vmem:[%s10543_s0 + $0xe8] sm:$0xff] }
 0x227   : > { %8472 = vmatpush3.bf16.msra.mxu0 %v8835_v6  ;;  %v7864_v6 = vcombine.low %v4397_v2, %v4413_v5 }
 0x228   : > { %8500 = vmatpush3.bf16.msra.mxu1 %v8836_v7  ;;  %8473 = vmatprep.subr.bf16.mxu0 %v8837_v8  ;;  %v7865_v7 = vcombine.high %v4397_v2, %v4413_v5  ;;  %v8877_v8 = vld [vmem:[%s10058_s17 + $0x740] sm:$0xff]   ;;  %v8900_v2 = vld [vmem:[%s10058_s17 + $0x7a8] sm:$0xff]   ;;  %v8902_v5 = vld [vmem:[%s10058_s17 + $0x7f0] sm:$0xff]  }
 0x229   : > { %8501 = vmatprep.subr.bf16.mxu1 %v8838_v9  ;;  %v8878_v9 = vld [vmem:[%s10058_s17 + $0x7c0] sm:$0xff]  }
 0x22b   : > { %8474 = vmatpush3.bf16.msra.mxu0 %v8839_v10  ;;  %v8879_v10 = vld [vmem:[%s10058_s17 + $0x700] sm:$0xff]  }
 0x22c   : > { %8502 = vmatpush3.bf16.msra.mxu1 %v8840_v11  ;;  %8475 = vmatprep.subr.bf16.mxu0 %v8841_v12  ;;  %v8880_v11 = vld [vmem:[%s10058_s17 + $0x780] sm:$0xff]   ;;  %v8881_v12 = vld [vmem:[%s10058_s17 + $0x748] sm:$0xff]  }
 0x22d   : > { %8503 = vmatprep.subr.bf16.mxu1 %v8842_v13  ;;  %v8882_v13 = vld [vmem:[%s10058_s17 + $0x7c8] sm:$0xff]  }
 0x22f   : > { %8476 = vmatpush3.bf16.msra.mxu0 %v8843_v14  ;;  %v8883_v14 = vld [vmem:[%s10058_s17 + $0x708] sm:$0xff]  }
 0x230   : > { %8504 = vmatpush3.bf16.msra.mxu1 %v8844_v15  ;;  %8517 = vmatprep.subr.bf16.mxu0 %v8845_v24  ;;  %v8884_v15 = vld [vmem:[%s10058_s17 + $0x788] sm:$0xff]  }
 0x231   : > { %8545 = vmatprep.subr.bf16.mxu1 %v8846_v25  ;;  %v4429_v25 = vld [vmem:[%s10543_s0 + $0x168] sm:$0xff] }
 0x232   : > { %7339 = vmatmul.mubr.bf16.vlgmr.msra.gmra.mrb[40].mxu0 %v7858_v18 }
 0x233   : > { %7388 = vmatmul.mubr.bf16.vlgmr.msra.gmra.mrb[40].mxu1 %v7860_v22  ;;  %8518 = vmatpush3.bf16.msra.mxu0 %v8847_v26  ;;  %v4445_v26 = vld [vmem:[%s10543_s0 + $0x1e8] sm:$0xff] }
 0x234   : > { %8546 = vmatpush3.bf16.msra.mxu1 %v8848_v27  ;;  %8519 = vmatprep.subr.bf16.mxu0 %v8849_v28  ;;  %v7896_v32 = vcombine.low %v4429_v25, %v4445_v26 }
 0x235   : > { %8547 = vmatprep.subr.bf16.mxu1 %v8850_v29  ;;  %7346 = vmatprep.mubr.bf16.mxu0 %v7891_v34 }
 0x236   : > { %7395 = vmatprep.mubr.bf16.mxu1 %v7893_v40 }
 0x237   : > { %8520 = vmatpush3.bf16.msra.mxu0 %v8851_v30  ;;  %v7897_v30 = vcombine.high %v4429_v25, %v4445_v26 }
 0x238   : > { %8548 = vmatpush3.bf16.msra.mxu1 %v8852_v31  ;;  %8521 = vmatprep.subr.bf16.mxu0 %v8853_v36  ;;  %v8887_v31 = vld [vmem:[%s10058_s17 + $0x710] sm:$0xff]  }
 0x239   : > { %8549 = vmatprep.subr.bf16.mxu1 %v8854_v37  ;;  %v8889_v37 = vld [vmem:[%s10058_s17 + $0x758] sm:$0xff]  }
 0x23a   : > { %7347 = vmatmul.mubr.bf16.gmra.mrb[44].mxu0 %v7890_v35  ;;  %v8888_v35 = vld [vmem:[%s10058_s17 + $0x790] sm:$0xff]  }
 0x23b   : > { %8522 = vmatpush3.bf16.msra.mxu0 %v8855_v41  ;;  %7396 = vmatmul.mubr.bf16.gmra.mrb[44].mxu1 %v7892_v42  ;;  %v8890_v41 = vld [vmem:[%s10058_s17 + $0x7d8] sm:$0xff]  }
 0x23c   : > { %8550 = vmatpush3.bf16.msra.mxu1 %v8856_v43  ;;  %8523 = vmatprep.subr.bf16.mxu0 %v8857_v44  ;;  %v8891_v43 = vld [vmem:[%s10058_s17 + $0x718] sm:$0xff]  }
 0x23d   : > { %8551 = vmatprep.subr.bf16.mxu1 %v8858_v45  ;;  %7436 = vmatprep.mubr.bf16.mxu0 %v7863_v4  ;;  %v8892_v45 = vld [vmem:[%s10058_s17 + $0x798] sm:$0xff]  }
 0x23e   : > { %7485 = vmatprep.mubr.bf16.mxu1 %v7865_v7  ;;  %v8904_v7 = vld [vmem:[%s10058_s17 + $0x7b0] sm:$0xff]  }
 0x23f   : > { %8524 = vmatpush3.bf16.msra.mxu0 %v8859_v46 }
 0x240   : > { %8552 = vmatpush3.bf16.msra.mxu1 %v8860_v47  ;;  %8525 = vmatprep.subr.bf16.mxu0 %v8861_v48  ;;  %v8893_v48 = vld [vmem:[%s10058_s17 + $0x760] sm:$0xff]  }
 0x241   : > { %8553 = vmatprep.subr.bf16.mxu1 %v8862_v49 }
 0x243   : > { %8526 = vmatpush3.bf16.msra.mxu0 %v8863_v50  ;;  %v8894_v50 = vld [vmem:[%s10058_s17 + $0x7e0] sm:$0xff]  }
 0x244   : > { %8554 = vmatpush3.bf16.msra.mxu1 %v8864_v51  ;;  %8527 = vmatprep.subr.bf16.mxu0 %v8865_v52 }
 0x245   : > { %8555 = vmatprep.subr.bf16.mxu1 %v8866_v53  ;;  %v8895_v53 = vld [vmem:[%s10058_s17 + $0x720] sm:$0xff]  }
 0x247   : > { %8528 = vmatpush3.bf16.msra.mxu0 %v8867_v54 }
 0x248   : > { %8556 = vmatpush3.bf16.msra.mxu1 %v8868_v55  ;;  %8529 = vmatprep.subr.bf16.mxu0 %v8869_v56  ;;  %v8896_v56 = vld [vmem:[%s10058_s17 + $0x7a0] sm:$0xff]  }
 0x249   : > { %8557 = vmatprep.subr.bf16.mxu1 %v8870_v57 }
 0x24b   : > { %8530 = vmatpush3.bf16.msra.mxu0 %v8871_v58  ;;  %v8897_v58 = vld [vmem:[%s10058_s17 + $0x768] sm:$0xff]  }
 0x24c   : > { %8558 = vmatpush3.bf16.msra.mxu1 %v8872_v59  ;;  %8531 = vmatprep.subr.bf16.mxu0 %v8873_v60 }
 0x24d   : > { %8559 = vmatprep.subr.bf16.mxu1 %v8874_v61  ;;  %v8898_v61 = vld [vmem:[%s10058_s17 + $0x7e8] sm:$0xff]  }
 0x24f   : > { %8532 = vmatpush3.bf16.msra.mxu0 %v8875_v62 }
 0x250   : > { %8560 = vmatpush3.bf16.msra.mxu1 %v8876_v63  ;;  %8573 = vmatprep.subr.bf16.mxu0 %v8877_v8  ;;  %v8905_v8 = vld [vmem:[%s10058_s17 + $0x778] sm:$0xff]  }
 0x251   : > { %8601 = vmatprep.subr.bf16.mxu1 %v8878_v9  ;;  %v8906_v9 = vld [vmem:[%s10058_s17 + $0x7f8] sm:$0xff]  }
 0x252   : > { %7437 = vmatmul.mubr.bf16.vlgmr.msra.gmra.mrb[48].mxu0 %v7862_v3  ;;  %v8901_v3 = vld [vmem:[%s10058_s17 + $0x770] sm:$0xff]  }
 0x253   : > { %7486 = vmatmul.mubr.bf16.vlgmr.msra.gmra.mrb[48].mxu1 %v7864_v6  ;;  %8574 = vmatpush3.bf16.msra.mxu0 %v8879_v10  ;;  %v8903_v6 = vld [vmem:[%s10058_s17 + $0x730] sm:$0xff]   ;;  %v8907_v10 = vld [vmem:[%s10058_s17 + $0x738] sm:$0xff]  }
 0x254   : > { %8602 = vmatpush3.bf16.msra.mxu1 %v8880_v11  ;;  %8575 = vmatprep.subr.bf16.mxu0 %v8881_v12  ;;  %v8908_v11 = vld [vmem:[%s10058_s17 + $0x7b8] sm:$0xff]   ;;  %v4398_v12 = vld [vmem:[%s10543_s0 + $0x70] sm:$0xff] }
 0x255   : > { %8603 = vmatprep.subr.bf16.mxu1 %v8882_v13  ;;  %7444 = vmatprep.mubr.bf16.mxu0 %v7895_v19  ;;  %v4414_v13 = vld [vmem:[%s10543_s0 + $0xf0] sm:$0xff] }
 0x256   : > { %7493 = vmatprep.mubr.bf16.mxu1 %v7897_v30  ;;  %v7866_v16 = vcombine.low %v4398_v12, %v4414_v13  ;;  %v7867_v17 = vcombine.high %v4398_v12, %v4414_v13 }
 0x257   : > { %8576 = vmatpush3.bf16.msra.mxu0 %v8883_v14  ;;  %v4399_v14 = vld [vmem:[%s10543_s0 + $0x78] sm:$0xff] }
 0x258   : > { %8604 = vmatpush3.bf16.msra.mxu1 %v8884_v15  ;;  %8577 = vmatprep.subr.bf16.mxu0 %v8885_v21  ;;  %v4415_v15 = vld [vmem:[%s10543_s0 + $0xf8] sm:$0xff]  ;;  %v4446_v21 = vld [vmem:[%s10543_s0 + $0x1f0] sm:$0xff] }
 0x259   : > { %8605 = vmatprep.subr.bf16.mxu1 %v8886_v23  ;;  %v7869_v19 = vcombine.high %v4399_v14, %v4415_v15 }
 0x25a   : > { %7445 = vmatmul.mubr.bf16.gmra.mrb[52].mxu0 %v7894_v20  ;;  %v4430_v20 = vld [vmem:[%s10543_s0 + $0x170] sm:$0xff] }
 0x25b   : > { %8578 = vmatpush3.bf16.msra.mxu0 %v8887_v31  ;;  %7494 = vmatmul.mubr.bf16.gmra.mrb[52].mxu1 %v7896_v32  ;;  %v7899_v23 = vcombine.high %v4430_v20, %v4446_v21 }
 0x25c   : > { %8606 = vmatpush3.bf16.msra.mxu1 %v8888_v35  ;;  %8579 = vmatprep.subr.bf16.mxu0 %v8889_v37 }
 0x25d   : > { %8607 = vmatprep.subr.bf16.mxu1 %v8890_v41  ;;  %7534 = vmatprep.mubr.bf16.mxu0 %v7867_v17 }
 0x25e   : > { %7583 = vmatprep.mubr.bf16.mxu1 %v7869_v19 }
 0x25f   : > { %8580 = vmatpush3.bf16.msra.mxu0 %v8891_v43 }
 0x260   : > { %8608 = vmatpush3.bf16.msra.mxu1 %v8892_v45  ;;  %8581 = vmatprep.subr.bf16.mxu0 %v8893_v48 }
 0x261   : > { %8609 = vmatprep.subr.bf16.mxu1 %v8894_v50 }
 0x263   : > { %8582 = vmatpush3.bf16.msra.mxu0 %v8895_v53 }
 0x264   : > { %8610 = vmatpush3.bf16.msra.mxu1 %v8896_v56  ;;  %8583 = vmatprep.subr.bf16.mxu0 %v8897_v58 }
 0x265   : > { %v8197_v18 = vpop.f32.mrb[0].mxu0  ;;  %8611 = vmatprep.subr.bf16.mxu1 %v8898_v61 }
 0x266   : > { %v8225_v22 = vpop.f32.mrb[0].mxu1  ;;  %v8198_v24 = vpop.f32.mrb[1].mxu0 }
 0x267   : > { %v8199_v27 = vadd.f32 %v8198_v24, %v8197_v18  ;;  %v8226_v28 = vpop.f32.mrb[1].mxu1  ;;  %v8200_v29 = vpop.f32.mrb[2].mxu0  ;;  %8584 = vmatpush3.bf16.msra.mxu0 %v8899_v0  ;;  %v7868_v18 = vcombine.low %v4399_v14, %v4415_v15  ;;  %v4447_v24 = vld [vmem:[%s10543_s0 + $0x1f8] sm:$0xff] }
 0x268   : > { %v8227_v33 = vadd.f32 %v8226_v28, %v8225_v22  ;;  %v8228_v34 = vpop.f32.mrb[2].mxu1  ;;  %v8201_v36 = vpop.f32.mrb[3].mxu0  ;;  %8612 = vmatpush3.bf16.msra.mxu1 %v8900_v2  ;;  %8585 = vmatprep.subr.bf16.mxu0 %v8901_v3  ;;  %v4431_v22 = vld [vmem:[%s10543_s0 + $0x178] sm:$0xff]  ;;  %v7898_v28 = vcombine.low %v4430_v20, %v4446_v21 }
 0x269   : > { %v8202_v39 = vadd.f32 %v8201_v36, %v8200_v29  ;;  %v8229_v40 = vpop.f32.mrb[3].mxu1  ;;  %8613 = vmatprep.subr.bf16.mxu1 %v8902_v5  ;;  %v7901_v25 = vcombine.high %v4431_v22, %v4447_v24  ;;  %v7900_v29 = vcombine.low %v4431_v22, %v4447_v24 }
 0x26a   : > { %v10457_v38 = vadd.f32 %v8227_v33, %v8199_v27  ;;  %v8230_v42 = vadd.f32 %v8229_v40, %v8228_v34 }
 0x26b   : > { %8586 = vmatpush3.bf16.msra.mxu0 %v8903_v6 }
 0x26c   : > { %v10462_v46 = vadd.f32 %v8230_v42, %v8202_v39  ;;  %8614 = vmatpush3.bf16.msra.mxu1 %v8904_v7  ;;  %8587 = vmatprep.subr.bf16.mxu0 %v8905_v8 }
 0x26d   : > { %v8203_v44 = vpop.f32.mrb[4].mxu0  ;;  %8615 = vmatprep.subr.bf16.mxu1 %v8906_v9 }
 0x26e   : > { %v8231_v47 = vpop.f32.mrb[4].mxu1  ;;  %v8204_v49 = vpop.f32.mrb[5].mxu0 }
 0x26f   : > { %v8205_v51 = vadd.f32 %v8204_v49, %v8203_v44  ;;  %v8232_v52 = vpop.f32.mrb[5].mxu1  ;;  %v8206_v55 = vpop.f32.mrb[6].mxu0  ;;  %8588 = vmatpush3.bf16.msra.mxu0 %v8907_v10 }
 0x270   : > { %v8233_v54 = vadd.f32 %v8232_v52, %v8231_v47  ;;  %v8234_v57 = vpop.f32.mrb[6].mxu1  ;;  %v8207_v60 = vpop.f32.mrb[7].mxu0  ;;  %8616 = vmatpush3.bf16.msra.mxu1 %v8908_v11 }
 0x271   : > { %v8208_v62 = vadd.f32 %v8207_v60, %v8206_v55  ;;  %v8235_v63 = vpop.f32.mrb[7].mxu1 }
 0x272   : > { %v10469_v59 = vadd.f32 %v8233_v54, %v8205_v51  ;;  %v8236_v1 = vadd.f32 %v8235_v63, %v8234_v57  ;;  %7535 = vmatmul.mubr.bf16.vlgmr.msra.gmra.mrb[56].mxu0 %v7866_v16 }
 0x273   : > { %7584 = vmatmul.mubr.bf16.vlgmr.msra.gmra.mrb[56].mxu1 %v7868_v18  ;;  %7542 = vmatprep.mubr.bf16.mxu0 %v7899_v23 }
 0x274   : > { %v10475_v4 = vadd.f32 %v8236_v1, %v8208_v62  ;;  %7591 = vmatprep.mubr.bf16.mxu1 %v7901_v25 }
 0x27a   : > { %7543 = vmatmul.mubr.bf16.gmra.mrb[60].mxu0 %v7898_v28 }
 0x27b   : > { %7592 = vmatmul.mubr.bf16.gmra.mrb[60].mxu1 %v7900_v29 }
 0x285   : > { %v8253_v26 = vpop.f32.mrb[8].mxu0 }
 0x286   : > { %v8281_v27 = vpop.f32.mrb[8].mxu1  ;;  %v8254_v30 = vpop.f32.mrb[9].mxu0 }
 0x287   : > { %v8282_v31 = vpop.f32.mrb[9].mxu1  ;;  %v8255_v32 = vadd.f32 %v8254_v30, %v8253_v26  ;;  %v8256_v34 = vpop.f32.mrb[10].mxu0 }
 0x288   : > { %v8283_v33 = vadd.f32 %v8282_v31, %v8281_v27  ;;  %v8284_v35 = vpop.f32.mrb[10].mxu1  ;;  %v8257_v36 = vpop.f32.mrb[11].mxu0 }
 0x289   : > { %v8285_v37 = vpop.f32.mrb[11].mxu1  ;;  %v6949_v39 = vadd.f32 %v8255_v32, %v10457_v38  ;;  %v8258_v40 = vadd.f32 %v8257_v36, %v8256_v34 }
 0x28a   : > { %v8286_v41 = vadd.f32 %v8285_v37, %v8284_v35 }
 0x28b   : > { %v6998_v42 = vadd.f32 %v8283_v33, %v6949_v39  ;;  %v6952_v43 = vadd.f32 %v8258_v40, %v10462_v46 }
 0x28d   : > { %v7001_v44 = vadd.f32 %v8286_v41, %v6952_v43  ;;  %v8259_v45 = vpop.f32.mrb[12].mxu0 }
 0x28e   : > { %v8260_v47 = vpop.f32.mrb[13].mxu0  ;;  %v8287_v52 = vpop.f32.mrb[12].mxu1 }
 0x28f   : > { %v8261_v48 = vadd.f32 %v8260_v47, %v8259_v45  ;;  %v8262_v49 = vpop.f32.mrb[14].mxu0  ;;  %v8288_v54 = vpop.f32.mrb[13].mxu1 }
 0x290   : > { %v8263_v50 = vpop.f32.mrb[15].mxu0  ;;  %v8289_v55 = vadd.f32 %v8288_v54, %v8287_v52  ;;  %v8290_v56 = vpop.f32.mrb[14].mxu1 }
 0x291   : > { %v6957_v51 = vadd.f32 %v8261_v48, %v10469_v59  ;;  %v8264_v53 = vadd.f32 %v8263_v50, %v8262_v49  ;;  %v8291_v57 = vpop.f32.mrb[15].mxu1 }
 0x292   : > { %v8292_v60 = vadd.f32 %v8291_v57, %v8290_v56 }
 0x293   : > { %v6960_v38 = vadd.f32 %v8264_v53, %v10475_v4  ;;  %v7006_v58 = vadd.f32 %v8289_v55, %v6957_v51 }
 0x295   : > { %v7009_v61 = vadd.f32 %v8292_v60, %v6960_v38 }
 0x2a5   : > { %v8309_v46 = vpop.f32.mrb[16].mxu0 }
 0x2a6   : > { %v8337_v62 = vpop.f32.mrb[16].mxu1  ;;  %v8310_v63 = vpop.f32.mrb[17].mxu0 }
 0x2a7   : > { %v8311_v0 = vadd.f32 %v8310_v63, %v8309_v46  ;;  %v8338_v1 = vpop.f32.mrb[17].mxu1  ;;  %v8312_v2 = vpop.f32.mrb[18].mxu0 }
 0x2a8   : > { %v8339_v3 = vadd.f32 %v8338_v1, %v8337_v62  ;;  %v8340_v5 = vpop.f32.mrb[18].mxu1  ;;  %v8313_v59 = vpop.f32.mrb[19].mxu0 }
 0x2a9   : > { %v7047_v6 = vadd.f32 %v8311_v0, %v6998_v42  ;;  %v8314_v7 = vadd.f32 %v8313_v59, %v8312_v2  ;;  %v8341_v8 = vpop.f32.mrb[19].mxu1 }
 0x2aa   : > { %v8342_v9 = vadd.f32 %v8341_v8, %v8340_v5 }
 0x2ab   : > { %v7096_v4 = vadd.f32 %v8339_v3, %v7047_v6  ;;  %v7050_v10 = vadd.f32 %v8314_v7, %v7001_v44 }
 0x2ad   : > { %v7099_v11 = vadd.f32 %v8342_v9, %v7050_v10  ;;  %v8315_v12 = vpop.f32.mrb[20].mxu0 }
 0x2ae   : > { %v8316_v13 = vpop.f32.mrb[21].mxu0  ;;  %v8343_v16 = vpop.f32.mrb[20].mxu1 }
 0x2af   : > { %v8317_v14 = vadd.f32 %v8316_v13, %v8315_v12  ;;  %v8318_v15 = vpop.f32.mrb[22].mxu0  ;;  %v8344_v20 = vpop.f32.mrb[21].mxu1 }
 0x2b0   : > { %v8319_v17 = vpop.f32.mrb[23].mxu0  ;;  %v8345_v21 = vadd.f32 %v8344_v20, %v8343_v16  ;;  %v8346_v22 = vpop.f32.mrb[22].mxu1 }
 0x2b1   : > { %v7055_v18 = vadd.f32 %v8317_v14, %v7006_v58  ;;  %v8320_v19 = vadd.f32 %v8319_v17, %v8318_v15  ;;  %v8347_v24 = vpop.f32.mrb[23].mxu1 }
 0x2b2   : > { %v8348_v26 = vadd.f32 %v8347_v24, %v8346_v22 }
 0x2b3   : > { %v7058_v23 = vadd.f32 %v8320_v19, %v7009_v61  ;;  %v7104_v25 = vadd.f32 %v8345_v21, %v7055_v18 }
 0x2b5   : > { %v7107_v27 = vadd.f32 %v8348_v26, %v7058_v23 }
 0x2c5   : > { %v8365_v28 = vpop.f32.mrb[24].mxu0 }
 0x2c6   : > { %v8393_v29 = vpop.f32.mrb[24].mxu1  ;;  %v8366_v30 = vpop.f32.mrb[25].mxu0 }
 0x2c7   : > { %v8367_v31 = vadd.f32 %v8366_v30, %v8365_v28  ;;  %v8394_v32 = vpop.f32.mrb[25].mxu1  ;;  %v8368_v33 = vpop.f32.mrb[26].mxu0 }
 0x2c8   : > { %v8395_v34 = vadd.f32 %v8394_v32, %v8393_v29  ;;  %v8396_v35 = vpop.f32.mrb[26].mxu1  ;;  %v8369_v36 = vpop.f32.mrb[27].mxu0 }
 0x2c9   : > { %v7145_v37 = vadd.f32 %v8367_v31, %v7096_v4  ;;  %v8370_v39 = vadd.f32 %v8369_v36, %v8368_v33  ;;  %v8397_v40 = vpop.f32.mrb[27].mxu1 }
 0x2ca   : > { %v8398_v41 = vadd.f32 %v8397_v40, %v8396_v35 }
 0x2cb   : > { %v7194_v42 = vadd.f32 %v8395_v34, %v7145_v37  ;;  %v7148_v43 = vadd.f32 %v8370_v39, %v7099_v11 }
 0x2cd   : > { %v7197_v44 = vadd.f32 %v8398_v41, %v7148_v43  ;;  %v8371_v45 = vpop.f32.mrb[28].mxu0 }
 0x2ce   : > { %v8372_v47 = vpop.f32.mrb[29].mxu0  ;;  %v8399_v52 = vpop.f32.mrb[28].mxu1 }
 0x2cf   : > { %v8373_v48 = vadd.f32 %v8372_v47, %v8371_v45  ;;  %v8374_v49 = vpop.f32.mrb[30].mxu0  ;;  %v8400_v54 = vpop.f32.mrb[29].mxu1 }
 0x2d0   : > { %v8375_v50 = vpop.f32.mrb[31].mxu0  ;;  %v8401_v55 = vadd.f32 %v8400_v54, %v8399_v52  ;;  %v8402_v56 = vpop.f32.mrb[30].mxu1 }
 0x2d1   : > { %v7153_v51 = vadd.f32 %v8373_v48, %v7104_v25  ;;  %v8376_v53 = vadd.f32 %v8375_v50, %v8374_v49  ;;  %v8403_v57 = vpop.f32.mrb[31].mxu1 }
 0x2d2   : > { %v8404_v60 = vadd.f32 %v8403_v57, %v8402_v56 }
 0x2d3   : > { %v7156_v38 = vadd.f32 %v8376_v53, %v7107_v27  ;;  %v7202_v58 = vadd.f32 %v8401_v55, %v7153_v51 }
 0x2d5   : > { %v7205_v61 = vadd.f32 %v8404_v60, %v7156_v38 }
 0x2e5   : > { %v8421_v46 = vpop.f32.mrb[32].mxu0 }
 0x2e6   : > { %v8449_v62 = vpop.f32.mrb[32].mxu1  ;;  %v8422_v63 = vpop.f32.mrb[33].mxu0 }
 0x2e7   : > { %v8450_v0 = vpop.f32.mrb[33].mxu1  ;;  %v8423_v1 = vadd.f32 %v8422_v63, %v8421_v46  ;;  %v8424_v3 = vpop.f32.mrb[34].mxu0 }
 0x2e8   : > { %v8451_v2 = vadd.f32 %v8450_v0, %v8449_v62  ;;  %v8452_v5 = vpop.f32.mrb[34].mxu1  ;;  %v8425_v59 = vpop.f32.mrb[35].mxu0 }
 0x2e9   : > { %v8453_v6 = vpop.f32.mrb[35].mxu1  ;;  %v7243_v7 = vadd.f32 %v8423_v1, %v7194_v42  ;;  %v8426_v8 = vadd.f32 %v8425_v59, %v8424_v3 }
 0x2ea   : > { %v8454_v9 = vadd.f32 %v8453_v6, %v8452_v5 }
 0x2eb   : > { %v7292_v4 = vadd.f32 %v8451_v2, %v7243_v7  ;;  %v7246_v10 = vadd.f32 %v8426_v8, %v7197_v44 }
 0x2ed   : > { %v7295_v11 = vadd.f32 %v8454_v9, %v7246_v10  ;;  %v8427_v12 = vpop.f32.mrb[36].mxu0 }
 0x2ee   : > { %v8428_v13 = vpop.f32.mrb[37].mxu0  ;;  %v8455_v18 = vpop.f32.mrb[36].mxu1 }
 0x2ef   : > { %v8429_v14 = vadd.f32 %v8428_v13, %v8427_v12  ;;  %v8430_v15 = vpop.f32.mrb[38].mxu0  ;;  %v8456_v20 = vpop.f32.mrb[37].mxu1 }
 0x2f0   : > { %v8431_v16 = vpop.f32.mrb[39].mxu0  ;;  %v8457_v22 = vadd.f32 %v8456_v20, %v8455_v18  ;;  %v8458_v23 = vpop.f32.mrb[38].mxu1 }
 0x2f1   : > { %v7251_v17 = vadd.f32 %v8429_v14, %v7202_v58  ;;  %v8432_v19 = vadd.f32 %v8431_v16, %v8430_v15  ;;  %v8459_v24 = vpop.f32.mrb[39].mxu1 }
 0x2f2   : > { %v8460_v26 = vadd.f32 %v8459_v24, %v8458_v23 }
 0x2f3   : > { %v7254_v21 = vadd.f32 %v8432_v19, %v7205_v61  ;;  %v7300_v25 = vadd.f32 %v8457_v22, %v7251_v17 }
 0x2f5   : > { %v7303_v27 = vadd.f32 %v8460_v26, %v7254_v21 }
 0x305   : > { %v8477_v28 = vpop.f32.mrb[40].mxu0 }
 0x306   : > { %v8505_v29 = vpop.f32.mrb[40].mxu1  ;;  %v8478_v30 = vpop.f32.mrb[41].mxu0 }
 0x307   : > { %v8479_v31 = vadd.f32 %v8478_v30, %v8477_v28  ;;  %v8506_v32 = vpop.f32.mrb[41].mxu1  ;;  %v8480_v33 = vpop.f32.mrb[42].mxu0 }
 0x308   : > { %v8507_v34 = vadd.f32 %v8506_v32, %v8505_v29  ;;  %v8508_v35 = vpop.f32.mrb[42].mxu1  ;;  %v8481_v36 = vpop.f32.mrb[43].mxu0 }
 0x309   : > { %v7341_v37 = vadd.f32 %v8479_v31, %v7292_v4  ;;  %v8482_v39 = vadd.f32 %v8481_v36, %v8480_v33  ;;  %v8509_v40 = vpop.f32.mrb[43].mxu1 }
 0x30a   : > { %v8510_v41 = vadd.f32 %v8509_v40, %v8508_v35 }
 0x30b   : > { %v7390_v42 = vadd.f32 %v8507_v34, %v7341_v37  ;;  %v7344_v43 = vadd.f32 %v8482_v39, %v7295_v11 }
 0x30d   : > { %v7393_v44 = vadd.f32 %v8510_v41, %v7344_v43  ;;  %v8483_v45 = vpop.f32.mrb[44].mxu0 }
 0x30e   : > { %v8484_v47 = vpop.f32.mrb[45].mxu0  ;;  %v8511_v50 = vpop.f32.mrb[44].mxu1 }
 0x30f   : > { %v8485_v48 = vadd.f32 %v8484_v47, %v8483_v45  ;;  %v8486_v49 = vpop.f32.mrb[46].mxu0  ;;  %v8512_v54 = vpop.f32.mrb[45].mxu1 }
 0x310   : > { %v8487_v51 = vpop.f32.mrb[47].mxu0  ;;  %v8513_v38 = vadd.f32 %v8512_v54, %v8511_v50  ;;  %v8514_v55 = vpop.f32.mrb[46].mxu1 }
 0x311   : > { %v7349_v52 = vadd.f32 %v8485_v48, %v7300_v25  ;;  %v8488_v53 = vadd.f32 %v8487_v51, %v8486_v49  ;;  %v8515_v57 = vpop.f32.mrb[47].mxu1 }
 0x312   : > { %v8516_v60 = vadd.f32 %v8515_v57, %v8514_v55 }
 0x313   : > { %v7352_v56 = vadd.f32 %v8488_v53, %v7303_v27  ;;  %v7398_v58 = vadd.f32 %v8513_v38, %v7349_v52 }
 0x315   : > { %v7401_v61 = vadd.f32 %v8516_v60, %v7352_v56 }
 0x325   : > { %v8533_v46 = vpop.f32.mrb[48].mxu0 }
 0x326   : > { %v8561_v62 = vpop.f32.mrb[48].mxu1  ;;  %v8534_v63 = vpop.f32.mrb[49].mxu0 }
 0x327   : > { %v8535_v0 = vadd.f32 %v8534_v63, %v8533_v46  ;;  %v8562_v1 = vpop.f32.mrb[49].mxu1  ;;  %v8536_v2 = vpop.f32.mrb[50].mxu0 }
 0x328   : > { %v8563_v3 = vadd.f32 %v8562_v1, %v8561_v62  ;;  %v8564_v5 = vpop.f32.mrb[50].mxu1  ;;  %v8537_v59 = vpop.f32.mrb[51].mxu0 }
 0x329   : > { %v7439_v6 = vadd.f32 %v8535_v0, %v7390_v42  ;;  %v8538_v7 = vadd.f32 %v8537_v59, %v8536_v2  ;;  %v8565_v8 = vpop.f32.mrb[51].mxu1 }
 0x32a   : > { %v8566_v9 = vadd.f32 %v8565_v8, %v8564_v5 }
 0x32b   : > { %v7488_v4 = vadd.f32 %v8563_v3, %v7439_v6  ;;  %v7442_v10 = vadd.f32 %v8538_v7, %v7393_v44 }
 0x32d   : > { %v7491_v11 = vadd.f32 %v8566_v9, %v7442_v10  ;;  %v8539_v12 = vpop.f32.mrb[52].mxu0 }
 0x32e   : > { %v8540_v13 = vpop.f32.mrb[53].mxu0  ;;  %v8567_v18 = vpop.f32.mrb[52].mxu1 }
 0x32f   : > { %v8541_v14 = vadd.f32 %v8540_v13, %v8539_v12  ;;  %v8542_v15 = vpop.f32.mrb[54].mxu0  ;;  %v8568_v20 = vpop.f32.mrb[53].mxu1 }
 0x330   : > { %v8543_v16 = vpop.f32.mrb[55].mxu0  ;;  %v8569_v22 = vadd.f32 %v8568_v20, %v8567_v18  ;;  %v8570_v23 = vpop.f32.mrb[54].mxu1 }
 0x331   : > { %v7447_v17 = vadd.f32 %v8541_v14, %v7398_v58  ;;  %v8544_v19 = vadd.f32 %v8543_v16, %v8542_v15  ;;  %v8571_v24 = vpop.f32.mrb[55].mxu1 }
 0x332   : > { %v8572_v26 = vadd.f32 %v8571_v24, %v8570_v23 }
 0x333   : > { %v7450_v21 = vadd.f32 %v8544_v19, %v7401_v61  ;;  %v7496_v25 = vadd.f32 %v8569_v22, %v7447_v17 }
 0x335   : > { %v7499_v27 = vadd.f32 %v8572_v26, %v7450_v21 }
 0x345   : > { %v8589_v28 = vpop.f32.mrb[56].mxu0 }
 0x346   : > { %v8617_v29 = vpop.f32.mrb[56].mxu1  ;;  %v8590_v30 = vpop.f32.mrb[57].mxu0 }
 0x347   : > { %v8618_v31 = vpop.f32.mrb[57].mxu1  ;;  %v8591_v32 = vadd.f32 %v8590_v30, %v8589_v28  ;;  %v8592_v34 = vpop.f32.mrb[58].mxu0 }
 0x348   : > { %v8619_v33 = vadd.f32 %v8618_v31, %v8617_v29  ;;  %v8620_v35 = vpop.f32.mrb[58].mxu1  ;;  %v8593_v36 = vpop.f32.mrb[59].mxu0  ;;  %v7632_v31 = vld [vmem:[%s4382_s14] sm:$0x1] }
 0x349   : > { %v8621_v37 = vpop.f32.mrb[59].mxu1  ;;  %v7537_v39 = vadd.f32 %v8591_v32, %v7488_v4  ;;  %v8594_v40 = vadd.f32 %v8593_v36, %v8592_v34 }
 0x34a   : > { %v8622_v41 = vadd.f32 %v8621_v37, %v8620_v35 }
 0x34b   : > { %v10512_v42 = vadd.f32 %v8619_v33, %v7537_v39  ;;  %v7540_v43 = vadd.f32 %v8594_v40, %v7491_v11 }
 0x34d   : > { %v7589_v44 = vadd.f32 %v8622_v41, %v7540_v43  ;;  %v8595_v45 = vpop.f32.mrb[60].mxu0 }
 0x34e   : > { %v8623_v47 = vpop.f32.mrb[60].mxu1  ;;  %v8596_v48 = vpop.f32.mrb[61].mxu0 }
 0x34f   : > { %v8624_v49 = vpop.f32.mrb[61].mxu1  ;;  %v7600_v50 = vadd.f32 %v7589_v44, %v10512_v42  ;;  %v8597_v51 = vadd.f32 %v8596_v48, %v8595_v45  ;;  %v8598_v53 = vpop.f32.mrb[62].mxu0 }
 0x350   : > { %v8625_v52 = vadd.f32 %v8624_v49, %v8623_v47  ;;  %v8626_v54 = vpop.f32.mrb[62].mxu1  ;;  %v8599_v38 = vpop.f32.mrb[63].mxu0 }
 0x351   : > { %v8627_v55 = vpop.f32.mrb[63].mxu1  ;;  %v7545_v56 = vadd.f32 %v8597_v51, %v7496_v25  ;;  %v8600_v57 = vadd.f32 %v8599_v38, %v8598_v53  ;;  %v7636_v25 = vlaneseq }
 0x352   : > { %v8628_v58 = vadd.f32 %v8627_v55, %v8626_v54 }
 0x353   : > { %v7594_v60 = vadd.f32 %v8625_v52, %v7545_v56  ;;  %v7548_v61 = vadd.f32 %v8600_v57, %v7499_v27  ;;  %v7637_v26 = vshrl.u32 %v7636_v25, 7  ;;  %v7628_v27 = vld [vmem:[%s4379_s11] sm:$0x1] }
 0x355   : > { %v7601_v46 = vadd.f32 %v7600_v50, %v7594_v60  ;;  %v7597_v62 = vadd.f32 %v8628_v58, %v7548_v61  ;;  %v7638_v28 = vsub.s32 0, %v7637_v26 }
 0x357   : > { %v7602_v63 = vadd.f32 %v7601_v46, %v7597_v62 }
 0x359   : > { %v7603_v0 = vrot.slane %v7602_v63, 4 }
 0x35b   : > { %v7604_v1 = vadd.f32 %v7603_v0, %v7602_v63 }
 0x35d   : > { %v7605_v2 = vrot.slane %v7604_v1, 2 }
 0x35f   : > { %v7606_v3 = vadd.f32 %v7605_v2, %v7604_v1 }
 0x361   : > { %v7607_v5 = vrot.slane %v7606_v3, 1 }
 0x363   : > { %v7608_v59 = vadd.f32 %v7607_v5, %v7606_v3 }
 0x365   : > { %v7609_v6 = vmul.f32 0.03125, %v7608_v59 }
 0x367   : > { %v7610_v7 = vsub.f32 %v10512_v42, %v7609_v6  ;;  %v7611_v8 = vsub.f32 %v7589_v44, %v7609_v6  ;;  %v7612_v9 = vsub.f32 %v7594_v60, %v7609_v6  ;;  %v7613_v4 = vsub.f32 %v7597_v62, %v7609_v6 }
 0x369   : > { %v7614_v10 = vmul.f32 %v7610_v7, %v7610_v7  ;;  %v7615_v11 = vmul.f32 %v7611_v8, %v7611_v8  ;;  %v7616_v12 = vmul.f32 %v7612_v9, %v7612_v9  ;;  %v7617_v14 = vmul.f32 %v7613_v4, %v7613_v4 }
 0x36b   : > { %v7618_v13 = vadd.f32 %v7615_v11, %v7614_v10 }
 0x36d   : > { %v7619_v15 = vadd.f32 %v7618_v13, %v7616_v12 }
 0x36f   : > { %v7620_v16 = vadd.f32 %v7619_v15, %v7617_v14 }
 0x371   : > { %v7621_v17 = vrot.slane %v7620_v16, 4 }
 0x373   : > { %v7622_v18 = vadd.f32 %v7621_v17, %v7620_v16 }
 0x375   : > { %v7623_v19 = vrot.slane %v7622_v18, 2 }
 0x377   : > { %v7624_v20 = vadd.f32 %v7623_v19, %v7622_v18 }
 0x379   : > { %v7625_v21 = vrot.slane %v7624_v20, 1 }
 0x37b   : > { %v7626_v22 = vadd.f32 %v7625_v21, %v7624_v20 }
 0x37d   : > { %v7627_v23 = vmul.f32 0.03125, %v7626_v22 }
 0x37f   : > { %v7629_v24 = vadd.f32 1e-05, %v7627_v23 }
 0x381   : > { %8909 = vrsqrt.f32 %v7629_v24 }
 0x38b   : > { %v8910_v29 = vpop.eup %8909 }
 0x38c   : > { %v7631_v30 = vmul.f32 %v8910_v29, %v7628_v27 }
 0x38e   : > { %v7633_v32 = vmul.f32 %v7631_v30, %v7609_v6  ;;  %v7639_v33 = vrot.slane %v7631_v30, %v7638_v28 }
 0x390   : > { %v7634_v34 = vsub.f32 %v7632_v31, %v7633_v32  ;;  %v7641_v35 = vmul.f32 %v7639_v33, %v10512_v42  ;;  %v7642_v36 = vmul.f32 %v7639_v33, %v7589_v44  ;;  %v7643_v37 = vmul.f32 %v7639_v33, %v7594_v60 }
 0x391   : > { %v7644_v39 = vmul.f32 %v7639_v33, %v7597_v62 }
 0x392   : > { %v7649_v40 = vrot.slane %v7634_v34, %v7638_v28 }
 0x394   : > { %v7651_v41 = vadd.f32 %v7649_v40, %v7641_v35  ;;  %v7652_v43 = vadd.f32 %v7649_v40, %v7642_v36  ;;  %v7653_v45 = vadd.f32 %v7649_v40, %v7643_v37  ;;  %v7654_v47 = vadd.f32 %v7649_v40, %v7644_v39 }
 0x396   : > { %vm7655_vm0 = vcmp.gt.f32.partialorder %v7651_v41, 0.0  ;;  %vm7656_vm1 = vcmp.gt.f32.partialorder %v7652_v43, 0.0  ;;  %vm7657_vm2 = vcmp.gt.f32.partialorder %v7653_v45, 0.0  ;;  %vm7658_vm3 = vcmp.gt.f32.partialorder %v7654_v47, 0.0 }
 0x397   : > { %v7659_v48 = vmul.f32 0.2, %v7651_v41  ;;  %v7660_v49 = vmul.f32 0.2, %v7652_v43  ;;  %v7661_v50 = vmul.f32 0.2, %v7653_v45 }
 0x398   : > { %v7662_v51 = vmul.f32 0.2, %v7654_v47  ;;  %7693 = sbr.rel (!%p8991_p5) target bundleno = 935 (0x3a7), region = 92 }
 0x399   : > { %v7663_v52 = vsel %vm7655_vm0, %v7651_v41, %v7659_v48  ;;  %v7664_v42 = vsel %vm7656_vm1, %v7652_v43, %v7660_v49  ;;  %v7665_v44 = vsel %vm7657_vm2, %v7653_v45, %v7661_v50 }
 0x39a   : > { %v7666_v53 = vsel %vm7658_vm3, %v7654_v47, %v7662_v51  ;;  %v8173_v54 = vpack.c.bf16 %v7664_v42, %v7663_v52 }
 0x39b   : > { %v8178_v38 = vpack.c.bf16 %v7666_v53, %v7665_v44 }
 0x39c   : > { %8174 = vst [vmem:[%s4376_s21] sm:$0xff] %v8173_v54  }
 0x39d   : > { %8180 = vst [vmem:[%s4376_s21 + $0x8] sm:$0xff] %v8178_v38  }
 0x3a3   : > { %v7711_v55 = vld [vmem:[%s4376_s21] sm:$0xf]  ;;  %v7713_v56 = vld [vmem:[%s4376_s21 + $0x4] sm:$0xf] }
 0x3a4   : > { %v7715_v57 = vld [vmem:[%s4376_s21 + $0x8] sm:$0xf]  ;;  %v7717_v58 = vld [vmem:[%s4376_s21 + $0xc] sm:$0xf]  ;;  %7712 = vst [vmem:[%s7695_s25] sm:$0xf] %v7711_v55 }
 0x3a5   : > { %7714 = vst [vmem:[%s7695_s25 + $0x10] sm:$0xf] %v7713_v56  ;;  %7716 = vst [vmem:[%s7695_s25 + $0x20] sm:$0xf] %v7715_v57 }
 0x3a6   : > { %7718 = vst [vmem:[%s7695_s25 + $0x30] sm:$0xf] %v7717_v58 }
 0x3a7 PF: > { %p11_p11 = scmp.ge.s32.totalorder %s8979_s19, 6   ;;  %s10549_s15 = smov %s8929_s16 }
 0x3a8   : > { %s10550_s16 = smov %s8989_s22  ;;  %s10551_s17 = smov %s8979_s19 }
 0x3a9   :  { %13 = sbr.rel (!%p11_p11) target bundleno = 2 (0x2), region = 174 }

</bundles_post_ra>
